<compile_context>
chip_gen: v6e
topology: v6e:2x2x1
jax: 0.10.0
libtpu: 0.0.40
codegen_flags: <defaults>
</compile_context>

<pallas_src>
import functools

import jax
import jax.numpy as jnp
from jax.experimental import pallas as pl
from jax.experimental.pallas import tpu as pltpu

LANE = 128
_VMEM_LIMIT_BYTES = 32 * 1024 * 1024


def _round_up(x, m):
    return (x + m - 1) // m * m


def _pick_row_tile(mp):
    """Largest row tile in {512..8} that divides mp (mp is a multiple of 8)."""
    return next(c for c in (512, 256, 128, 64, 32, 16, 8) if mp % c == 0)


# ---------------------------------------------------------------------------
# Fused GEMM kernel:  o = maybe_relu(acc * scale + bias [+ residual])
# bf16 operands, f32 accumulation, K-reduction over grid axis 2.
# ---------------------------------------------------------------------------

def _gemm_bn_act_kernel(*refs, relu, has_res):
    if has_res:
        a_ref, b_ref, s_ref, c_ref, r_ref, o_ref, acc_ref = refs
    else:
        a_ref, b_ref, s_ref, c_ref, o_ref, acc_ref = refs
    k = pl.program_id(2)

    @pl.when(k == 0)
    def _():
        acc_ref[...] = jnp.zeros_like(acc_ref)

    acc_ref[...] += jnp.dot(a_ref[...], b_ref[...],
                            preferred_element_type=jnp.float32)

    @pl.when(k == pl.num_programs(2) - 1)
    def _():
        y = acc_ref[...] * s_ref[...] + c_ref[...]
        if has_res:
            y = y + r_ref[...].astype(jnp.float32)
        if relu:
            y = jnp.maximum(y, 0.0)
        o_ref[...] = y.astype(o_ref.dtype)


def matmul_bn_act(a, b, scale, bias, *, residual=None, relu=True,
                  out_dtype=jnp.bfloat16, tk=128):
    """a:(M,K) any float -> bf16.  b:(Kp,Np) bf16 pre-padded.  scale/bias:(1,Np) f32.

    Returns (Mp, Np) with Mp = round_up(M, 8); caller slices rows if needed.
    Output channels stay padded (lane-dense); slice N only at the network end.
    """
    M, K = a.shape
    Kp, Np = b.shape
    assert Kp % tk == 0 and Np % LANE == 0 and K <= Kp
    tn = 256 if Np % 256 == 0 else 128
    Mp = _round_up(M, 8)
    tm = _pick_row_tile(Mp)

    a = a.astype(jnp.bfloat16)
    if Mp != M or Kp != K:
        a = jnp.pad(a, ((0, Mp - M), (0, Kp - K)))

    has_res = residual is not None
    inputs = [a, b, scale, bias]
    in_specs = [
        pl.BlockSpec((tm, tk), lambda i, j, k: (i, k)),
        pl.BlockSpec((tk, tn), lambda i, j, k: (k, j)),
        pl.BlockSpec((1, tn), lambda i, j, k: (0, j)),
        pl.BlockSpec((1, tn), lambda i, j, k: (0, j)),
    ]
    if has_res:
        assert residual.shape[1] == Np
        r = residual.astype(jnp.bfloat16)
        if r.shape[0] != Mp:
            r = jnp.pad(r, ((0, Mp - r.shape[0]), (0, 0)))
        inputs.append(r)
        in_specs.append(pl.BlockSpec((tm, tn), lambda i, j, k: (i, j)))

    return pl.pallas_call(
        functools.partial(_gemm_bn_act_kernel, relu=relu, has_res=has_res),
        out_shape=jax.ShapeDtypeStruct((Mp, Np), out_dtype),
        grid_spec=pltpu.PrefetchScalarGridSpec(
            num_scalar_prefetch=0,
            grid=(Mp // tm, Np // tn, Kp // tk),
            in_specs=in_specs,
            out_specs=pl.BlockSpec((tm, tn), lambda i, j, k: (i, j)),
            scratch_shapes=[pltpu.VMEM((tm, tn), jnp.float32)],
        ),
        compiler_params=pltpu.CompilerParams(
            dimension_semantics=("parallel", "parallel", "arbitrary"),
            vmem_limit_bytes=_VMEM_LIMIT_BYTES),
    )(*inputs)


# ---------------------------------------------------------------------------
# Maxpool 3x3 / stride 2 / pad 1 : tiled running max of the 9 taps in-kernel
# ---------------------------------------------------------------------------

def _max9_kernel(*refs):
    tap_refs, o_ref = refs[:-1], refs[-1]
    m = tap_refs[0][...]
    for r in tap_refs[1:]:
        m = jnp.maximum(m, r[...])
    o_ref[...] = m


def maxpool2d_3x3_s2_p1(x):
    N, H, W, C = x.shape
    OH = (H - 1) // 2 + 1
    OW = (W - 1) // 2 + 1
    xp = jnp.pad(x, ((0, 0), (1, 1), (1, 1), (0, 0)), constant_values=-jnp.inf)
    M = N * OH * OW
    Mp = _round_up(M, 8)
    taps = [xp[:, kh:kh + 2 * OH:2, kw:kw + 2 * OW:2, :].reshape(M, C)
            for kh in range(3) for kw in range(3)]
    if Mp != M:
        taps = [jnp.pad(t, ((0, Mp - M), (0, 0))) for t in taps]
    tmr = _pick_row_tile(Mp)
    out = pl.pallas_call(
        _max9_kernel,
        out_shape=jax.ShapeDtypeStruct((Mp, C), x.dtype),
        grid_spec=pltpu.PrefetchScalarGridSpec(
            num_scalar_prefetch=0,
            grid=(Mp // tmr,),
            in_specs=[pl.BlockSpec((tmr, C), lambda i: (i, 0)) for _ in range(9)],
            out_specs=pl.BlockSpec((tmr, C), lambda i: (i, 0)),
        ),
        compiler_params=pltpu.CompilerParams(
            dimension_semantics=("parallel",),
            vmem_limit_bytes=_VMEM_LIMIT_BYTES),
    )(*taps)
    if Mp != M:
        out = out[:M]
    return out.reshape(N, OH, OW, C)


# ---------------------------------------------------------------------------
# Global average pool (adaptive 1x1) : per-sample mean reduction kernel
# ---------------------------------------------------------------------------

def _avgpool_kernel(x_ref, o_ref):
    o_ref[...] = jnp.mean(x_ref[...].astype(jnp.float32), axis=1, keepdims=True)


def global_avgpool(x):
    N, H, W, C = x.shape
    xr = x.reshape(N, H * W, C)
    out = pl.pallas_call(
        _avgpool_kernel,
        out_shape=jax.ShapeDtypeStruct((N, 1, C), jnp.float32),
        grid_spec=pltpu.PrefetchScalarGridSpec(
            num_scalar_prefetch=0,
            grid=(N,),
            in_specs=[pl.BlockSpec((1, H * W, C), lambda n: (n, 0, 0))],
            out_specs=pl.BlockSpec((1, 1, C), lambda n: (n, 0, 0)),
        ),
        compiler_params=pltpu.CompilerParams(
            dimension_semantics=("parallel",),
            vmem_limit_bytes=_VMEM_LIMIT_BYTES),
    )(xr)
    return out.reshape(N, C)


# ---------------------------------------------------------------------------
# Conv wrapper: 1x1 convs feed the GEMM directly; kxk convs build bf16 im2col.
# ---------------------------------------------------------------------------

def conv2d_bn(x, cp, *, relu=True, residual=None, out_dtype=jnp.bfloat16):
    """x: NHWC bf16 (channel-padded).  cp: prepped conv params dict."""
    N, H, W, C = x.shape
    KH, KW, stride, pad = cp["kh"], cp["kw"], cp["stride"], cp["pad"]
    OH = (H + 2 * pad - KH) // stride + 1
    OW = (W + 2 * pad - KW) // stride + 1

    if KH == 1 and KW == 1 and pad == 0:
        xs = x if stride == 1 else x[:, ::stride, ::stride, :]
        a = xs.reshape(N * OH * OW, C)
    else:
        # TODO(synk): replace materialized im2col with a direct-conv (im2col-free)
        # Pallas kernel that streams shifted row windows from HBM.
        xp = jnp.pad(x, ((0, 0), (pad, pad), (pad, pad), (0, 0)))
        cols = [xp[:, kh:kh + stride * OH:stride, kw:kw + stride * OW:stride, :]
                for kh in range(KH) for kw in range(KW)]
        a = jnp.concatenate(cols, axis=-1).reshape(N * OH * OW, KH * KW * C)

    r = None
    if residual is not None:
        r = residual.reshape(N * OH * OW, residual.shape[-1])

    y = matmul_bn_act(a, cp["b"], cp["s"], cp["c"], residual=r, relu=relu,
                      out_dtype=out_dtype)
    M = N * OH * OW
    if y.shape[0] != M:
        y = y[:M]
    return y.reshape(N, OH, OW, y.shape[-1])


def fold_bn(gamma, beta, mean, var, eps=1e-5):
    inv = gamma / jnp.sqrt(var + eps)
    return inv, beta - mean * inv


# ---------------------------------------------------------------------------
# One-time weight prep (hoisted out of the forward path):
# transpose -> (KH,KW,I,O), pad I to the padded input channels, pad O to a
# multiple of 128 lanes, pad K to a tile multiple, cast to bf16.
# ---------------------------------------------------------------------------

def prep_conv(w, scale, shift, in_phys, *, stride, pad, tk=128):
    O, I, KH, KW = w.shape
    Op = _round_up(O, LANE)
    wt = jnp.transpose(w, (2, 3, 1, 0))                            # (KH,KW,I,O)
    wt = jnp.pad(wt, ((0, 0), (0, 0), (0, in_phys - I), (0, Op - O)))
    K = KH * KW * in_phys
    Kp = _round_up(K, tk)
    bmat = wt.reshape(K, Op)
    if Kp != K:
        bmat = jnp.pad(bmat, ((0, Kp - K), (0, 0)))
    return dict(
        b=bmat.astype(jnp.bfloat16),
        s=jnp.pad(scale.astype(jnp.float32), (0, Op - O)).reshape(1, Op),
        c=jnp.pad(shift.astype(jnp.float32), (0, Op - O)).reshape(1, Op),
        kh=KH, kw=KW, stride=stride, pad=pad)


def prep_fc(w, bias):
    O, K = w.shape
    Op = _round_up(O, LANE)
    assert K % LANE == 0
    bmat = jnp.pad(w.T.astype(jnp.float32), ((0, 0), (0, Op - O)))
    return dict(
        b=bmat.astype(jnp.bfloat16),
        s=jnp.pad(jnp.ones((O,), jnp.float32), (0, Op - O)).reshape(1, Op),
        c=jnp.pad(bias.astype(jnp.float32), (0, Op - O)).reshape(1, Op))


# ---------------------------------------------------------------------------
# Deterministic parameter construction (synthetic; no checkpoint load)
# ---------------------------------------------------------------------------

class ParamGen:
    def __init__(self, seed=0):
        self.key = jax.random.PRNGKey(seed)

    def next(self):
        self.key, sub = jax.random.split(self.key)
        return sub

    def conv(self, o, i, kh, kw):
        std = (2.0 / (i * kh * kw)) ** 0.5
        return jax.random.normal(self.next(), (o, i, kh, kw), jnp.float32) * std

    def bn(self, c):
        gamma = jnp.ones((c,), jnp.float32)
        beta = 0.01 * jax.random.normal(self.next(), (c,), jnp.float32)
        mean = 0.01 * jax.random.normal(self.next(), (c,), jnp.float32)
        var = jnp.ones((c,), jnp.float32)
        return fold_bn(gamma, beta, mean, var)


def make_bottleneck_params(pg, in_c, planes, stride):
    in_phys = _round_up(in_c, LANE)
    mid_phys = _round_up(planes, LANE)
    p = {}
    w = pg.conv(planes, in_c, 1, 1); sc, sh = pg.bn(planes)
    p["conv1"] = prep_conv(w, sc, sh, in_phys, stride=1, pad=0)
    w = pg.conv(planes, planes, 3, 3); sc, sh = pg.bn(planes)
    p["conv2"] = prep_conv(w, sc, sh, mid_phys, stride=stride, pad=1)
    w = pg.conv(planes * 4, planes, 1, 1); sc, sh = pg.bn(planes * 4)
    p["conv3"] = prep_conv(w, sc, sh, mid_phys, stride=1, pad=0)
    if stride != 1 or in_c != planes * 4:
        w = pg.conv(planes * 4, in_c, 1, 1); sc, sh = pg.bn(planes * 4)
        p["down"] = prep_conv(w, sc, sh, in_phys, stride=stride, pad=0)
    return p


def make_resnet50_params(num_classes, seed=0):
    pg = ParamGen(seed)
    params = {}
    w = pg.conv(64, 3, 7, 7); sc, sh = pg.bn(64)
    params["conv1"] = prep_conv(w, sc, sh, 3, stride=2, pad=3)
    cfg = [(64, 3, 1), (128, 4, 2), (256, 6, 2), (512, 3, 2)]
    in_c = 64
    layers = []
    for planes, blocks, stride in cfg:
        blks = []
        for bi in range(blocks):
            s = stride if bi == 0 else 1
            blks.append(make_bottleneck_params(pg, in_c, planes, s))
            in_c = planes * 4
        layers.append(blks)
    params["layers"] = layers
    # classifier: nn.Linear(2048, num_classes) with kaiming_normal(weight)
    fan_in = 2048
    w = jax.random.normal(pg.next(), (num_classes, fan_in), jnp.float32) * (2.0 / fan_in) ** 0.5
    b = 0.01 * jax.random.normal(pg.next(), (num_classes,), jnp.float32)
    params["fc"] = prep_fc(w, b)
    params["num_classes"] = num_classes
    return params


# ---------------------------------------------------------------------------
# Forward
# ---------------------------------------------------------------------------

def bottleneck_forward(x, p):
    if "down" in p:
        identity = conv2d_bn(x, p["down"], relu=False)
    else:
        identity = x
    out = conv2d_bn(x, p["conv1"], relu=True)
    out = conv2d_bn(out, p["conv2"], relu=True)
    # residual add + ReLU fused into the conv3 GEMM epilogue
    out = conv2d_bn(out, p["conv3"], relu=True, residual=identity)
    return out


def resnet50_forward(x_nchw, params):
    x = jnp.transpose(x_nchw, (0, 2, 3, 1)).astype(jnp.bfloat16)   # NCHW -> NHWC
    x = conv2d_bn(x, params["conv1"], relu=True)
    x = maxpool2d_3x3_s2_p1(x)
    for blks in params["layers"]:
        for p in blks:
            x = bottleneck_forward(x, p)
    f = global_avgpool(x)                       # (N, 2048) f32, == f.view(N, -1)
    fc = params["fc"]
    logits = matmul_bn_act(f, fc["b"], fc["s"], fc["c"],
                           relu=False, out_dtype=jnp.float32)
    n = x_nchw.shape[0]
    return logits[:n, :params["num_classes"]]   # slice padded lanes at the very end


if __name__ == "__main__":
    num_classes = 10
    key = jax.random.PRNGKey(0)
    x = jax.random.normal(key, (2, 3, 32, 32), jnp.float32)   # NCHW, like PyTorch
    params = make_resnet50_params(num_classes, seed=0)
    fwd = jax.jit(functools.partial(resnet50_forward, params=params))
    y = jax.block_until_ready(fwd(x))
    assert y.shape == (2, num_classes), y.shape
    assert bool(jnp.all(jnp.isfinite(y)))
    print("KERNEL_OK")
</pallas_src>

<mosaic_0001>
module attributes {stable_mosaic.version = 11 : i64} {
  func.func @_gemm_bn_act_kernel(%arg0: i32, %arg1: i32, %arg2: i32, %arg3: memref<512x128xbf16, #tpu.memory_space<vmem>>, %arg4: memref<128x128xbf16, #tpu.memory_space<vmem>>, %arg5: memref<1x128xf32, #tpu.memory_space<vmem>>, %arg6: memref<1x128xf32, #tpu.memory_space<vmem>>, %arg7: memref<512x128xbf16, #tpu.memory_space<vmem>>, %arg8: memref<512x128xf32, #tpu.memory_space<vmem>>) attributes {dimension_semantics = [#tpu.dimension_semantics<parallel>, #tpu.dimension_semantics<parallel>, #tpu.dimension_semantics<arbitrary>], iteration_bounds = array<i64: 1, 1, 2>, scalar_prefetch = 0 : i64, scratch_operands = 1 : i64, tpu.core_type = #tpu.core_type<tc>, window_params = [{transform_indices = @transform_0, window_bounds = array<i64: 512, 128>}, {transform_indices = @transform_1, window_bounds = array<i64: 128, 128>}, {transform_indices = @transform_2, window_bounds = array<i64: 1, 128>}, {transform_indices = @transform_3, window_bounds = array<i64: 1, 128>}, {transform_indices = @transform_4, window_bounds = array<i64: 512, 128>}]} {
    %c0_i32 = arith.constant 0 : i32
    %0 = arith.cmpi eq, %arg2, %c0_i32 : i32
    %1 = arith.extui %0 : i1 to i32
    %c0_i32_0 = arith.constant 0 : i32
    %2 = arith.cmpi ne, %1, %c0_i32_0 : i32
    scf.if %2 {
      %cst_9 = arith.constant 0.000000e+00 : f32
      %12 = vector.broadcast %cst_9 : f32 to vector<512x128xf32>
      %c0_10 = arith.constant 0 : index
      %c0_11 = arith.constant 0 : index
      %13 = vector.load %arg8[%c0_10, %c0_11] : memref<512x128xf32, #tpu.memory_space<vmem>>, vector<512x128xf32>
      tpu.vector_store %arg8[%c0_10, %c0_11], %12 {strides = array<i32>} : memref<512x128xf32, #tpu.memory_space<vmem>>, vector<512x128xf32>,
    } else {
    }
    %c0 = arith.constant 0 : index
    %c0_1 = arith.constant 0 : index
    %3 = vector.load %arg8[%c0, %c0_1] : memref<512x128xf32, #tpu.memory_space<vmem>>, vector<512x128xf32>
    %c0_2 = arith.constant 0 : index
    %c0_3 = arith.constant 0 : index
    %4 = vector.load %arg3[%c0_2, %c0_3] : memref<512x128xbf16, #tpu.memory_space<vmem>>, vector<512x128xbf16>
    %c0_4 = arith.constant 0 : index
    %c0_5 = arith.constant 0 : index
    %5 = vector.load %arg4[%c0_4, %c0_5] : memref<128x128xbf16, #tpu.memory_space<vmem>>, vector<128x128xbf16>
    %cst = arith.constant dense<0.000000e+00> : vector<512x128xf32>
    %6 = tpu.matmul %4, %5, %cst {dimension_numbers = #tpu.dot_dimension_numbers<[1], [0], [0], [1], [0, 0, 1, 1], [], []>} : vector<512x128xbf16>, vector<128x128xbf16>, vector<512x128xf32> -> vector<512x128xf32>
    %7 = arith.addf %3, %6 : vector<512x128xf32>
    %c0_6 = arith.constant 0 : index
    %c0_7 = arith.constant 0 : index
    %8 = vector.load %arg8[%c0_6, %c0_7] : memref<512x128xf32, #tpu.memory_space<vmem>>, vector<512x128xf32>
    tpu.vector_store %arg8[%c0_6, %c0_7], %7 {strides = array<i32>} : memref<512x128xf32, #tpu.memory_space<vmem>>, vector<512x128xf32>,
    %c1_i32 = arith.constant 1 : i32
    %9 = arith.cmpi eq, %arg2, %c1_i32 : i32
    %10 = arith.extui %9 : i1 to i32
    %c0_i32_8 = arith.constant 0 : i32
    %11 = arith.cmpi ne, %10, %c0_i32_8 : i32
    scf.if %11 {
      %c0_9 = arith.constant 0 : index
      %c0_10 = arith.constant 0 : index
      %12 = vector.load %arg8[%c0_9, %c0_10] : memref<512x128xf32, #tpu.memory_space<vmem>>, vector<512x128xf32>
      %c0_11 = arith.constant 0 : index
      %c0_12 = arith.constant 0 : index
      %13 = vector.load %arg5[%c0_11, %c0_12] : memref<1x128xf32, #tpu.memory_space<vmem>>, vector<1x128xf32>
      %14 = vector.broadcast %13 : vector<1x128xf32> to vector<512x128xf32>
      %15 = arith.mulf %12, %14 : vector<512x128xf32>
      %c0_13 = arith.constant 0 : index
      %c0_14 = arith.constant 0 : index
      %16 = vector.load %arg6[%c0_13, %c0_14] : memref<1x128xf32, #tpu.memory_space<vmem>>, vector<1x128xf32>
      %17 = vector.broadcast %16 : vector<1x128xf32> to vector<512x128xf32>
      %18 = arith.addf %15, %17 : vector<512x128xf32>
      %cst_15 = arith.constant 0.000000e+00 : f32
      %19 = vector.broadcast %cst_15 : f32 to vector<512x128xf32>
      %20 = arith.maximumf %18, %19 : vector<512x128xf32>
      %21 = arith.truncf %20 : vector<512x128xf32> to vector<512x128xbf16>
      %c0_16 = arith.constant 0 : index
      %c0_17 = arith.constant 0 : index
      %22 = vector.load %arg7[%c0_16, %c0_17] : memref<512x128xbf16, #tpu.memory_space<vmem>>, vector<512x128xbf16>
      tpu.vector_store %arg7[%c0_16, %c0_17], %21 {strides = array<i32>} : memref<512x128xbf16, #tpu.memory_space<vmem>>, vector<512x128xbf16>,
    } else {
    }
    return
  }
  func.func @transform_0(%arg0: i32, %arg1: i32, %arg2: i32) -> (i32, i32) {
    %c0_i32 = arith.constant 0 : i32
    return %arg0, %arg2 : i32, i32
  }
  func.func @transform_1(%arg0: i32, %arg1: i32, %arg2: i32) -> (i32, i32) {
    %c0_i32 = arith.constant 0 : i32
    return %arg2, %arg1 : i32, i32
  }
  func.func @transform_2(%arg0: i32, %arg1: i32, %arg2: i32) -> (i32, i32) {
    %c0_i32 = arith.constant 0 : i32
    %c0_i32_0 = arith.constant 0 : i32
    return %c0_i32, %arg1 : i32, i32
  }
  func.func @transform_3(%arg0: i32, %arg1: i32, %arg2: i32) -> (i32, i32) {
    %c0_i32 = arith.constant 0 : i32
    %c0_i32_0 = arith.constant 0 : i32
    return %c0_i32, %arg1 : i32, i32
  }
  func.func @transform_4(%arg0: i32, %arg1: i32, %arg2: i32) -> (i32, i32) {
    %c0_i32 = arith.constant 0 : i32
    return %arg0, %arg1 : i32, i32
  }
}

module attributes {stable_mosaic.version = 11 : i64} {
  func.func @_gemm_bn_act_kernel(%arg0: i32, %arg1: i32, %arg2: i32, %arg3: memref<128x128xbf16, #tpu.memory_space<vmem>>, %arg4: memref<128x128xbf16, #tpu.memory_space<vmem>>, %arg5: memref<1x128xf32, #tpu.memory_space<vmem>>, %arg6: memref<1x128xf32, #tpu.memory_space<vmem>>, %arg7: memref<128x128xbf16, #tpu.memory_space<vmem>>, %arg8: memref<128x128xf32, #tpu.memory_space<vmem>>) attributes {dimension_semantics = [#tpu.dimension_semantics<parallel>, #tpu.dimension_semantics<parallel>, #tpu.dimension_semantics<arbitrary>], iteration_bounds = array<i64: 1, 1, 1>, scalar_prefetch = 0 : i64, scratch_operands = 1 : i64, tpu.core_type = #tpu.core_type<tc>, window_params = [{transform_indices = @transform_0, window_bounds = array<i64: 128, 128>}, {transform_indices = @transform_1, window_bounds = array<i64: 128, 128>}, {transform_indices = @transform_2, window_bounds = array<i64: 1, 128>}, {transform_indices = @transform_3, window_bounds = array<i64: 1, 128>}, {transform_indices = @transform_4, window_bounds = array<i64: 128, 128>}]} {
    %c0_i32 = arith.constant 0 : i32
    %0 = arith.cmpi eq, %arg2, %c0_i32 : i32
    %1 = arith.extui %0 : i1 to i32
    %c0_i32_0 = arith.constant 0 : i32
    %2 = arith.cmpi ne, %1, %c0_i32_0 : i32
    scf.if %2 {
      %cst_10 = arith.constant 0.000000e+00 : f32
      %12 = vector.broadcast %cst_10 : f32 to vector<128x128xf32>
      %c0_11 = arith.constant 0 : index
      %c0_12 = arith.constant 0 : index
      %13 = vector.load %arg8[%c0_11, %c0_12] : memref<128x128xf32, #tpu.memory_space<vmem>>, vector<128x128xf32>
      tpu.vector_store %arg8[%c0_11, %c0_12], %12 {strides = array<i32>} : memref<128x128xf32, #tpu.memory_space<vmem>>, vector<128x128xf32>,
    } else {
    }
    %c0 = arith.constant 0 : index
    %c0_1 = arith.constant 0 : index
    %3 = vector.load %arg8[%c0, %c0_1] : memref<128x128xf32, #tpu.memory_space<vmem>>, vector<128x128xf32>
    %c0_2 = arith.constant 0 : index
    %c0_3 = arith.constant 0 : index
    %4 = vector.load %arg3[%c0_2, %c0_3] : memref<128x128xbf16, #tpu.memory_space<vmem>>, vector<128x128xbf16>
    %c0_4 = arith.constant 0 : index
    %c0_5 = arith.constant 0 : index
    %5 = vector.load %arg4[%c0_4, %c0_5] : memref<128x128xbf16, #tpu.memory_space<vmem>>, vector<128x128xbf16>
    %cst = arith.constant dense<0.000000e+00> : vector<128x128xf32>
    %6 = tpu.matmul %4, %5, %cst {dimension_numbers = #tpu.dot_dimension_numbers<[1], [0], [0], [1], [0, 0, 1, 1], [], []>} : vector<128x128xbf16>, vector<128x128xbf16>, vector<128x128xf32> -> vector<128x128xf32>
    %7 = arith.addf %3, %6 : vector<128x128xf32>
    %c0_6 = arith.constant 0 : index
    %c0_7 = arith.constant 0 : index
    %8 = vector.load %arg8[%c0_6, %c0_7] : memref<128x128xf32, #tpu.memory_space<vmem>>, vector<128x128xf32>
    tpu.vector_store %arg8[%c0_6, %c0_7], %7 {strides = array<i32>} : memref<128x128xf32, #tpu.memory_space<vmem>>, vector<128x128xf32>,
    %c0_i32_8 = arith.constant 0 : i32
    %9 = arith.cmpi eq, %arg2, %c0_i32_8 : i32
    %10 = arith.extui %9 : i1 to i32
    %c0_i32_9 = arith.constant 0 : i32
    %11 = arith.cmpi ne, %10, %c0_i32_9 : i32
    scf.if %11 {
      %c0_10 = arith.constant 0 : index
      %c0_11 = arith.constant 0 : index
      %12 = vector.load %arg8[%c0_10, %c0_11] : memref<128x128xf32, #tpu.memory_space<vmem>>, vector<128x128xf32>
      %c0_12 = arith.constant 0 : index
      %c0_13 = arith.constant 0 : index
      %13 = vector.load %arg5[%c0_12, %c0_13] : memref<1x128xf32, #tpu.memory_space<vmem>>, vector<1x128xf32>
      %14 = vector.broadcast %13 : vector<1x128xf32> to vector<128x128xf32>
      %15 = arith.mulf %12, %14 : vector<128x128xf32>
      %c0_14 = arith.constant 0 : index
      %c0_15 = arith.constant 0 : index
      %16 = vector.load %arg6[%c0_14, %c0_15] : memref<1x128xf32, #tpu.memory_space<vmem>>, vector<1x128xf32>
      %17 = vector.broadcast %16 : vector<1x128xf32> to vector<128x128xf32>
      %18 = arith.addf %15, %17 : vector<128x128xf32>
      %cst_16 = arith.constant 0.000000e+00 : f32
      %19 = vector.broadcast %cst_16 : f32 to vector<128x128xf32>
      %20 = arith.maximumf %18, %19 : vector<128x128xf32>
      %21 = arith.truncf %20 : vector<128x128xf32> to vector<128x128xbf16>
      %c0_17 = arith.constant 0 : index
      %c0_18 = arith.constant 0 : index
      %22 = vector.load %arg7[%c0_17, %c0_18] : memref<128x128xbf16, #tpu.memory_space<vmem>>, vector<128x128xbf16>
      tpu.vector_store %arg7[%c0_17, %c0_18], %21 {strides = array<i32>} : memref<128x128xbf16, #tpu.memory_space<vmem>>, vector<128x128xbf16>,
    } else {
    }
    return
  }
  func.func @transform_0(%arg0: i32, %arg1: i32, %arg2: i32) -> (i32, i32) {
    %c0_i32 = arith.constant 0 : i32
    return %arg0, %arg2 : i32, i32
  }
  func.func @transform_1(%arg0: i32, %arg1: i32, %arg2: i32) -> (i32, i32) {
    %c0_i32 = arith.constant 0 : i32
    return %arg2, %arg1 : i32, i32
  }
  func.func @transform_2(%arg0: i32, %arg1: i32, %arg2: i32) -> (i32, i32) {
    %c0_i32 = arith.constant 0 : i32
    %c0_i32_0 = arith.constant 0 : i32
    return %c0_i32, %arg1 : i32, i32
  }
  func.func @transform_3(%arg0: i32, %arg1: i32, %arg2: i32) -> (i32, i32) {
    %c0_i32 = arith.constant 0 : i32
    %c0_i32_0 = arith.constant 0 : i32
    return %c0_i32, %arg1 : i32, i32
  }
  func.func @transform_4(%arg0: i32, %arg1: i32, %arg2: i32) -> (i32, i32) {
    %c0_i32 = arith.constant 0 : i32
    return %arg0, %arg1 : i32, i32
  }
}

module attributes {stable_mosaic.version = 11 : i64} {
  func.func @_max9_kernel(%arg0: i32, %arg1: memref<128x128xbf16, #tpu.memory_space<vmem>>, %arg2: memref<128x128xbf16, #tpu.memory_space<vmem>>, %arg3: memref<128x128xbf16, #tpu.memory_space<vmem>>, %arg4: memref<128x128xbf16, #tpu.memory_space<vmem>>, %arg5: memref<128x128xbf16, #tpu.memory_space<vmem>>, %arg6: memref<128x128xbf16, #tpu.memory_space<vmem>>, %arg7: memref<128x128xbf16, #tpu.memory_space<vmem>>, %arg8: memref<128x128xbf16, #tpu.memory_space<vmem>>, %arg9: memref<128x128xbf16, #tpu.memory_space<vmem>>, %arg10: memref<128x128xbf16, #tpu.memory_space<vmem>>) attributes {dimension_semantics = [#tpu.dimension_semantics<parallel>], iteration_bounds = array<i64: 1>, scalar_prefetch = 0 : i64, scratch_operands = 0 : i64, tpu.core_type = #tpu.core_type<tc>, window_params = [{transform_indices = @transform_0, window_bounds = array<i64: 128, 128>}, {transform_indices = @transform_1, window_bounds = array<i64: 128, 128>}, {transform_indices = @transform_2, window_bounds = array<i64: 128, 128>}, {transform_indices = @transform_3, window_bounds = array<i64: 128, 128>}, {transform_indices = @transform_4, window_bounds = array<i64: 128, 128>}, {transform_indices = @transform_5, window_bounds = array<i64: 128, 128>}, {transform_indices = @transform_6, window_bounds = array<i64: 128, 128>}, {transform_indices = @transform_7, window_bounds = array<i64: 128, 128>}, {transform_indices = @transform_8, window_bounds = array<i64: 128, 128>}, {transform_indices = @transform_9, window_bounds = array<i64: 128, 128>}]} {
    %c0 = arith.constant 0 : index
    %c0_0 = arith.constant 0 : index
    %0 = vector.load %arg1[%c0, %c0_0] : memref<128x128xbf16, #tpu.memory_space<vmem>>, vector<128x128xbf16>
    %c0_1 = arith.constant 0 : index
    %c0_2 = arith.constant 0 : index
    %1 = vector.load %arg2[%c0_1, %c0_2] : memref<128x128xbf16, #tpu.memory_space<vmem>>, vector<128x128xbf16>
    %2 = arith.maximumf %0, %1 : vector<128x128xbf16>
    %c0_3 = arith.constant 0 : index
    %c0_4 = arith.constant 0 : index
    %3 = vector.load %arg3[%c0_3, %c0_4] : memref<128x128xbf16, #tpu.memory_space<vmem>>, vector<128x128xbf16>
    %4 = arith.maximumf %2, %3 : vector<128x128xbf16>
    %c0_5 = arith.constant 0 : index
    %c0_6 = arith.constant 0 : index
    %5 = vector.load %arg4[%c0_5, %c0_6] : memref<128x128xbf16, #tpu.memory_space<vmem>>, vector<128x128xbf16>
    %6 = arith.maximumf %4, %5 : vector<128x128xbf16>
    %c0_7 = arith.constant 0 : index
    %c0_8 = arith.constant 0 : index
    %7 = vector.load %arg5[%c0_7, %c0_8] : memref<128x128xbf16, #tpu.memory_space<vmem>>, vector<128x128xbf16>
    %8 = arith.maximumf %6, %7 : vector<128x128xbf16>
    %c0_9 = arith.constant 0 : index
    %c0_10 = arith.constant 0 : index
    %9 = vector.load %arg6[%c0_9, %c0_10] : memref<128x128xbf16, #tpu.memory_space<vmem>>, vector<128x128xbf16>
    %10 = arith.maximumf %8, %9 : vector<128x128xbf16>
    %c0_11 = arith.constant 0 : index
    %c0_12 = arith.constant 0 : index
    %11 = vector.load %arg7[%c0_11, %c0_12] : memref<128x128xbf16, #tpu.memory_space<vmem>>, vector<128x128xbf16>
    %12 = arith.maximumf %10, %11 : vector<128x128xbf16>
    %c0_13 = arith.constant 0 : index
    %c0_14 = arith.constant 0 : index
    %13 = vector.load %arg8[%c0_13, %c0_14] : memref<128x128xbf16, #tpu.memory_space<vmem>>, vector<128x128xbf16>
    %14 = arith.maximumf %12, %13 : vector<128x128xbf16>
    %c0_15 = arith.constant 0 : index
    %c0_16 = arith.constant 0 : index
    %15 = vector.load %arg9[%c0_15, %c0_16] : memref<128x128xbf16, #tpu.memory_space<vmem>>, vector<128x128xbf16>
    %16 = arith.maximumf %14, %15 : vector<128x128xbf16>
    %c0_17 = arith.constant 0 : index
    %c0_18 = arith.constant 0 : index
    %17 = vector.load %arg10[%c0_17, %c0_18] : memref<128x128xbf16, #tpu.memory_space<vmem>>, vector<128x128xbf16>
    tpu.vector_store %arg10[%c0_17, %c0_18], %16 {strides = array<i32>} : memref<128x128xbf16, #tpu.memory_space<vmem>>, vector<128x128xbf16>,
    return
  }
  func.func @transform_0(%arg0: i32) -> (i32, i32) {
    %c0_i32 = arith.constant 0 : i32
    %c0_i32_0 = arith.constant 0 : i32
    return %arg0, %c0_i32 : i32, i32
  }
  func.func @transform_1(%arg0: i32) -> (i32, i32) {
    %c0_i32 = arith.constant 0 : i32
    %c0_i32_0 = arith.constant 0 : i32
    return %arg0, %c0_i32 : i32, i32
  }
  func.func @transform_2(%arg0: i32) -> (i32, i32) {
    %c0_i32 = arith.constant 0 : i32
    %c0_i32_0 = arith.constant 0 : i32
    return %arg0, %c0_i32 : i32, i32
  }
  func.func @transform_3(%arg0: i32) -> (i32, i32) {
    %c0_i32 = arith.constant 0 : i32
    %c0_i32_0 = arith.constant 0 : i32
    return %arg0, %c0_i32 : i32, i32
  }
  func.func @transform_4(%arg0: i32) -> (i32, i32) {
    %c0_i32 = arith.constant 0 : i32
    %c0_i32_0 = arith.constant 0 : i32
    return %arg0, %c0_i32 : i32, i32
  }
  func.func @transform_5(%arg0: i32) -> (i32, i32) {
    %c0_i32 = arith.constant 0 : i32
    %c0_i32_0 = arith.constant 0 : i32
    return %arg0, %c0_i32 : i32, i32
  }
  func.func @transform_6(%arg0: i32) -> (i32, i32) {
    %c0_i32 = arith.constant 0 : i32
    %c0_i32_0 = arith.constant 0 : i32
    return %arg0, %c0_i32 : i32, i32
  }
  func.func @transform_7(%arg0: i32) -> (i32, i32) {
    %c0_i32 = arith.constant 0 : i32
    %c0_i32_0 = arith.constant 0 : i32
    return %arg0, %c0_i32 : i32, i32
  }
  func.func @transform_8(%arg0: i32) -> (i32, i32) {
    %c0_i32 = arith.constant 0 : i32
    %c0_i32_0 = arith.constant 0 : i32
    return %arg0, %c0_i32 : i32, i32
  }
  func.func @transform_9(%arg0: i32) -> (i32, i32) {
    %c0_i32 = arith.constant 0 : i32
    %c0_i32_0 = arith.constant 0 : i32
    return %arg0, %c0_i32 : i32, i32
  }
}

module attributes {stable_mosaic.version = 11 : i64} {
  func.func @_gemm_bn_act_kernel(%arg0: i32, %arg1: i32, %arg2: i32, %arg3: memref<128x128xbf16, #tpu.memory_space<vmem>>, %arg4: memref<128x128xbf16, #tpu.memory_space<vmem>>, %arg5: memref<1x128xf32, #tpu.memory_space<vmem>>, %arg6: memref<1x128xf32, #tpu.memory_space<vmem>>, %arg7: memref<128x128xbf16, #tpu.memory_space<vmem>>, %arg8: memref<128x128xf32, #tpu.memory_space<vmem>>) attributes {dimension_semantics = [#tpu.dimension_semantics<parallel>, #tpu.dimension_semantics<parallel>, #tpu.dimension_semantics<arbitrary>], iteration_bounds = array<i64: 1, 1, 9>, scalar_prefetch = 0 : i64, scratch_operands = 1 : i64, tpu.core_type = #tpu.core_type<tc>, window_params = [{transform_indices = @transform_0, window_bounds = array<i64: 128, 128>}, {transform_indices = @transform_1, window_bounds = array<i64: 128, 128>}, {transform_indices = @transform_2, window_bounds = array<i64: 1, 128>}, {transform_indices = @transform_3, window_bounds = array<i64: 1, 128>}, {transform_indices = @transform_4, window_bounds = array<i64: 128, 128>}]} {
    %c0_i32 = arith.constant 0 : i32
    %0 = arith.cmpi eq, %arg2, %c0_i32 : i32
    %1 = arith.extui %0 : i1 to i32
    %c0_i32_0 = arith.constant 0 : i32
    %2 = arith.cmpi ne, %1, %c0_i32_0 : i32
    scf.if %2 {
      %cst_9 = arith.constant 0.000000e+00 : f32
      %12 = vector.broadcast %cst_9 : f32 to vector<128x128xf32>
      %c0_10 = arith.constant 0 : index
      %c0_11 = arith.constant 0 : index
      %13 = vector.load %arg8[%c0_10, %c0_11] : memref<128x128xf32, #tpu.memory_space<vmem>>, vector<128x128xf32>
      tpu.vector_store %arg8[%c0_10, %c0_11], %12 {strides = array<i32>} : memref<128x128xf32, #tpu.memory_space<vmem>>, vector<128x128xf32>,
    } else {
    }
    %c0 = arith.constant 0 : index
    %c0_1 = arith.constant 0 : index
    %3 = vector.load %arg8[%c0, %c0_1] : memref<128x128xf32, #tpu.memory_space<vmem>>, vector<128x128xf32>
    %c0_2 = arith.constant 0 : index
    %c0_3 = arith.constant 0 : index
    %4 = vector.load %arg3[%c0_2, %c0_3] : memref<128x128xbf16, #tpu.memory_space<vmem>>, vector<128x128xbf16>
    %c0_4 = arith.constant 0 : index
    %c0_5 = arith.constant 0 : index
    %5 = vector.load %arg4[%c0_4, %c0_5] : memref<128x128xbf16, #tpu.memory_space<vmem>>, vector<128x128xbf16>
    %cst = arith.constant dense<0.000000e+00> : vector<128x128xf32>
    %6 = tpu.matmul %4, %5, %cst {dimension_numbers = #tpu.dot_dimension_numbers<[1], [0], [0], [1], [0, 0, 1, 1], [], []>} : vector<128x128xbf16>, vector<128x128xbf16>, vector<128x128xf32> -> vector<128x128xf32>
    %7 = arith.addf %3, %6 : vector<128x128xf32>
    %c0_6 = arith.constant 0 : index
    %c0_7 = arith.constant 0 : index
    %8 = vector.load %arg8[%c0_6, %c0_7] : memref<128x128xf32, #tpu.memory_space<vmem>>, vector<128x128xf32>
    tpu.vector_store %arg8[%c0_6, %c0_7], %7 {strides = array<i32>} : memref<128x128xf32, #tpu.memory_space<vmem>>, vector<128x128xf32>,
    %c8_i32 = arith.constant 8 : i32
    %9 = arith.cmpi eq, %arg2, %c8_i32 : i32
    %10 = arith.extui %9 : i1 to i32
    %c0_i32_8 = arith.constant 0 : i32
    %11 = arith.cmpi ne, %10, %c0_i32_8 : i32
    scf.if %11 {
      %c0_9 = arith.constant 0 : index
      %c0_10 = arith.constant 0 : index
      %12 = vector.load %arg8[%c0_9, %c0_10] : memref<128x128xf32, #tpu.memory_space<vmem>>, vector<128x128xf32>
      %c0_11 = arith.constant 0 : index
      %c0_12 = arith.constant 0 : index
      %13 = vector.load %arg5[%c0_11, %c0_12] : memref<1x128xf32, #tpu.memory_space<vmem>>, vector<1x128xf32>
      %14 = vector.broadcast %13 : vector<1x128xf32> to vector<128x128xf32>
      %15 = arith.mulf %12, %14 : vector<128x128xf32>
      %c0_13 = arith.constant 0 : index
      %c0_14 = arith.constant 0 : index
      %16 = vector.load %arg6[%c0_13, %c0_14] : memref<1x128xf32, #tpu.memory_space<vmem>>, vector<1x128xf32>
      %17 = vector.broadcast %16 : vector<1x128xf32> to vector<128x128xf32>
      %18 = arith.addf %15, %17 : vector<128x128xf32>
      %cst_15 = arith.constant 0.000000e+00 : f32
      %19 = vector.broadcast %cst_15 : f32 to vector<128x128xf32>
      %20 = arith.maximumf %18, %19 : vector<128x128xf32>
      %21 = arith.truncf %20 : vector<128x128xf32> to vector<128x128xbf16>
      %c0_16 = arith.constant 0 : index
      %c0_17 = arith.constant 0 : index
      %22 = vector.load %arg7[%c0_16, %c0_17] : memref<128x128xbf16, #tpu.memory_space<vmem>>, vector<128x128xbf16>
      tpu.vector_store %arg7[%c0_16, %c0_17], %21 {strides = array<i32>} : memref<128x128xbf16, #tpu.memory_space<vmem>>, vector<128x128xbf16>,
    } else {
    }
    return
  }
  func.func @transform_0(%arg0: i32, %arg1: i32, %arg2: i32) -> (i32, i32) {
    %c0_i32 = arith.constant 0 : i32
    return %arg0, %arg2 : i32, i32
  }
  func.func @transform_1(%arg0: i32, %arg1: i32, %arg2: i32) -> (i32, i32) {
    %c0_i32 = arith.constant 0 : i32
    return %arg2, %arg1 : i32, i32
  }
  func.func @transform_2(%arg0: i32, %arg1: i32, %arg2: i32) -> (i32, i32) {
    %c0_i32 = arith.constant 0 : i32
    %c0_i32_0 = arith.constant 0 : i32
    return %c0_i32, %arg1 : i32, i32
  }
  func.func @transform_3(%arg0: i32, %arg1: i32, %arg2: i32) -> (i32, i32) {
    %c0_i32 = arith.constant 0 : i32
    %c0_i32_0 = arith.constant 0 : i32
    return %c0_i32, %arg1 : i32, i32
  }
  func.func @transform_4(%arg0: i32, %arg1: i32, %arg2: i32) -> (i32, i32) {
    %c0_i32 = arith.constant 0 : i32
    return %arg0, %arg1 : i32, i32
  }
}

module attributes {stable_mosaic.version = 11 : i64} {
  func.func @_gemm_bn_act_kernel(%arg0: i32, %arg1: i32, %arg2: i32, %arg3: memref<128x128xbf16, #tpu.memory_space<vmem>>, %arg4: memref<128x256xbf16, #tpu.memory_space<vmem>>, %arg5: memref<1x256xf32, #tpu.memory_space<vmem>>, %arg6: memref<1x256xf32, #tpu.memory_space<vmem>>, %arg7: memref<128x256xbf16, #tpu.memory_space<vmem>>, %arg8: memref<128x256xf32, #tpu.memory_space<vmem>>) attributes {dimension_semantics = [#tpu.dimension_semantics<parallel>, #tpu.dimension_semantics<parallel>, #tpu.dimension_semantics<arbitrary>], iteration_bounds = array<i64: 1, 1, 1>, scalar_prefetch = 0 : i64, scratch_operands = 1 : i64, tpu.core_type = #tpu.core_type<tc>, window_params = [{transform_indices = @transform_0, window_bounds = array<i64: 128, 128>}, {transform_indices = @transform_1, window_bounds = array<i64: 128, 256>}, {transform_indices = @transform_2, window_bounds = array<i64: 1, 256>}, {transform_indices = @transform_3, window_bounds = array<i64: 1, 256>}, {transform_indices = @transform_4, window_bounds = array<i64: 128, 256>}]} {
    %c0_i32 = arith.constant 0 : i32
    %0 = arith.cmpi eq, %arg2, %c0_i32 : i32
    %1 = arith.extui %0 : i1 to i32
    %c0_i32_0 = arith.constant 0 : i32
    %2 = arith.cmpi ne, %1, %c0_i32_0 : i32
    scf.if %2 {
      %cst_10 = arith.constant 0.000000e+00 : f32
      %12 = vector.broadcast %cst_10 : f32 to vector<128x256xf32>
      %c0_11 = arith.constant 0 : index
      %c0_12 = arith.constant 0 : index
      %13 = vector.load %arg8[%c0_11, %c0_12] : memref<128x256xf32, #tpu.memory_space<vmem>>, vector<128x256xf32>
      tpu.vector_store %arg8[%c0_11, %c0_12], %12 {strides = array<i32>} : memref<128x256xf32, #tpu.memory_space<vmem>>, vector<128x256xf32>,
    } else {
    }
    %c0 = arith.constant 0 : index
    %c0_1 = arith.constant 0 : index
    %3 = vector.load %arg8[%c0, %c0_1] : memref<128x256xf32, #tpu.memory_space<vmem>>, vector<128x256xf32>
    %c0_2 = arith.constant 0 : index
    %c0_3 = arith.constant 0 : index
    %4 = vector.load %arg3[%c0_2, %c0_3] : memref<128x128xbf16, #tpu.memory_space<vmem>>, vector<128x128xbf16>
    %c0_4 = arith.constant 0 : index
    %c0_5 = arith.constant 0 : index
    %5 = vector.load %arg4[%c0_4, %c0_5] : memref<128x256xbf16, #tpu.memory_space<vmem>>, vector<128x256xbf16>
    %cst = arith.constant dense<0.000000e+00> : vector<128x256xf32>
    %6 = tpu.matmul %4, %5, %cst {dimension_numbers = #tpu.dot_dimension_numbers<[1], [0], [0], [1], [0, 0, 1, 1], [], []>} : vector<128x128xbf16>, vector<128x256xbf16>, vector<128x256xf32> -> vector<128x256xf32>
    %7 = arith.addf %3, %6 : vector<128x256xf32>
    %c0_6 = arith.constant 0 : index
    %c0_7 = arith.constant 0 : index
    %8 = vector.load %arg8[%c0_6, %c0_7] : memref<128x256xf32, #tpu.memory_space<vmem>>, vector<128x256xf32>
    tpu.vector_store %arg8[%c0_6, %c0_7], %7 {strides = array<i32>} : memref<128x256xf32, #tpu.memory_space<vmem>>, vector<128x256xf32>,
    %c0_i32_8 = arith.constant 0 : i32
    %9 = arith.cmpi eq, %arg2, %c0_i32_8 : i32
    %10 = arith.extui %9 : i1 to i32
    %c0_i32_9 = arith.constant 0 : i32
    %11 = arith.cmpi ne, %10, %c0_i32_9 : i32
    scf.if %11 {
      %c0_10 = arith.constant 0 : index
      %c0_11 = arith.constant 0 : index
      %12 = vector.load %arg8[%c0_10, %c0_11] : memref<128x256xf32, #tpu.memory_space<vmem>>, vector<128x256xf32>
      %c0_12 = arith.constant 0 : index
      %c0_13 = arith.constant 0 : index
      %13 = vector.load %arg5[%c0_12, %c0_13] : memref<1x256xf32, #tpu.memory_space<vmem>>, vector<1x256xf32>
      %14 = vector.broadcast %13 : vector<1x256xf32> to vector<128x256xf32>
      %15 = arith.mulf %12, %14 : vector<128x256xf32>
      %c0_14 = arith.constant 0 : index
      %c0_15 = arith.constant 0 : index
      %16 = vector.load %arg6[%c0_14, %c0_15] : memref<1x256xf32, #tpu.memory_space<vmem>>, vector<1x256xf32>
      %17 = vector.broadcast %16 : vector<1x256xf32> to vector<128x256xf32>
      %18 = arith.addf %15, %17 : vector<128x256xf32>
      %19 = arith.truncf %18 : vector<128x256xf32> to vector<128x256xbf16>
      %c0_16 = arith.constant 0 : index
      %c0_17 = arith.constant 0 : index
      %20 = vector.load %arg7[%c0_16, %c0_17] : memref<128x256xbf16, #tpu.memory_space<vmem>>, vector<128x256xbf16>
      tpu.vector_store %arg7[%c0_16, %c0_17], %19 {strides = array<i32>} : memref<128x256xbf16, #tpu.memory_space<vmem>>, vector<128x256xbf16>,
    } else {
    }
    return
  }
  func.func @transform_0(%arg0: i32, %arg1: i32, %arg2: i32) -> (i32, i32) {
    %c0_i32 = arith.constant 0 : i32
    return %arg0, %arg2 : i32, i32
  }
  func.func @transform_1(%arg0: i32, %arg1: i32, %arg2: i32) -> (i32, i32) {
    %c0_i32 = arith.constant 0 : i32
    return %arg2, %arg1 : i32, i32
  }
  func.func @transform_2(%arg0: i32, %arg1: i32, %arg2: i32) -> (i32, i32) {
    %c0_i32 = arith.constant 0 : i32
    %c0_i32_0 = arith.constant 0 : i32
    return %c0_i32, %arg1 : i32, i32
  }
  func.func @transform_3(%arg0: i32, %arg1: i32, %arg2: i32) -> (i32, i32) {
    %c0_i32 = arith.constant 0 : i32
    %c0_i32_0 = arith.constant 0 : i32
    return %c0_i32, %arg1 : i32, i32
  }
  func.func @transform_4(%arg0: i32, %arg1: i32, %arg2: i32) -> (i32, i32) {
    %c0_i32 = arith.constant 0 : i32
    return %arg0, %arg1 : i32, i32
  }
}

module attributes {stable_mosaic.version = 11 : i64} {
  func.func @_gemm_bn_act_kernel(%arg0: i32, %arg1: i32, %arg2: i32, %arg3: memref<128x128xbf16, #tpu.memory_space<vmem>>, %arg4: memref<128x256xbf16, #tpu.memory_space<vmem>>, %arg5: memref<1x256xf32, #tpu.memory_space<vmem>>, %arg6: memref<1x256xf32, #tpu.memory_space<vmem>>, %arg7: memref<128x256xbf16, #tpu.memory_space<vmem>>, %arg8: memref<128x256xbf16, #tpu.memory_space<vmem>>, %arg9: memref<128x256xf32, #tpu.memory_space<vmem>>) attributes {dimension_semantics = [#tpu.dimension_semantics<parallel>, #tpu.dimension_semantics<parallel>, #tpu.dimension_semantics<arbitrary>], iteration_bounds = array<i64: 1, 1, 1>, scalar_prefetch = 0 : i64, scratch_operands = 1 : i64, tpu.core_type = #tpu.core_type<tc>, window_params = [{transform_indices = @transform_0, window_bounds = array<i64: 128, 128>}, {transform_indices = @transform_1, window_bounds = array<i64: 128, 256>}, {transform_indices = @transform_2, window_bounds = array<i64: 1, 256>}, {transform_indices = @transform_3, window_bounds = array<i64: 1, 256>}, {transform_indices = @transform_4, window_bounds = array<i64: 128, 256>}, {transform_indices = @transform_5, window_bounds = array<i64: 128, 256>}]} {
    %c0_i32 = arith.constant 0 : i32
    %0 = arith.cmpi eq, %arg2, %c0_i32 : i32
    %1 = arith.extui %0 : i1 to i32
    %c0_i32_0 = arith.constant 0 : i32
    %2 = arith.cmpi ne, %1, %c0_i32_0 : i32
    scf.if %2 {
      %cst_10 = arith.constant 0.000000e+00 : f32
      %12 = vector.broadcast %cst_10 : f32 to vector<128x256xf32>
      %c0_11 = arith.constant 0 : index
      %c0_12 = arith.constant 0 : index
      %13 = vector.load %arg9[%c0_11, %c0_12] : memref<128x256xf32, #tpu.memory_space<vmem>>, vector<128x256xf32>
      tpu.vector_store %arg9[%c0_11, %c0_12], %12 {strides = array<i32>} : memref<128x256xf32, #tpu.memory_space<vmem>>, vector<128x256xf32>,
    } else {
    }
    %c0 = arith.constant 0 : index
    %c0_1 = arith.constant 0 : index
    %3 = vector.load %arg9[%c0, %c0_1] : memref<128x256xf32, #tpu.memory_space<vmem>>, vector<128x256xf32>
    %c0_2 = arith.constant 0 : index
    %c0_3 = arith.constant 0 : index
    %4 = vector.load %arg3[%c0_2, %c0_3] : memref<128x128xbf16, #tpu.memory_space<vmem>>, vector<128x128xbf16>
    %c0_4 = arith.constant 0 : index
    %c0_5 = arith.constant 0 : index
    %5 = vector.load %arg4[%c0_4, %c0_5] : memref<128x256xbf16, #tpu.memory_space<vmem>>, vector<128x256xbf16>
    %cst = arith.constant dense<0.000000e+00> : vector<128x256xf32>
    %6 = tpu.matmul %4, %5, %cst {dimension_numbers = #tpu.dot_dimension_numbers<[1], [0], [0], [1], [0, 0, 1, 1], [], []>} : vector<128x128xbf16>, vector<128x256xbf16>, vector<128x256xf32> -> vector<128x256xf32>
    %7 = arith.addf %3, %6 : vector<128x256xf32>
    %c0_6 = arith.constant 0 : index
    %c0_7 = arith.constant 0 : index
    %8 = vector.load %arg9[%c0_6, %c0_7] : memref<128x256xf32, #tpu.memory_space<vmem>>, vector<128x256xf32>
    tpu.vector_store %arg9[%c0_6, %c0_7], %7 {strides = array<i32>} : memref<128x256xf32, #tpu.memory_space<vmem>>, vector<128x256xf32>,
    %c0_i32_8 = arith.constant 0 : i32
    %9 = arith.cmpi eq, %arg2, %c0_i32_8 : i32
    %10 = arith.extui %9 : i1 to i32
    %c0_i32_9 = arith.constant 0 : i32
    %11 = arith.cmpi ne, %10, %c0_i32_9 : i32
    scf.if %11 {
      %c0_10 = arith.constant 0 : index
      %c0_11 = arith.constant 0 : index
      %12 = vector.load %arg9[%c0_10, %c0_11] : memref<128x256xf32, #tpu.memory_space<vmem>>, vector<128x256xf32>
      %c0_12 = arith.constant 0 : index
      %c0_13 = arith.constant 0 : index
      %13 = vector.load %arg5[%c0_12, %c0_13] : memref<1x256xf32, #tpu.memory_space<vmem>>, vector<1x256xf32>
      %14 = vector.broadcast %13 : vector<1x256xf32> to vector<128x256xf32>
      %15 = arith.mulf %12, %14 : vector<128x256xf32>
      %c0_14 = arith.constant 0 : index
      %c0_15 = arith.constant 0 : index
      %16 = vector.load %arg6[%c0_14, %c0_15] : memref<1x256xf32, #tpu.memory_space<vmem>>, vector<1x256xf32>
      %17 = vector.broadcast %16 : vector<1x256xf32> to vector<128x256xf32>
      %18 = arith.addf %15, %17 : vector<128x256xf32>
      %c0_16 = arith.constant 0 : index
      %c0_17 = arith.constant 0 : index
      %19 = vector.load %arg7[%c0_16, %c0_17] : memref<128x256xbf16, #tpu.memory_space<vmem>>, vector<128x256xbf16>
      %20 = arith.extf %19 : vector<128x256xbf16> to vector<128x256xf32>
      %21 = arith.addf %18, %20 : vector<128x256xf32>
      %cst_18 = arith.constant 0.000000e+00 : f32
      %22 = vector.broadcast %cst_18 : f32 to vector<128x256xf32>
      %23 = arith.maximumf %21, %22 : vector<128x256xf32>
      %24 = arith.truncf %23 : vector<128x256xf32> to vector<128x256xbf16>
      %c0_19 = arith.constant 0 : index
      %c0_20 = arith.constant 0 : index
      %25 = vector.load %arg8[%c0_19, %c0_20] : memref<128x256xbf16, #tpu.memory_space<vmem>>, vector<128x256xbf16>
      tpu.vector_store %arg8[%c0_19, %c0_20], %24 {strides = array<i32>} : memref<128x256xbf16, #tpu.memory_space<vmem>>, vector<128x256xbf16>,
    } else {
    }
    return
  }
  func.func @transform_0(%arg0: i32, %arg1: i32, %arg2: i32) -> (i32, i32) {
    %c0_i32 = arith.constant 0 : i32
    return %arg0, %arg2 : i32, i32
  }
  func.func @transform_1(%arg0: i32, %arg1: i32, %arg2: i32) -> (i32, i32) {
    %c0_i32 = arith.constant 0 : i32
    return %arg2, %arg1 : i32, i32
  }
  func.func @transform_2(%arg0: i32, %arg1: i32, %arg2: i32) -> (i32, i32) {
    %c0_i32 = arith.constant 0 : i32
    %c0_i32_0 = arith.constant 0 : i32
    return %c0_i32, %arg1 : i32, i32
  }
  func.func @transform_3(%arg0: i32, %arg1: i32, %arg2: i32) -> (i32, i32) {
    %c0_i32 = arith.constant 0 : i32
    %c0_i32_0 = arith.constant 0 : i32
    return %c0_i32, %arg1 : i32, i32
  }
  func.func @transform_4(%arg0: i32, %arg1: i32, %arg2: i32) -> (i32, i32) {
    %c0_i32 = arith.constant 0 : i32
    return %arg0, %arg1 : i32, i32
  }
  func.func @transform_5(%arg0: i32, %arg1: i32, %arg2: i32) -> (i32, i32) {
    %c0_i32 = arith.constant 0 : i32
    return %arg0, %arg1 : i32, i32
  }
}

module attributes {stable_mosaic.version = 11 : i64} {
  func.func @_gemm_bn_act_kernel(%arg0: i32, %arg1: i32, %arg2: i32, %arg3: memref<128x128xbf16, #tpu.memory_space<vmem>>, %arg4: memref<128x128xbf16, #tpu.memory_space<vmem>>, %arg5: memref<1x128xf32, #tpu.memory_space<vmem>>, %arg6: memref<1x128xf32, #tpu.memory_space<vmem>>, %arg7: memref<128x128xbf16, #tpu.memory_space<vmem>>, %arg8: memref<128x128xf32, #tpu.memory_space<vmem>>) attributes {dimension_semantics = [#tpu.dimension_semantics<parallel>, #tpu.dimension_semantics<parallel>, #tpu.dimension_semantics<arbitrary>], iteration_bounds = array<i64: 1, 1, 2>, scalar_prefetch = 0 : i64, scratch_operands = 1 : i64, tpu.core_type = #tpu.core_type<tc>, window_params = [{transform_indices = @transform_0, window_bounds = array<i64: 128, 128>}, {transform_indices = @transform_1, window_bounds = array<i64: 128, 128>}, {transform_indices = @transform_2, window_bounds = array<i64: 1, 128>}, {transform_indices = @transform_3, window_bounds = array<i64: 1, 128>}, {transform_indices = @transform_4, window_bounds = array<i64: 128, 128>}]} {
    %c0_i32 = arith.constant 0 : i32
    %0 = arith.cmpi eq, %arg2, %c0_i32 : i32
    %1 = arith.extui %0 : i1 to i32
    %c0_i32_0 = arith.constant 0 : i32
    %2 = arith.cmpi ne, %1, %c0_i32_0 : i32
    scf.if %2 {
      %cst_9 = arith.constant 0.000000e+00 : f32
      %12 = vector.broadcast %cst_9 : f32 to vector<128x128xf32>
      %c0_10 = arith.constant 0 : index
      %c0_11 = arith.constant 0 : index
      %13 = vector.load %arg8[%c0_10, %c0_11] : memref<128x128xf32, #tpu.memory_space<vmem>>, vector<128x128xf32>
      tpu.vector_store %arg8[%c0_10, %c0_11], %12 {strides = array<i32>} : memref<128x128xf32, #tpu.memory_space<vmem>>, vector<128x128xf32>,
    } else {
    }
    %c0 = arith.constant 0 : index
    %c0_1 = arith.constant 0 : index
    %3 = vector.load %arg8[%c0, %c0_1] : memref<128x128xf32, #tpu.memory_space<vmem>>, vector<128x128xf32>
    %c0_2 = arith.constant 0 : index
    %c0_3 = arith.constant 0 : index
    %4 = vector.load %arg3[%c0_2, %c0_3] : memref<128x128xbf16, #tpu.memory_space<vmem>>, vector<128x128xbf16>
    %c0_4 = arith.constant 0 : index
    %c0_5 = arith.constant 0 : index
    %5 = vector.load %arg4[%c0_4, %c0_5] : memref<128x128xbf16, #tpu.memory_space<vmem>>, vector<128x128xbf16>
    %cst = arith.constant dense<0.000000e+00> : vector<128x128xf32>
    %6 = tpu.matmul %4, %5, %cst {dimension_numbers = #tpu.dot_dimension_numbers<[1], [0], [0], [1], [0, 0, 1, 1], [], []>} : vector<128x128xbf16>, vector<128x128xbf16>, vector<128x128xf32> -> vector<128x128xf32>
    %7 = arith.addf %3, %6 : vector<128x128xf32>
    %c0_6 = arith.constant 0 : index
    %c0_7 = arith.constant 0 : index
    %8 = vector.load %arg8[%c0_6, %c0_7] : memref<128x128xf32, #tpu.memory_space<vmem>>, vector<128x128xf32>
    tpu.vector_store %arg8[%c0_6, %c0_7], %7 {strides = array<i32>} : memref<128x128xf32, #tpu.memory_space<vmem>>, vector<128x128xf32>,
    %c1_i32 = arith.constant 1 : i32
    %9 = arith.cmpi eq, %arg2, %c1_i32 : i32
    %10 = arith.extui %9 : i1 to i32
    %c0_i32_8 = arith.constant 0 : i32
    %11 = arith.cmpi ne, %10, %c0_i32_8 : i32
    scf.if %11 {
      %c0_9 = arith.constant 0 : index
      %c0_10 = arith.constant 0 : index
      %12 = vector.load %arg8[%c0_9, %c0_10] : memref<128x128xf32, #tpu.memory_space<vmem>>, vector<128x128xf32>
      %c0_11 = arith.constant 0 : index
      %c0_12 = arith.constant 0 : index
      %13 = vector.load %arg5[%c0_11, %c0_12] : memref<1x128xf32, #tpu.memory_space<vmem>>, vector<1x128xf32>
      %14 = vector.broadcast %13 : vector<1x128xf32> to vector<128x128xf32>
      %15 = arith.mulf %12, %14 : vector<128x128xf32>
      %c0_13 = arith.constant 0 : index
      %c0_14 = arith.constant 0 : index
      %16 = vector.load %arg6[%c0_13, %c0_14] : memref<1x128xf32, #tpu.memory_space<vmem>>, vector<1x128xf32>
      %17 = vector.broadcast %16 : vector<1x128xf32> to vector<128x128xf32>
      %18 = arith.addf %15, %17 : vector<128x128xf32>
      %cst_15 = arith.constant 0.000000e+00 : f32
      %19 = vector.broadcast %cst_15 : f32 to vector<128x128xf32>
      %20 = arith.maximumf %18, %19 : vector<128x128xf32>
      %21 = arith.truncf %20 : vector<128x128xf32> to vector<128x128xbf16>
      %c0_16 = arith.constant 0 : index
      %c0_17 = arith.constant 0 : index
      %22 = vector.load %arg7[%c0_16, %c0_17] : memref<128x128xbf16, #tpu.memory_space<vmem>>, vector<128x128xbf16>
      tpu.vector_store %arg7[%c0_16, %c0_17], %21 {strides = array<i32>} : memref<128x128xbf16, #tpu.memory_space<vmem>>, vector<128x128xbf16>,
    } else {
    }
    return
  }
  func.func @transform_0(%arg0: i32, %arg1: i32, %arg2: i32) -> (i32, i32) {
    %c0_i32 = arith.constant 0 : i32
    return %arg0, %arg2 : i32, i32
  }
  func.func @transform_1(%arg0: i32, %arg1: i32, %arg2: i32) -> (i32, i32) {
    %c0_i32 = arith.constant 0 : i32
    return %arg2, %arg1 : i32, i32
  }
  func.func @transform_2(%arg0: i32, %arg1: i32, %arg2: i32) -> (i32, i32) {
    %c0_i32 = arith.constant 0 : i32
    %c0_i32_0 = arith.constant 0 : i32
    return %c0_i32, %arg1 : i32, i32
  }
  func.func @transform_3(%arg0: i32, %arg1: i32, %arg2: i32) -> (i32, i32) {
    %c0_i32 = arith.constant 0 : i32
    %c0_i32_0 = arith.constant 0 : i32
    return %c0_i32, %arg1 : i32, i32
  }
  func.func @transform_4(%arg0: i32, %arg1: i32, %arg2: i32) -> (i32, i32) {
    %c0_i32 = arith.constant 0 : i32
    return %arg0, %arg1 : i32, i32
  }
}

module attributes {stable_mosaic.version = 11 : i64} {
  func.func @_gemm_bn_act_kernel(%arg0: i32, %arg1: i32, %arg2: i32, %arg3: memref<32x128xbf16, #tpu.memory_space<vmem>>, %arg4: memref<128x128xbf16, #tpu.memory_space<vmem>>, %arg5: memref<1x128xf32, #tpu.memory_space<vmem>>, %arg6: memref<1x128xf32, #tpu.memory_space<vmem>>, %arg7: memref<32x128xbf16, #tpu.memory_space<vmem>>, %arg8: memref<32x128xf32, #tpu.memory_space<vmem>>) attributes {dimension_semantics = [#tpu.dimension_semantics<parallel>, #tpu.dimension_semantics<parallel>, #tpu.dimension_semantics<arbitrary>], iteration_bounds = array<i64: 1, 1, 9>, scalar_prefetch = 0 : i64, scratch_operands = 1 : i64, tpu.core_type = #tpu.core_type<tc>, window_params = [{transform_indices = @transform_0, window_bounds = array<i64: 32, 128>}, {transform_indices = @transform_1, window_bounds = array<i64: 128, 128>}, {transform_indices = @transform_2, window_bounds = array<i64: 1, 128>}, {transform_indices = @transform_3, window_bounds = array<i64: 1, 128>}, {transform_indices = @transform_4, window_bounds = array<i64: 32, 128>}]} {
    %c0_i32 = arith.constant 0 : i32
    %0 = arith.cmpi eq, %arg2, %c0_i32 : i32
    %1 = arith.extui %0 : i1 to i32
    %c0_i32_0 = arith.constant 0 : i32
    %2 = arith.cmpi ne, %1, %c0_i32_0 : i32
    scf.if %2 {
      %cst_9 = arith.constant 0.000000e+00 : f32
      %12 = vector.broadcast %cst_9 : f32 to vector<32x128xf32>
      %c0_10 = arith.constant 0 : index
      %c0_11 = arith.constant 0 : index
      %13 = vector.load %arg8[%c0_10, %c0_11] : memref<32x128xf32, #tpu.memory_space<vmem>>, vector<32x128xf32>
      tpu.vector_store %arg8[%c0_10, %c0_11], %12 {strides = array<i32>} : memref<32x128xf32, #tpu.memory_space<vmem>>, vector<32x128xf32>,
    } else {
    }
    %c0 = arith.constant 0 : index
    %c0_1 = arith.constant 0 : index
    %3 = vector.load %arg8[%c0, %c0_1] : memref<32x128xf32, #tpu.memory_space<vmem>>, vector<32x128xf32>
    %c0_2 = arith.constant 0 : index
    %c0_3 = arith.constant 0 : index
    %4 = vector.load %arg3[%c0_2, %c0_3] : memref<32x128xbf16, #tpu.memory_space<vmem>>, vector<32x128xbf16>
    %c0_4 = arith.constant 0 : index
    %c0_5 = arith.constant 0 : index
    %5 = vector.load %arg4[%c0_4, %c0_5] : memref<128x128xbf16, #tpu.memory_space<vmem>>, vector<128x128xbf16>
    %cst = arith.constant dense<0.000000e+00> : vector<32x128xf32>
    %6 = tpu.matmul %4, %5, %cst {dimension_numbers = #tpu.dot_dimension_numbers<[1], [0], [0], [1], [0, 0, 1, 1], [], []>} : vector<32x128xbf16>, vector<128x128xbf16>, vector<32x128xf32> -> vector<32x128xf32>
    %7 = arith.addf %3, %6 : vector<32x128xf32>
    %c0_6 = arith.constant 0 : index
    %c0_7 = arith.constant 0 : index
    %8 = vector.load %arg8[%c0_6, %c0_7] : memref<32x128xf32, #tpu.memory_space<vmem>>, vector<32x128xf32>
    tpu.vector_store %arg8[%c0_6, %c0_7], %7 {strides = array<i32>} : memref<32x128xf32, #tpu.memory_space<vmem>>, vector<32x128xf32>,
    %c8_i32 = arith.constant 8 : i32
    %9 = arith.cmpi eq, %arg2, %c8_i32 : i32
    %10 = arith.extui %9 : i1 to i32
    %c0_i32_8 = arith.constant 0 : i32
    %11 = arith.cmpi ne, %10, %c0_i32_8 : i32
    scf.if %11 {
      %c0_9 = arith.constant 0 : index
      %c0_10 = arith.constant 0 : index
      %12 = vector.load %arg8[%c0_9, %c0_10] : memref<32x128xf32, #tpu.memory_space<vmem>>, vector<32x128xf32>
      %c0_11 = arith.constant 0 : index
      %c0_12 = arith.constant 0 : index
      %13 = vector.load %arg5[%c0_11, %c0_12] : memref<1x128xf32, #tpu.memory_space<vmem>>, vector<1x128xf32>
      %14 = vector.broadcast %13 : vector<1x128xf32> to vector<32x128xf32>
      %15 = arith.mulf %12, %14 : vector<32x128xf32>
      %c0_13 = arith.constant 0 : index
      %c0_14 = arith.constant 0 : index
      %16 = vector.load %arg6[%c0_13, %c0_14] : memref<1x128xf32, #tpu.memory_space<vmem>>, vector<1x128xf32>
      %17 = vector.broadcast %16 : vector<1x128xf32> to vector<32x128xf32>
      %18 = arith.addf %15, %17 : vector<32x128xf32>
      %cst_15 = arith.constant 0.000000e+00 : f32
      %19 = vector.broadcast %cst_15 : f32 to vector<32x128xf32>
      %20 = arith.maximumf %18, %19 : vector<32x128xf32>
      %21 = arith.truncf %20 : vector<32x128xf32> to vector<32x128xbf16>
      %c0_16 = arith.constant 0 : index
      %c0_17 = arith.constant 0 : index
      %22 = vector.load %arg7[%c0_16, %c0_17] : memref<32x128xbf16, #tpu.memory_space<vmem>>, vector<32x128xbf16>
      tpu.vector_store %arg7[%c0_16, %c0_17], %21 {strides = array<i32>} : memref<32x128xbf16, #tpu.memory_space<vmem>>, vector<32x128xbf16>,
    } else {
    }
    return
  }
  func.func @transform_0(%arg0: i32, %arg1: i32, %arg2: i32) -> (i32, i32) {
    %c0_i32 = arith.constant 0 : i32
    return %arg0, %arg2 : i32, i32
  }
  func.func @transform_1(%arg0: i32, %arg1: i32, %arg2: i32) -> (i32, i32) {
    %c0_i32 = arith.constant 0 : i32
    return %arg2, %arg1 : i32, i32
  }
  func.func @transform_2(%arg0: i32, %arg1: i32, %arg2: i32) -> (i32, i32) {
    %c0_i32 = arith.constant 0 : i32
    %c0_i32_0 = arith.constant 0 : i32
    return %c0_i32, %arg1 : i32, i32
  }
  func.func @transform_3(%arg0: i32, %arg1: i32, %arg2: i32) -> (i32, i32) {
    %c0_i32 = arith.constant 0 : i32
    %c0_i32_0 = arith.constant 0 : i32
    return %c0_i32, %arg1 : i32, i32
  }
  func.func @transform_4(%arg0: i32, %arg1: i32, %arg2: i32) -> (i32, i32) {
    %c0_i32 = arith.constant 0 : i32
    return %arg0, %arg1 : i32, i32
  }
}

module attributes {stable_mosaic.version = 11 : i64} {
  func.func @_gemm_bn_act_kernel(%arg0: i32, %arg1: i32, %arg2: i32, %arg3: memref<32x128xbf16, #tpu.memory_space<vmem>>, %arg4: memref<128x256xbf16, #tpu.memory_space<vmem>>, %arg5: memref<1x256xf32, #tpu.memory_space<vmem>>, %arg6: memref<1x256xf32, #tpu.memory_space<vmem>>, %arg7: memref<32x256xbf16, #tpu.memory_space<vmem>>, %arg8: memref<32x256xf32, #tpu.memory_space<vmem>>) attributes {dimension_semantics = [#tpu.dimension_semantics<parallel>, #tpu.dimension_semantics<parallel>, #tpu.dimension_semantics<arbitrary>], iteration_bounds = array<i64: 1, 2, 2>, scalar_prefetch = 0 : i64, scratch_operands = 1 : i64, tpu.core_type = #tpu.core_type<tc>, window_params = [{transform_indices = @transform_0, window_bounds = array<i64: 32, 128>}, {transform_indices = @transform_1, window_bounds = array<i64: 128, 256>}, {transform_indices = @transform_2, window_bounds = array<i64: 1, 256>}, {transform_indices = @transform_3, window_bounds = array<i64: 1, 256>}, {transform_indices = @transform_4, window_bounds = array<i64: 32, 256>}]} {
    %c0_i32 = arith.constant 0 : i32
    %0 = arith.cmpi eq, %arg2, %c0_i32 : i32
    %1 = arith.extui %0 : i1 to i32
    %c0_i32_0 = arith.constant 0 : i32
    %2 = arith.cmpi ne, %1, %c0_i32_0 : i32
    scf.if %2 {
      %cst_9 = arith.constant 0.000000e+00 : f32
      %12 = vector.broadcast %cst_9 : f32 to vector<32x256xf32>
      %c0_10 = arith.constant 0 : index
      %c0_11 = arith.constant 0 : index
      %13 = vector.load %arg8[%c0_10, %c0_11] : memref<32x256xf32, #tpu.memory_space<vmem>>, vector<32x256xf32>
      tpu.vector_store %arg8[%c0_10, %c0_11], %12 {strides = array<i32>} : memref<32x256xf32, #tpu.memory_space<vmem>>, vector<32x256xf32>,
    } else {
    }
    %c0 = arith.constant 0 : index
    %c0_1 = arith.constant 0 : index
    %3 = vector.load %arg8[%c0, %c0_1] : memref<32x256xf32, #tpu.memory_space<vmem>>, vector<32x256xf32>
    %c0_2 = arith.constant 0 : index
    %c0_3 = arith.constant 0 : index
    %4 = vector.load %arg3[%c0_2, %c0_3] : memref<32x128xbf16, #tpu.memory_space<vmem>>, vector<32x128xbf16>
    %c0_4 = arith.constant 0 : index
    %c0_5 = arith.constant 0 : index
    %5 = vector.load %arg4[%c0_4, %c0_5] : memref<128x256xbf16, #tpu.memory_space<vmem>>, vector<128x256xbf16>
    %cst = arith.constant dense<0.000000e+00> : vector<32x256xf32>
    %6 = tpu.matmul %4, %5, %cst {dimension_numbers = #tpu.dot_dimension_numbers<[1], [0], [0], [1], [0, 0, 1, 1], [], []>} : vector<32x128xbf16>, vector<128x256xbf16>, vector<32x256xf32> -> vector<32x256xf32>
    %7 = arith.addf %3, %6 : vector<32x256xf32>
    %c0_6 = arith.constant 0 : index
    %c0_7 = arith.constant 0 : index
    %8 = vector.load %arg8[%c0_6, %c0_7] : memref<32x256xf32, #tpu.memory_space<vmem>>, vector<32x256xf32>
    tpu.vector_store %arg8[%c0_6, %c0_7], %7 {strides = array<i32>} : memref<32x256xf32, #tpu.memory_space<vmem>>, vector<32x256xf32>,
    %c1_i32 = arith.constant 1 : i32
    %9 = arith.cmpi eq, %arg2, %c1_i32 : i32
    %10 = arith.extui %9 : i1 to i32
    %c0_i32_8 = arith.constant 0 : i32
    %11 = arith.cmpi ne, %10, %c0_i32_8 : i32
    scf.if %11 {
      %c0_9 = arith.constant 0 : index
      %c0_10 = arith.constant 0 : index
      %12 = vector.load %arg8[%c0_9, %c0_10] : memref<32x256xf32, #tpu.memory_space<vmem>>, vector<32x256xf32>
      %c0_11 = arith.constant 0 : index
      %c0_12 = arith.constant 0 : index
      %13 = vector.load %arg5[%c0_11, %c0_12] : memref<1x256xf32, #tpu.memory_space<vmem>>, vector<1x256xf32>
      %14 = vector.broadcast %13 : vector<1x256xf32> to vector<32x256xf32>
      %15 = arith.mulf %12, %14 : vector<32x256xf32>
      %c0_13 = arith.constant 0 : index
      %c0_14 = arith.constant 0 : index
      %16 = vector.load %arg6[%c0_13, %c0_14] : memref<1x256xf32, #tpu.memory_space<vmem>>, vector<1x256xf32>
      %17 = vector.broadcast %16 : vector<1x256xf32> to vector<32x256xf32>
      %18 = arith.addf %15, %17 : vector<32x256xf32>
      %19 = arith.truncf %18 : vector<32x256xf32> to vector<32x256xbf16>
      %c0_15 = arith.constant 0 : index
      %c0_16 = arith.constant 0 : index
      %20 = vector.load %arg7[%c0_15, %c0_16] : memref<32x256xbf16, #tpu.memory_space<vmem>>, vector<32x256xbf16>
      tpu.vector_store %arg7[%c0_15, %c0_16], %19 {strides = array<i32>} : memref<32x256xbf16, #tpu.memory_space<vmem>>, vector<32x256xbf16>,
    } else {
    }
    return
  }
  func.func @transform_0(%arg0: i32, %arg1: i32, %arg2: i32) -> (i32, i32) {
    %c0_i32 = arith.constant 0 : i32
    return %arg0, %arg2 : i32, i32
  }
  func.func @transform_1(%arg0: i32, %arg1: i32, %arg2: i32) -> (i32, i32) {
    %c0_i32 = arith.constant 0 : i32
    return %arg2, %arg1 : i32, i32
  }
  func.func @transform_2(%arg0: i32, %arg1: i32, %arg2: i32) -> (i32, i32) {
    %c0_i32 = arith.constant 0 : i32
    %c0_i32_0 = arith.constant 0 : i32
    return %c0_i32, %arg1 : i32, i32
  }
  func.func @transform_3(%arg0: i32, %arg1: i32, %arg2: i32) -> (i32, i32) {
    %c0_i32 = arith.constant 0 : i32
    %c0_i32_0 = arith.constant 0 : i32
    return %c0_i32, %arg1 : i32, i32
  }
  func.func @transform_4(%arg0: i32, %arg1: i32, %arg2: i32) -> (i32, i32) {
    %c0_i32 = arith.constant 0 : i32
    return %arg0, %arg1 : i32, i32
  }
}

module attributes {stable_mosaic.version = 11 : i64} {
  func.func @_gemm_bn_act_kernel(%arg0: i32, %arg1: i32, %arg2: i32, %arg3: memref<32x128xbf16, #tpu.memory_space<vmem>>, %arg4: memref<128x256xbf16, #tpu.memory_space<vmem>>, %arg5: memref<1x256xf32, #tpu.memory_space<vmem>>, %arg6: memref<1x256xf32, #tpu.memory_space<vmem>>, %arg7: memref<32x256xbf16, #tpu.memory_space<vmem>>, %arg8: memref<32x256xbf16, #tpu.memory_space<vmem>>, %arg9: memref<32x256xf32, #tpu.memory_space<vmem>>) attributes {dimension_semantics = [#tpu.dimension_semantics<parallel>, #tpu.dimension_semantics<parallel>, #tpu.dimension_semantics<arbitrary>], iteration_bounds = array<i64: 1, 2, 1>, scalar_prefetch = 0 : i64, scratch_operands = 1 : i64, tpu.core_type = #tpu.core_type<tc>, window_params = [{transform_indices = @transform_0, window_bounds = array<i64: 32, 128>}, {transform_indices = @transform_1, window_bounds = array<i64: 128, 256>}, {transform_indices = @transform_2, window_bounds = array<i64: 1, 256>}, {transform_indices = @transform_3, window_bounds = array<i64: 1, 256>}, {transform_indices = @transform_4, window_bounds = array<i64: 32, 256>}, {transform_indices = @transform_5, window_bounds = array<i64: 32, 256>}]} {
    %c0_i32 = arith.constant 0 : i32
    %0 = arith.cmpi eq, %arg2, %c0_i32 : i32
    %1 = arith.extui %0 : i1 to i32
    %c0_i32_0 = arith.constant 0 : i32
    %2 = arith.cmpi ne, %1, %c0_i32_0 : i32
    scf.if %2 {
      %cst_10 = arith.constant 0.000000e+00 : f32
      %12 = vector.broadcast %cst_10 : f32 to vector<32x256xf32>
      %c0_11 = arith.constant 0 : index
      %c0_12 = arith.constant 0 : index
      %13 = vector.load %arg9[%c0_11, %c0_12] : memref<32x256xf32, #tpu.memory_space<vmem>>, vector<32x256xf32>
      tpu.vector_store %arg9[%c0_11, %c0_12], %12 {strides = array<i32>} : memref<32x256xf32, #tpu.memory_space<vmem>>, vector<32x256xf32>,
    } else {
    }
    %c0 = arith.constant 0 : index
    %c0_1 = arith.constant 0 : index
    %3 = vector.load %arg9[%c0, %c0_1] : memref<32x256xf32, #tpu.memory_space<vmem>>, vector<32x256xf32>
    %c0_2 = arith.constant 0 : index
    %c0_3 = arith.constant 0 : index
    %4 = vector.load %arg3[%c0_2, %c0_3] : memref<32x128xbf16, #tpu.memory_space<vmem>>, vector<32x128xbf16>
    %c0_4 = arith.constant 0 : index
    %c0_5 = arith.constant 0 : index
    %5 = vector.load %arg4[%c0_4, %c0_5] : memref<128x256xbf16, #tpu.memory_space<vmem>>, vector<128x256xbf16>
    %cst = arith.constant dense<0.000000e+00> : vector<32x256xf32>
    %6 = tpu.matmul %4, %5, %cst {dimension_numbers = #tpu.dot_dimension_numbers<[1], [0], [0], [1], [0, 0, 1, 1], [], []>} : vector<32x128xbf16>, vector<128x256xbf16>, vector<32x256xf32> -> vector<32x256xf32>
    %7 = arith.addf %3, %6 : vector<32x256xf32>
    %c0_6 = arith.constant 0 : index
    %c0_7 = arith.constant 0 : index
    %8 = vector.load %arg9[%c0_6, %c0_7] : memref<32x256xf32, #tpu.memory_space<vmem>>, vector<32x256xf32>
    tpu.vector_store %arg9[%c0_6, %c0_7], %7 {strides = array<i32>} : memref<32x256xf32, #tpu.memory_space<vmem>>, vector<32x256xf32>,
    %c0_i32_8 = arith.constant 0 : i32
    %9 = arith.cmpi eq, %arg2, %c0_i32_8 : i32
    %10 = arith.extui %9 : i1 to i32
    %c0_i32_9 = arith.constant 0 : i32
    %11 = arith.cmpi ne, %10, %c0_i32_9 : i32
    scf.if %11 {
      %c0_10 = arith.constant 0 : index
      %c0_11 = arith.constant 0 : index
      %12 = vector.load %arg9[%c0_10, %c0_11] : memref<32x256xf32, #tpu.memory_space<vmem>>, vector<32x256xf32>
      %c0_12 = arith.constant 0 : index
      %c0_13 = arith.constant 0 : index
      %13 = vector.load %arg5[%c0_12, %c0_13] : memref<1x256xf32, #tpu.memory_space<vmem>>, vector<1x256xf32>
      %14 = vector.broadcast %13 : vector<1x256xf32> to vector<32x256xf32>
      %15 = arith.mulf %12, %14 : vector<32x256xf32>
      %c0_14 = arith.constant 0 : index
      %c0_15 = arith.constant 0 : index
      %16 = vector.load %arg6[%c0_14, %c0_15] : memref<1x256xf32, #tpu.memory_space<vmem>>, vector<1x256xf32>
      %17 = vector.broadcast %16 : vector<1x256xf32> to vector<32x256xf32>
      %18 = arith.addf %15, %17 : vector<32x256xf32>
      %c0_16 = arith.constant 0 : index
      %c0_17 = arith.constant 0 : index
      %19 = vector.load %arg7[%c0_16, %c0_17] : memref<32x256xbf16, #tpu.memory_space<vmem>>, vector<32x256xbf16>
      %20 = arith.extf %19 : vector<32x256xbf16> to vector<32x256xf32>
      %21 = arith.addf %18, %20 : vector<32x256xf32>
      %cst_18 = arith.constant 0.000000e+00 : f32
      %22 = vector.broadcast %cst_18 : f32 to vector<32x256xf32>
      %23 = arith.maximumf %21, %22 : vector<32x256xf32>
      %24 = arith.truncf %23 : vector<32x256xf32> to vector<32x256xbf16>
      %c0_19 = arith.constant 0 : index
      %c0_20 = arith.constant 0 : index
      %25 = vector.load %arg8[%c0_19, %c0_20] : memref<32x256xbf16, #tpu.memory_space<vmem>>, vector<32x256xbf16>
      tpu.vector_store %arg8[%c0_19, %c0_20], %24 {strides = array<i32>} : memref<32x256xbf16, #tpu.memory_space<vmem>>, vector<32x256xbf16>,
    } else {
    }
    return
  }
  func.func @transform_0(%arg0: i32, %arg1: i32, %arg2: i32) -> (i32, i32) {
    %c0_i32 = arith.constant 0 : i32
    return %arg0, %arg2 : i32, i32
  }
  func.func @transform_1(%arg0: i32, %arg1: i32, %arg2: i32) -> (i32, i32) {
    %c0_i32 = arith.constant 0 : i32
    return %arg2, %arg1 : i32, i32
  }
  func.func @transform_2(%arg0: i32, %arg1: i32, %arg2: i32) -> (i32, i32) {
    %c0_i32 = arith.constant 0 : i32
    %c0_i32_0 = arith.constant 0 : i32
    return %c0_i32, %arg1 : i32, i32
  }
  func.func @transform_3(%arg0: i32, %arg1: i32, %arg2: i32) -> (i32, i32) {
    %c0_i32 = arith.constant 0 : i32
    %c0_i32_0 = arith.constant 0 : i32
    return %c0_i32, %arg1 : i32, i32
  }
  func.func @transform_4(%arg0: i32, %arg1: i32, %arg2: i32) -> (i32, i32) {
    %c0_i32 = arith.constant 0 : i32
    return %arg0, %arg1 : i32, i32
  }
  func.func @transform_5(%arg0: i32, %arg1: i32, %arg2: i32) -> (i32, i32) {
    %c0_i32 = arith.constant 0 : i32
    return %arg0, %arg1 : i32, i32
  }
}

module attributes {stable_mosaic.version = 11 : i64} {
  func.func @_gemm_bn_act_kernel(%arg0: i32, %arg1: i32, %arg2: i32, %arg3: memref<32x128xbf16, #tpu.memory_space<vmem>>, %arg4: memref<128x128xbf16, #tpu.memory_space<vmem>>, %arg5: memref<1x128xf32, #tpu.memory_space<vmem>>, %arg6: memref<1x128xf32, #tpu.memory_space<vmem>>, %arg7: memref<32x128xbf16, #tpu.memory_space<vmem>>, %arg8: memref<32x128xf32, #tpu.memory_space<vmem>>) attributes {dimension_semantics = [#tpu.dimension_semantics<parallel>, #tpu.dimension_semantics<parallel>, #tpu.dimension_semantics<arbitrary>], iteration_bounds = array<i64: 1, 1, 4>, scalar_prefetch = 0 : i64, scratch_operands = 1 : i64, tpu.core_type = #tpu.core_type<tc>, window_params = [{transform_indices = @transform_0, window_bounds = array<i64: 32, 128>}, {transform_indices = @transform_1, window_bounds = array<i64: 128, 128>}, {transform_indices = @transform_2, window_bounds = array<i64: 1, 128>}, {transform_indices = @transform_3, window_bounds = array<i64: 1, 128>}, {transform_indices = @transform_4, window_bounds = array<i64: 32, 128>}]} {
    %c0_i32 = arith.constant 0 : i32
    %0 = arith.cmpi eq, %arg2, %c0_i32 : i32
    %1 = arith.extui %0 : i1 to i32
    %c0_i32_0 = arith.constant 0 : i32
    %2 = arith.cmpi ne, %1, %c0_i32_0 : i32
    scf.if %2 {
      %cst_9 = arith.constant 0.000000e+00 : f32
      %12 = vector.broadcast %cst_9 : f32 to vector<32x128xf32>
      %c0_10 = arith.constant 0 : index
      %c0_11 = arith.constant 0 : index
      %13 = vector.load %arg8[%c0_10, %c0_11] : memref<32x128xf32, #tpu.memory_space<vmem>>, vector<32x128xf32>
      tpu.vector_store %arg8[%c0_10, %c0_11], %12 {strides = array<i32>} : memref<32x128xf32, #tpu.memory_space<vmem>>, vector<32x128xf32>,
    } else {
    }
    %c0 = arith.constant 0 : index
    %c0_1 = arith.constant 0 : index
    %3 = vector.load %arg8[%c0, %c0_1] : memref<32x128xf32, #tpu.memory_space<vmem>>, vector<32x128xf32>
    %c0_2 = arith.constant 0 : index
    %c0_3 = arith.constant 0 : index
    %4 = vector.load %arg3[%c0_2, %c0_3] : memref<32x128xbf16, #tpu.memory_space<vmem>>, vector<32x128xbf16>
    %c0_4 = arith.constant 0 : index
    %c0_5 = arith.constant 0 : index
    %5 = vector.load %arg4[%c0_4, %c0_5] : memref<128x128xbf16, #tpu.memory_space<vmem>>, vector<128x128xbf16>
    %cst = arith.constant dense<0.000000e+00> : vector<32x128xf32>
    %6 = tpu.matmul %4, %5, %cst {dimension_numbers = #tpu.dot_dimension_numbers<[1], [0], [0], [1], [0, 0, 1, 1], [], []>} : vector<32x128xbf16>, vector<128x128xbf16>, vector<32x128xf32> -> vector<32x128xf32>
    %7 = arith.addf %3, %6 : vector<32x128xf32>
    %c0_6 = arith.constant 0 : index
    %c0_7 = arith.constant 0 : index
    %8 = vector.load %arg8[%c0_6, %c0_7] : memref<32x128xf32, #tpu.memory_space<vmem>>, vector<32x128xf32>
    tpu.vector_store %arg8[%c0_6, %c0_7], %7 {strides = array<i32>} : memref<32x128xf32, #tpu.memory_space<vmem>>, vector<32x128xf32>,
    %c3_i32 = arith.constant 3 : i32
    %9 = arith.cmpi eq, %arg2, %c3_i32 : i32
    %10 = arith.extui %9 : i1 to i32
    %c0_i32_8 = arith.constant 0 : i32
    %11 = arith.cmpi ne, %10, %c0_i32_8 : i32
    scf.if %11 {
      %c0_9 = arith.constant 0 : index
      %c0_10 = arith.constant 0 : index
      %12 = vector.load %arg8[%c0_9, %c0_10] : memref<32x128xf32, #tpu.memory_space<vmem>>, vector<32x128xf32>
      %c0_11 = arith.constant 0 : index
      %c0_12 = arith.constant 0 : index
      %13 = vector.load %arg5[%c0_11, %c0_12] : memref<1x128xf32, #tpu.memory_space<vmem>>, vector<1x128xf32>
      %14 = vector.broadcast %13 : vector<1x128xf32> to vector<32x128xf32>
      %15 = arith.mulf %12, %14 : vector<32x128xf32>
      %c0_13 = arith.constant 0 : index
      %c0_14 = arith.constant 0 : index
      %16 = vector.load %arg6[%c0_13, %c0_14] : memref<1x128xf32, #tpu.memory_space<vmem>>, vector<1x128xf32>
      %17 = vector.broadcast %16 : vector<1x128xf32> to vector<32x128xf32>
      %18 = arith.addf %15, %17 : vector<32x128xf32>
      %cst_15 = arith.constant 0.000000e+00 : f32
      %19 = vector.broadcast %cst_15 : f32 to vector<32x128xf32>
      %20 = arith.maximumf %18, %19 : vector<32x128xf32>
      %21 = arith.truncf %20 : vector<32x128xf32> to vector<32x128xbf16>
      %c0_16 = arith.constant 0 : index
      %c0_17 = arith.constant 0 : index
      %22 = vector.load %arg7[%c0_16, %c0_17] : memref<32x128xbf16, #tpu.memory_space<vmem>>, vector<32x128xbf16>
      tpu.vector_store %arg7[%c0_16, %c0_17], %21 {strides = array<i32>} : memref<32x128xbf16, #tpu.memory_space<vmem>>, vector<32x128xbf16>,
    } else {
    }
    return
  }
  func.func @transform_0(%arg0: i32, %arg1: i32, %arg2: i32) -> (i32, i32) {
    %c0_i32 = arith.constant 0 : i32
    return %arg0, %arg2 : i32, i32
  }
  func.func @transform_1(%arg0: i32, %arg1: i32, %arg2: i32) -> (i32, i32) {
    %c0_i32 = arith.constant 0 : i32
    return %arg2, %arg1 : i32, i32
  }
  func.func @transform_2(%arg0: i32, %arg1: i32, %arg2: i32) -> (i32, i32) {
    %c0_i32 = arith.constant 0 : i32
    %c0_i32_0 = arith.constant 0 : i32
    return %c0_i32, %arg1 : i32, i32
  }
  func.func @transform_3(%arg0: i32, %arg1: i32, %arg2: i32) -> (i32, i32) {
    %c0_i32 = arith.constant 0 : i32
    %c0_i32_0 = arith.constant 0 : i32
    return %c0_i32, %arg1 : i32, i32
  }
  func.func @transform_4(%arg0: i32, %arg1: i32, %arg2: i32) -> (i32, i32) {
    %c0_i32 = arith.constant 0 : i32
    return %arg0, %arg1 : i32, i32
  }
}

module attributes {stable_mosaic.version = 11 : i64} {
  func.func @_gemm_bn_act_kernel(%arg0: i32, %arg1: i32, %arg2: i32, %arg3: memref<32x128xbf16, #tpu.memory_space<vmem>>, %arg4: memref<128x256xbf16, #tpu.memory_space<vmem>>, %arg5: memref<1x256xf32, #tpu.memory_space<vmem>>, %arg6: memref<1x256xf32, #tpu.memory_space<vmem>>, %arg7: memref<32x256xbf16, #tpu.memory_space<vmem>>, %arg8: memref<32x256xf32, #tpu.memory_space<vmem>>) attributes {dimension_semantics = [#tpu.dimension_semantics<parallel>, #tpu.dimension_semantics<parallel>, #tpu.dimension_semantics<arbitrary>], iteration_bounds = array<i64: 1, 1, 4>, scalar_prefetch = 0 : i64, scratch_operands = 1 : i64, tpu.core_type = #tpu.core_type<tc>, window_params = [{transform_indices = @transform_0, window_bounds = array<i64: 32, 128>}, {transform_indices = @transform_1, window_bounds = array<i64: 128, 256>}, {transform_indices = @transform_2, window_bounds = array<i64: 1, 256>}, {transform_indices = @transform_3, window_bounds = array<i64: 1, 256>}, {transform_indices = @transform_4, window_bounds = array<i64: 32, 256>}]} {
    %c0_i32 = arith.constant 0 : i32
    %0 = arith.cmpi eq, %arg2, %c0_i32 : i32
    %1 = arith.extui %0 : i1 to i32
    %c0_i32_0 = arith.constant 0 : i32
    %2 = arith.cmpi ne, %1, %c0_i32_0 : i32
    scf.if %2 {
      %cst_9 = arith.constant 0.000000e+00 : f32
      %12 = vector.broadcast %cst_9 : f32 to vector<32x256xf32>
      %c0_10 = arith.constant 0 : index
      %c0_11 = arith.constant 0 : index
      %13 = vector.load %arg8[%c0_10, %c0_11] : memref<32x256xf32, #tpu.memory_space<vmem>>, vector<32x256xf32>
      tpu.vector_store %arg8[%c0_10, %c0_11], %12 {strides = array<i32>} : memref<32x256xf32, #tpu.memory_space<vmem>>, vector<32x256xf32>,
    } else {
    }
    %c0 = arith.constant 0 : index
    %c0_1 = arith.constant 0 : index
    %3 = vector.load %arg8[%c0, %c0_1] : memref<32x256xf32, #tpu.memory_space<vmem>>, vector<32x256xf32>
    %c0_2 = arith.constant 0 : index
    %c0_3 = arith.constant 0 : index
    %4 = vector.load %arg3[%c0_2, %c0_3] : memref<32x128xbf16, #tpu.memory_space<vmem>>, vector<32x128xbf16>
    %c0_4 = arith.constant 0 : index
    %c0_5 = arith.constant 0 : index
    %5 = vector.load %arg4[%c0_4, %c0_5] : memref<128x256xbf16, #tpu.memory_space<vmem>>, vector<128x256xbf16>
    %cst = arith.constant dense<0.000000e+00> : vector<32x256xf32>
    %6 = tpu.matmul %4, %5, %cst {dimension_numbers = #tpu.dot_dimension_numbers<[1], [0], [0], [1], [0, 0, 1, 1], [], []>} : vector<32x128xbf16>, vector<128x256xbf16>, vector<32x256xf32> -> vector<32x256xf32>
    %7 = arith.addf %3, %6 : vector<32x256xf32>
    %c0_6 = arith.constant 0 : index
    %c0_7 = arith.constant 0 : index
    %8 = vector.load %arg8[%c0_6, %c0_7] : memref<32x256xf32, #tpu.memory_space<vmem>>, vector<32x256xf32>
    tpu.vector_store %arg8[%c0_6, %c0_7], %7 {strides = array<i32>} : memref<32x256xf32, #tpu.memory_space<vmem>>, vector<32x256xf32>,
    %c3_i32 = arith.constant 3 : i32
    %9 = arith.cmpi eq, %arg2, %c3_i32 : i32
    %10 = arith.extui %9 : i1 to i32
    %c0_i32_8 = arith.constant 0 : i32
    %11 = arith.cmpi ne, %10, %c0_i32_8 : i32
    scf.if %11 {
      %c0_9 = arith.constant 0 : index
      %c0_10 = arith.constant 0 : index
      %12 = vector.load %arg8[%c0_9, %c0_10] : memref<32x256xf32, #tpu.memory_space<vmem>>, vector<32x256xf32>
      %c0_11 = arith.constant 0 : index
      %c0_12 = arith.constant 0 : index
      %13 = vector.load %arg5[%c0_11, %c0_12] : memref<1x256xf32, #tpu.memory_space<vmem>>, vector<1x256xf32>
      %14 = vector.broadcast %13 : vector<1x256xf32> to vector<32x256xf32>
      %15 = arith.mulf %12, %14 : vector<32x256xf32>
      %c0_13 = arith.constant 0 : index
      %c0_14 = arith.constant 0 : index
      %16 = vector.load %arg6[%c0_13, %c0_14] : memref<1x256xf32, #tpu.memory_space<vmem>>, vector<1x256xf32>
      %17 = vector.broadcast %16 : vector<1x256xf32> to vector<32x256xf32>
      %18 = arith.addf %15, %17 : vector<32x256xf32>
      %cst_15 = arith.constant 0.000000e+00 : f32
      %19 = vector.broadcast %cst_15 : f32 to vector<32x256xf32>
      %20 = arith.maximumf %18, %19 : vector<32x256xf32>
      %21 = arith.truncf %20 : vector<32x256xf32> to vector<32x256xbf16>
      %c0_16 = arith.constant 0 : index
      %c0_17 = arith.constant 0 : index
      %22 = vector.load %arg7[%c0_16, %c0_17] : memref<32x256xbf16, #tpu.memory_space<vmem>>, vector<32x256xbf16>
      tpu.vector_store %arg7[%c0_16, %c0_17], %21 {strides = array<i32>} : memref<32x256xbf16, #tpu.memory_space<vmem>>, vector<32x256xbf16>,
    } else {
    }
    return
  }
  func.func @transform_0(%arg0: i32, %arg1: i32, %arg2: i32) -> (i32, i32) {
    %c0_i32 = arith.constant 0 : i32
    return %arg0, %arg2 : i32, i32
  }
  func.func @transform_1(%arg0: i32, %arg1: i32, %arg2: i32) -> (i32, i32) {
    %c0_i32 = arith.constant 0 : i32
    return %arg2, %arg1 : i32, i32
  }
  func.func @transform_2(%arg0: i32, %arg1: i32, %arg2: i32) -> (i32, i32) {
    %c0_i32 = arith.constant 0 : i32
    %c0_i32_0 = arith.constant 0 : i32
    return %c0_i32, %arg1 : i32, i32
  }
  func.func @transform_3(%arg0: i32, %arg1: i32, %arg2: i32) -> (i32, i32) {
    %c0_i32 = arith.constant 0 : i32
    %c0_i32_0 = arith.constant 0 : i32
    return %c0_i32, %arg1 : i32, i32
  }
  func.func @transform_4(%arg0: i32, %arg1: i32, %arg2: i32) -> (i32, i32) {
    %c0_i32 = arith.constant 0 : i32
    return %arg0, %arg1 : i32, i32
  }
}

module attributes {stable_mosaic.version = 11 : i64} {
  func.func @_gemm_bn_act_kernel(%arg0: i32, %arg1: i32, %arg2: i32, %arg3: memref<8x128xbf16, #tpu.memory_space<vmem>>, %arg4: memref<128x256xbf16, #tpu.memory_space<vmem>>, %arg5: memref<1x256xf32, #tpu.memory_space<vmem>>, %arg6: memref<1x256xf32, #tpu.memory_space<vmem>>, %arg7: memref<8x256xbf16, #tpu.memory_space<vmem>>, %arg8: memref<8x256xf32, #tpu.memory_space<vmem>>) attributes {dimension_semantics = [#tpu.dimension_semantics<parallel>, #tpu.dimension_semantics<parallel>, #tpu.dimension_semantics<arbitrary>], iteration_bounds = array<i64: 1, 1, 18>, scalar_prefetch = 0 : i64, scratch_operands = 1 : i64, tpu.core_type = #tpu.core_type<tc>, window_params = [{transform_indices = @transform_0, window_bounds = array<i64: 8, 128>}, {transform_indices = @transform_1, window_bounds = array<i64: 128, 256>}, {transform_indices = @transform_2, window_bounds = array<i64: 1, 256>}, {transform_indices = @transform_3, window_bounds = array<i64: 1, 256>}, {transform_indices = @transform_4, window_bounds = array<i64: 8, 256>}]} {
    %c0_i32 = arith.constant 0 : i32
    %0 = arith.cmpi eq, %arg2, %c0_i32 : i32
    %1 = arith.extui %0 : i1 to i32
    %c0_i32_0 = arith.constant 0 : i32
    %2 = arith.cmpi ne, %1, %c0_i32_0 : i32
    scf.if %2 {
      %cst_9 = arith.constant 0.000000e+00 : f32
      %12 = vector.broadcast %cst_9 : f32 to vector<8x256xf32>
      %c0_10 = arith.constant 0 : index
      %c0_11 = arith.constant 0 : index
      %13 = vector.load %arg8[%c0_10, %c0_11] : memref<8x256xf32, #tpu.memory_space<vmem>>, vector<8x256xf32>
      tpu.vector_store %arg8[%c0_10, %c0_11], %12 {strides = array<i32>} : memref<8x256xf32, #tpu.memory_space<vmem>>, vector<8x256xf32>,
    } else {
    }
    %c0 = arith.constant 0 : index
    %c0_1 = arith.constant 0 : index
    %3 = vector.load %arg8[%c0, %c0_1] : memref<8x256xf32, #tpu.memory_space<vmem>>, vector<8x256xf32>
    %c0_2 = arith.constant 0 : index
    %c0_3 = arith.constant 0 : index
    %4 = vector.load %arg3[%c0_2, %c0_3] : memref<8x128xbf16, #tpu.memory_space<vmem>>, vector<8x128xbf16>
    %c0_4 = arith.constant 0 : index
    %c0_5 = arith.constant 0 : index
    %5 = vector.load %arg4[%c0_4, %c0_5] : memref<128x256xbf16, #tpu.memory_space<vmem>>, vector<128x256xbf16>
    %cst = arith.constant dense<0.000000e+00> : vector<8x256xf32>
    %6 = tpu.matmul %4, %5, %cst {dimension_numbers = #tpu.dot_dimension_numbers<[1], [0], [0], [1], [0, 0, 1, 1], [], []>} : vector<8x128xbf16>, vector<128x256xbf16>, vector<8x256xf32> -> vector<8x256xf32>
    %7 = arith.addf %3, %6 : vector<8x256xf32>
    %c0_6 = arith.constant 0 : index
    %c0_7 = arith.constant 0 : index
    %8 = vector.load %arg8[%c0_6, %c0_7] : memref<8x256xf32, #tpu.memory_space<vmem>>, vector<8x256xf32>
    tpu.vector_store %arg8[%c0_6, %c0_7], %7 {strides = array<i32>} : memref<8x256xf32, #tpu.memory_space<vmem>>, vector<8x256xf32>,
    %c17_i32 = arith.constant 17 : i32
    %9 = arith.cmpi eq, %arg2, %c17_i32 : i32
    %10 = arith.extui %9 : i1 to i32
    %c0_i32_8 = arith.constant 0 : i32
    %11 = arith.cmpi ne, %10, %c0_i32_8 : i32
    scf.if %11 {
      %c0_9 = arith.constant 0 : index
      %c0_10 = arith.constant 0 : index
      %12 = vector.load %arg8[%c0_9, %c0_10] : memref<8x256xf32, #tpu.memory_space<vmem>>, vector<8x256xf32>
      %c0_11 = arith.constant 0 : index
      %c0_12 = arith.constant 0 : index
      %13 = vector.load %arg5[%c0_11, %c0_12] : memref<1x256xf32, #tpu.memory_space<vmem>>, vector<1x256xf32>
      %14 = vector.broadcast %13 : vector<1x256xf32> to vector<8x256xf32>
      %15 = arith.mulf %12, %14 : vector<8x256xf32>
      %c0_13 = arith.constant 0 : index
      %c0_14 = arith.constant 0 : index
      %16 = vector.load %arg6[%c0_13, %c0_14] : memref<1x256xf32, #tpu.memory_space<vmem>>, vector<1x256xf32>
      %17 = vector.broadcast %16 : vector<1x256xf32> to vector<8x256xf32>
      %18 = arith.addf %15, %17 : vector<8x256xf32>
      %cst_15 = arith.constant 0.000000e+00 : f32
      %19 = vector.broadcast %cst_15 : f32 to vector<8x256xf32>
      %20 = arith.maximumf %18, %19 : vector<8x256xf32>
      %21 = arith.truncf %20 : vector<8x256xf32> to vector<8x256xbf16>
      %c0_16 = arith.constant 0 : index
      %c0_17 = arith.constant 0 : index
      %22 = vector.load %arg7[%c0_16, %c0_17] : memref<8x256xbf16, #tpu.memory_space<vmem>>, vector<8x256xbf16>
      tpu.vector_store %arg7[%c0_16, %c0_17], %21 {strides = array<i32>} : memref<8x256xbf16, #tpu.memory_space<vmem>>, vector<8x256xbf16>,
    } else {
    }
    return
  }
  func.func @transform_0(%arg0: i32, %arg1: i32, %arg2: i32) -> (i32, i32) {
    %c0_i32 = arith.constant 0 : i32
    return %arg0, %arg2 : i32, i32
  }
  func.func @transform_1(%arg0: i32, %arg1: i32, %arg2: i32) -> (i32, i32) {
    %c0_i32 = arith.constant 0 : i32
    return %arg2, %arg1 : i32, i32
  }
  func.func @transform_2(%arg0: i32, %arg1: i32, %arg2: i32) -> (i32, i32) {
    %c0_i32 = arith.constant 0 : i32
    %c0_i32_0 = arith.constant 0 : i32
    return %c0_i32, %arg1 : i32, i32
  }
  func.func @transform_3(%arg0: i32, %arg1: i32, %arg2: i32) -> (i32, i32) {
    %c0_i32 = arith.constant 0 : i32
    %c0_i32_0 = arith.constant 0 : i32
    return %c0_i32, %arg1 : i32, i32
  }
  func.func @transform_4(%arg0: i32, %arg1: i32, %arg2: i32) -> (i32, i32) {
    %c0_i32 = arith.constant 0 : i32
    return %arg0, %arg1 : i32, i32
  }
}

module attributes {stable_mosaic.version = 11 : i64} {
  func.func @_gemm_bn_act_kernel(%arg0: i32, %arg1: i32, %arg2: i32, %arg3: memref<8x128xbf16, #tpu.memory_space<vmem>>, %arg4: memref<128x256xbf16, #tpu.memory_space<vmem>>, %arg5: memref<1x256xf32, #tpu.memory_space<vmem>>, %arg6: memref<1x256xf32, #tpu.memory_space<vmem>>, %arg7: memref<8x256xbf16, #tpu.memory_space<vmem>>, %arg8: memref<8x256xf32, #tpu.memory_space<vmem>>) attributes {dimension_semantics = [#tpu.dimension_semantics<parallel>, #tpu.dimension_semantics<parallel>, #tpu.dimension_semantics<arbitrary>], iteration_bounds = array<i64: 1, 4, 4>, scalar_prefetch = 0 : i64, scratch_operands = 1 : i64, tpu.core_type = #tpu.core_type<tc>, window_params = [{transform_indices = @transform_0, window_bounds = array<i64: 8, 128>}, {transform_indices = @transform_1, window_bounds = array<i64: 128, 256>}, {transform_indices = @transform_2, window_bounds = array<i64: 1, 256>}, {transform_indices = @transform_3, window_bounds = array<i64: 1, 256>}, {transform_indices = @transform_4, window_bounds = array<i64: 8, 256>}]} {
    %c0_i32 = arith.constant 0 : i32
    %0 = arith.cmpi eq, %arg2, %c0_i32 : i32
    %1 = arith.extui %0 : i1 to i32
    %c0_i32_0 = arith.constant 0 : i32
    %2 = arith.cmpi ne, %1, %c0_i32_0 : i32
    scf.if %2 {
      %cst_9 = arith.constant 0.000000e+00 : f32
      %12 = vector.broadcast %cst_9 : f32 to vector<8x256xf32>
      %c0_10 = arith.constant 0 : index
      %c0_11 = arith.constant 0 : index
      %13 = vector.load %arg8[%c0_10, %c0_11] : memref<8x256xf32, #tpu.memory_space<vmem>>, vector<8x256xf32>
      tpu.vector_store %arg8[%c0_10, %c0_11], %12 {strides = array<i32>} : memref<8x256xf32, #tpu.memory_space<vmem>>, vector<8x256xf32>,
    } else {
    }
    %c0 = arith.constant 0 : index
    %c0_1 = arith.constant 0 : index
    %3 = vector.load %arg8[%c0, %c0_1] : memref<8x256xf32, #tpu.memory_space<vmem>>, vector<8x256xf32>
    %c0_2 = arith.constant 0 : index
    %c0_3 = arith.constant 0 : index
    %4 = vector.load %arg3[%c0_2, %c0_3] : memref<8x128xbf16, #tpu.memory_space<vmem>>, vector<8x128xbf16>
    %c0_4 = arith.constant 0 : index
    %c0_5 = arith.constant 0 : index
    %5 = vector.load %arg4[%c0_4, %c0_5] : memref<128x256xbf16, #tpu.memory_space<vmem>>, vector<128x256xbf16>
    %cst = arith.constant dense<0.000000e+00> : vector<8x256xf32>
    %6 = tpu.matmul %4, %5, %cst {dimension_numbers = #tpu.dot_dimension_numbers<[1], [0], [0], [1], [0, 0, 1, 1], [], []>} : vector<8x128xbf16>, vector<128x256xbf16>, vector<8x256xf32> -> vector<8x256xf32>
    %7 = arith.addf %3, %6 : vector<8x256xf32>
    %c0_6 = arith.constant 0 : index
    %c0_7 = arith.constant 0 : index
    %8 = vector.load %arg8[%c0_6, %c0_7] : memref<8x256xf32, #tpu.memory_space<vmem>>, vector<8x256xf32>
    tpu.vector_store %arg8[%c0_6, %c0_7], %7 {strides = array<i32>} : memref<8x256xf32, #tpu.memory_space<vmem>>, vector<8x256xf32>,
    %c3_i32 = arith.constant 3 : i32
    %9 = arith.cmpi eq, %arg2, %c3_i32 : i32
    %10 = arith.extui %9 : i1 to i32
    %c0_i32_8 = arith.constant 0 : i32
    %11 = arith.cmpi ne, %10, %c0_i32_8 : i32
    scf.if %11 {
      %c0_9 = arith.constant 0 : index
      %c0_10 = arith.constant 0 : index
      %12 = vector.load %arg8[%c0_9, %c0_10] : memref<8x256xf32, #tpu.memory_space<vmem>>, vector<8x256xf32>
      %c0_11 = arith.constant 0 : index
      %c0_12 = arith.constant 0 : index
      %13 = vector.load %arg5[%c0_11, %c0_12] : memref<1x256xf32, #tpu.memory_space<vmem>>, vector<1x256xf32>
      %14 = vector.broadcast %13 : vector<1x256xf32> to vector<8x256xf32>
      %15 = arith.mulf %12, %14 : vector<8x256xf32>
      %c0_13 = arith.constant 0 : index
      %c0_14 = arith.constant 0 : index
      %16 = vector.load %arg6[%c0_13, %c0_14] : memref<1x256xf32, #tpu.memory_space<vmem>>, vector<1x256xf32>
      %17 = vector.broadcast %16 : vector<1x256xf32> to vector<8x256xf32>
      %18 = arith.addf %15, %17 : vector<8x256xf32>
      %19 = arith.truncf %18 : vector<8x256xf32> to vector<8x256xbf16>
      %c0_15 = arith.constant 0 : index
      %c0_16 = arith.constant 0 : index
      %20 = vector.load %arg7[%c0_15, %c0_16] : memref<8x256xbf16, #tpu.memory_space<vmem>>, vector<8x256xbf16>
      tpu.vector_store %arg7[%c0_15, %c0_16], %19 {strides = array<i32>} : memref<8x256xbf16, #tpu.memory_space<vmem>>, vector<8x256xbf16>,
    } else {
    }
    return
  }
  func.func @transform_0(%arg0: i32, %arg1: i32, %arg2: i32) -> (i32, i32) {
    %c0_i32 = arith.constant 0 : i32
    return %arg0, %arg2 : i32, i32
  }
  func.func @transform_1(%arg0: i32, %arg1: i32, %arg2: i32) -> (i32, i32) {
    %c0_i32 = arith.constant 0 : i32
    return %arg2, %arg1 : i32, i32
  }
  func.func @transform_2(%arg0: i32, %arg1: i32, %arg2: i32) -> (i32, i32) {
    %c0_i32 = arith.constant 0 : i32
    %c0_i32_0 = arith.constant 0 : i32
    return %c0_i32, %arg1 : i32, i32
  }
  func.func @transform_3(%arg0: i32, %arg1: i32, %arg2: i32) -> (i32, i32) {
    %c0_i32 = arith.constant 0 : i32
    %c0_i32_0 = arith.constant 0 : i32
    return %c0_i32, %arg1 : i32, i32
  }
  func.func @transform_4(%arg0: i32, %arg1: i32, %arg2: i32) -> (i32, i32) {
    %c0_i32 = arith.constant 0 : i32
    return %arg0, %arg1 : i32, i32
  }
}

module attributes {stable_mosaic.version = 11 : i64} {
  func.func @_gemm_bn_act_kernel(%arg0: i32, %arg1: i32, %arg2: i32, %arg3: memref<8x128xbf16, #tpu.memory_space<vmem>>, %arg4: memref<128x256xbf16, #tpu.memory_space<vmem>>, %arg5: memref<1x256xf32, #tpu.memory_space<vmem>>, %arg6: memref<1x256xf32, #tpu.memory_space<vmem>>, %arg7: memref<8x256xbf16, #tpu.memory_space<vmem>>, %arg8: memref<8x256xbf16, #tpu.memory_space<vmem>>, %arg9: memref<8x256xf32, #tpu.memory_space<vmem>>) attributes {dimension_semantics = [#tpu.dimension_semantics<parallel>, #tpu.dimension_semantics<parallel>, #tpu.dimension_semantics<arbitrary>], iteration_bounds = array<i64: 1, 4, 2>, scalar_prefetch = 0 : i64, scratch_operands = 1 : i64, tpu.core_type = #tpu.core_type<tc>, window_params = [{transform_indices = @transform_0, window_bounds = array<i64: 8, 128>}, {transform_indices = @transform_1, window_bounds = array<i64: 128, 256>}, {transform_indices = @transform_2, window_bounds = array<i64: 1, 256>}, {transform_indices = @transform_3, window_bounds = array<i64: 1, 256>}, {transform_indices = @transform_4, window_bounds = array<i64: 8, 256>}, {transform_indices = @transform_5, window_bounds = array<i64: 8, 256>}]} {
    %c0_i32 = arith.constant 0 : i32
    %0 = arith.cmpi eq, %arg2, %c0_i32 : i32
    %1 = arith.extui %0 : i1 to i32
    %c0_i32_0 = arith.constant 0 : i32
    %2 = arith.cmpi ne, %1, %c0_i32_0 : i32
    scf.if %2 {
      %cst_9 = arith.constant 0.000000e+00 : f32
      %12 = vector.broadcast %cst_9 : f32 to vector<8x256xf32>
      %c0_10 = arith.constant 0 : index
      %c0_11 = arith.constant 0 : index
      %13 = vector.load %arg9[%c0_10, %c0_11] : memref<8x256xf32, #tpu.memory_space<vmem>>, vector<8x256xf32>
      tpu.vector_store %arg9[%c0_10, %c0_11], %12 {strides = array<i32>} : memref<8x256xf32, #tpu.memory_space<vmem>>, vector<8x256xf32>,
    } else {
    }
    %c0 = arith.constant 0 : index
    %c0_1 = arith.constant 0 : index
    %3 = vector.load %arg9[%c0, %c0_1] : memref<8x256xf32, #tpu.memory_space<vmem>>, vector<8x256xf32>
    %c0_2 = arith.constant 0 : index
    %c0_3 = arith.constant 0 : index
    %4 = vector.load %arg3[%c0_2, %c0_3] : memref<8x128xbf16, #tpu.memory_space<vmem>>, vector<8x128xbf16>
    %c0_4 = arith.constant 0 : index
    %c0_5 = arith.constant 0 : index
    %5 = vector.load %arg4[%c0_4, %c0_5] : memref<128x256xbf16, #tpu.memory_space<vmem>>, vector<128x256xbf16>
    %cst = arith.constant dense<0.000000e+00> : vector<8x256xf32>
    %6 = tpu.matmul %4, %5, %cst {dimension_numbers = #tpu.dot_dimension_numbers<[1], [0], [0], [1], [0, 0, 1, 1], [], []>} : vector<8x128xbf16>, vector<128x256xbf16>, vector<8x256xf32> -> vector<8x256xf32>
    %7 = arith.addf %3, %6 : vector<8x256xf32>
    %c0_6 = arith.constant 0 : index
    %c0_7 = arith.constant 0 : index
    %8 = vector.load %arg9[%c0_6, %c0_7] : memref<8x256xf32, #tpu.memory_space<vmem>>, vector<8x256xf32>
    tpu.vector_store %arg9[%c0_6, %c0_7], %7 {strides = array<i32>} : memref<8x256xf32, #tpu.memory_space<vmem>>, vector<8x256xf32>,
    %c1_i32 = arith.constant 1 : i32
    %9 = arith.cmpi eq, %arg2, %c1_i32 : i32
    %10 = arith.extui %9 : i1 to i32
    %c0_i32_8 = arith.constant 0 : i32
    %11 = arith.cmpi ne, %10, %c0_i32_8 : i32
    scf.if %11 {
      %c0_9 = arith.constant 0 : index
      %c0_10 = arith.constant 0 : index
      %12 = vector.load %arg9[%c0_9, %c0_10] : memref<8x256xf32, #tpu.memory_space<vmem>>, vector<8x256xf32>
      %c0_11 = arith.constant 0 : index
      %c0_12 = arith.constant 0 : index
      %13 = vector.load %arg5[%c0_11, %c0_12] : memref<1x256xf32, #tpu.memory_space<vmem>>, vector<1x256xf32>
      %14 = vector.broadcast %13 : vector<1x256xf32> to vector<8x256xf32>
      %15 = arith.mulf %12, %14 : vector<8x256xf32>
      %c0_13 = arith.constant 0 : index
      %c0_14 = arith.constant 0 : index
      %16 = vector.load %arg6[%c0_13, %c0_14] : memref<1x256xf32, #tpu.memory_space<vmem>>, vector<1x256xf32>
      %17 = vector.broadcast %16 : vector<1x256xf32> to vector<8x256xf32>
      %18 = arith.addf %15, %17 : vector<8x256xf32>
      %c0_15 = arith.constant 0 : index
      %c0_16 = arith.constant 0 : index
      %19 = vector.load %arg7[%c0_15, %c0_16] : memref<8x256xbf16, #tpu.memory_space<vmem>>, vector<8x256xbf16>
      %20 = arith.extf %19 : vector<8x256xbf16> to vector<8x256xf32>
      %21 = arith.addf %18, %20 : vector<8x256xf32>
      %cst_17 = arith.constant 0.000000e+00 : f32
      %22 = vector.broadcast %cst_17 : f32 to vector<8x256xf32>
      %23 = arith.maximumf %21, %22 : vector<8x256xf32>
      %24 = arith.truncf %23 : vector<8x256xf32> to vector<8x256xbf16>
      %c0_18 = arith.constant 0 : index
      %c0_19 = arith.constant 0 : index
      %25 = vector.load %arg8[%c0_18, %c0_19] : memref<8x256xbf16, #tpu.memory_space<vmem>>, vector<8x256xbf16>
      tpu.vector_store %arg8[%c0_18, %c0_19], %24 {strides = array<i32>} : memref<8x256xbf16, #tpu.memory_space<vmem>>, vector<8x256xbf16>,
    } else {
    }
    return
  }
  func.func @transform_0(%arg0: i32, %arg1: i32, %arg2: i32) -> (i32, i32) {
    %c0_i32 = arith.constant 0 : i32
    return %arg0, %arg2 : i32, i32
  }
  func.func @transform_1(%arg0: i32, %arg1: i32, %arg2: i32) -> (i32, i32) {
    %c0_i32 = arith.constant 0 : i32
    return %arg2, %arg1 : i32, i32
  }
  func.func @transform_2(%arg0: i32, %arg1: i32, %arg2: i32) -> (i32, i32) {
    %c0_i32 = arith.constant 0 : i32
    %c0_i32_0 = arith.constant 0 : i32
    return %c0_i32, %arg1 : i32, i32
  }
  func.func @transform_3(%arg0: i32, %arg1: i32, %arg2: i32) -> (i32, i32) {
    %c0_i32 = arith.constant 0 : i32
    %c0_i32_0 = arith.constant 0 : i32
    return %c0_i32, %arg1 : i32, i32
  }
  func.func @transform_4(%arg0: i32, %arg1: i32, %arg2: i32) -> (i32, i32) {
    %c0_i32 = arith.constant 0 : i32
    return %arg0, %arg1 : i32, i32
  }
  func.func @transform_5(%arg0: i32, %arg1: i32, %arg2: i32) -> (i32, i32) {
    %c0_i32 = arith.constant 0 : i32
    return %arg0, %arg1 : i32, i32
  }
}

module attributes {stable_mosaic.version = 11 : i64} {
  func.func @_gemm_bn_act_kernel(%arg0: i32, %arg1: i32, %arg2: i32, %arg3: memref<8x128xbf16, #tpu.memory_space<vmem>>, %arg4: memref<128x256xbf16, #tpu.memory_space<vmem>>, %arg5: memref<1x256xf32, #tpu.memory_space<vmem>>, %arg6: memref<1x256xf32, #tpu.memory_space<vmem>>, %arg7: memref<8x256xbf16, #tpu.memory_space<vmem>>, %arg8: memref<8x256xf32, #tpu.memory_space<vmem>>) attributes {dimension_semantics = [#tpu.dimension_semantics<parallel>, #tpu.dimension_semantics<parallel>, #tpu.dimension_semantics<arbitrary>], iteration_bounds = array<i64: 1, 1, 8>, scalar_prefetch = 0 : i64, scratch_operands = 1 : i64, tpu.core_type = #tpu.core_type<tc>, window_params = [{transform_indices = @transform_0, window_bounds = array<i64: 8, 128>}, {transform_indices = @transform_1, window_bounds = array<i64: 128, 256>}, {transform_indices = @transform_2, window_bounds = array<i64: 1, 256>}, {transform_indices = @transform_3, window_bounds = array<i64: 1, 256>}, {transform_indices = @transform_4, window_bounds = array<i64: 8, 256>}]} {
    %c0_i32 = arith.constant 0 : i32
    %0 = arith.cmpi eq, %arg2, %c0_i32 : i32
    %1 = arith.extui %0 : i1 to i32
    %c0_i32_0 = arith.constant 0 : i32
    %2 = arith.cmpi ne, %1, %c0_i32_0 : i32
    scf.if %2 {
      %cst_9 = arith.constant 0.000000e+00 : f32
      %12 = vector.broadcast %cst_9 : f32 to vector<8x256xf32>
      %c0_10 = arith.constant 0 : index
      %c0_11 = arith.constant 0 : index
      %13 = vector.load %arg8[%c0_10, %c0_11] : memref<8x256xf32, #tpu.memory_space<vmem>>, vector<8x256xf32>
      tpu.vector_store %arg8[%c0_10, %c0_11], %12 {strides = array<i32>} : memref<8x256xf32, #tpu.memory_space<vmem>>, vector<8x256xf32>,
    } else {
    }
    %c0 = arith.constant 0 : index
    %c0_1 = arith.constant 0 : index
    %3 = vector.load %arg8[%c0, %c0_1] : memref<8x256xf32, #tpu.memory_space<vmem>>, vector<8x256xf32>
    %c0_2 = arith.constant 0 : index
    %c0_3 = arith.constant 0 : index
    %4 = vector.load %arg3[%c0_2, %c0_3] : memref<8x128xbf16, #tpu.memory_space<vmem>>, vector<8x128xbf16>
    %c0_4 = arith.constant 0 : index
    %c0_5 = arith.constant 0 : index
    %5 = vector.load %arg4[%c0_4, %c0_5] : memref<128x256xbf16, #tpu.memory_space<vmem>>, vector<128x256xbf16>
    %cst = arith.constant dense<0.000000e+00> : vector<8x256xf32>
    %6 = tpu.matmul %4, %5, %cst {dimension_numbers = #tpu.dot_dimension_numbers<[1], [0], [0], [1], [0, 0, 1, 1], [], []>} : vector<8x128xbf16>, vector<128x256xbf16>, vector<8x256xf32> -> vector<8x256xf32>
    %7 = arith.addf %3, %6 : vector<8x256xf32>
    %c0_6 = arith.constant 0 : index
    %c0_7 = arith.constant 0 : index
    %8 = vector.load %arg8[%c0_6, %c0_7] : memref<8x256xf32, #tpu.memory_space<vmem>>, vector<8x256xf32>
    tpu.vector_store %arg8[%c0_6, %c0_7], %7 {strides = array<i32>} : memref<8x256xf32, #tpu.memory_space<vmem>>, vector<8x256xf32>,
    %c7_i32 = arith.constant 7 : i32
    %9 = arith.cmpi eq, %arg2, %c7_i32 : i32
    %10 = arith.extui %9 : i1 to i32
    %c0_i32_8 = arith.constant 0 : i32
    %11 = arith.cmpi ne, %10, %c0_i32_8 : i32
    scf.if %11 {
      %c0_9 = arith.constant 0 : index
      %c0_10 = arith.constant 0 : index
      %12 = vector.load %arg8[%c0_9, %c0_10] : memref<8x256xf32, #tpu.memory_space<vmem>>, vector<8x256xf32>
      %c0_11 = arith.constant 0 : index
      %c0_12 = arith.constant 0 : index
      %13 = vector.load %arg5[%c0_11, %c0_12] : memref<1x256xf32, #tpu.memory_space<vmem>>, vector<1x256xf32>
      %14 = vector.broadcast %13 : vector<1x256xf32> to vector<8x256xf32>
      %15 = arith.mulf %12, %14 : vector<8x256xf32>
      %c0_13 = arith.constant 0 : index
      %c0_14 = arith.constant 0 : index
      %16 = vector.load %arg6[%c0_13, %c0_14] : memref<1x256xf32, #tpu.memory_space<vmem>>, vector<1x256xf32>
      %17 = vector.broadcast %16 : vector<1x256xf32> to vector<8x256xf32>
      %18 = arith.addf %15, %17 : vector<8x256xf32>
      %cst_15 = arith.constant 0.000000e+00 : f32
      %19 = vector.broadcast %cst_15 : f32 to vector<8x256xf32>
      %20 = arith.maximumf %18, %19 : vector<8x256xf32>
      %21 = arith.truncf %20 : vector<8x256xf32> to vector<8x256xbf16>
      %c0_16 = arith.constant 0 : index
      %c0_17 = arith.constant 0 : index
      %22 = vector.load %arg7[%c0_16, %c0_17] : memref<8x256xbf16, #tpu.memory_space<vmem>>, vector<8x256xbf16>
      tpu.vector_store %arg7[%c0_16, %c0_17], %21 {strides = array<i32>} : memref<8x256xbf16, #tpu.memory_space<vmem>>, vector<8x256xbf16>,
    } else {
    }
    return
  }
  func.func @transform_0(%arg0: i32, %arg1: i32, %arg2: i32) -> (i32, i32) {
    %c0_i32 = arith.constant 0 : i32
    return %arg0, %arg2 : i32, i32
  }
  func.func @transform_1(%arg0: i32, %arg1: i32, %arg2: i32) -> (i32, i32) {
    %c0_i32 = arith.constant 0 : i32
    return %arg2, %arg1 : i32, i32
  }
  func.func @transform_2(%arg0: i32, %arg1: i32, %arg2: i32) -> (i32, i32) {
    %c0_i32 = arith.constant 0 : i32
    %c0_i32_0 = arith.constant 0 : i32
    return %c0_i32, %arg1 : i32, i32
  }
  func.func @transform_3(%arg0: i32, %arg1: i32, %arg2: i32) -> (i32, i32) {
    %c0_i32 = arith.constant 0 : i32
    %c0_i32_0 = arith.constant 0 : i32
    return %c0_i32, %arg1 : i32, i32
  }
  func.func @transform_4(%arg0: i32, %arg1: i32, %arg2: i32) -> (i32, i32) {
    %c0_i32 = arith.constant 0 : i32
    return %arg0, %arg1 : i32, i32
  }
}

module attributes {stable_mosaic.version = 11 : i64} {
  func.func @_gemm_bn_act_kernel(%arg0: i32, %arg1: i32, %arg2: i32, %arg3: memref<8x128xbf16, #tpu.memory_space<vmem>>, %arg4: memref<128x256xbf16, #tpu.memory_space<vmem>>, %arg5: memref<1x256xf32, #tpu.memory_space<vmem>>, %arg6: memref<1x256xf32, #tpu.memory_space<vmem>>, %arg7: memref<8x256xbf16, #tpu.memory_space<vmem>>, %arg8: memref<8x256xf32, #tpu.memory_space<vmem>>) attributes {dimension_semantics = [#tpu.dimension_semantics<parallel>, #tpu.dimension_semantics<parallel>, #tpu.dimension_semantics<arbitrary>], iteration_bounds = array<i64: 1, 2, 8>, scalar_prefetch = 0 : i64, scratch_operands = 1 : i64, tpu.core_type = #tpu.core_type<tc>, window_params = [{transform_indices = @transform_0, window_bounds = array<i64: 8, 128>}, {transform_indices = @transform_1, window_bounds = array<i64: 128, 256>}, {transform_indices = @transform_2, window_bounds = array<i64: 1, 256>}, {transform_indices = @transform_3, window_bounds = array<i64: 1, 256>}, {transform_indices = @transform_4, window_bounds = array<i64: 8, 256>}]} {
    %c0_i32 = arith.constant 0 : i32
    %0 = arith.cmpi eq, %arg2, %c0_i32 : i32
    %1 = arith.extui %0 : i1 to i32
    %c0_i32_0 = arith.constant 0 : i32
    %2 = arith.cmpi ne, %1, %c0_i32_0 : i32
    scf.if %2 {
      %cst_9 = arith.constant 0.000000e+00 : f32
      %12 = vector.broadcast %cst_9 : f32 to vector<8x256xf32>
      %c0_10 = arith.constant 0 : index
      %c0_11 = arith.constant 0 : index
      %13 = vector.load %arg8[%c0_10, %c0_11] : memref<8x256xf32, #tpu.memory_space<vmem>>, vector<8x256xf32>
      tpu.vector_store %arg8[%c0_10, %c0_11], %12 {strides = array<i32>} : memref<8x256xf32, #tpu.memory_space<vmem>>, vector<8x256xf32>,
    } else {
    }
    %c0 = arith.constant 0 : index
    %c0_1 = arith.constant 0 : index
    %3 = vector.load %arg8[%c0, %c0_1] : memref<8x256xf32, #tpu.memory_space<vmem>>, vector<8x256xf32>
    %c0_2 = arith.constant 0 : index
    %c0_3 = arith.constant 0 : index
    %4 = vector.load %arg3[%c0_2, %c0_3] : memref<8x128xbf16, #tpu.memory_space<vmem>>, vector<8x128xbf16>
    %c0_4 = arith.constant 0 : index
    %c0_5 = arith.constant 0 : index
    %5 = vector.load %arg4[%c0_4, %c0_5] : memref<128x256xbf16, #tpu.memory_space<vmem>>, vector<128x256xbf16>
    %cst = arith.constant dense<0.000000e+00> : vector<8x256xf32>
    %6 = tpu.matmul %4, %5, %cst {dimension_numbers = #tpu.dot_dimension_numbers<[1], [0], [0], [1], [0, 0, 1, 1], [], []>} : vector<8x128xbf16>, vector<128x256xbf16>, vector<8x256xf32> -> vector<8x256xf32>
    %7 = arith.addf %3, %6 : vector<8x256xf32>
    %c0_6 = arith.constant 0 : index
    %c0_7 = arith.constant 0 : index
    %8 = vector.load %arg8[%c0_6, %c0_7] : memref<8x256xf32, #tpu.memory_space<vmem>>, vector<8x256xf32>
    tpu.vector_store %arg8[%c0_6, %c0_7], %7 {strides = array<i32>} : memref<8x256xf32, #tpu.memory_space<vmem>>, vector<8x256xf32>,
    %c7_i32 = arith.constant 7 : i32
    %9 = arith.cmpi eq, %arg2, %c7_i32 : i32
    %10 = arith.extui %9 : i1 to i32
    %c0_i32_8 = arith.constant 0 : i32
    %11 = arith.cmpi ne, %10, %c0_i32_8 : i32
    scf.if %11 {
      %c0_9 = arith.constant 0 : index
      %c0_10 = arith.constant 0 : index
      %12 = vector.load %arg8[%c0_9, %c0_10] : memref<8x256xf32, #tpu.memory_space<vmem>>, vector<8x256xf32>
      %c0_11 = arith.constant 0 : index
      %c0_12 = arith.constant 0 : index
      %13 = vector.load %arg5[%c0_11, %c0_12] : memref<1x256xf32, #tpu.memory_space<vmem>>, vector<1x256xf32>
      %14 = vector.broadcast %13 : vector<1x256xf32> to vector<8x256xf32>
      %15 = arith.mulf %12, %14 : vector<8x256xf32>
      %c0_13 = arith.constant 0 : index
      %c0_14 = arith.constant 0 : index
      %16 = vector.load %arg6[%c0_13, %c0_14] : memref<1x256xf32, #tpu.memory_space<vmem>>, vector<1x256xf32>
      %17 = vector.broadcast %16 : vector<1x256xf32> to vector<8x256xf32>
      %18 = arith.addf %15, %17 : vector<8x256xf32>
      %cst_15 = arith.constant 0.000000e+00 : f32
      %19 = vector.broadcast %cst_15 : f32 to vector<8x256xf32>
      %20 = arith.maximumf %18, %19 : vector<8x256xf32>
      %21 = arith.truncf %20 : vector<8x256xf32> to vector<8x256xbf16>
      %c0_16 = arith.constant 0 : index
      %c0_17 = arith.constant 0 : index
      %22 = vector.load %arg7[%c0_16, %c0_17] : memref<8x256xbf16, #tpu.memory_space<vmem>>, vector<8x256xbf16>
      tpu.vector_store %arg7[%c0_16, %c0_17], %21 {strides = array<i32>} : memref<8x256xbf16, #tpu.memory_space<vmem>>, vector<8x256xbf16>,
    } else {
    }
    return
  }
  func.func @transform_0(%arg0: i32, %arg1: i32, %arg2: i32) -> (i32, i32) {
    %c0_i32 = arith.constant 0 : i32
    return %arg0, %arg2 : i32, i32
  }
  func.func @transform_1(%arg0: i32, %arg1: i32, %arg2: i32) -> (i32, i32) {
    %c0_i32 = arith.constant 0 : i32
    return %arg2, %arg1 : i32, i32
  }
  func.func @transform_2(%arg0: i32, %arg1: i32, %arg2: i32) -> (i32, i32) {
    %c0_i32 = arith.constant 0 : i32
    %c0_i32_0 = arith.constant 0 : i32
    return %c0_i32, %arg1 : i32, i32
  }
  func.func @transform_3(%arg0: i32, %arg1: i32, %arg2: i32) -> (i32, i32) {
    %c0_i32 = arith.constant 0 : i32
    %c0_i32_0 = arith.constant 0 : i32
    return %c0_i32, %arg1 : i32, i32
  }
  func.func @transform_4(%arg0: i32, %arg1: i32, %arg2: i32) -> (i32, i32) {
    %c0_i32 = arith.constant 0 : i32
    return %arg0, %arg1 : i32, i32
  }
}

module attributes {stable_mosaic.version = 11 : i64} {
  func.func @_gemm_bn_act_kernel(%arg0: i32, %arg1: i32, %arg2: i32, %arg3: memref<8x128xbf16, #tpu.memory_space<vmem>>, %arg4: memref<128x256xbf16, #tpu.memory_space<vmem>>, %arg5: memref<1x256xf32, #tpu.memory_space<vmem>>, %arg6: memref<1x256xf32, #tpu.memory_space<vmem>>, %arg7: memref<8x256xbf16, #tpu.memory_space<vmem>>, %arg8: memref<8x256xf32, #tpu.memory_space<vmem>>) attributes {dimension_semantics = [#tpu.dimension_semantics<parallel>, #tpu.dimension_semantics<parallel>, #tpu.dimension_semantics<arbitrary>], iteration_bounds = array<i64: 1, 2, 36>, scalar_prefetch = 0 : i64, scratch_operands = 1 : i64, tpu.core_type = #tpu.core_type<tc>, window_params = [{transform_indices = @transform_0, window_bounds = array<i64: 8, 128>}, {transform_indices = @transform_1, window_bounds = array<i64: 128, 256>}, {transform_indices = @transform_2, window_bounds = array<i64: 1, 256>}, {transform_indices = @transform_3, window_bounds = array<i64: 1, 256>}, {transform_indices = @transform_4, window_bounds = array<i64: 8, 256>}]} {
    %c0_i32 = arith.constant 0 : i32
    %0 = arith.cmpi eq, %arg2, %c0_i32 : i32
    %1 = arith.extui %0 : i1 to i32
    %c0_i32_0 = arith.constant 0 : i32
    %2 = arith.cmpi ne, %1, %c0_i32_0 : i32
    scf.if %2 {
      %cst_9 = arith.constant 0.000000e+00 : f32
      %12 = vector.broadcast %cst_9 : f32 to vector<8x256xf32>
      %c0_10 = arith.constant 0 : index
      %c0_11 = arith.constant 0 : index
      %13 = vector.load %arg8[%c0_10, %c0_11] : memref<8x256xf32, #tpu.memory_space<vmem>>, vector<8x256xf32>
      tpu.vector_store %arg8[%c0_10, %c0_11], %12 {strides = array<i32>} : memref<8x256xf32, #tpu.memory_space<vmem>>, vector<8x256xf32>,
    } else {
    }
    %c0 = arith.constant 0 : index
    %c0_1 = arith.constant 0 : index
    %3 = vector.load %arg8[%c0, %c0_1] : memref<8x256xf32, #tpu.memory_space<vmem>>, vector<8x256xf32>
    %c0_2 = arith.constant 0 : index
    %c0_3 = arith.constant 0 : index
    %4 = vector.load %arg3[%c0_2, %c0_3] : memref<8x128xbf16, #tpu.memory_space<vmem>>, vector<8x128xbf16>
    %c0_4 = arith.constant 0 : index
    %c0_5 = arith.constant 0 : index
    %5 = vector.load %arg4[%c0_4, %c0_5] : memref<128x256xbf16, #tpu.memory_space<vmem>>, vector<128x256xbf16>
    %cst = arith.constant dense<0.000000e+00> : vector<8x256xf32>
    %6 = tpu.matmul %4, %5, %cst {dimension_numbers = #tpu.dot_dimension_numbers<[1], [0], [0], [1], [0, 0, 1, 1], [], []>} : vector<8x128xbf16>, vector<128x256xbf16>, vector<8x256xf32> -> vector<8x256xf32>
    %7 = arith.addf %3, %6 : vector<8x256xf32>
    %c0_6 = arith.constant 0 : index
    %c0_7 = arith.constant 0 : index
    %8 = vector.load %arg8[%c0_6, %c0_7] : memref<8x256xf32, #tpu.memory_space<vmem>>, vector<8x256xf32>
    tpu.vector_store %arg8[%c0_6, %c0_7], %7 {strides = array<i32>} : memref<8x256xf32, #tpu.memory_space<vmem>>, vector<8x256xf32>,
    %c35_i32 = arith.constant 35 : i32
    %9 = arith.cmpi eq, %arg2, %c35_i32 : i32
    %10 = arith.extui %9 : i1 to i32
    %c0_i32_8 = arith.constant 0 : i32
    %11 = arith.cmpi ne, %10, %c0_i32_8 : i32
    scf.if %11 {
      %c0_9 = arith.constant 0 : index
      %c0_10 = arith.constant 0 : index
      %12 = vector.load %arg8[%c0_9, %c0_10] : memref<8x256xf32, #tpu.memory_space<vmem>>, vector<8x256xf32>
      %c0_11 = arith.constant 0 : index
      %c0_12 = arith.constant 0 : index
      %13 = vector.load %arg5[%c0_11, %c0_12] : memref<1x256xf32, #tpu.memory_space<vmem>>, vector<1x256xf32>
      %14 = vector.broadcast %13 : vector<1x256xf32> to vector<8x256xf32>
      %15 = arith.mulf %12, %14 : vector<8x256xf32>
      %c0_13 = arith.constant 0 : index
      %c0_14 = arith.constant 0 : index
      %16 = vector.load %arg6[%c0_13, %c0_14] : memref<1x256xf32, #tpu.memory_space<vmem>>, vector<1x256xf32>
      %17 = vector.broadcast %16 : vector<1x256xf32> to vector<8x256xf32>
      %18 = arith.addf %15, %17 : vector<8x256xf32>
      %cst_15 = arith.constant 0.000000e+00 : f32
      %19 = vector.broadcast %cst_15 : f32 to vector<8x256xf32>
      %20 = arith.maximumf %18, %19 : vector<8x256xf32>
      %21 = arith.truncf %20 : vector<8x256xf32> to vector<8x256xbf16>
      %c0_16 = arith.constant 0 : index
      %c0_17 = arith.constant 0 : index
      %22 = vector.load %arg7[%c0_16, %c0_17] : memref<8x256xbf16, #tpu.memory_space<vmem>>, vector<8x256xbf16>
      tpu.vector_store %arg7[%c0_16, %c0_17], %21 {strides = array<i32>} : memref<8x256xbf16, #tpu.memory_space<vmem>>, vector<8x256xbf16>,
    } else {
    }
    return
  }
  func.func @transform_0(%arg0: i32, %arg1: i32, %arg2: i32) -> (i32, i32) {
    %c0_i32 = arith.constant 0 : i32
    return %arg0, %arg2 : i32, i32
  }
  func.func @transform_1(%arg0: i32, %arg1: i32, %arg2: i32) -> (i32, i32) {
    %c0_i32 = arith.constant 0 : i32
    return %arg2, %arg1 : i32, i32
  }
  func.func @transform_2(%arg0: i32, %arg1: i32, %arg2: i32) -> (i32, i32) {
    %c0_i32 = arith.constant 0 : i32
    %c0_i32_0 = arith.constant 0 : i32
    return %c0_i32, %arg1 : i32, i32
  }
  func.func @transform_3(%arg0: i32, %arg1: i32, %arg2: i32) -> (i32, i32) {
    %c0_i32 = arith.constant 0 : i32
    %c0_i32_0 = arith.constant 0 : i32
    return %c0_i32, %arg1 : i32, i32
  }
  func.func @transform_4(%arg0: i32, %arg1: i32, %arg2: i32) -> (i32, i32) {
    %c0_i32 = arith.constant 0 : i32
    return %arg0, %arg1 : i32, i32
  }
}

module attributes {stable_mosaic.version = 11 : i64} {
  func.func @_gemm_bn_act_kernel(%arg0: i32, %arg1: i32, %arg2: i32, %arg3: memref<8x128xbf16, #tpu.memory_space<vmem>>, %arg4: memref<128x256xbf16, #tpu.memory_space<vmem>>, %arg5: memref<1x256xf32, #tpu.memory_space<vmem>>, %arg6: memref<1x256xf32, #tpu.memory_space<vmem>>, %arg7: memref<8x256xbf16, #tpu.memory_space<vmem>>, %arg8: memref<8x256xf32, #tpu.memory_space<vmem>>) attributes {dimension_semantics = [#tpu.dimension_semantics<parallel>, #tpu.dimension_semantics<parallel>, #tpu.dimension_semantics<arbitrary>], iteration_bounds = array<i64: 1, 8, 8>, scalar_prefetch = 0 : i64, scratch_operands = 1 : i64, tpu.core_type = #tpu.core_type<tc>, window_params = [{transform_indices = @transform_0, window_bounds = array<i64: 8, 128>}, {transform_indices = @transform_1, window_bounds = array<i64: 128, 256>}, {transform_indices = @transform_2, window_bounds = array<i64: 1, 256>}, {transform_indices = @transform_3, window_bounds = array<i64: 1, 256>}, {transform_indices = @transform_4, window_bounds = array<i64: 8, 256>}]} {
    %c0_i32 = arith.constant 0 : i32
    %0 = arith.cmpi eq, %arg2, %c0_i32 : i32
    %1 = arith.extui %0 : i1 to i32
    %c0_i32_0 = arith.constant 0 : i32
    %2 = arith.cmpi ne, %1, %c0_i32_0 : i32
    scf.if %2 {
      %cst_9 = arith.constant 0.000000e+00 : f32
      %12 = vector.broadcast %cst_9 : f32 to vector<8x256xf32>
      %c0_10 = arith.constant 0 : index
      %c0_11 = arith.constant 0 : index
      %13 = vector.load %arg8[%c0_10, %c0_11] : memref<8x256xf32, #tpu.memory_space<vmem>>, vector<8x256xf32>
      tpu.vector_store %arg8[%c0_10, %c0_11], %12 {strides = array<i32>} : memref<8x256xf32, #tpu.memory_space<vmem>>, vector<8x256xf32>,
    } else {
    }
    %c0 = arith.constant 0 : index
    %c0_1 = arith.constant 0 : index
    %3 = vector.load %arg8[%c0, %c0_1] : memref<8x256xf32, #tpu.memory_space<vmem>>, vector<8x256xf32>
    %c0_2 = arith.constant 0 : index
    %c0_3 = arith.constant 0 : index
    %4 = vector.load %arg3[%c0_2, %c0_3] : memref<8x128xbf16, #tpu.memory_space<vmem>>, vector<8x128xbf16>
    %c0_4 = arith.constant 0 : index
    %c0_5 = arith.constant 0 : index
    %5 = vector.load %arg4[%c0_4, %c0_5] : memref<128x256xbf16, #tpu.memory_space<vmem>>, vector<128x256xbf16>
    %cst = arith.constant dense<0.000000e+00> : vector<8x256xf32>
    %6 = tpu.matmul %4, %5, %cst {dimension_numbers = #tpu.dot_dimension_numbers<[1], [0], [0], [1], [0, 0, 1, 1], [], []>} : vector<8x128xbf16>, vector<128x256xbf16>, vector<8x256xf32> -> vector<8x256xf32>
    %7 = arith.addf %3, %6 : vector<8x256xf32>
    %c0_6 = arith.constant 0 : index
    %c0_7 = arith.constant 0 : index
    %8 = vector.load %arg8[%c0_6, %c0_7] : memref<8x256xf32, #tpu.memory_space<vmem>>, vector<8x256xf32>
    tpu.vector_store %arg8[%c0_6, %c0_7], %7 {strides = array<i32>} : memref<8x256xf32, #tpu.memory_space<vmem>>, vector<8x256xf32>,
    %c7_i32 = arith.constant 7 : i32
    %9 = arith.cmpi eq, %arg2, %c7_i32 : i32
    %10 = arith.extui %9 : i1 to i32
    %c0_i32_8 = arith.constant 0 : i32
    %11 = arith.cmpi ne, %10, %c0_i32_8 : i32
    scf.if %11 {
      %c0_9 = arith.constant 0 : index
      %c0_10 = arith.constant 0 : index
      %12 = vector.load %arg8[%c0_9, %c0_10] : memref<8x256xf32, #tpu.memory_space<vmem>>, vector<8x256xf32>
      %c0_11 = arith.constant 0 : index
      %c0_12 = arith.constant 0 : index
      %13 = vector.load %arg5[%c0_11, %c0_12] : memref<1x256xf32, #tpu.memory_space<vmem>>, vector<1x256xf32>
      %14 = vector.broadcast %13 : vector<1x256xf32> to vector<8x256xf32>
      %15 = arith.mulf %12, %14 : vector<8x256xf32>
      %c0_13 = arith.constant 0 : index
      %c0_14 = arith.constant 0 : index
      %16 = vector.load %arg6[%c0_13, %c0_14] : memref<1x256xf32, #tpu.memory_space<vmem>>, vector<1x256xf32>
      %17 = vector.broadcast %16 : vector<1x256xf32> to vector<8x256xf32>
      %18 = arith.addf %15, %17 : vector<8x256xf32>
      %19 = arith.truncf %18 : vector<8x256xf32> to vector<8x256xbf16>
      %c0_15 = arith.constant 0 : index
      %c0_16 = arith.constant 0 : index
      %20 = vector.load %arg7[%c0_15, %c0_16] : memref<8x256xbf16, #tpu.memory_space<vmem>>, vector<8x256xbf16>
      tpu.vector_store %arg7[%c0_15, %c0_16], %19 {strides = array<i32>} : memref<8x256xbf16, #tpu.memory_space<vmem>>, vector<8x256xbf16>,
    } else {
    }
    return
  }
  func.func @transform_0(%arg0: i32, %arg1: i32, %arg2: i32) -> (i32, i32) {
    %c0_i32 = arith.constant 0 : i32
    return %arg0, %arg2 : i32, i32
  }
  func.func @transform_1(%arg0: i32, %arg1: i32, %arg2: i32) -> (i32, i32) {
    %c0_i32 = arith.constant 0 : i32
    return %arg2, %arg1 : i32, i32
  }
  func.func @transform_2(%arg0: i32, %arg1: i32, %arg2: i32) -> (i32, i32) {
    %c0_i32 = arith.constant 0 : i32
    %c0_i32_0 = arith.constant 0 : i32
    return %c0_i32, %arg1 : i32, i32
  }
  func.func @transform_3(%arg0: i32, %arg1: i32, %arg2: i32) -> (i32, i32) {
    %c0_i32 = arith.constant 0 : i32
    %c0_i32_0 = arith.constant 0 : i32
    return %c0_i32, %arg1 : i32, i32
  }
  func.func @transform_4(%arg0: i32, %arg1: i32, %arg2: i32) -> (i32, i32) {
    %c0_i32 = arith.constant 0 : i32
    return %arg0, %arg1 : i32, i32
  }
}

module attributes {stable_mosaic.version = 11 : i64} {
  func.func @_gemm_bn_act_kernel(%arg0: i32, %arg1: i32, %arg2: i32, %arg3: memref<8x128xbf16, #tpu.memory_space<vmem>>, %arg4: memref<128x256xbf16, #tpu.memory_space<vmem>>, %arg5: memref<1x256xf32, #tpu.memory_space<vmem>>, %arg6: memref<1x256xf32, #tpu.memory_space<vmem>>, %arg7: memref<8x256xbf16, #tpu.memory_space<vmem>>, %arg8: memref<8x256xf32, #tpu.memory_space<vmem>>) attributes {dimension_semantics = [#tpu.dimension_semantics<parallel>, #tpu.dimension_semantics<parallel>, #tpu.dimension_semantics<arbitrary>], iteration_bounds = array<i64: 1, 2, 16>, scalar_prefetch = 0 : i64, scratch_operands = 1 : i64, tpu.core_type = #tpu.core_type<tc>, window_params = [{transform_indices = @transform_0, window_bounds = array<i64: 8, 128>}, {transform_indices = @transform_1, window_bounds = array<i64: 128, 256>}, {transform_indices = @transform_2, window_bounds = array<i64: 1, 256>}, {transform_indices = @transform_3, window_bounds = array<i64: 1, 256>}, {transform_indices = @transform_4, window_bounds = array<i64: 8, 256>}]} {
    %c0_i32 = arith.constant 0 : i32
    %0 = arith.cmpi eq, %arg2, %c0_i32 : i32
    %1 = arith.extui %0 : i1 to i32
    %c0_i32_0 = arith.constant 0 : i32
    %2 = arith.cmpi ne, %1, %c0_i32_0 : i32
    scf.if %2 {
      %cst_9 = arith.constant 0.000000e+00 : f32
      %12 = vector.broadcast %cst_9 : f32 to vector<8x256xf32>
      %c0_10 = arith.constant 0 : index
      %c0_11 = arith.constant 0 : index
      %13 = vector.load %arg8[%c0_10, %c0_11] : memref<8x256xf32, #tpu.memory_space<vmem>>, vector<8x256xf32>
      tpu.vector_store %arg8[%c0_10, %c0_11], %12 {strides = array<i32>} : memref<8x256xf32, #tpu.memory_space<vmem>>, vector<8x256xf32>,
    } else {
    }
    %c0 = arith.constant 0 : index
    %c0_1 = arith.constant 0 : index
    %3 = vector.load %arg8[%c0, %c0_1] : memref<8x256xf32, #tpu.memory_space<vmem>>, vector<8x256xf32>
    %c0_2 = arith.constant 0 : index
    %c0_3 = arith.constant 0 : index
    %4 = vector.load %arg3[%c0_2, %c0_3] : memref<8x128xbf16, #tpu.memory_space<vmem>>, vector<8x128xbf16>
    %c0_4 = arith.constant 0 : index
    %c0_5 = arith.constant 0 : index
    %5 = vector.load %arg4[%c0_4, %c0_5] : memref<128x256xbf16, #tpu.memory_space<vmem>>, vector<128x256xbf16>
    %cst = arith.constant dense<0.000000e+00> : vector<8x256xf32>
    %6 = tpu.matmul %4, %5, %cst {dimension_numbers = #tpu.dot_dimension_numbers<[1], [0], [0], [1], [0, 0, 1, 1], [], []>} : vector<8x128xbf16>, vector<128x256xbf16>, vector<8x256xf32> -> vector<8x256xf32>
    %7 = arith.addf %3, %6 : vector<8x256xf32>
    %c0_6 = arith.constant 0 : index
    %c0_7 = arith.constant 0 : index
    %8 = vector.load %arg8[%c0_6, %c0_7] : memref<8x256xf32, #tpu.memory_space<vmem>>, vector<8x256xf32>
    tpu.vector_store %arg8[%c0_6, %c0_7], %7 {strides = array<i32>} : memref<8x256xf32, #tpu.memory_space<vmem>>, vector<8x256xf32>,
    %c15_i32 = arith.constant 15 : i32
    %9 = arith.cmpi eq, %arg2, %c15_i32 : i32
    %10 = arith.extui %9 : i1 to i32
    %c0_i32_8 = arith.constant 0 : i32
    %11 = arith.cmpi ne, %10, %c0_i32_8 : i32
    scf.if %11 {
      %c0_9 = arith.constant 0 : index
      %c0_10 = arith.constant 0 : index
      %12 = vector.load %arg8[%c0_9, %c0_10] : memref<8x256xf32, #tpu.memory_space<vmem>>, vector<8x256xf32>
      %c0_11 = arith.constant 0 : index
      %c0_12 = arith.constant 0 : index
      %13 = vector.load %arg5[%c0_11, %c0_12] : memref<1x256xf32, #tpu.memory_space<vmem>>, vector<1x256xf32>
      %14 = vector.broadcast %13 : vector<1x256xf32> to vector<8x256xf32>
      %15 = arith.mulf %12, %14 : vector<8x256xf32>
      %c0_13 = arith.constant 0 : index
      %c0_14 = arith.constant 0 : index
      %16 = vector.load %arg6[%c0_13, %c0_14] : memref<1x256xf32, #tpu.memory_space<vmem>>, vector<1x256xf32>
      %17 = vector.broadcast %16 : vector<1x256xf32> to vector<8x256xf32>
      %18 = arith.addf %15, %17 : vector<8x256xf32>
      %cst_15 = arith.constant 0.000000e+00 : f32
      %19 = vector.broadcast %cst_15 : f32 to vector<8x256xf32>
      %20 = arith.maximumf %18, %19 : vector<8x256xf32>
      %21 = arith.truncf %20 : vector<8x256xf32> to vector<8x256xbf16>
      %c0_16 = arith.constant 0 : index
      %c0_17 = arith.constant 0 : index
      %22 = vector.load %arg7[%c0_16, %c0_17] : memref<8x256xbf16, #tpu.memory_space<vmem>>, vector<8x256xbf16>
      tpu.vector_store %arg7[%c0_16, %c0_17], %21 {strides = array<i32>} : memref<8x256xbf16, #tpu.memory_space<vmem>>, vector<8x256xbf16>,
    } else {
    }
    return
  }
  func.func @transform_0(%arg0: i32, %arg1: i32, %arg2: i32) -> (i32, i32) {
    %c0_i32 = arith.constant 0 : i32
    return %arg0, %arg2 : i32, i32
  }
  func.func @transform_1(%arg0: i32, %arg1: i32, %arg2: i32) -> (i32, i32) {
    %c0_i32 = arith.constant 0 : i32
    return %arg2, %arg1 : i32, i32
  }
  func.func @transform_2(%arg0: i32, %arg1: i32, %arg2: i32) -> (i32, i32) {
    %c0_i32 = arith.constant 0 : i32
    %c0_i32_0 = arith.constant 0 : i32
    return %c0_i32, %arg1 : i32, i32
  }
  func.func @transform_3(%arg0: i32, %arg1: i32, %arg2: i32) -> (i32, i32) {
    %c0_i32 = arith.constant 0 : i32
    %c0_i32_0 = arith.constant 0 : i32
    return %c0_i32, %arg1 : i32, i32
  }
  func.func @transform_4(%arg0: i32, %arg1: i32, %arg2: i32) -> (i32, i32) {
    %c0_i32 = arith.constant 0 : i32
    return %arg0, %arg1 : i32, i32
  }
}

module attributes {stable_mosaic.version = 11 : i64} {
  func.func @_gemm_bn_act_kernel(%arg0: i32, %arg1: i32, %arg2: i32, %arg3: memref<8x128xbf16, #tpu.memory_space<vmem>>, %arg4: memref<128x256xbf16, #tpu.memory_space<vmem>>, %arg5: memref<1x256xf32, #tpu.memory_space<vmem>>, %arg6: memref<1x256xf32, #tpu.memory_space<vmem>>, %arg7: memref<8x256xbf16, #tpu.memory_space<vmem>>, %arg8: memref<8x256xbf16, #tpu.memory_space<vmem>>, %arg9: memref<8x256xf32, #tpu.memory_space<vmem>>) attributes {dimension_semantics = [#tpu.dimension_semantics<parallel>, #tpu.dimension_semantics<parallel>, #tpu.dimension_semantics<arbitrary>], iteration_bounds = array<i64: 1, 8, 4>, scalar_prefetch = 0 : i64, scratch_operands = 1 : i64, tpu.core_type = #tpu.core_type<tc>, window_params = [{transform_indices = @transform_0, window_bounds = array<i64: 8, 128>}, {transform_indices = @transform_1, window_bounds = array<i64: 128, 256>}, {transform_indices = @transform_2, window_bounds = array<i64: 1, 256>}, {transform_indices = @transform_3, window_bounds = array<i64: 1, 256>}, {transform_indices = @transform_4, window_bounds = array<i64: 8, 256>}, {transform_indices = @transform_5, window_bounds = array<i64: 8, 256>}]} {
    %c0_i32 = arith.constant 0 : i32
    %0 = arith.cmpi eq, %arg2, %c0_i32 : i32
    %1 = arith.extui %0 : i1 to i32
    %c0_i32_0 = arith.constant 0 : i32
    %2 = arith.cmpi ne, %1, %c0_i32_0 : i32
    scf.if %2 {
      %cst_9 = arith.constant 0.000000e+00 : f32
      %12 = vector.broadcast %cst_9 : f32 to vector<8x256xf32>
      %c0_10 = arith.constant 0 : index
      %c0_11 = arith.constant 0 : index
      %13 = vector.load %arg9[%c0_10, %c0_11] : memref<8x256xf32, #tpu.memory_space<vmem>>, vector<8x256xf32>
      tpu.vector_store %arg9[%c0_10, %c0_11], %12 {strides = array<i32>} : memref<8x256xf32, #tpu.memory_space<vmem>>, vector<8x256xf32>,
    } else {
    }
    %c0 = arith.constant 0 : index
    %c0_1 = arith.constant 0 : index
    %3 = vector.load %arg9[%c0, %c0_1] : memref<8x256xf32, #tpu.memory_space<vmem>>, vector<8x256xf32>
    %c0_2 = arith.constant 0 : index
    %c0_3 = arith.constant 0 : index
    %4 = vector.load %arg3[%c0_2, %c0_3] : memref<8x128xbf16, #tpu.memory_space<vmem>>, vector<8x128xbf16>
    %c0_4 = arith.constant 0 : index
    %c0_5 = arith.constant 0 : index
    %5 = vector.load %arg4[%c0_4, %c0_5] : memref<128x256xbf16, #tpu.memory_space<vmem>>, vector<128x256xbf16>
    %cst = arith.constant dense<0.000000e+00> : vector<8x256xf32>
    %6 = tpu.matmul %4, %5, %cst {dimension_numbers = #tpu.dot_dimension_numbers<[1], [0], [0], [1], [0, 0, 1, 1], [], []>} : vector<8x128xbf16>, vector<128x256xbf16>, vector<8x256xf32> -> vector<8x256xf32>
    %7 = arith.addf %3, %6 : vector<8x256xf32>
    %c0_6 = arith.constant 0 : index
    %c0_7 = arith.constant 0 : index
    %8 = vector.load %arg9[%c0_6, %c0_7] : memref<8x256xf32, #tpu.memory_space<vmem>>, vector<8x256xf32>
    tpu.vector_store %arg9[%c0_6, %c0_7], %7 {strides = array<i32>} : memref<8x256xf32, #tpu.memory_space<vmem>>, vector<8x256xf32>,
    %c3_i32 = arith.constant 3 : i32
    %9 = arith.cmpi eq, %arg2, %c3_i32 : i32
    %10 = arith.extui %9 : i1 to i32
    %c0_i32_8 = arith.constant 0 : i32
    %11 = arith.cmpi ne, %10, %c0_i32_8 : i32
    scf.if %11 {
      %c0_9 = arith.constant 0 : index
      %c0_10 = arith.constant 0 : index
      %12 = vector.load %arg9[%c0_9, %c0_10] : memref<8x256xf32, #tpu.memory_space<vmem>>, vector<8x256xf32>
      %c0_11 = arith.constant 0 : index
      %c0_12 = arith.constant 0 : index
      %13 = vector.load %arg5[%c0_11, %c0_12] : memref<1x256xf32, #tpu.memory_space<vmem>>, vector<1x256xf32>
      %14 = vector.broadcast %13 : vector<1x256xf32> to vector<8x256xf32>
      %15 = arith.mulf %12, %14 : vector<8x256xf32>
      %c0_13 = arith.constant 0 : index
      %c0_14 = arith.constant 0 : index
      %16 = vector.load %arg6[%c0_13, %c0_14] : memref<1x256xf32, #tpu.memory_space<vmem>>, vector<1x256xf32>
      %17 = vector.broadcast %16 : vector<1x256xf32> to vector<8x256xf32>
      %18 = arith.addf %15, %17 : vector<8x256xf32>
      %c0_15 = arith.constant 0 : index
      %c0_16 = arith.constant 0 : index
      %19 = vector.load %arg7[%c0_15, %c0_16] : memref<8x256xbf16, #tpu.memory_space<vmem>>, vector<8x256xbf16>
      %20 = arith.extf %19 : vector<8x256xbf16> to vector<8x256xf32>
      %21 = arith.addf %18, %20 : vector<8x256xf32>
      %cst_17 = arith.constant 0.000000e+00 : f32
      %22 = vector.broadcast %cst_17 : f32 to vector<8x256xf32>
      %23 = arith.maximumf %21, %22 : vector<8x256xf32>
      %24 = arith.truncf %23 : vector<8x256xf32> to vector<8x256xbf16>
      %c0_18 = arith.constant 0 : index
      %c0_19 = arith.constant 0 : index
      %25 = vector.load %arg8[%c0_18, %c0_19] : memref<8x256xbf16, #tpu.memory_space<vmem>>, vector<8x256xbf16>
      tpu.vector_store %arg8[%c0_18, %c0_19], %24 {strides = array<i32>} : memref<8x256xbf16, #tpu.memory_space<vmem>>, vector<8x256xbf16>,
    } else {
    }
    return
  }
  func.func @transform_0(%arg0: i32, %arg1: i32, %arg2: i32) -> (i32, i32) {
    %c0_i32 = arith.constant 0 : i32
    return %arg0, %arg2 : i32, i32
  }
  func.func @transform_1(%arg0: i32, %arg1: i32, %arg2: i32) -> (i32, i32) {
    %c0_i32 = arith.constant 0 : i32
    return %arg2, %arg1 : i32, i32
  }
  func.func @transform_2(%arg0: i32, %arg1: i32, %arg2: i32) -> (i32, i32) {
    %c0_i32 = arith.constant 0 : i32
    %c0_i32_0 = arith.constant 0 : i32
    return %c0_i32, %arg1 : i32, i32
  }
  func.func @transform_3(%arg0: i32, %arg1: i32, %arg2: i32) -> (i32, i32) {
    %c0_i32 = arith.constant 0 : i32
    %c0_i32_0 = arith.constant 0 : i32
    return %c0_i32, %arg1 : i32, i32
  }
  func.func @transform_4(%arg0: i32, %arg1: i32, %arg2: i32) -> (i32, i32) {
    %c0_i32 = arith.constant 0 : i32
    return %arg0, %arg1 : i32, i32
  }
  func.func @transform_5(%arg0: i32, %arg1: i32, %arg2: i32) -> (i32, i32) {
    %c0_i32 = arith.constant 0 : i32
    return %arg0, %arg1 : i32, i32
  }
}

module attributes {stable_mosaic.version = 11 : i64} {
  func.func @_avgpool_kernel(%arg0: i32, %arg1: memref<1x1x2048xbf16, #tpu.memory_space<vmem>>, %arg2: memref<1x1x2048xf32, #tpu.memory_space<vmem>>) attributes {dimension_semantics = [#tpu.dimension_semantics<parallel>], iteration_bounds = array<i64: 2>, scalar_prefetch = 0 : i64, scratch_operands = 0 : i64, tpu.core_type = #tpu.core_type<tc>, window_params = [{transform_indices = @transform_0, window_bounds = array<i64: 1, 1, 2048>}, {transform_indices = @transform_1, window_bounds = array<i64: 1, 1, 2048>}]} {
    %c0 = arith.constant 0 : index
    %c0_0 = arith.constant 0 : index
    %c0_1 = arith.constant 0 : index
    %0 = vector.load %arg1[%c0, %c0_0, %c0_1] : memref<1x1x2048xbf16, #tpu.memory_space<vmem>>, vector<1x1x2048xbf16>
    %1 = arith.extf %0 : vector<1x1x2048xbf16> to vector<1x1x2048xf32>
    %cst = arith.constant dense<0.000000e+00> : vector<1x2048xf32>
    %2 = vector.multi_reduction <add>, %1, %cst [1] : vector<1x1x2048xf32> to vector<1x2048xf32>
    %3 = vector.shape_cast %2 : vector<1x2048xf32> to vector<1x1x2048xf32>
    %cst_2 = arith.constant 1.000000e+00 : f32
    %4 = vector.broadcast %cst_2 : f32 to vector<1x1x2048xf32>
    %5 = arith.divf %3, %4 : vector<1x1x2048xf32>
    %c0_3 = arith.constant 0 : index
    %c0_4 = arith.constant 0 : index
    %c0_5 = arith.constant 0 : index
    %6 = vector.load %arg2[%c0_3, %c0_4, %c0_5] : memref<1x1x2048xf32, #tpu.memory_space<vmem>>, vector<1x1x2048xf32>
    tpu.vector_store %arg2[%c0_3, %c0_4, %c0_5], %5 {strides = array<i32>} : memref<1x1x2048xf32, #tpu.memory_space<vmem>>, vector<1x1x2048xf32>,
    return
  }
  func.func @transform_0(%arg0: i32) -> (i32, i32, i32) {
    %c0_i32 = arith.constant 0 : i32
    %c0_i32_0 = arith.constant 0 : i32
    %c0_i32_1 = arith.constant 0 : i32
    return %arg0, %c0_i32, %c0_i32_0 : i32, i32, i32
  }
  func.func @transform_1(%arg0: i32) -> (i32, i32, i32) {
    %c0_i32 = arith.constant 0 : i32
    %c0_i32_0 = arith.constant 0 : i32
    %c0_i32_1 = arith.constant 0 : i32
    return %arg0, %c0_i32, %c0_i32_0 : i32, i32, i32
  }
}

module attributes {stable_mosaic.version = 11 : i64} {
  func.func @_gemm_bn_act_kernel(%arg0: i32, %arg1: i32, %arg2: i32, %arg3: memref<8x128xbf16, #tpu.memory_space<vmem>>, %arg4: memref<128x128xbf16, #tpu.memory_space<vmem>>, %arg5: memref<1x128xf32, #tpu.memory_space<vmem>>, %arg6: memref<1x128xf32, #tpu.memory_space<vmem>>, %arg7: memref<8x128xf32, #tpu.memory_space<vmem>>, %arg8: memref<8x128xf32, #tpu.memory_space<vmem>>) attributes {dimension_semantics = [#tpu.dimension_semantics<parallel>, #tpu.dimension_semantics<parallel>, #tpu.dimension_semantics<arbitrary>], iteration_bounds = array<i64: 1, 1, 16>, scalar_prefetch = 0 : i64, scratch_operands = 1 : i64, tpu.core_type = #tpu.core_type<tc>, window_params = [{transform_indices = @transform_0, window_bounds = array<i64: 8, 128>}, {transform_indices = @transform_1, window_bounds = array<i64: 128, 128>}, {transform_indices = @transform_2, window_bounds = array<i64: 1, 128>}, {transform_indices = @transform_3, window_bounds = array<i64: 1, 128>}, {transform_indices = @transform_4, window_bounds = array<i64: 8, 128>}]} {
    %c0_i32 = arith.constant 0 : i32
    %0 = arith.cmpi eq, %arg2, %c0_i32 : i32
    %1 = arith.extui %0 : i1 to i32
    %c0_i32_0 = arith.constant 0 : i32
    %2 = arith.cmpi ne, %1, %c0_i32_0 : i32
    scf.if %2 {
      %cst_9 = arith.constant 0.000000e+00 : f32
      %12 = vector.broadcast %cst_9 : f32 to vector<8x128xf32>
      %c0_10 = arith.constant 0 : index
      %c0_11 = arith.constant 0 : index
      %13 = vector.load %arg8[%c0_10, %c0_11] : memref<8x128xf32, #tpu.memory_space<vmem>>, vector<8x128xf32>
      tpu.vector_store %arg8[%c0_10, %c0_11], %12 {strides = array<i32>} : memref<8x128xf32, #tpu.memory_space<vmem>>, vector<8x128xf32>,
    } else {
    }
    %c0 = arith.constant 0 : index
    %c0_1 = arith.constant 0 : index
    %3 = vector.load %arg8[%c0, %c0_1] : memref<8x128xf32, #tpu.memory_space<vmem>>, vector<8x128xf32>
    %c0_2 = arith.constant 0 : index
    %c0_3 = arith.constant 0 : index
    %4 = vector.load %arg3[%c0_2, %c0_3] : memref<8x128xbf16, #tpu.memory_space<vmem>>, vector<8x128xbf16>
    %c0_4 = arith.constant 0 : index
    %c0_5 = arith.constant 0 : index
    %5 = vector.load %arg4[%c0_4, %c0_5] : memref<128x128xbf16, #tpu.memory_space<vmem>>, vector<128x128xbf16>
    %cst = arith.constant dense<0.000000e+00> : vector<8x128xf32>
    %6 = tpu.matmul %4, %5, %cst {dimension_numbers = #tpu.dot_dimension_numbers<[1], [0], [0], [1], [0, 0, 1, 1], [], []>} : vector<8x128xbf16>, vector<128x128xbf16>, vector<8x128xf32> -> vector<8x128xf32>
    %7 = arith.addf %3, %6 : vector<8x128xf32>
    %c0_6 = arith.constant 0 : index
    %c0_7 = arith.constant 0 : index
    %8 = vector.load %arg8[%c0_6, %c0_7] : memref<8x128xf32, #tpu.memory_space<vmem>>, vector<8x128xf32>
    tpu.vector_store %arg8[%c0_6, %c0_7], %7 {strides = array<i32>} : memref<8x128xf32, #tpu.memory_space<vmem>>, vector<8x128xf32>,
    %c15_i32 = arith.constant 15 : i32
    %9 = arith.cmpi eq, %arg2, %c15_i32 : i32
    %10 = arith.extui %9 : i1 to i32
    %c0_i32_8 = arith.constant 0 : i32
    %11 = arith.cmpi ne, %10, %c0_i32_8 : i32
    scf.if %11 {
      %c0_9 = arith.constant 0 : index
      %c0_10 = arith.constant 0 : index
      %12 = vector.load %arg8[%c0_9, %c0_10] : memref<8x128xf32, #tpu.memory_space<vmem>>, vector<8x128xf32>
      %c0_11 = arith.constant 0 : index
      %c0_12 = arith.constant 0 : index
      %13 = vector.load %arg5[%c0_11, %c0_12] : memref<1x128xf32, #tpu.memory_space<vmem>>, vector<1x128xf32>
      %14 = vector.broadcast %13 : vector<1x128xf32> to vector<8x128xf32>
      %15 = arith.mulf %12, %14 : vector<8x128xf32>
      %c0_13 = arith.constant 0 : index
      %c0_14 = arith.constant 0 : index
      %16 = vector.load %arg6[%c0_13, %c0_14] : memref<1x128xf32, #tpu.memory_space<vmem>>, vector<1x128xf32>
      %17 = vector.broadcast %16 : vector<1x128xf32> to vector<8x128xf32>
      %18 = arith.addf %15, %17 : vector<8x128xf32>
      %c0_15 = arith.constant 0 : index
      %c0_16 = arith.constant 0 : index
      %19 = vector.load %arg7[%c0_15, %c0_16] : memref<8x128xf32, #tpu.memory_space<vmem>>, vector<8x128xf32>
      tpu.vector_store %arg7[%c0_15, %c0_16], %18 {strides = array<i32>} : memref<8x128xf32, #tpu.memory_space<vmem>>, vector<8x128xf32>,
    } else {
    }
    return
  }
  func.func @transform_0(%arg0: i32, %arg1: i32, %arg2: i32) -> (i32, i32) {
    %c0_i32 = arith.constant 0 : i32
    return %arg0, %arg2 : i32, i32
  }
  func.func @transform_1(%arg0: i32, %arg1: i32, %arg2: i32) -> (i32, i32) {
    %c0_i32 = arith.constant 0 : i32
    return %arg2, %arg1 : i32, i32
  }
  func.func @transform_2(%arg0: i32, %arg1: i32, %arg2: i32) -> (i32, i32) {
    %c0_i32 = arith.constant 0 : i32
    %c0_i32_0 = arith.constant 0 : i32
    return %c0_i32, %arg1 : i32, i32
  }
  func.func @transform_3(%arg0: i32, %arg1: i32, %arg2: i32) -> (i32, i32) {
    %c0_i32 = arith.constant 0 : i32
    %c0_i32_0 = arith.constant 0 : i32
    return %c0_i32, %arg1 : i32, i32
  }
  func.func @transform_4(%arg0: i32, %arg1: i32, %arg2: i32) -> (i32, i32) {
    %c0_i32 = arith.constant 0 : i32
    return %arg0, %arg1 : i32, i32
  }
}

</mosaic_0001>

<bundles_post_ra>
// kernel: resnet50_forward.59
= control target key start
LH: loop header
LB: loop body
LE: loop exit
PB: predicated region body
PF: predicated region fallthrough
CT: control target
= control target key end

     0   :  { %s774_s1 = inlined_call_operand.vmem [shape: bf16[128,128], index: 1, kind: input, shape index: {}]   ;;  %s775_s0 = inlined_call_operand.vmem [shape: bf16[128,128], index: 0, kind: input, shape index: {}]   ;;  %s776_s2 = inlined_call_operand.vmem [shape: f32[1,128], index: 2, kind: input, shape index: {}]   ;;  %s777_s3 = inlined_call_operand.vmem [shape: f32[1,128], index: 3, kind: input, shape index: {}]   ;;  %s778_s4 = inlined_call_operand.vmem [shape: bf16[128,128], index: 4, kind: output, shape index: {}]  }
   0x1   :  { %v637_v0 = vld [vmem:[%s774_s1 + $0x38] sm:$0xff]   ;;  %v638_v1 = vld [vmem:[%s774_s1 + $0x30] sm:$0xff]   ;;  %v639_v2 = vld [vmem:[%s774_s1 + $0x28] sm:$0xff]  }
   0x2   :  { %589 = vmatprep.subr.bf16.mxu0 %v637_v0  ;;  %621 = vmatprep.subr.bf16.mxu1 %v637_v0  ;;  %v640_v3 = vld [vmem:[%s774_s1 + $0x20] sm:$0xff]   ;;  %v641_v6 = vld [vmem:[%s774_s1 + $0x18] sm:$0xff]   ;;  %v642_v7 = vld [vmem:[%s774_s1 + $0x10] sm:$0xff]  }
   0x3   :  { %590 = vmatpush3.bf16.msra.mxu0 %v637_v0  ;;  %629 = vmatpush3.bf16.msra.mxu1 %v637_v0  ;;  %v645_v4 = vld [vmem:[%s775_s0] sm:$0xff]   ;;  %v643_v8 = vld [vmem:[%s774_s1 + $0x8] sm:$0xff]   ;;  %v649_v12 = vld [vmem:[%s775_s0 + $0x10] sm:$0xff]  }
   0x4   :  { %591 = vmatprep.subr.bf16.mxu0 %v638_v1  ;;  %622 = vmatprep.subr.bf16.mxu1 %v638_v1  ;;  %v646_v5 = vld [vmem:[%s775_s0 + $0x20] sm:$0xff]   ;;  %v647_v10 = vld [vmem:[%s775_s0 + $0x8] sm:$0xff]   ;;  %v650_v13 = vld [vmem:[%s775_s0 + $0x30] sm:$0xff]  }
   0x5   :  { %605 = vmatprep.mubr.bf16.mxu0 %v645_v4  ;;  %613 = vmatprep.mubr.bf16.mxu1 %v646_v5  ;;  %v644_v9 = vld [vmem:[%s774_s1] sm:$0xff]   ;;  %v648_v11 = vld [vmem:[%s775_s0 + $0x28] sm:$0xff]   ;;  %v651_v14 = vld [vmem:[%s775_s0 + $0x18] sm:$0xff]  }
   0x6   :  { %v652_v15 = vld [vmem:[%s775_s0 + $0x38] sm:$0xff]   ;;  %v729_v16 = vld [vmem:[%s776_s2] ss:$0 sm:$0xff] }
   0x7   :  { %592 = vmatpush3.bf16.msra.mxu0 %v638_v1  ;;  %630 = vmatpush3.bf16.msra.mxu1 %v638_v1  ;;  %v493_v21 = vld [vmem:[%s777_s3] ss:$0 sm:$0xff] }
   0x8   :  { %593 = vmatprep.subr.bf16.mxu0 %v639_v2  ;;  %623 = vmatprep.subr.bf16.mxu1 %v639_v2 }
   0xb   :  { %594 = vmatpush3.bf16.msra.mxu0 %v639_v2  ;;  %631 = vmatpush3.bf16.msra.mxu1 %v639_v2 }
   0xc   :  { %595 = vmatprep.subr.bf16.mxu0 %v640_v3  ;;  %624 = vmatprep.subr.bf16.mxu1 %v640_v3 }
   0xf   :  { %596 = vmatpush3.bf16.msra.mxu0 %v640_v3  ;;  %632 = vmatpush3.bf16.msra.mxu1 %v640_v3 }
  0x10   :  { %597 = vmatprep.subr.bf16.mxu0 %v641_v6  ;;  %625 = vmatprep.subr.bf16.mxu1 %v641_v6 }
  0x13   :  { %598 = vmatpush3.bf16.msra.mxu0 %v641_v6  ;;  %633 = vmatpush3.bf16.msra.mxu1 %v641_v6 }
  0x14   :  { %599 = vmatprep.subr.bf16.mxu0 %v642_v7  ;;  %626 = vmatprep.subr.bf16.mxu1 %v642_v7 }
  0x17   :  { %600 = vmatpush3.bf16.msra.mxu0 %v642_v7  ;;  %634 = vmatpush3.bf16.msra.mxu1 %v642_v7 }
  0x18   :  { %601 = vmatprep.subr.bf16.mxu0 %v643_v8  ;;  %627 = vmatprep.subr.bf16.mxu1 %v643_v8 }
  0x1b   :  { %602 = vmatpush3.bf16.msra.mxu0 %v643_v8  ;;  %635 = vmatpush3.bf16.msra.mxu1 %v643_v8 }
  0x1c   :  { %603 = vmatprep.subr.bf16.mxu0 %v644_v9  ;;  %628 = vmatprep.subr.bf16.mxu1 %v644_v9 }
  0x1f   :  { %604 = vmatpush3.bf16.msra.mxu0 %v644_v9  ;;  %636 = vmatpush3.bf16.msra.mxu1 %v644_v9 }
  0x22   :  { %606 = vmatmul.mubr.bf16.vlgmr.msra.gmra.mxu0 %v647_v10  ;;  %614 = vmatmul.mubr.bf16.vlgmr.msra.gmra.mxu1 %v648_v11 }
  0x23   :  { %609 = vmatprep.mubr.bf16.mxu0 %v649_v12  ;;  %617 = vmatprep.mubr.bf16.mxu1 %v650_v13 }
  0x2a   :  { %610 = vmatmul.mubr.bf16.gmra.mxu0 %v651_v14  ;;  %618 = vmatmul.mubr.bf16.gmra.mxu1 %v652_v15 }
  0xe2   :  { %v607_v17 = vpop.f32.mrf.mxu0  ;;  %v615_v18 = vpop.f32.mrf.mxu1 }
  0xe3   :  { %v339_v19 = vmul.f32 %v607_v17, %v729_v16  ;;  %v347_v20 = vmul.f32 %v615_v18, %v729_v16 }
  0xe4   :  { %v216_v22 = vpop.f32.mrf.mxu0  ;;  %v248_v23 = vpop.f32.mrf.mxu1 }
  0xe5   :  { %v337_v24 = vmul.f32 %v729_v16, %v216_v22  ;;  %v345_v25 = vmul.f32 %v729_v16, %v248_v23  ;;  %v362_v28 = vadd.f32 %v493_v21, %v339_v19  ;;  %v370_v29 = vadd.f32 %v493_v21, %v347_v20 }
  0xe6   :  { %v608_v26 = vpop.f32.mrf.mxu0  ;;  %v616_v27 = vpop.f32.mrf.mxu1 }
  0xe7   :  { %v340_v30 = vmul.f32 %v608_v26, %v729_v16  ;;  %v348_v31 = vmul.f32 %v616_v27, %v729_v16  ;;  %v360_v34 = vadd.f32 %v493_v21, %v337_v24  ;;  %v368_v35 = vadd.f32 %v493_v21, %v345_v25 }
  0xe8   :  { %v219_v32 = vpop.f32.mrf.mxu0  ;;  %v251_v33 = vpop.f32.mrf.mxu1  ;;  %v378_v42 = vmax.f32 %v362_v28, 0.0  ;;  %v386_v43 = vmax.f32 %v370_v29, 0.0 }
  0xe9   :  { %v338_v36 = vmul.f32 %v729_v16, %v219_v32  ;;  %v346_v37 = vmul.f32 %v729_v16, %v251_v33  ;;  %v363_v38 = vadd.f32 %v493_v21, %v340_v30  ;;  %v371_v39 = vadd.f32 %v493_v21, %v348_v31 }
  0xea   :  { %v611_v40 = vpop.f32.mrf.mxu0  ;;  %v619_v41 = vpop.f32.mrf.mxu1  ;;  %v376_v52 = vmax.f32 %v360_v34, 0.0  ;;  %v384_v53 = vmax.f32 %v368_v35, 0.0 }
  0xeb   :  { %v361_v44 = vadd.f32 %v493_v21, %v338_v36  ;;  %v369_v45 = vadd.f32 %v493_v21, %v346_v37  ;;  %v379_v46 = vmax.f32 %v363_v38, 0.0  ;;  %v387_v47 = vmax.f32 %v371_v39, 0.0 }
  0xec   :  { %v343_v48 = vmul.f32 %v611_v40, %v729_v16  ;;  %v351_v49 = vmul.f32 %v619_v41, %v729_v16  ;;  %v232_v50 = vpop.f32.mrf.mxu0  ;;  %v264_v51 = vpop.f32.mrf.mxu1 }
  0xed   :  { %v377_v54 = vmax.f32 %v361_v44, 0.0  ;;  %v385_v55 = vmax.f32 %v369_v45, 0.0  ;;  %v534_v56 = vpack.c.bf16 %v379_v46, %v378_v42  ;;  %v554_v57 = vpack.c.bf16 %v387_v47, %v386_v43 }
  0xee   :  { %v341_v58 = vmul.f32 %v729_v16, %v232_v50  ;;  %v349_v59 = vmul.f32 %v729_v16, %v264_v51  ;;  %v612_v60 = vpop.f32.mrf.mxu0  ;;  %v620_v61 = vpop.f32.mrf.mxu1  ;;  %v366_v0 = vadd.f32 %v493_v21, %v343_v48  ;;  %v374_v1 = vadd.f32 %v493_v21, %v351_v49 }
  0xef   :  { %v529_v62 = vpack.c.bf16 %v377_v54, %v376_v52  ;;  %v549_v63 = vpack.c.bf16 %v385_v55, %v384_v53  ;;  %566 = vst [vmem:[%s778_s4 + $0x8] sm:$0xff] %v534_v56   ;;  %570 = vst [vmem:[%s778_s4 + $0x28] sm:$0xff] %v554_v57   ;;  %v344_v2 = vmul.f32 %v612_v60, %v729_v16 }
  0xf0   :  { %v352_v3 = vmul.f32 %v620_v61, %v729_v16  ;;  %v235_v4 = vpop.f32.mrf.mxu0  ;;  %v267_v5 = vpop.f32.mrf.mxu1  ;;  %v364_v6 = vadd.f32 %v493_v21, %v341_v58  ;;  %v372_v7 = vadd.f32 %v493_v21, %v349_v59  ;;  %v382_v14 = vmax.f32 %v366_v0, 0.0 }
  0xf1   :  { %530 = vst [vmem:[%s778_s4] sm:$0xff] %v529_v62   ;;  %569 = vst [vmem:[%s778_s4 + $0x20] sm:$0xff] %v549_v63   ;;  %v342_v8 = vmul.f32 %v729_v16, %v235_v4  ;;  %v350_v9 = vmul.f32 %v729_v16, %v267_v5  ;;  %v367_v10 = vadd.f32 %v493_v21, %v344_v2  ;;  %v390_v15 = vmax.f32 %v374_v1, 0.0 }
  0xf2   :  { %v375_v11 = vadd.f32 %v493_v21, %v352_v3  ;;  %v380_v19 = vmax.f32 %v364_v6, 0.0  ;;  %v388_v20 = vmax.f32 %v372_v7, 0.0 }
  0xf3   :  { %v365_v12 = vadd.f32 %v493_v21, %v342_v8  ;;  %v373_v13 = vadd.f32 %v493_v21, %v350_v9  ;;  %v383_v17 = vmax.f32 %v367_v10, 0.0 }
  0xf4   :  { %v391_v18 = vmax.f32 %v375_v11, 0.0 }
  0xf5   :  { %v381_v22 = vmax.f32 %v365_v12, 0.0  ;;  %v389_v23 = vmax.f32 %v373_v13, 0.0  ;;  %v544_v24 = vpack.c.bf16 %v383_v17, %v382_v14 }
  0xf6   :  { %v564_v25 = vpack.c.bf16 %v391_v18, %v390_v15 }
  0xf7   :  { %v539_v26 = vpack.c.bf16 %v381_v22, %v380_v19  ;;  %v559_v27 = vpack.c.bf16 %v389_v23, %v388_v20  ;;  %568 = vst [vmem:[%s778_s4 + $0x18] sm:$0xff] %v544_v24  }
  0xf8   :  { %572 = vst [vmem:[%s778_s4 + $0x38] sm:$0xff] %v564_v25  }
  0xf9   :  { %567 = vst [vmem:[%s778_s4 + $0x10] sm:$0xff] %v539_v26   ;;  %571 = vst [vmem:[%s778_s4 + $0x30] sm:$0xff] %v559_v27  }

// kernel: resnet50_forward.57
= control target key start
LH: loop header
LB: loop body
LE: loop exit
PB: predicated region body
PF: predicated region fallthrough
CT: control target
= control target key end

     0   :  { %s885_s0 = inlined_call_operand.vmem [shape: bf16[128,128], index: 0, kind: input, shape index: {}]   ;;  %s886_s1 = inlined_call_operand.vmem [shape: bf16[128,128], index: 1, kind: input, shape index: {}]   ;;  %s887_s2 = inlined_call_operand.vmem [shape: bf16[128,128], index: 2, kind: input, shape index: {}]   ;;  %s888_s3 = inlined_call_operand.vmem [shape: bf16[128,128], index: 3, kind: input, shape index: {}]   ;;  %s889_s4 = inlined_call_operand.vmem [shape: bf16[128,128], index: 4, kind: input, shape index: {}]   ;;  %s890_s5 = inlined_call_operand.vmem [shape: bf16[128,128], index: 5, kind: input, shape index: {}]   ;;  %s891_s6 = inlined_call_operand.vmem [shape: bf16[128,128], index: 6, kind: input, shape index: {}]   ;;  %s892_s7 = inlined_call_operand.vmem [shape: bf16[128,128], index: 7, kind: input, shape index: {}]   ;;  %s893_s8 = inlined_call_operand.vmem [shape: bf16[128,128], index: 8, kind: input, shape index: {}]   ;;  %s894_s9 = inlined_call_operand.vmem [shape: bf16[128,128], index: 9, kind: output, shape index: {}]  }
   0x1   :  { %v32_v0 = vld [vmem:[%s885_s0] sm:$0xf]  ;;  %v33_v1 = vld [vmem:[%s885_s0 + $0x4] sm:$0xf]  ;;  %v34_v18 = vld [vmem:[%s885_s0 + $0x8] sm:$0xf] }
   0x2   :  { %v48_v2 = vld [vmem:[%s886_s1] sm:$0xf]  ;;  %v49_v3 = vld [vmem:[%s886_s1 + $0x4] sm:$0xf]  ;;  %v35_v19 = vld [vmem:[%s885_s0 + $0xc] sm:$0xf] }
   0x3   :  { %v64_v4 = vmax.bf16 %v48_v2, %v32_v0  ;;  %v80_v5 = vld [vmem:[%s887_s2] sm:$0xf]  ;;  %v81_v6 = vld [vmem:[%s887_s2 + $0x4] sm:$0xf]  ;;  %v65_v7 = vmax.bf16 %v49_v3, %v33_v1  ;;  %v50_v20 = vld [vmem:[%s886_s1 + $0x8] sm:$0xf] }
   0x4   :  { %v112_v8 = vld [vmem:[%s888_s3] sm:$0xf]  ;;  %v113_v10 = vld [vmem:[%s888_s3 + $0x4] sm:$0xf]  ;;  %v51_v22 = vld [vmem:[%s886_s1 + $0xc] sm:$0xf]  ;;  %v66_v23 = vmax.bf16 %v50_v20, %v34_v18 }
   0x5   :  { %v96_v9 = vmax.bf16 %v80_v5, %v64_v4  ;;  %v97_v11 = vmax.bf16 %v81_v6, %v65_v7  ;;  %v144_v12 = vld [vmem:[%s889_s4] sm:$0xf]  ;;  %v145_v14 = vld [vmem:[%s889_s4 + $0x4] sm:$0xf]  ;;  %v82_v24 = vld [vmem:[%s887_s2 + $0x8] sm:$0xf]  ;;  %v67_v28 = vmax.bf16 %v51_v22, %v35_v19 }
   0x6   :  { %v176_v15 = vld [vmem:[%s890_s5] sm:$0xf]  ;;  %v177_v16 = vld [vmem:[%s890_s5 + $0x4] sm:$0xf]  ;;  %v83_v25 = vld [vmem:[%s887_s2 + $0xc] sm:$0xf]  ;;  %v98_v33 = vmax.bf16 %v82_v24, %v66_v23 }
   0x7   :  { %v128_v13 = vmax.bf16 %v112_v8, %v96_v9  ;;  %v129_v17 = vmax.bf16 %v113_v10, %v97_v11  ;;  %v208_v27 = vld [vmem:[%s891_s6] sm:$0xf]  ;;  %v114_v29 = vld [vmem:[%s888_s3 + $0x8] sm:$0xf]  ;;  %v209_v31 = vld [vmem:[%s891_s6 + $0x4] sm:$0xf]  ;;  %v99_v38 = vmax.bf16 %v83_v25, %v67_v28 }
   0x8   :  { %v240_v32 = vld [vmem:[%s892_s7] sm:$0xf]  ;;  %v115_v34 = vld [vmem:[%s888_s3 + $0xc] sm:$0xf]  ;;  %v241_v36 = vld [vmem:[%s892_s7 + $0x4] sm:$0xf]  ;;  %v130_v42 = vmax.bf16 %v114_v29, %v98_v33 }
   0x9   :  { %v160_v21 = vmax.bf16 %v144_v12, %v128_v13  ;;  %v161_v26 = vmax.bf16 %v145_v14, %v129_v17  ;;  %v272_v37 = vld [vmem:[%s893_s8] sm:$0xf]  ;;  %v146_v39 = vld [vmem:[%s889_s4 + $0x8] sm:$0xf]  ;;  %v273_v41 = vld [vmem:[%s893_s8 + $0x4] sm:$0xf]  ;;  %v131_v47 = vmax.bf16 %v115_v34, %v99_v38 }
   0xa   :  { %v147_v43 = vld [vmem:[%s889_s4 + $0xc] sm:$0xf]  ;;  %v178_v44 = vld [vmem:[%s890_s5 + $0x8] sm:$0xf]  ;;  %v36_v48 = vld [vmem:[%s885_s0 + $0x10] sm:$0xf]  ;;  %v162_v52 = vmax.bf16 %v146_v39, %v130_v42 }
   0xb   :  { %v192_v30 = vmax.bf16 %v176_v15, %v160_v21  ;;  %v193_v35 = vmax.bf16 %v177_v16, %v161_v26  ;;  %v179_v45 = vld [vmem:[%s890_s5 + $0xc] sm:$0xf]  ;;  %v37_v49 = vld [vmem:[%s885_s0 + $0x14] sm:$0xf]  ;;  %v52_v50 = vld [vmem:[%s886_s1 + $0x10] sm:$0xf]  ;;  %v163_v58 = vmax.bf16 %v147_v43, %v131_v47 }
   0xc   :  { %v53_v53 = vld [vmem:[%s886_s1 + $0x14] sm:$0xf]  ;;  %v68_v54 = vmax.bf16 %v52_v50, %v36_v48  ;;  %v84_v55 = vld [vmem:[%s887_s2 + $0x10] sm:$0xf]  ;;  %v210_v59 = vld [vmem:[%s891_s6 + $0x8] sm:$0xf]  ;;  %v194_v63 = vmax.bf16 %v178_v44, %v162_v52 }
   0xd   :  { %v224_v40 = vmax.bf16 %v208_v27, %v192_v30  ;;  %v225_v46 = vmax.bf16 %v209_v31, %v193_v35  ;;  %v85_v56 = vld [vmem:[%s887_s2 + $0x14] sm:$0xf]  ;;  %v69_v60 = vmax.bf16 %v53_v53, %v37_v49  ;;  %v116_v61 = vld [vmem:[%s888_s3 + $0x10] sm:$0xf]  ;;  %v211_v0 = vld [vmem:[%s891_s6 + $0xc] sm:$0xf]  ;;  %v195_v5 = vmax.bf16 %v179_v45, %v163_v58 }
   0xe   :  { %v242_v1 = vld [vmem:[%s892_s7 + $0x8] sm:$0xf]  ;;  %v100_v2 = vmax.bf16 %v84_v55, %v68_v54  ;;  %v117_v3 = vld [vmem:[%s888_s3 + $0x14] sm:$0xf]  ;;  %v243_v6 = vld [vmem:[%s892_s7 + $0xc] sm:$0xf]  ;;  %v226_v10 = vmax.bf16 %v210_v59, %v194_v63 }
   0xf   :  { %v256_v51 = vmax.bf16 %v240_v32, %v224_v40  ;;  %v257_v57 = vmax.bf16 %v241_v36, %v225_v46  ;;  %v274_v7 = vld [vmem:[%s893_s8 + $0x8] sm:$0xf]  ;;  %v101_v8 = vmax.bf16 %v85_v56, %v69_v60  ;;  %v148_v9 = vld [vmem:[%s889_s4 + $0x10] sm:$0xf]  ;;  %v275_v11 = vld [vmem:[%s893_s8 + $0xc] sm:$0xf]  ;;  %v227_v17 = vmax.bf16 %v211_v0, %v195_v5 }
  0x10   :  { %v132_v12 = vmax.bf16 %v116_v61, %v100_v2  ;;  %v149_v13 = vld [vmem:[%s889_s4 + $0x14] sm:$0xf]  ;;  %v180_v14 = vld [vmem:[%s890_s5 + $0x10] sm:$0xf]  ;;  %v38_v19 = vld [vmem:[%s885_s0 + $0x18] sm:$0xf]  ;;  %v258_v22 = vmax.bf16 %v242_v1, %v226_v10 }
  0x11   :  { %v288_v62 = vmax.bf16 %v272_v37, %v256_v51  ;;  %v289_v4 = vmax.bf16 %v273_v41, %v257_v57  ;;  %v181_v15 = vld [vmem:[%s890_s5 + $0x14] sm:$0xf]  ;;  %v133_v18 = vmax.bf16 %v117_v3, %v101_v8  ;;  %v39_v20 = vld [vmem:[%s885_s0 + $0x1c] sm:$0xf]  ;;  %v54_v21 = vld [vmem:[%s886_s1 + $0x18] sm:$0xf]  ;;  %v259_v28 = vmax.bf16 %v243_v6, %v227_v17 }
  0x12   :  { %v164_v23 = vmax.bf16 %v148_v9, %v132_v12  ;;  %v55_v24 = vld [vmem:[%s886_s1 + $0x1c] sm:$0xf]  ;;  %v70_v25 = vmax.bf16 %v54_v21, %v38_v19  ;;  %v86_v26 = vld [vmem:[%s887_s2 + $0x18] sm:$0xf]  ;;  %v212_v30 = vld [vmem:[%s891_s6 + $0x10] sm:$0xf]  ;;  %v290_v33 = vmax.bf16 %v274_v7, %v258_v22 }
  0x13   :  { %v364_v16 = vcombine.low %v288_v62, %v289_v4  ;;  %v87_v27 = vld [vmem:[%s887_s2 + $0x1c] sm:$0xf]  ;;  %v165_v29 = vmax.bf16 %v149_v13, %v133_v18  ;;  %v71_v31 = vmax.bf16 %v55_v24, %v39_v20  ;;  %v118_v32 = vld [vmem:[%s888_s3 + $0x18] sm:$0xf]  ;;  %v213_v35 = vld [vmem:[%s891_s6 + $0x14] sm:$0xf]  ;;  %v291_v39 = vmax.bf16 %v275_v11, %v259_v28 }
  0x14   :  { %v196_v34 = vmax.bf16 %v180_v14, %v164_v23  ;;  %v244_v36 = vld [vmem:[%s892_s7 + $0x10] sm:$0xf]  ;;  %v102_v37 = vmax.bf16 %v86_v26, %v70_v25  ;;  %v119_v38 = vld [vmem:[%s888_s3 + $0x1c] sm:$0xf]  ;;  %v245_v41 = vld [vmem:[%s892_s7 + $0x14] sm:$0xf] }
  0x15   :  { %328 = vst [vmem:[%s894_s9] sm:$0xff] %v364_v16   ;;  %v197_v40 = vmax.bf16 %v181_v15, %v165_v29  ;;  %v276_v42 = vld [vmem:[%s893_s8 + $0x10] sm:$0xf]  ;;  %v103_v43 = vmax.bf16 %v87_v27, %v71_v31  ;;  %v150_v44 = vld [vmem:[%s889_s4 + $0x18] sm:$0xf]  ;;  %v277_v46 = vld [vmem:[%s893_s8 + $0x14] sm:$0xf]  ;;  %v365_v51 = vcombine.low %v290_v33, %v291_v39 }
  0x16   :  { %v228_v45 = vmax.bf16 %v212_v30, %v196_v34  ;;  %v134_v47 = vmax.bf16 %v118_v32, %v102_v37  ;;  %v151_v48 = vld [vmem:[%s889_s4 + $0x1c] sm:$0xf]  ;;  %v182_v49 = vld [vmem:[%s890_s5 + $0x18] sm:$0xf]  ;;  %v40_v54 = vld [vmem:[%s885_s0 + $0x20] sm:$0xf] }
  0x17   :  { %v183_v50 = vld [vmem:[%s890_s5 + $0x1c] sm:$0xf]  ;;  %v229_v52 = vmax.bf16 %v213_v35, %v197_v40  ;;  %v135_v53 = vmax.bf16 %v119_v38, %v103_v43  ;;  %v41_v55 = vld [vmem:[%s885_s0 + $0x24] sm:$0xf]  ;;  %v56_v56 = vld [vmem:[%s886_s1 + $0x20] sm:$0xf] }
  0x18   :  { %v260_v57 = vmax.bf16 %v244_v36, %v228_v45  ;;  %v166_v58 = vmax.bf16 %v150_v44, %v134_v47  ;;  %v57_v59 = vld [vmem:[%s886_s1 + $0x24] sm:$0xf]  ;;  %v72_v60 = vmax.bf16 %v56_v56, %v40_v54  ;;  %v88_v61 = vld [vmem:[%s887_s2 + $0x20] sm:$0xf]  ;;  %366 = vst [vmem:[%s894_s9 + $0x8] sm:$0xff] %v365_v51  }
  0x19   :  { %v89_v62 = vld [vmem:[%s887_s2 + $0x24] sm:$0xf]  ;;  %v261_v63 = vmax.bf16 %v245_v41, %v229_v52  ;;  %v167_v0 = vmax.bf16 %v151_v48, %v135_v53  ;;  %v214_v1 = vld [vmem:[%s891_s6 + $0x18] sm:$0xf]  ;;  %v73_v2 = vmax.bf16 %v57_v59, %v41_v55  ;;  %v120_v3 = vld [vmem:[%s888_s3 + $0x20] sm:$0xf] }
  0x1a   :  { %v292_v4 = vmax.bf16 %v276_v42, %v260_v57  ;;  %v198_v5 = vmax.bf16 %v182_v49, %v166_v58  ;;  %v215_v6 = vld [vmem:[%s891_s6 + $0x1c] sm:$0xf]  ;;  %v246_v7 = vld [vmem:[%s892_s7 + $0x18] sm:$0xf]  ;;  %v104_v8 = vmax.bf16 %v88_v61, %v72_v60  ;;  %v121_v9 = vld [vmem:[%s888_s3 + $0x24] sm:$0xf] }
  0x1b   :  { %v293_v10 = vmax.bf16 %v277_v46, %v261_v63  ;;  %v199_v11 = vmax.bf16 %v183_v50, %v167_v0  ;;  %v247_v12 = vld [vmem:[%s892_s7 + $0x1c] sm:$0xf]  ;;  %v278_v13 = vld [vmem:[%s893_s8 + $0x18] sm:$0xf]  ;;  %v105_v14 = vmax.bf16 %v89_v62, %v73_v2  ;;  %v152_v15 = vld [vmem:[%s889_s4 + $0x20] sm:$0xf] }
  0x1c   :  { %v230_v16 = vmax.bf16 %v214_v1, %v198_v5  ;;  %v279_v17 = vld [vmem:[%s893_s8 + $0x1c] sm:$0xf]  ;;  %v136_v18 = vmax.bf16 %v120_v3, %v104_v8  ;;  %v153_v19 = vld [vmem:[%s889_s4 + $0x24] sm:$0xf]  ;;  %v184_v20 = vld [vmem:[%s890_s5 + $0x20] sm:$0xf] }
  0x1d   :  { %v185_v21 = vld [vmem:[%s890_s5 + $0x24] sm:$0xf]  ;;  %v367_v22 = vcombine.low %v292_v4, %v293_v10  ;;  %v231_v23 = vmax.bf16 %v215_v6, %v199_v11  ;;  %v137_v24 = vmax.bf16 %v121_v9, %v105_v14  ;;  %v42_v25 = vld [vmem:[%s885_s0 + $0x28] sm:$0xf]  ;;  %v43_v26 = vld [vmem:[%s885_s0 + $0x2c] sm:$0xf] }
  0x1e   :  { %v58_v27 = vld [vmem:[%s886_s1 + $0x28] sm:$0xf]  ;;  %v262_v28 = vmax.bf16 %v246_v7, %v230_v16  ;;  %v168_v29 = vmax.bf16 %v152_v15, %v136_v18  ;;  %v59_v30 = vld [vmem:[%s886_s1 + $0x2c] sm:$0xf]  ;;  %v216_v36 = vld [vmem:[%s891_s6 + $0x20] sm:$0xf] }
  0x1f   :  { %v74_v31 = vmax.bf16 %v58_v27, %v42_v25  ;;  %v90_v32 = vld [vmem:[%s887_s2 + $0x28] sm:$0xf]  ;;  %v91_v33 = vld [vmem:[%s887_s2 + $0x2c] sm:$0xf]  ;;  %368 = vst [vmem:[%s894_s9 + $0x10] sm:$0xff] %v367_v22   ;;  %v263_v34 = vmax.bf16 %v247_v12, %v231_v23  ;;  %v169_v35 = vmax.bf16 %v153_v19, %v137_v24  ;;  %v75_v37 = vmax.bf16 %v59_v30, %v43_v26 }
  0x20   :  { %v122_v38 = vld [vmem:[%s888_s3 + $0x28] sm:$0xf]  ;;  %v294_v39 = vmax.bf16 %v278_v13, %v262_v28  ;;  %v200_v40 = vmax.bf16 %v184_v20, %v168_v29  ;;  %v217_v41 = vld [vmem:[%s891_s6 + $0x24] sm:$0xf]  ;;  %v248_v42 = vld [vmem:[%s892_s7 + $0x20] sm:$0xf] }
  0x21   :  { %v106_v43 = vmax.bf16 %v90_v32, %v74_v31  ;;  %v123_v44 = vld [vmem:[%s888_s3 + $0x2c] sm:$0xf]  ;;  %v295_v45 = vmax.bf16 %v279_v17, %v263_v34  ;;  %v201_v46 = vmax.bf16 %v185_v21, %v169_v35  ;;  %v249_v47 = vld [vmem:[%s892_s7 + $0x24] sm:$0xf]  ;;  %v280_v48 = vld [vmem:[%s893_s8 + $0x20] sm:$0xf]  ;;  %v107_v49 = vmax.bf16 %v91_v33, %v75_v37 }
  0x22   :  { %v154_v50 = vld [vmem:[%s889_s4 + $0x28] sm:$0xf]  ;;  %v232_v51 = vmax.bf16 %v216_v36, %v200_v40  ;;  %v281_v52 = vld [vmem:[%s893_s8 + $0x24] sm:$0xf]  ;;  %v155_v54 = vld [vmem:[%s889_s4 + $0x2c] sm:$0xf] }
  0x23   :  { %v138_v53 = vmax.bf16 %v122_v38, %v106_v43  ;;  %v186_v55 = vld [vmem:[%s890_s5 + $0x28] sm:$0xf]  ;;  %v187_v56 = vld [vmem:[%s890_s5 + $0x2c] sm:$0xf]  ;;  %v369_v57 = vcombine.low %v294_v39, %v295_v45  ;;  %v233_v58 = vmax.bf16 %v217_v41, %v201_v46  ;;  %v139_v59 = vmax.bf16 %v123_v44, %v107_v49  ;;  %v44_v60 = vld [vmem:[%s885_s0 + $0x30] sm:$0xf] }
  0x24   :  { %v45_v61 = vld [vmem:[%s885_s0 + $0x34] sm:$0xf]  ;;  %v60_v62 = vld [vmem:[%s886_s1 + $0x30] sm:$0xf]  ;;  %v264_v63 = vmax.bf16 %v248_v42, %v232_v51  ;;  %v218_v7 = vld [vmem:[%s891_s6 + $0x28] sm:$0xf] }
  0x25   :  { %v170_v0 = vmax.bf16 %v154_v50, %v138_v53  ;;  %v61_v1 = vld [vmem:[%s886_s1 + $0x34] sm:$0xf]  ;;  %v76_v2 = vmax.bf16 %v60_v62, %v44_v60  ;;  %v92_v3 = vld [vmem:[%s887_s2 + $0x30] sm:$0xf]  ;;  %370 = vst [vmem:[%s894_s9 + $0x18] sm:$0xff] %v369_v57   ;;  %v265_v5 = vmax.bf16 %v249_v47, %v233_v58  ;;  %v171_v6 = vmax.bf16 %v155_v54, %v139_v59 }
  0x26   :  { %v93_v4 = vld [vmem:[%s887_s2 + $0x34] sm:$0xf]  ;;  %v77_v8 = vmax.bf16 %v61_v1, %v45_v61  ;;  %v124_v9 = vld [vmem:[%s888_s3 + $0x30] sm:$0xf]  ;;  %v296_v10 = vmax.bf16 %v280_v48, %v264_v63  ;;  %v219_v12 = vld [vmem:[%s891_s6 + $0x2c] sm:$0xf] }
  0x27   :  { %v202_v11 = vmax.bf16 %v186_v55, %v170_v0  ;;  %v250_v13 = vld [vmem:[%s892_s7 + $0x28] sm:$0xf]  ;;  %v108_v14 = vmax.bf16 %v92_v3, %v76_v2  ;;  %v125_v15 = vld [vmem:[%s888_s3 + $0x34] sm:$0xf]  ;;  %v297_v16 = vmax.bf16 %v281_v52, %v265_v5  ;;  %v203_v17 = vmax.bf16 %v187_v56, %v171_v6  ;;  %v251_v18 = vld [vmem:[%s892_s7 + $0x2c] sm:$0xf] }
  0x28   :  { %v282_v19 = vld [vmem:[%s893_s8 + $0x28] sm:$0xf]  ;;  %v109_v20 = vmax.bf16 %v93_v4, %v77_v8  ;;  %v156_v21 = vld [vmem:[%s889_s4 + $0x30] sm:$0xf]  ;;  %v283_v23 = vld [vmem:[%s893_s8 + $0x2c] sm:$0xf] }
  0x29   :  { %v234_v22 = vmax.bf16 %v218_v7, %v202_v11  ;;  %v140_v24 = vmax.bf16 %v124_v9, %v108_v14  ;;  %v157_v25 = vld [vmem:[%s889_s4 + $0x34] sm:$0xf]  ;;  %v188_v26 = vld [vmem:[%s890_s5 + $0x30] sm:$0xf]  ;;  %v371_v28 = vcombine.low %v296_v10, %v297_v16  ;;  %v235_v29 = vmax.bf16 %v219_v12, %v203_v17  ;;  %v46_v31 = vld [vmem:[%s885_s0 + $0x38] sm:$0xf] }
  0x2a   :  { %v189_v27 = vld [vmem:[%s890_s5 + $0x34] sm:$0xf]  ;;  %v141_v30 = vmax.bf16 %v125_v15, %v109_v20  ;;  %v47_v32 = vld [vmem:[%s885_s0 + $0x3c] sm:$0xf]  ;;  %v62_v33 = vld [vmem:[%s886_s1 + $0x38] sm:$0xf] }
  0x2b   :  { %v266_v34 = vmax.bf16 %v250_v13, %v234_v22  ;;  %v172_v35 = vmax.bf16 %v156_v21, %v140_v24  ;;  %v63_v36 = vld [vmem:[%s886_s1 + $0x3c] sm:$0xf]  ;;  %v78_v37 = vmax.bf16 %v62_v33, %v46_v31  ;;  %v94_v38 = vld [vmem:[%s887_s2 + $0x38] sm:$0xf]  ;;  %372 = vst [vmem:[%s894_s9 + $0x20] sm:$0xff] %v371_v28   ;;  %v267_v40 = vmax.bf16 %v251_v18, %v235_v29 }
  0x2c   :  { %v95_v39 = vld [vmem:[%s887_s2 + $0x3c] sm:$0xf]  ;;  %v173_v41 = vmax.bf16 %v157_v25, %v141_v30  ;;  %v220_v42 = vld [vmem:[%s891_s6 + $0x30] sm:$0xf]  ;;  %v79_v43 = vmax.bf16 %v63_v36, %v47_v32  ;;  %v126_v44 = vld [vmem:[%s888_s3 + $0x38] sm:$0xf] }
  0x2d   :  { %v298_v45 = vmax.bf16 %v282_v19, %v266_v34  ;;  %v204_v46 = vmax.bf16 %v188_v26, %v172_v35  ;;  %v221_v47 = vld [vmem:[%s891_s6 + $0x34] sm:$0xf]  ;;  %v110_v48 = vmax.bf16 %v94_v38, %v78_v37  ;;  %v127_v49 = vld [vmem:[%s888_s3 + $0x3c] sm:$0xf]  ;;  %v299_v50 = vmax.bf16 %v283_v23, %v267_v40  ;;  %v252_v52 = vld [vmem:[%s892_s7 + $0x30] sm:$0xf] }
  0x2e   :  { %v205_v51 = vmax.bf16 %v189_v27, %v173_v41  ;;  %v111_v53 = vmax.bf16 %v95_v39, %v79_v43  ;;  %v158_v54 = vld [vmem:[%s889_s4 + $0x38] sm:$0xf]  ;;  %v253_v56 = vld [vmem:[%s892_s7 + $0x34] sm:$0xf]  ;;  %v159_v58 = vld [vmem:[%s889_s4 + $0x3c] sm:$0xf] }
  0x2f   :  { %v236_v55 = vmax.bf16 %v220_v42, %v204_v46  ;;  %v142_v57 = vmax.bf16 %v126_v44, %v110_v48  ;;  %v373_v59 = vcombine.low %v298_v45, %v299_v50  ;;  %v284_v61 = vld [vmem:[%s893_s8 + $0x30] sm:$0xf]  ;;  %v190_v63 = vld [vmem:[%s890_s5 + $0x38] sm:$0xf]  ;;  %v285_v1 = vld [vmem:[%s893_s8 + $0x34] sm:$0xf] }
  0x30   :  { %v237_v60 = vmax.bf16 %v221_v47, %v205_v51  ;;  %v143_v62 = vmax.bf16 %v127_v49, %v111_v53  ;;  %v191_v3 = vld [vmem:[%s890_s5 + $0x3c] sm:$0xf]  ;;  %v222_v6 = vld [vmem:[%s891_s6 + $0x38] sm:$0xf] }
  0x31   :  { %v268_v0 = vmax.bf16 %v252_v52, %v236_v55  ;;  %v174_v2 = vmax.bf16 %v158_v54, %v142_v57  ;;  %374 = vst [vmem:[%s894_s9 + $0x28] sm:$0xff] %v373_v59   ;;  %v223_v9 = vld [vmem:[%s891_s6 + $0x3c] sm:$0xf]  ;;  %v254_v12 = vld [vmem:[%s892_s7 + $0x38] sm:$0xf] }
  0x32   :  { %v269_v4 = vmax.bf16 %v253_v56, %v237_v60  ;;  %v175_v5 = vmax.bf16 %v159_v58, %v143_v62  ;;  %v255_v14 = vld [vmem:[%s892_s7 + $0x3c] sm:$0xf]  ;;  %v286_v17 = vld [vmem:[%s893_s8 + $0x38] sm:$0xf] }
  0x33   :  { %v300_v7 = vmax.bf16 %v284_v61, %v268_v0  ;;  %v206_v8 = vmax.bf16 %v190_v63, %v174_v2  ;;  %v287_v19 = vld [vmem:[%s893_s8 + $0x3c] sm:$0xf] }
  0x34   :  { %v301_v10 = vmax.bf16 %v285_v1, %v269_v4  ;;  %v207_v11 = vmax.bf16 %v191_v3, %v175_v5 }
  0x35   :  { %v238_v13 = vmax.bf16 %v222_v6, %v206_v8 }
  0x36   :  { %v375_v15 = vcombine.low %v300_v7, %v301_v10  ;;  %v239_v16 = vmax.bf16 %v223_v9, %v207_v11 }
  0x37   :  { %v270_v18 = vmax.bf16 %v254_v12, %v238_v13 }
  0x38   :  { %376 = vst [vmem:[%s894_s9 + $0x30] sm:$0xff] %v375_v15   ;;  %v271_v20 = vmax.bf16 %v255_v14, %v239_v16 }
  0x39   :  { %v302_v21 = vmax.bf16 %v286_v17, %v270_v18 }
  0x3a   :  { %v303_v22 = vmax.bf16 %v287_v19, %v271_v20 }
  0x3c   :  { %v377_v23 = vcombine.low %v302_v21, %v303_v22 }
  0x3e   :  { %378 = vst [vmem:[%s894_s9 + $0x38] sm:$0xff] %v377_v23  }

// kernel: resnet50_forward.56
= control target key start
LH: loop header
LB: loop body
LE: loop exit
PB: predicated region body
PF: predicated region fallthrough
CT: control target
= control target key end

     0   :  { %s2835_s15 = smov 0   ;;  %s2837_s16 = smov 0   ;;  %s3376_s0 = inlined_call_operand.vmem [shape: bf16[512,256], index: 0, kind: input, shape index: {}]   ;;  %s3377_s1 = inlined_call_operand.vmem [shape: bf16[256,128], index: 1, kind: input, shape index: {}]   ;;  %s3378_s2 = inlined_call_operand.vmem [shape: f32[1,128], index: 2, kind: input, shape index: {}]   ;;  %s3379_s3 = inlined_call_operand.vmem [shape: f32[1,128], index: 3, kind: input, shape index: {}]   ;;  %s3380_s4 = inlined_call_operand.vmem [shape: bf16[512,128], index: 4, kind: output, shape index: {}]  }
   0x1   :  { %s2839_s17 = smov 0   ;;  %s2841_s18 = smov 0  }
   0x2   :  { %s2843_s19 = smov 0  }
   0x3 LB: > { %s26_s20 = sadd.s32 1, %s2803_s18  ;;  %p49_p1 = scmp.ne.s32.totalorder %s2795_s16, %s2791_s15  ;;  %s2807_s19 = sphi %s2843_s19, %s14_s19   ;;  %s2803_s18 = sphi %s2841_s18, %s3384_s18   ;;  %s2799_s17 = sphi %s2839_s17, %s3383_s17   ;;  %s2795_s16 = sphi %s2837_s16, %s3382_s16   ;;  %s2791_s15 = sphi %s2835_s15, %s3381_s15  }
   0x4   : > { %p27_p0 = scmp.ge.s32.totalorder %s26_s20, 2  ;;  %p50_p2 = scmp.eq.s32.totalorder %s2807_s19, 0 }
   0x5   : > { %s42_s22 = sadd.s32 1, %s2795_s16  ;;  %p2178_p5 = scmp.ge.s32.totalorder %s2807_s19, 2 }
   0x6   : > { %s3386_s20 = smov (%p27_p0, %s26_s20), 0  ;;  %p51_p3 = por %p50_p2, %p49_p1 }
   0x7   : > { %s38_s21 = ssub.s32 %s2803_s18, %s3386_s20  ;;  %195 = sbr.rel (%p2178_p5) target bundleno = 58 (0x3a), region = 24 }
   0x8   : > { %p40_p4 = scmp.eq.s32.totalorder %s38_s21, 0 }
   0xa   : > { %s2870_s23 = scalar_select %p40_p4, %s2795_s16, %s42_s22  }
   0xc   : > { %198 = sbr.rel (!%p51_p3) target bundleno = 58 (0x3a), region = 28  ;;  %s200_s24 = sand.u32 (%p51_p3), 1, %s2795_s16  }
   0xd   : > { %s2180_s25 = sshll.u32 (%p51_p3), %s2803_s18, 2  ;;  %s2179_s26 = sshll.u32 (%p51_p3), %s200_s24, 8 }
   0xe   : > { %s2878_s29 = scalar_lea.vmem (%p51_p3), %s3376_s0, %s2180_s25  ;;  %s2882_s30 = scalar_lea.vmem (%p51_p3), [#allocation3], %s2179_s26 }
   0xf   : > { %v224_v0 = vld [vmem:[%s2878_s29] sm:$0xf] (%p51_p3)  ;;  %v226_v1 = vld [vmem:[%s2878_s29 + $0x8] sm:$0xf] (%p51_p3)  ;;  %v228_v2 = vld [vmem:[%s2878_s29 + $0x10] sm:$0xf] (%p51_p3) }
  0x10   : > { %225 = vst [vmem:[%s2882_s30] sm:$0xf] (%p51_p3), %v224_v0  ;;  %227 = vst [vmem:[%s2882_s30 + $0x4] sm:$0xf] (%p51_p3), %v226_v1  ;;  %v230_v3 = vld [vmem:[%s2878_s29 + $0x18] sm:$0xf] (%p51_p3) }
  0x11   : > { %v232_v4 = vld [vmem:[%s2878_s29 + $0x20] sm:$0xf]  ;;  %229 = vst [vmem:[%s2882_s30 + $0x8] sm:$0xf] %v228_v2  ;;  %231 = vst [vmem:[%s2882_s30 + $0xc] sm:$0xf] %v230_v3 }
  0x12   : > { %233 = vst [vmem:[%s2882_s30 + $0x10] sm:$0xf] %v232_v4  ;;  %v234_v5 = vld [vmem:[%s2878_s29 + $0x28] sm:$0xf]  ;;  %v236_v6 = vld [vmem:[%s2878_s29 + $0x30] sm:$0xf] }
  0x13   : > { %v238_v7 = vld [vmem:[%s2878_s29 + $0x38] sm:$0xf]  ;;  %235 = vst [vmem:[%s2882_s30 + $0x14] sm:$0xf] %v234_v5  ;;  %237 = vst [vmem:[%s2882_s30 + $0x18] sm:$0xf] %v236_v6 }
  0x14   : > { %239 = vst [vmem:[%s2882_s30 + $0x1c] sm:$0xf] %v238_v7  ;;  %v240_v8 = vld [vmem:[%s2878_s29 + $0x40] sm:$0xf]  ;;  %v242_v9 = vld [vmem:[%s2878_s29 + $0x48] sm:$0xf] }
  0x15   : > { %v244_v10 = vld [vmem:[%s2878_s29 + $0x50] sm:$0xf]  ;;  %241 = vst [vmem:[%s2882_s30 + $0x20] sm:$0xf] %v240_v8  ;;  %243 = vst [vmem:[%s2882_s30 + $0x24] sm:$0xf] %v242_v9 }
  0x16   : > { %245 = vst [vmem:[%s2882_s30 + $0x28] sm:$0xf] %v244_v10  ;;  %v246_v11 = vld [vmem:[%s2878_s29 + $0x58] sm:$0xf]  ;;  %v248_v12 = vld [vmem:[%s2878_s29 + $0x60] sm:$0xf] }
  0x17   : > { %v250_v13 = vld [vmem:[%s2878_s29 + $0x68] sm:$0xf]  ;;  %247 = vst [vmem:[%s2882_s30 + $0x2c] sm:$0xf] %v246_v11  ;;  %249 = vst [vmem:[%s2882_s30 + $0x30] sm:$0xf] %v248_v12 }
  0x18   : > { %251 = vst [vmem:[%s2882_s30 + $0x34] sm:$0xf] %v250_v13  ;;  %v252_v14 = vld [vmem:[%s2878_s29 + $0x70] sm:$0xf]  ;;  %v254_v15 = vld [vmem:[%s2878_s29 + $0x78] sm:$0xf] }
  0x19   : > { %v256_v16 = vld [vmem:[%s2878_s29 + $0x80] sm:$0xf]  ;;  %253 = vst [vmem:[%s2882_s30 + $0x38] sm:$0xf] %v252_v14  ;;  %255 = vst [vmem:[%s2882_s30 + $0x3c] sm:$0xf] %v254_v15 }
  0x1a   : > { %257 = vst [vmem:[%s2882_s30 + $0x40] sm:$0xf] %v256_v16  ;;  %v258_v17 = vld [vmem:[%s2878_s29 + $0x88] sm:$0xf]  ;;  %v260_v18 = vld [vmem:[%s2878_s29 + $0x90] sm:$0xf] }
  0x1b   : > { %v262_v19 = vld [vmem:[%s2878_s29 + $0x98] sm:$0xf]  ;;  %259 = vst [vmem:[%s2882_s30 + $0x44] sm:$0xf] %v258_v17  ;;  %261 = vst [vmem:[%s2882_s30 + $0x48] sm:$0xf] %v260_v18 }
  0x1c   : > { %263 = vst [vmem:[%s2882_s30 + $0x4c] sm:$0xf] %v262_v19  ;;  %v264_v20 = vld [vmem:[%s2878_s29 + $0xa0] sm:$0xf]  ;;  %v266_v21 = vld [vmem:[%s2878_s29 + $0xa8] sm:$0xf] }
  0x1d   : > { %v268_v22 = vld [vmem:[%s2878_s29 + $0xb0] sm:$0xf]  ;;  %265 = vst [vmem:[%s2882_s30 + $0x50] sm:$0xf] %v264_v20  ;;  %267 = vst [vmem:[%s2882_s30 + $0x54] sm:$0xf] %v266_v21 }
  0x1e   : > { %269 = vst [vmem:[%s2882_s30 + $0x58] sm:$0xf] %v268_v22  ;;  %v270_v23 = vld [vmem:[%s2878_s29 + $0xb8] sm:$0xf]  ;;  %v272_v24 = vld [vmem:[%s2878_s29 + $0xc0] sm:$0xf] }
  0x1f   : > { %v274_v25 = vld [vmem:[%s2878_s29 + $0xc8] sm:$0xf]  ;;  %271 = vst [vmem:[%s2882_s30 + $0x5c] sm:$0xf] %v270_v23  ;;  %273 = vst [vmem:[%s2882_s30 + $0x60] sm:$0xf] %v272_v24 }
  0x20   : > { %275 = vst [vmem:[%s2882_s30 + $0x64] sm:$0xf] %v274_v25  ;;  %v276_v26 = vld [vmem:[%s2878_s29 + $0xd0] sm:$0xf]  ;;  %v278_v27 = vld [vmem:[%s2878_s29 + $0xd8] sm:$0xf] }
  0x21   : > { %v280_v28 = vld [vmem:[%s2878_s29 + $0xe0] sm:$0xf]  ;;  %277 = vst [vmem:[%s2882_s30 + $0x68] sm:$0xf] %v276_v26  ;;  %279 = vst [vmem:[%s2882_s30 + $0x6c] sm:$0xf] %v278_v27 }
  0x22   : > { %281 = vst [vmem:[%s2882_s30 + $0x70] sm:$0xf] %v280_v28  ;;  %v282_v29 = vld [vmem:[%s2878_s29 + $0xe8] sm:$0xf]  ;;  %v284_v30 = vld [vmem:[%s2878_s29 + $0xf0] sm:$0xf] }
  0x23   : > { %v286_v31 = vld [vmem:[%s2878_s29 + $0xf8] sm:$0xf]  ;;  %283 = vst [vmem:[%s2882_s30 + $0x74] sm:$0xf] %v282_v29  ;;  %285 = vst [vmem:[%s2882_s30 + $0x78] sm:$0xf] %v284_v30 }
  0x24   : > { %287 = vst [vmem:[%s2882_s30 + $0x7c] sm:$0xf] %v286_v31  ;;  %v288_v32 = vld [vmem:[%s2878_s29 + $0x100] sm:$0xf]  ;;  %v290_v33 = vld [vmem:[%s2878_s29 + $0x108] sm:$0xf] }
  0x25   : > { %v292_v34 = vld [vmem:[%s2878_s29 + $0x110] sm:$0xf]  ;;  %289 = vst [vmem:[%s2882_s30 + $0x80] sm:$0xf] %v288_v32  ;;  %291 = vst [vmem:[%s2882_s30 + $0x84] sm:$0xf] %v290_v33 }
  0x26   : > { %293 = vst [vmem:[%s2882_s30 + $0x88] sm:$0xf] %v292_v34  ;;  %v294_v35 = vld [vmem:[%s2878_s29 + $0x118] sm:$0xf]  ;;  %v296_v36 = vld [vmem:[%s2878_s29 + $0x120] sm:$0xf] }
  0x27   : > { %v298_v37 = vld [vmem:[%s2878_s29 + $0x128] sm:$0xf]  ;;  %295 = vst [vmem:[%s2882_s30 + $0x8c] sm:$0xf] %v294_v35  ;;  %297 = vst [vmem:[%s2882_s30 + $0x90] sm:$0xf] %v296_v36 }
  0x28   : > { %299 = vst [vmem:[%s2882_s30 + $0x94] sm:$0xf] %v298_v37  ;;  %v300_v38 = vld [vmem:[%s2878_s29 + $0x130] sm:$0xf]  ;;  %v302_v39 = vld [vmem:[%s2878_s29 + $0x138] sm:$0xf] }
  0x29   : > { %v304_v40 = vld [vmem:[%s2878_s29 + $0x140] sm:$0xf]  ;;  %301 = vst [vmem:[%s2882_s30 + $0x98] sm:$0xf] %v300_v38  ;;  %303 = vst [vmem:[%s2882_s30 + $0x9c] sm:$0xf] %v302_v39 }
  0x2a   : > { %305 = vst [vmem:[%s2882_s30 + $0xa0] sm:$0xf] %v304_v40  ;;  %v306_v41 = vld [vmem:[%s2878_s29 + $0x148] sm:$0xf]  ;;  %v308_v42 = vld [vmem:[%s2878_s29 + $0x150] sm:$0xf] }
  0x2b   : > { %v310_v43 = vld [vmem:[%s2878_s29 + $0x158] sm:$0xf]  ;;  %307 = vst [vmem:[%s2882_s30 + $0xa4] sm:$0xf] %v306_v41  ;;  %309 = vst [vmem:[%s2882_s30 + $0xa8] sm:$0xf] %v308_v42 }
  0x2c   : > { %311 = vst [vmem:[%s2882_s30 + $0xac] sm:$0xf] %v310_v43  ;;  %v312_v44 = vld [vmem:[%s2878_s29 + $0x160] sm:$0xf]  ;;  %v314_v45 = vld [vmem:[%s2878_s29 + $0x168] sm:$0xf] }
  0x2d   : > { %v316_v46 = vld [vmem:[%s2878_s29 + $0x170] sm:$0xf]  ;;  %313 = vst [vmem:[%s2882_s30 + $0xb0] sm:$0xf] %v312_v44  ;;  %315 = vst [vmem:[%s2882_s30 + $0xb4] sm:$0xf] %v314_v45 }
  0x2e   : > { %317 = vst [vmem:[%s2882_s30 + $0xb8] sm:$0xf] %v316_v46  ;;  %v318_v47 = vld [vmem:[%s2878_s29 + $0x178] sm:$0xf]  ;;  %v320_v48 = vld [vmem:[%s2878_s29 + $0x180] sm:$0xf] }
  0x2f   : > { %v322_v49 = vld [vmem:[%s2878_s29 + $0x188] sm:$0xf]  ;;  %319 = vst [vmem:[%s2882_s30 + $0xbc] sm:$0xf] %v318_v47  ;;  %321 = vst [vmem:[%s2882_s30 + $0xc0] sm:$0xf] %v320_v48 }
  0x30   : > { %323 = vst [vmem:[%s2882_s30 + $0xc4] sm:$0xf] %v322_v49  ;;  %v324_v50 = vld [vmem:[%s2878_s29 + $0x190] sm:$0xf]  ;;  %v326_v51 = vld [vmem:[%s2878_s29 + $0x198] sm:$0xf] }
  0x31   : > { %v328_v52 = vld [vmem:[%s2878_s29 + $0x1a0] sm:$0xf]  ;;  %325 = vst [vmem:[%s2882_s30 + $0xc8] sm:$0xf] %v324_v50  ;;  %327 = vst [vmem:[%s2882_s30 + $0xcc] sm:$0xf] %v326_v51 }
  0x32   : > { %329 = vst [vmem:[%s2882_s30 + $0xd0] sm:$0xf] %v328_v52  ;;  %v330_v53 = vld [vmem:[%s2878_s29 + $0x1a8] sm:$0xf]  ;;  %v332_v54 = vld [vmem:[%s2878_s29 + $0x1b0] sm:$0xf] }
  0x33   : > { %v334_v55 = vld [vmem:[%s2878_s29 + $0x1b8] sm:$0xf]  ;;  %331 = vst [vmem:[%s2882_s30 + $0xd4] sm:$0xf] %v330_v53  ;;  %333 = vst [vmem:[%s2882_s30 + $0xd8] sm:$0xf] %v332_v54 }
  0x34   : > { %335 = vst [vmem:[%s2882_s30 + $0xdc] sm:$0xf] %v334_v55  ;;  %v336_v56 = vld [vmem:[%s2878_s29 + $0x1c0] sm:$0xf]  ;;  %v338_v57 = vld [vmem:[%s2878_s29 + $0x1c8] sm:$0xf] }
  0x35   : > { %v340_v58 = vld [vmem:[%s2878_s29 + $0x1d0] sm:$0xf]  ;;  %337 = vst [vmem:[%s2882_s30 + $0xe0] sm:$0xf] %v336_v56  ;;  %339 = vst [vmem:[%s2882_s30 + $0xe4] sm:$0xf] %v338_v57 }
  0x36   : > { %341 = vst [vmem:[%s2882_s30 + $0xe8] sm:$0xf] %v340_v58  ;;  %v342_v59 = vld [vmem:[%s2878_s29 + $0x1d8] sm:$0xf]  ;;  %v344_v60 = vld [vmem:[%s2878_s29 + $0x1e0] sm:$0xf] }
  0x37   : > { %v346_v61 = vld [vmem:[%s2878_s29 + $0x1e8] sm:$0xf]  ;;  %343 = vst [vmem:[%s2882_s30 + $0xec] sm:$0xf] %v342_v59  ;;  %345 = vst [vmem:[%s2882_s30 + $0xf0] sm:$0xf] %v344_v60 }
  0x38   : > { %347 = vst [vmem:[%s2882_s30 + $0xf4] sm:$0xf] %v346_v61  ;;  %v348_v62 = vld [vmem:[%s2878_s29 + $0x1f0] sm:$0xf]  ;;  %v350_v63 = vld [vmem:[%s2878_s29 + $0x1f8] sm:$0xf] }
  0x39   : > { %349 = vst [vmem:[%s2882_s30 + $0xf8] sm:$0xf] %v348_v62  ;;  %351 = vst [vmem:[%s2882_s30 + $0xfc] sm:$0xf] %v350_v63 }
  0x3a PF: > { %p2181_p6 = scmp.ge.s32.totalorder %s2807_s19, 1  ;;  %p514_p7 = scmp.lt.s32.totalorder %s2807_s19, 3 }
  0x3c   : > { %p515_p8 = pnand %p2181_p6, %p514_p7 }
  0x3d   : > { %s521_s5 = sand.u32 (!%p515_p8), 1, %s2791_s15   ;;  %s2183_s6 = sshll.u32 (!%p515_p8), %s2799_s17, 4 }
  0x3e   : > { %518 = sbr.rel (%p515_p8) target bundleno = 460 (0x1cc), region = 73  ;;  %s2182_s7 = sshll.u32 (!%p515_p8), %s521_s5, 8 }
  0x3f   : > { %p565_p9 = scmp.lt.s32.totalorder (!%p515_p8), %s2183_s6, 31  ;;  %s3019_s12 = scalar_lea.vmem (!%p515_p8), [#allocation3], %s2182_s7 }
  0x40   : > { %p2185_p10 = scmp.ne.s32.totalorder (!%p515_p8), %s2799_s17, 0 }
  0x43   : > { %s3388_s6 = smov (!%p565_p9, %s2183_s6), 31  ;;  %592 = sbr.rel (%p2185_p10) target bundleno = 105 (0x69), region = 81 }
  0x44   : > { %s2184_s8 = sshll.u32 %s3388_s6, 2 }
  0x45   : > { %s3017_s11 = scalar_lea.vmem %s3377_s1, %s2184_s8 }
  0x48   : > { %v2809_v0 = vmov 0.0  }
  0x49   : > { %593 = vst [vmem:[#allocation2 + $0xb0] sm:$0xff] %v2809_v0  ;;  %594 = vst [vmem:[#allocation2 + $0x1b0] sm:$0xff] %v2809_v0 }
  0x4a   : > { %595 = vst [vmem:[#allocation2 + $0xd8] sm:$0xff] %v2809_v0  ;;  %596 = vst [vmem:[#allocation2 + $0x18] sm:$0xff] %v2809_v0 }
  0x4b   : > { %597 = vst [vmem:[#allocation2 + $0x50] sm:$0xff] %v2809_v0  ;;  %598 = vst [vmem:[#allocation2 + $0x168] sm:$0xff] %v2809_v0 }
  0x4c   : > { %599 = vst [vmem:[#allocation2 + $0x130] sm:$0xff] %v2809_v0  ;;  %600 = vst [vmem:[#allocation2 + $0x48] sm:$0xff] %v2809_v0 }
  0x4d   : > { %601 = vst [vmem:[#allocation2 + $0x180] sm:$0xff] %v2809_v0  ;;  %602 = vst [vmem:[#allocation2 + $0x110] sm:$0xff] %v2809_v0 }
  0x4e   : > { %603 = vst [vmem:[#allocation2 + $0x118] sm:$0xff] %v2809_v0  ;;  %604 = vst [vmem:[#allocation2 + $0x98] sm:$0xff] %v2809_v0 }
  0x4f   : > { %605 = vst [vmem:[#allocation2 + $0x120] sm:$0xff] %v2809_v0  ;;  %606 = vst [vmem:[#allocation2 + $0x150] sm:$0xff] %v2809_v0 }
  0x50   : > { %607 = vst [vmem:[#allocation2 + $0x108] sm:$0xff] %v2809_v0  ;;  %608 = vst [vmem:[#allocation2 + $0x60] sm:$0xff] %v2809_v0 }
  0x51   : > { %609 = vst [vmem:[#allocation2 + $0xe0] sm:$0xff] %v2809_v0  ;;  %610 = vst [vmem:[#allocation2 + $0x188] sm:$0xff] %v2809_v0 }
  0x52   : > { %611 = vst [vmem:[#allocation2 + $0x138] sm:$0xff] %v2809_v0  ;;  %612 = vst [vmem:[#allocation2 + $0x140] sm:$0xff] %v2809_v0 }
  0x53   : > { %613 = vst [vmem:[#allocation2 + $0x80] sm:$0xff] %v2809_v0  ;;  %614 = vst [vmem:[#allocation2 + $0x1a8] sm:$0xff] %v2809_v0 }
  0x54   : > { %615 = vst [vmem:[#allocation2 + $0x1b8] sm:$0xff] %v2809_v0  ;;  %616 = vst [vmem:[#allocation2 + $0x28] sm:$0xff] %v2809_v0 }
  0x55   : > { %617 = vst [vmem:[#allocation2 + $0x1e8] sm:$0xff] %v2809_v0  ;;  %618 = vst [vmem:[#allocation2 + $0xf8] sm:$0xff] %v2809_v0 }
  0x56   : > { %619 = vst [vmem:[#allocation2 + $0x160] sm:$0xff] %v2809_v0  ;;  %620 = vst [vmem:[#allocation2 + $0x30] sm:$0xff] %v2809_v0 }
  0x57   : > { %621 = vst [vmem:[#allocation2 + $0x1e0] sm:$0xff] %v2809_v0  ;;  %622 = vst [vmem:[#allocation2] sm:$0xff] %v2809_v0 }
  0x58   : > { %623 = vst [vmem:[#allocation2 + $0xf0] sm:$0xff] %v2809_v0  ;;  %624 = vst [vmem:[#allocation2 + $0x8] sm:$0xff] %v2809_v0 }
  0x59   : > { %625 = vst [vmem:[#allocation2 + $0x148] sm:$0xff] %v2809_v0  ;;  %626 = vst [vmem:[#allocation2 + $0x1d0] sm:$0xff] %v2809_v0 }
  0x5a   : > { %627 = vst [vmem:[#allocation2 + $0x100] sm:$0xff] %v2809_v0  ;;  %628 = vst [vmem:[#allocation2 + $0xc8] sm:$0xff] %v2809_v0 }
  0x5b   : > { %629 = vst [vmem:[#allocation2 + $0x40] sm:$0xff] %v2809_v0  ;;  %630 = vst [vmem:[#allocation2 + $0x1f8] sm:$0xff] %v2809_v0 }
  0x5c   : > { %631 = vst [vmem:[#allocation2 + $0x20] sm:$0xff] %v2809_v0  ;;  %632 = vst [vmem:[#allocation2 + $0x128] sm:$0xff] %v2809_v0 }
  0x5d   : > { %633 = vst [vmem:[#allocation2 + $0x1a0] sm:$0xff] %v2809_v0  ;;  %634 = vst [vmem:[#allocation2 + $0x1f0] sm:$0xff] %v2809_v0 }
  0x5e   : > { %635 = vst [vmem:[#allocation2 + $0xe8] sm:$0xff] %v2809_v0  ;;  %636 = vst [vmem:[#allocation2 + $0x78] sm:$0xff] %v2809_v0 }
  0x5f   : > { %637 = vst [vmem:[#allocation2 + $0x70] sm:$0xff] %v2809_v0  ;;  %638 = vst [vmem:[#allocation2 + $0x90] sm:$0xff] %v2809_v0 }
  0x60   : > { %639 = vst [vmem:[#allocation2 + $0x1d8] sm:$0xff] %v2809_v0  ;;  %640 = vst [vmem:[#allocation2 + $0xd0] sm:$0xff] %v2809_v0 }
  0x61   : > { %641 = vst [vmem:[#allocation2 + $0xb8] sm:$0xff] %v2809_v0  ;;  %642 = vst [vmem:[#allocation2 + $0x88] sm:$0xff] %v2809_v0 }
  0x62   : > { %643 = vst [vmem:[#allocation2 + $0xa8] sm:$0xff] %v2809_v0  ;;  %644 = vst [vmem:[#allocation2 + $0x1c8] sm:$0xff] %v2809_v0 }
  0x63   : > { %645 = vst [vmem:[#allocation2 + $0x170] sm:$0xff] %v2809_v0  ;;  %646 = vst [vmem:[#allocation2 + $0x178] sm:$0xff] %v2809_v0 }
  0x64   : > { %647 = vst [vmem:[#allocation2 + $0x68] sm:$0xff] %v2809_v0  ;;  %648 = vst [vmem:[#allocation2 + $0x190] sm:$0xff] %v2809_v0 }
  0x65   : > { %649 = vst [vmem:[#allocation2 + $0x198] sm:$0xff] %v2809_v0  ;;  %650 = vst [vmem:[#allocation2 + $0x38] sm:$0xff] %v2809_v0 }
  0x66   : > { %651 = vst [vmem:[#allocation2 + $0xc0] sm:$0xff] %v2809_v0  ;;  %652 = vst [vmem:[#allocation2 + $0x1c0] sm:$0xff] %v2809_v0 }
  0x67   : > { %653 = vst [vmem:[#allocation2 + $0x158] sm:$0xff] %v2809_v0  ;;  %654 = vst [vmem:[#allocation2 + $0x10] sm:$0xff] %v2809_v0 }
  0x68   : > { %655 = vst [vmem:[#allocation2 + $0x58] sm:$0xff] %v2809_v0  ;;  %656 = vst [vmem:[#allocation2 + $0xa0] sm:$0xff] %v2809_v0 }
  0x69 PF: > { %v2729_v1 = vld [vmem:[%s3017_s11 + $0x38] sm:$0xff]   ;;  %v2730_v2 = vld [vmem:[%s3017_s11 + $0x30] sm:$0xff]   ;;  %v2731_v3 = vld [vmem:[%s3017_s11 + $0x28] sm:$0xff]   ;;  %p2226_p11 = scmp.ne.s32.totalorder %s2799_s17, 1 }
  0x6a   : > { %2592 = vmatprep.subr.bf16.mxu0 %v2729_v1  ;;  %2672 = vmatprep.subr.bf16.mxu1 %v2729_v1  ;;  %v2732_v4 = vld [vmem:[%s3017_s11 + $0x20] sm:$0xff]   ;;  %v2737_v5 = vld [vmem:[%s3019_s12] sm:$0xff]   ;;  %v2733_v7 = vld [vmem:[%s3017_s11 + $0x18] sm:$0xff]  }
  0x6b   : > { %2593 = vmatpush3.bf16.msra.mxu0 %v2729_v1  ;;  %2680 = vmatpush3.bf16.msra.mxu1 %v2729_v1  ;;  %v2738_v6 = vld [vmem:[%s3019_s12 + $0x80] sm:$0xff]   ;;  %v2735_v9 = vld [vmem:[%s3017_s11 + $0x8] sm:$0xff]   ;;  %v2736_v10 = vld [vmem:[%s3017_s11] sm:$0xff]  }
  0x6c   : > { %2594 = vmatprep.subr.bf16.mxu0 %v2730_v2  ;;  %2673 = vmatprep.subr.bf16.mxu1 %v2730_v2  ;;  %v2734_v8 = vld [vmem:[%s3017_s11 + $0x10] sm:$0xff]   ;;  %v2739_v11 = vld [vmem:[%s3019_s12 + $0x8] sm:$0xff]   ;;  %v2741_v13 = vld [vmem:[%s3019_s12 + $0x10] sm:$0xff]  }
  0x6d   : > { %2608 = vmatprep.mubr.bf16.mxu0 %v2737_v5  ;;  %2640 = vmatprep.mubr.bf16.mxu1 %v2738_v6  ;;  %v2740_v12 = vld [vmem:[%s3019_s12 + $0x88] sm:$0xff]   ;;  %v2742_v14 = vld [vmem:[%s3019_s12 + $0x90] sm:$0xff]   ;;  %v2743_v15 = vld [vmem:[%s3019_s12 + $0x18] sm:$0xff]  }
  0x6e   : > { %v2744_v16 = vld [vmem:[%s3019_s12 + $0x98] sm:$0xff]   ;;  %v2745_v17 = vld [vmem:[%s3019_s12 + $0x20] sm:$0xff]   ;;  %v2747_v19 = vld [vmem:[%s3019_s12 + $0x28] sm:$0xff]  }
  0x6f   : > { %2595 = vmatpush3.bf16.msra.mxu0 %v2730_v2  ;;  %2681 = vmatpush3.bf16.msra.mxu1 %v2730_v2  ;;  %v2746_v18 = vld [vmem:[%s3019_s12 + $0xa0] sm:$0xff]   ;;  %v2748_v20 = vld [vmem:[%s3019_s12 + $0xa8] sm:$0xff]   ;;  %v2749_v21 = vld [vmem:[%s3019_s12 + $0x30] sm:$0xff]  }
  0x70   : > { %2596 = vmatprep.subr.bf16.mxu0 %v2731_v3  ;;  %2674 = vmatprep.subr.bf16.mxu1 %v2731_v3  ;;  %v2750_v22 = vld [vmem:[%s3019_s12 + $0xb0] sm:$0xff]   ;;  %v2751_v23 = vld [vmem:[%s3019_s12 + $0x38] sm:$0xff]   ;;  %v2753_v25 = vld [vmem:[%s3019_s12 + $0x40] sm:$0xff]  }
  0x71   : > { %v2752_v24 = vld [vmem:[%s3019_s12 + $0xb8] sm:$0xff]   ;;  %v2754_v26 = vld [vmem:[%s3019_s12 + $0xc0] sm:$0xff]   ;;  %v2755_v27 = vld [vmem:[%s3019_s12 + $0x48] sm:$0xff]  }
  0x72   : > { %v2756_v28 = vld [vmem:[%s3019_s12 + $0xc8] sm:$0xff]   ;;  %v2757_v29 = vld [vmem:[%s3019_s12 + $0x50] sm:$0xff]   ;;  %v2759_v31 = vld [vmem:[%s3019_s12 + $0x58] sm:$0xff]  }
  0x73   : > { %2597 = vmatpush3.bf16.msra.mxu0 %v2731_v3  ;;  %2682 = vmatpush3.bf16.msra.mxu1 %v2731_v3  ;;  %v2758_v30 = vld [vmem:[%s3019_s12 + $0xd0] sm:$0xff]   ;;  %v2760_v32 = vld [vmem:[%s3019_s12 + $0xd8] sm:$0xff]   ;;  %v2761_v33 = vld [vmem:[%s3019_s12 + $0x60] sm:$0xff]  }
  0x74   : > { %2598 = vmatprep.subr.bf16.mxu0 %v2732_v4  ;;  %2675 = vmatprep.subr.bf16.mxu1 %v2732_v4  ;;  %v2762_v34 = vld [vmem:[%s3019_s12 + $0xe0] sm:$0xff]   ;;  %v2763_v35 = vld [vmem:[%s3019_s12 + $0x68] sm:$0xff]   ;;  %v2765_v37 = vld [vmem:[%s3019_s12 + $0x70] sm:$0xff]  }
  0x75   : > { %v2764_v36 = vld [vmem:[%s3019_s12 + $0xe8] sm:$0xff]   ;;  %v2766_v38 = vld [vmem:[%s3019_s12 + $0xf0] sm:$0xff]   ;;  %v2767_v39 = vld [vmem:[%s3019_s12 + $0x78] sm:$0xff]  }
  0x76   : > { %v2768_v40 = vld [vmem:[%s3019_s12 + $0xf8] sm:$0xff]   ;;  %v691_v42 = vld [vmem:[#allocation2 + $0x100] sm:$0xff]  ;;  %v657_v45 = vld [vmem:[#allocation2 + $0xb0] sm:$0xff] }
  0x77   : > { %2599 = vmatpush3.bf16.msra.mxu0 %v2732_v4  ;;  %2683 = vmatpush3.bf16.msra.mxu1 %v2732_v4  ;;  %v659_v41 = vld [vmem:[#allocation2 + $0xd8] sm:$0xff]  ;;  %v689_v46 = vld [vmem:[#allocation2 + $0x148] sm:$0xff]  ;;  %v658_v57 = vld [vmem:[#allocation2 + $0x1b0] sm:$0xff] }
  0x78   : > { %2600 = vmatprep.subr.bf16.mxu0 %v2733_v7  ;;  %2676 = vmatprep.subr.bf16.mxu1 %v2733_v7  ;;  %v660_v51 = vld [vmem:[#allocation2 + $0x18] sm:$0xff]  ;;  %v692_v52 = vld [vmem:[#allocation2 + $0xc8] sm:$0xff]  ;;  %v690_v58 = vld [vmem:[#allocation2 + $0x1d0] sm:$0xff] }
  0x79   : > { %v663_v63 = vld [vmem:[#allocation2 + $0x130] sm:$0xff]  ;;  %v695_v0 = vld [vmem:[#allocation2 + $0x20] sm:$0xff] }
  0x7a   : > { %v661_v5 = vld [vmem:[#allocation2 + $0x50] sm:$0xff]  ;;  %v693_v6 = vld [vmem:[#allocation2 + $0x40] sm:$0xff] }
  0x7b   : > { %2601 = vmatpush3.bf16.msra.mxu0 %v2733_v7  ;;  %2684 = vmatpush3.bf16.msra.mxu1 %v2733_v7 }
  0x7c   : > { %2602 = vmatprep.subr.bf16.mxu0 %v2734_v8  ;;  %2677 = vmatprep.subr.bf16.mxu1 %v2734_v8 }
  0x7f   : > { %2603 = vmatpush3.bf16.msra.mxu0 %v2734_v8  ;;  %2685 = vmatpush3.bf16.msra.mxu1 %v2734_v8 }
  0x80   : > { %2604 = vmatprep.subr.bf16.mxu0 %v2735_v9  ;;  %2678 = vmatprep.subr.bf16.mxu1 %v2735_v9 }
  0x83   : > { %2605 = vmatpush3.bf16.msra.mxu0 %v2735_v9  ;;  %2686 = vmatpush3.bf16.msra.mxu1 %v2735_v9 }
  0x84   : > { %2606 = vmatprep.subr.bf16.mxu0 %v2736_v10  ;;  %2679 = vmatprep.subr.bf16.mxu1 %v2736_v10 }
  0x87   : > { %2607 = vmatpush3.bf16.msra.mxu0 %v2736_v10  ;;  %2687 = vmatpush3.bf16.msra.mxu1 %v2736_v10 }
  0x8a   : > { %2609 = vmatmul.mubr.bf16.vlgmr.msra.gmra.mxu0 %v2739_v11  ;;  %2641 = vmatmul.mubr.bf16.vlgmr.msra.gmra.mxu1 %v2740_v12  ;;  %v664_v11 = vld [vmem:[#allocation2 + $0x48] sm:$0xff] }
  0x8b   : > { %2612 = vmatprep.mubr.bf16.mxu0 %v2741_v13  ;;  %2644 = vmatprep.mubr.bf16.mxu1 %v2742_v14  ;;  %v696_v12 = vld [vmem:[#allocation2 + $0x128] sm:$0xff] }
  0x92   : > { %2613 = vmatmul.mubr.bf16.gmra.mxu0 %v2743_v15  ;;  %2645 = vmatmul.mubr.bf16.gmra.mxu1 %v2744_v16 }
  0x93   : > { %2616 = vmatprep.mubr.bf16.mxu0 %v2745_v17  ;;  %2648 = vmatprep.mubr.bf16.mxu1 %v2746_v18  ;;  %v662_v17 = vld [vmem:[#allocation2 + $0x168] sm:$0xff]  ;;  %v694_v18 = vld [vmem:[#allocation2 + $0x1f8] sm:$0xff] }
  0x9a   : > { %2617 = vmatmul.mubr.bf16.gmra.mxu0 %v2747_v19  ;;  %2649 = vmatmul.mubr.bf16.gmra.mxu1 %v2748_v20 }
  0x9b   : > { %2620 = vmatprep.mubr.bf16.mxu0 %v2749_v21  ;;  %2652 = vmatprep.mubr.bf16.mxu1 %v2750_v22 }
  0xa2   : > { %2621 = vmatmul.mubr.bf16.gmra.mxu0 %v2751_v23  ;;  %2653 = vmatmul.mubr.bf16.gmra.mxu1 %v2752_v24  ;;  %v667_v23 = vld [vmem:[#allocation2 + $0x118] sm:$0xff]  ;;  %v699_v24 = vld [vmem:[#allocation2 + $0xe8] sm:$0xff] }
  0xa3   : > { %2624 = vmatprep.mubr.bf16.mxu0 %v2753_v25  ;;  %2656 = vmatprep.mubr.bf16.mxu1 %v2754_v26 }
  0xaa   : > { %2625 = vmatmul.mubr.bf16.gmra.mxu0 %v2755_v27  ;;  %2657 = vmatmul.mubr.bf16.gmra.mxu1 %v2756_v28 }
  0xab   : > { %2628 = vmatprep.mubr.bf16.mxu0 %v2757_v29  ;;  %2660 = vmatprep.mubr.bf16.mxu1 %v2758_v30  ;;  %v665_v29 = vld [vmem:[#allocation2 + $0x180] sm:$0xff] }
  0xac   : > { %v697_v30 = vld [vmem:[#allocation2 + $0x1a0] sm:$0xff] }
  0xb2   : > { %2629 = vmatmul.mubr.bf16.gmra.mxu0 %v2759_v31  ;;  %2661 = vmatmul.mubr.bf16.gmra.mxu1 %v2760_v32 }
  0xb3   : > { %2632 = vmatprep.mubr.bf16.mxu0 %v2761_v33  ;;  %2664 = vmatprep.mubr.bf16.mxu1 %v2762_v34 }
  0xba   : > { %2633 = vmatmul.mubr.bf16.gmra.mxu0 %v2763_v35  ;;  %2665 = vmatmul.mubr.bf16.gmra.mxu1 %v2764_v36  ;;  %v668_v35 = vld [vmem:[#allocation2 + $0x98] sm:$0xff] }
  0xbb   : > { %2636 = vmatprep.mubr.bf16.mxu0 %v2765_v37  ;;  %2668 = vmatprep.mubr.bf16.mxu1 %v2766_v38  ;;  %v700_v36 = vld [vmem:[#allocation2 + $0x78] sm:$0xff] }
  0xc2   : > { %2637 = vmatmul.mubr.bf16.gmra.mxu0 %v2767_v39  ;;  %2669 = vmatmul.mubr.bf16.gmra.mxu1 %v2768_v40 }
 0x14a   : > { %v2610_v43 = vpop.f32.mrf.mxu0  ;;  %v2642_v44 = vpop.f32.mrf.mxu1 }
 0x14b   : > { %v1332_v47 = vadd.f32 %v2610_v43, %v659_v41  ;;  %v1364_v48 = vadd.f32 %v2642_v44, %v691_v42  ;;  %v666_v41 = vld [vmem:[#allocation2 + $0x110] sm:$0xff] }
 0x14c   : > { %v1075_v49 = vpop.f32.mrf.mxu0  ;;  %v1203_v50 = vpop.f32.mrf.mxu1  ;;  %v698_v42 = vld [vmem:[#allocation2 + $0x1f0] sm:$0xff] }
 0x14d   : > { %1396 = vst [vmem:[#allocation2 + $0xd8] sm:$0xff] %v1332_v47  ;;  %1428 = vst [vmem:[#allocation2 + $0x100] sm:$0xff] %v1364_v48  ;;  %v1330_v53 = vadd.f32 %v1075_v49, %v657_v45  ;;  %v1362_v54 = vadd.f32 %v1203_v50, %v689_v46  ;;  %v671_v47 = vld [vmem:[#allocation2 + $0x108] sm:$0xff]  ;;  %v703_v48 = vld [vmem:[#allocation2 + $0x1d8] sm:$0xff] }
 0x14e   : > { %v2611_v55 = vpop.f32.mrf.mxu0  ;;  %v2643_v56 = vpop.f32.mrf.mxu1 }
 0x14f   : > { %1394 = vst [vmem:[#allocation2 + $0xb0] sm:$0xff] %v1330_v53  ;;  %1426 = vst [vmem:[#allocation2 + $0x148] sm:$0xff] %v1362_v54  ;;  %v1333_v59 = vadd.f32 %v2611_v55, %v660_v51  ;;  %v1365_v60 = vadd.f32 %v2643_v56, %v692_v52  ;;  %v669_v53 = vld [vmem:[#allocation2 + $0x120] sm:$0xff]  ;;  %v701_v54 = vld [vmem:[#allocation2 + $0x70] sm:$0xff] }
 0x150   : > { %v1078_v61 = vpop.f32.mrf.mxu0  ;;  %v1206_v62 = vpop.f32.mrf.mxu1 }
 0x151   : > { %1397 = vst [vmem:[#allocation2 + $0x18] sm:$0xff] %v1333_v59  ;;  %1429 = vst [vmem:[#allocation2 + $0xc8] sm:$0xff] %v1365_v60  ;;  %v1331_v1 = vadd.f32 %v1078_v61, %v658_v57  ;;  %v1363_v2 = vadd.f32 %v1206_v62, %v690_v58  ;;  %v672_v59 = vld [vmem:[#allocation2 + $0x60] sm:$0xff]  ;;  %v704_v60 = vld [vmem:[#allocation2 + $0xd0] sm:$0xff] }
 0x152   : > { %v2614_v3 = vpop.f32.mrf.mxu0  ;;  %v2646_v4 = vpop.f32.mrf.mxu1 }
 0x153   : > { %1395 = vst [vmem:[#allocation2 + $0x1b0] sm:$0xff] %v1331_v1  ;;  %1427 = vst [vmem:[#allocation2 + $0x1d0] sm:$0xff] %v1363_v2  ;;  %v1336_v7 = vadd.f32 %v2614_v3, %v663_v63  ;;  %v1368_v8 = vadd.f32 %v2646_v4, %v695_v0  ;;  %v670_v1 = vld [vmem:[#allocation2 + $0x150] sm:$0xff] }
 0x154   : > { %v1091_v9 = vpop.f32.mrf.mxu0  ;;  %v1219_v10 = vpop.f32.mrf.mxu1  ;;  %v702_v2 = vld [vmem:[#allocation2 + $0x90] sm:$0xff] }
 0x155   : > { %1400 = vst [vmem:[#allocation2 + $0x130] sm:$0xff] %v1336_v7  ;;  %1432 = vst [vmem:[#allocation2 + $0x20] sm:$0xff] %v1368_v8  ;;  %v1334_v13 = vadd.f32 %v1091_v9, %v661_v5  ;;  %v1366_v14 = vadd.f32 %v1219_v10, %v693_v6  ;;  %v675_v7 = vld [vmem:[#allocation2 + $0x138] sm:$0xff]  ;;  %v707_v8 = vld [vmem:[#allocation2 + $0xa8] sm:$0xff] }
 0x156   : > { %v2615_v15 = vpop.f32.mrf.mxu0  ;;  %v2647_v16 = vpop.f32.mrf.mxu1 }
 0x157   : > { %1398 = vst [vmem:[#allocation2 + $0x50] sm:$0xff] %v1334_v13  ;;  %1430 = vst [vmem:[#allocation2 + $0x40] sm:$0xff] %v1366_v14  ;;  %v1337_v19 = vadd.f32 %v2615_v15, %v664_v11  ;;  %v1369_v20 = vadd.f32 %v2647_v16, %v696_v12  ;;  %v673_v13 = vld [vmem:[#allocation2 + $0xe0] sm:$0xff]  ;;  %v705_v14 = vld [vmem:[#allocation2 + $0xb8] sm:$0xff] }
 0x158   : > { %v1094_v21 = vpop.f32.mrf.mxu0  ;;  %v1222_v22 = vpop.f32.mrf.mxu1 }
 0x159   : > { %1401 = vst [vmem:[#allocation2 + $0x48] sm:$0xff] %v1337_v19  ;;  %1433 = vst [vmem:[#allocation2 + $0x128] sm:$0xff] %v1369_v20  ;;  %v1335_v25 = vadd.f32 %v1094_v21, %v662_v17  ;;  %v1367_v26 = vadd.f32 %v1222_v22, %v694_v18  ;;  %v676_v19 = vld [vmem:[#allocation2 + $0x140] sm:$0xff]  ;;  %v708_v20 = vld [vmem:[#allocation2 + $0x1c8] sm:$0xff] }
 0x15a   : > { %v2618_v27 = vpop.f32.mrf.mxu0  ;;  %v2650_v28 = vpop.f32.mrf.mxu1 }
 0x15b   : > { %1399 = vst [vmem:[#allocation2 + $0x168] sm:$0xff] %v1335_v25  ;;  %1431 = vst [vmem:[#allocation2 + $0x1f8] sm:$0xff] %v1367_v26  ;;  %v1340_v31 = vadd.f32 %v2618_v27, %v667_v23  ;;  %v1372_v32 = vadd.f32 %v2650_v28, %v699_v24  ;;  %v674_v25 = vld [vmem:[#allocation2 + $0x188] sm:$0xff] }
 0x15c   : > { %v1107_v33 = vpop.f32.mrf.mxu0  ;;  %v1235_v34 = vpop.f32.mrf.mxu1  ;;  %v706_v26 = vld [vmem:[#allocation2 + $0x88] sm:$0xff] }
 0x15d   : > { %1404 = vst [vmem:[#allocation2 + $0x118] sm:$0xff] %v1340_v31  ;;  %1436 = vst [vmem:[#allocation2 + $0xe8] sm:$0xff] %v1372_v32  ;;  %v1338_v37 = vadd.f32 %v1107_v33, %v665_v29  ;;  %v1370_v38 = vadd.f32 %v1235_v34, %v697_v30  ;;  %v679_v31 = vld [vmem:[#allocation2 + $0x1b8] sm:$0xff]  ;;  %v711_v32 = vld [vmem:[#allocation2 + $0x68] sm:$0xff] }
 0x15e   : > { %v2619_v39 = vpop.f32.mrf.mxu0  ;;  %v2651_v40 = vpop.f32.mrf.mxu1 }
 0x15f   : > { %1402 = vst [vmem:[#allocation2 + $0x180] sm:$0xff] %v1338_v37  ;;  %1434 = vst [vmem:[#allocation2 + $0x1a0] sm:$0xff] %v1370_v38  ;;  %v1341_v43 = vadd.f32 %v2619_v39, %v668_v35  ;;  %v1373_v44 = vadd.f32 %v2651_v40, %v700_v36  ;;  %v677_v37 = vld [vmem:[#allocation2 + $0x80] sm:$0xff]  ;;  %v709_v38 = vld [vmem:[#allocation2 + $0x170] sm:$0xff] }
 0x160   : > { %v1110_v45 = vpop.f32.mrf.mxu0  ;;  %v1238_v46 = vpop.f32.mrf.mxu1 }
 0x161   : > { %1405 = vst [vmem:[#allocation2 + $0x98] sm:$0xff] %v1341_v43  ;;  %1437 = vst [vmem:[#allocation2 + $0x78] sm:$0xff] %v1373_v44  ;;  %v1339_v49 = vadd.f32 %v1110_v45, %v666_v41  ;;  %v1371_v50 = vadd.f32 %v1238_v46, %v698_v42  ;;  %v680_v43 = vld [vmem:[#allocation2 + $0x28] sm:$0xff]  ;;  %v712_v44 = vld [vmem:[#allocation2 + $0x190] sm:$0xff] }
 0x162   : > { %v2622_v51 = vpop.f32.mrf.mxu0  ;;  %v2654_v52 = vpop.f32.mrf.mxu1 }
 0x163   : > { %1403 = vst [vmem:[#allocation2 + $0x110] sm:$0xff] %v1339_v49  ;;  %1435 = vst [vmem:[#allocation2 + $0x1f0] sm:$0xff] %v1371_v50  ;;  %v1344_v55 = vadd.f32 %v2622_v51, %v671_v47  ;;  %v1376_v56 = vadd.f32 %v2654_v52, %v703_v48  ;;  %v678_v49 = vld [vmem:[#allocation2 + $0x1a8] sm:$0xff]  ;;  %v710_v50 = vld [vmem:[#allocation2 + $0x178] sm:$0xff] }
 0x164   : > { %v1123_v57 = vpop.f32.mrf.mxu0  ;;  %v1251_v58 = vpop.f32.mrf.mxu1 }
 0x165   : > { %1408 = vst [vmem:[#allocation2 + $0x108] sm:$0xff] %v1344_v55  ;;  %1440 = vst [vmem:[#allocation2 + $0x1d8] sm:$0xff] %v1376_v56  ;;  %v1342_v61 = vadd.f32 %v1123_v57, %v669_v53  ;;  %v1374_v62 = vadd.f32 %v1251_v58, %v701_v54  ;;  %v683_v55 = vld [vmem:[#allocation2 + $0x160] sm:$0xff] }
 0x166   : > { %v2623_v63 = vpop.f32.mrf.mxu0  ;;  %v2655_v0 = vpop.f32.mrf.mxu1  ;;  %v715_v56 = vld [vmem:[#allocation2 + $0xc0] sm:$0xff] }
 0x167   : > { %1406 = vst [vmem:[#allocation2 + $0x120] sm:$0xff] %v1342_v61  ;;  %1438 = vst [vmem:[#allocation2 + $0x70] sm:$0xff] %v1374_v62  ;;  %v1345_v3 = vadd.f32 %v2623_v63, %v672_v59  ;;  %v1377_v4 = vadd.f32 %v2655_v0, %v704_v60  ;;  %v681_v61 = vld [vmem:[#allocation2 + $0x1e8] sm:$0xff]  ;;  %v713_v62 = vld [vmem:[#allocation2 + $0x198] sm:$0xff] }
 0x168   : > { %v1126_v5 = vpop.f32.mrf.mxu0  ;;  %v1254_v6 = vpop.f32.mrf.mxu1 }
 0x169   : > { %1409 = vst [vmem:[#allocation2 + $0x60] sm:$0xff] %v1345_v3  ;;  %1441 = vst [vmem:[#allocation2 + $0xd0] sm:$0xff] %v1377_v4  ;;  %v1343_v9 = vadd.f32 %v1126_v5, %v670_v1  ;;  %v1375_v10 = vadd.f32 %v1254_v6, %v702_v2  ;;  %v684_v3 = vld [vmem:[#allocation2 + $0x30] sm:$0xff]  ;;  %v716_v4 = vld [vmem:[#allocation2 + $0x1c0] sm:$0xff] }
 0x16a   : > { %v2626_v11 = vpop.f32.mrf.mxu0  ;;  %v2658_v12 = vpop.f32.mrf.mxu1 }
 0x16b   : > { %1407 = vst [vmem:[#allocation2 + $0x150] sm:$0xff] %v1343_v9  ;;  %1439 = vst [vmem:[#allocation2 + $0x90] sm:$0xff] %v1375_v10  ;;  %v1348_v15 = vadd.f32 %v2626_v11, %v675_v7  ;;  %v1380_v16 = vadd.f32 %v2658_v12, %v707_v8  ;;  %v682_v9 = vld [vmem:[#allocation2 + $0xf8] sm:$0xff] }
 0x16c   : > { %v1139_v17 = vpop.f32.mrf.mxu0  ;;  %v1267_v18 = vpop.f32.mrf.mxu1  ;;  %v714_v10 = vld [vmem:[#allocation2 + $0x38] sm:$0xff] }
 0x16d   : > { %1412 = vst [vmem:[#allocation2 + $0x138] sm:$0xff] %v1348_v15  ;;  %1444 = vst [vmem:[#allocation2 + $0xa8] sm:$0xff] %v1380_v16  ;;  %v1346_v21 = vadd.f32 %v1139_v17, %v673_v13  ;;  %v1378_v22 = vadd.f32 %v1267_v18, %v705_v14  ;;  %v687_v15 = vld [vmem:[#allocation2 + $0xf0] sm:$0xff]  ;;  %v719_v16 = vld [vmem:[#allocation2 + $0x58] sm:$0xff] }
 0x16e   : > { %v2627_v23 = vpop.f32.mrf.mxu0  ;;  %v2659_v24 = vpop.f32.mrf.mxu1 }
 0x16f   : > { %1410 = vst [vmem:[#allocation2 + $0xe0] sm:$0xff] %v1346_v21  ;;  %1442 = vst [vmem:[#allocation2 + $0xb8] sm:$0xff] %v1378_v22  ;;  %v1349_v27 = vadd.f32 %v2627_v23, %v676_v19  ;;  %v1381_v28 = vadd.f32 %v2659_v24, %v708_v20  ;;  %v685_v21 = vld [vmem:[#allocation2 + $0x1e0] sm:$0xff]  ;;  %v717_v22 = vld [vmem:[#allocation2 + $0x158] sm:$0xff] }
 0x170   : > { %v1142_v29 = vpop.f32.mrf.mxu0  ;;  %v1270_v30 = vpop.f32.mrf.mxu1 }
 0x171   : > { %1413 = vst [vmem:[#allocation2 + $0x140] sm:$0xff] %v1349_v27  ;;  %1445 = vst [vmem:[#allocation2 + $0x1c8] sm:$0xff] %v1381_v28  ;;  %v1347_v33 = vadd.f32 %v1142_v29, %v674_v25  ;;  %v1379_v34 = vadd.f32 %v1270_v30, %v706_v26  ;;  %v688_v27 = vld [vmem:[#allocation2 + $0x8] sm:$0xff]  ;;  %v720_v28 = vld [vmem:[#allocation2 + $0xa0] sm:$0xff] }
 0x172   : > { %v2630_v35 = vpop.f32.mrf.mxu0  ;;  %v2662_v36 = vpop.f32.mrf.mxu1 }
 0x173   : > { %1411 = vst [vmem:[#allocation2 + $0x188] sm:$0xff] %v1347_v33  ;;  %1443 = vst [vmem:[#allocation2 + $0x88] sm:$0xff] %v1379_v34  ;;  %v1352_v39 = vadd.f32 %v2630_v35, %v679_v31  ;;  %v1384_v40 = vadd.f32 %v2662_v36, %v711_v32  ;;  %v686_v33 = vld [vmem:[#allocation2] sm:$0xff]  ;;  %v718_v34 = vld [vmem:[#allocation2 + $0x10] sm:$0xff] }
 0x174   : > { %v1155_v41 = vpop.f32.mrf.mxu0  ;;  %v1283_v42 = vpop.f32.mrf.mxu1 }
 0x175   : > { %1416 = vst [vmem:[#allocation2 + $0x1b8] sm:$0xff] %v1352_v39  ;;  %1448 = vst [vmem:[#allocation2 + $0x68] sm:$0xff] %v1384_v40  ;;  %v1350_v45 = vadd.f32 %v1155_v41, %v677_v37  ;;  %v1382_v46 = vadd.f32 %v1283_v42, %v709_v38 }
 0x176   : > { %v2631_v47 = vpop.f32.mrf.mxu0  ;;  %v2663_v48 = vpop.f32.mrf.mxu1 }
 0x177   : > { %1414 = vst [vmem:[#allocation2 + $0x80] sm:$0xff] %v1350_v45  ;;  %1446 = vst [vmem:[#allocation2 + $0x170] sm:$0xff] %v1382_v46  ;;  %v1353_v51 = vadd.f32 %v2631_v47, %v680_v43  ;;  %v1385_v52 = vadd.f32 %v2663_v48, %v712_v44 }
 0x178   : > { %v1158_v53 = vpop.f32.mrf.mxu0  ;;  %v1286_v54 = vpop.f32.mrf.mxu1 }
 0x179   : > { %1417 = vst [vmem:[#allocation2 + $0x28] sm:$0xff] %v1353_v51  ;;  %1449 = vst [vmem:[#allocation2 + $0x190] sm:$0xff] %v1385_v52  ;;  %v1351_v57 = vadd.f32 %v1158_v53, %v678_v49  ;;  %v1383_v58 = vadd.f32 %v1286_v54, %v710_v50 }
 0x17a   : > { %v2634_v59 = vpop.f32.mrf.mxu0  ;;  %v2666_v60 = vpop.f32.mrf.mxu1 }
 0x17b   : > { %1415 = vst [vmem:[#allocation2 + $0x1a8] sm:$0xff] %v1351_v57  ;;  %1447 = vst [vmem:[#allocation2 + $0x178] sm:$0xff] %v1383_v58  ;;  %v1356_v63 = vadd.f32 %v2634_v59, %v683_v55  ;;  %v1388_v0 = vadd.f32 %v2666_v60, %v715_v56 }
 0x17c   : > { %v1171_v1 = vpop.f32.mrf.mxu0  ;;  %v1299_v2 = vpop.f32.mrf.mxu1 }
 0x17d   : > { %1420 = vst [vmem:[#allocation2 + $0x160] sm:$0xff] %v1356_v63  ;;  %1452 = vst [vmem:[#allocation2 + $0xc0] sm:$0xff] %v1388_v0  ;;  %v1354_v5 = vadd.f32 %v1171_v1, %v681_v61  ;;  %v1386_v6 = vadd.f32 %v1299_v2, %v713_v62 }
 0x17e   : > { %v2635_v7 = vpop.f32.mrf.mxu0  ;;  %v2667_v8 = vpop.f32.mrf.mxu1 }
 0x17f   : > { %1418 = vst [vmem:[#allocation2 + $0x1e8] sm:$0xff] %v1354_v5  ;;  %1450 = vst [vmem:[#allocation2 + $0x198] sm:$0xff] %v1386_v6  ;;  %v1357_v11 = vadd.f32 %v2635_v7, %v684_v3  ;;  %v1389_v12 = vadd.f32 %v2667_v8, %v716_v4 }
 0x180   : > { %v1174_v13 = vpop.f32.mrf.mxu0  ;;  %v1302_v14 = vpop.f32.mrf.mxu1 }
 0x181   : > { %1421 = vst [vmem:[#allocation2 + $0x30] sm:$0xff] %v1357_v11  ;;  %1453 = vst [vmem:[#allocation2 + $0x1c0] sm:$0xff] %v1389_v12  ;;  %v1355_v17 = vadd.f32 %v1174_v13, %v682_v9  ;;  %v1387_v18 = vadd.f32 %v1302_v14, %v714_v10 }
 0x182   : > { %v2638_v19 = vpop.f32.mrf.mxu0  ;;  %v2670_v20 = vpop.f32.mrf.mxu1 }
 0x183   : > { %1419 = vst [vmem:[#allocation2 + $0xf8] sm:$0xff] %v1355_v17  ;;  %1451 = vst [vmem:[#allocation2 + $0x38] sm:$0xff] %v1387_v18  ;;  %v1360_v23 = vadd.f32 %v2638_v19, %v687_v15  ;;  %v1392_v24 = vadd.f32 %v2670_v20, %v719_v16 }
 0x184   : > { %v1187_v25 = vpop.f32.mrf.mxu0  ;;  %v1315_v26 = vpop.f32.mrf.mxu1 }
 0x185   : > { %1424 = vst [vmem:[#allocation2 + $0xf0] sm:$0xff] %v1360_v23  ;;  %1456 = vst [vmem:[#allocation2 + $0x58] sm:$0xff] %v1392_v24  ;;  %v1358_v29 = vadd.f32 %v1187_v25, %v685_v21  ;;  %v1390_v30 = vadd.f32 %v1315_v26, %v717_v22 }
 0x186   : > { %v2639_v31 = vpop.f32.mrf.mxu0  ;;  %v2671_v32 = vpop.f32.mrf.mxu1 }
 0x187   : > { %1422 = vst [vmem:[#allocation2 + $0x1e0] sm:$0xff] %v1358_v29  ;;  %1454 = vst [vmem:[#allocation2 + $0x158] sm:$0xff] %v1390_v30  ;;  %v1361_v35 = vadd.f32 %v2639_v31, %v688_v27  ;;  %v1393_v36 = vadd.f32 %v2671_v32, %v720_v28  ;;  %1461 = sbr.rel (%p2226_p11) target bundleno = 460 (0x1cc), region = 85 }
 0x188   : > { %v1190_v37 = vpop.f32.mrf.mxu0  ;;  %v1318_v38 = vpop.f32.mrf.mxu1 }
 0x189   : > { %1425 = vst [vmem:[#allocation2 + $0x8] sm:$0xff] %v1361_v35  ;;  %1457 = vst [vmem:[#allocation2 + $0xa0] sm:$0xff] %v1393_v36  ;;  %v1359_v39 = vadd.f32 %v1190_v37, %v686_v33  ;;  %v1391_v40 = vadd.f32 %v1318_v38, %v718_v34 }
 0x18b   : > { %1423 = vst [vmem:[#allocation2] sm:$0xff] %v1359_v39  ;;  %1455 = vst [vmem:[#allocation2 + $0x10] sm:$0xff] %v1391_v40 }
 0x18c   : > { %v1462_v41 = vld [vmem:[#allocation2 + $0xb0] sm:$0xff]  ;;  %v1464_v47 = vld [vmem:[#allocation2 + $0xd8] sm:$0xff]  ;;  %v1467_v52 = vld [vmem:[#allocation2 + $0x168] sm:$0xff] }
 0x18d   : > { %v1463_v42 = vld [vmem:[#allocation2 + $0x1b0] sm:$0xff]  ;;  %v1465_v48 = vld [vmem:[#allocation2 + $0x18] sm:$0xff]  ;;  %v1469_v58 = vld [vmem:[#allocation2 + $0x48] sm:$0xff] }
 0x18e   : > { %v3130_v43 = vld [vmem:[%s3378_s2] ss:$0 sm:$0xff]  ;;  %v1470_v63 = vld [vmem:[#allocation2 + $0x180] sm:$0xff]  ;;  %v1472_v9 = vld [vmem:[#allocation2 + $0x118] sm:$0xff] }
 0x18f   : > { %v1533_v44 = vmul.f32 %v3130_v43, %v1462_v41  ;;  %v1534_v45 = vmul.f32 %v3130_v43, %v1463_v42  ;;  %v3137_v46 = vld [vmem:[%s3379_s3] ss:$0 sm:$0xff]  ;;  %v1535_v49 = vmul.f32 %v3130_v43, %v1464_v47  ;;  %v1536_v50 = vmul.f32 %v3130_v43, %v1465_v48  ;;  %v1473_v10 = vld [vmem:[#allocation2 + $0x98] sm:$0xff]  ;;  %v1474_v15 = vld [vmem:[#allocation2 + $0x120] sm:$0xff] }
 0x190   : > { %v1466_v51 = vld [vmem:[#allocation2 + $0x50] sm:$0xff]  ;;  %v1538_v57 = vmul.f32 %v3130_v43, %v1467_v52  ;;  %v1540_v62 = vmul.f32 %v3130_v43, %v1469_v58  ;;  %v1541_v14 = vmul.f32 %v3130_v43, %v1470_v63  ;;  %v1476_v21 = vld [vmem:[#allocation2 + $0x108] sm:$0xff]  ;;  %v1543_v24 = vmul.f32 %v3130_v43, %v1472_v9  ;;  %v1477_v26 = vld [vmem:[#allocation2 + $0x60] sm:$0xff] }
 0x191   : > { %v1468_v53 = vld [vmem:[#allocation2 + $0x130] sm:$0xff]  ;;  %v1604_v54 = vadd.f32 %v3137_v46, %v1533_v44  ;;  %v1605_v55 = vadd.f32 %v3137_v46, %v1534_v45  ;;  %v1537_v56 = vmul.f32 %v3130_v43, %v1466_v51  ;;  %v1606_v59 = vadd.f32 %v3137_v46, %v1535_v49  ;;  %v1478_v31 = vld [vmem:[#allocation2 + $0xe0] sm:$0xff]  ;;  %v1479_v40 = vld [vmem:[#allocation2 + $0x188] sm:$0xff] }
 0x192   : > { %v1607_v60 = vadd.f32 %v3137_v46, %v1536_v50  ;;  %v1539_v61 = vmul.f32 %v3130_v43, %v1468_v53  ;;  %v1609_v3 = vadd.f32 %v3137_v46, %v1538_v57  ;;  %v1471_v4 = vld [vmem:[#allocation2 + $0x110] sm:$0xff]  ;;  %v1611_v8 = vadd.f32 %v3137_v46, %v1540_v62  ;;  %v1480_v47 = vld [vmem:[#allocation2 + $0x138] sm:$0xff]  ;;  %v1481_v48 = vld [vmem:[#allocation2 + $0x140] sm:$0xff] }
 0x193   : > { %v1668_v0 = vmax.f32 %v1604_v54, 0.0  ;;  %v1669_v1 = vmax.f32 %v1605_v55, 0.0  ;;  %v1608_v2 = vadd.f32 %v3137_v46, %v1537_v56  ;;  %v1670_v5 = vmax.f32 %v1606_v59, 0.0  ;;  %v1475_v16 = vld [vmem:[#allocation2 + $0x150] sm:$0xff]  ;;  %v1482_v53 = vld [vmem:[#allocation2 + $0x80] sm:$0xff]  ;;  %v1483_v54 = vld [vmem:[#allocation2 + $0x1a8] sm:$0xff] }
 0x194   : > { %v1671_v6 = vmax.f32 %v1607_v60, 0.0  ;;  %v1610_v7 = vadd.f32 %v3137_v46, %v1539_v61  ;;  %v1673_v13 = vmax.f32 %v1609_v3, 0.0  ;;  %v1675_v19 = vmax.f32 %v1611_v8, 0.0  ;;  %v1484_v59 = vld [vmem:[#allocation2 + $0x1b8] sm:$0xff] }
 0x195   : > { %v2364_v11 = vpack.c.bf16 %v1669_v1, %v1668_v0  ;;  %v1672_v12 = vmax.f32 %v1608_v2, 0.0  ;;  %v1542_v20 = vmul.f32 %v3130_v43, %v1471_v4  ;;  %v1612_v23 = vadd.f32 %v3137_v46, %v1541_v14  ;;  %v1485_v0 = vld [vmem:[#allocation2 + $0x28] sm:$0xff]  ;;  %v1487_v14 = vld [vmem:[#allocation2 + $0xf8] sm:$0xff] }
 0x196   : > { %v2369_v17 = vpack.c.bf16 %v1671_v6, %v1670_v5  ;;  %v1674_v18 = vmax.f32 %v1610_v7, 0.0  ;;  %v1544_v25 = vmul.f32 %v3130_v43, %v1473_v10  ;;  %v1545_v29 = vmul.f32 %v3130_v43, %v1474_v15  ;;  %v1486_v5 = vld [vmem:[#allocation2 + $0x1e8] sm:$0xff] }
 0x197   : > { %2365 = vst [vmem:[%s3380_s4] sm:$0xff] %v2364_v11   ;;  %v2374_v22 = vpack.c.bf16 %v1673_v13, %v1672_v12  ;;  %v1613_v28 = vadd.f32 %v3137_v46, %v1542_v20  ;;  %v1546_v30 = vmul.f32 %v3130_v43, %v1475_v16  ;;  %v1676_v32 = vmax.f32 %v1612_v23, 0.0  ;;  %v1489_v20 = vld [vmem:[#allocation2 + $0x30] sm:$0xff] }
 0x198   : > { %2521 = vst [vmem:[%s3380_s4 + $0x8] sm:$0xff] %v2369_v17   ;;  %v2379_v27 = vpack.c.bf16 %v1675_v19, %v1674_v18  ;;  %v1614_v33 = vadd.f32 %v3137_v46, %v1543_v24  ;;  %v1615_v34 = vadd.f32 %v3137_v46, %v1544_v25  ;;  %v1547_v35 = vmul.f32 %v3130_v43, %v1476_v21  ;;  %v1488_v19 = vld [vmem:[#allocation2 + $0x160] sm:$0xff] }
 0x199   : > { %2522 = vst [vmem:[%s3380_s4 + $0x10] sm:$0xff] %v2374_v22   ;;  %v1677_v36 = vmax.f32 %v1613_v28, 0.0  ;;  %v1616_v37 = vadd.f32 %v3137_v46, %v1545_v29  ;;  %v1617_v38 = vadd.f32 %v3137_v46, %v1546_v30  ;;  %v1548_v39 = vmul.f32 %v3130_v43, %v1477_v26  ;;  %v1490_v25 = vld [vmem:[#allocation2 + $0x1e0] sm:$0xff] }
 0x19a   : > { %2523 = vst [vmem:[%s3380_s4 + $0x18] sm:$0xff] %v2379_v27   ;;  %v1678_v41 = vmax.f32 %v1614_v33, 0.0  ;;  %v1679_v42 = vmax.f32 %v1615_v34, 0.0  ;;  %v1618_v44 = vadd.f32 %v3137_v46, %v1547_v35  ;;  %v1549_v45 = vmul.f32 %v3130_v43, %v1478_v31  ;;  %v1491_v26 = vld [vmem:[#allocation2] sm:$0xff]  ;;  %v1492_v31 = vld [vmem:[#allocation2 + $0xf0] sm:$0xff] }
 0x19b   : > { %v2384_v49 = vpack.c.bf16 %v1677_v36, %v1676_v32  ;;  %v1680_v50 = vmax.f32 %v1616_v37, 0.0  ;;  %v1681_v51 = vmax.f32 %v1617_v38, 0.0  ;;  %v1619_v52 = vadd.f32 %v3137_v46, %v1548_v39  ;;  %v1493_v36 = vld [vmem:[#allocation2 + $0x8] sm:$0xff] }
 0x19c   : > { %v2389_v55 = vpack.c.bf16 %v1679_v42, %v1678_v41  ;;  %v1682_v56 = vmax.f32 %v1618_v44, 0.0  ;;  %v1550_v57 = vmul.f32 %v3130_v43, %v1479_v40  ;;  %v1620_v58 = vadd.f32 %v3137_v46, %v1549_v45  ;;  %v1494_v41 = vld [vmem:[#allocation2 + $0x148] sm:$0xff] }
 0x19d   : > { %2524 = vst [vmem:[%s3380_s4 + $0x20] sm:$0xff] %v2384_v49   ;;  %v2394_v60 = vpack.c.bf16 %v1681_v51, %v1680_v50  ;;  %v1683_v61 = vmax.f32 %v1619_v52, 0.0  ;;  %v1551_v62 = vmul.f32 %v3130_v43, %v1480_v47  ;;  %v1552_v63 = vmul.f32 %v3130_v43, %v1481_v48  ;;  %v1495_v52 = vld [vmem:[#allocation2 + $0x1d0] sm:$0xff] }
 0x19e   : > { %2525 = vst [vmem:[%s3380_s4 + $0x28] sm:$0xff] %v2389_v55   ;;  %v1621_v1 = vadd.f32 %v3137_v46, %v1550_v57  ;;  %v1684_v2 = vmax.f32 %v1620_v58, 0.0  ;;  %v1553_v3 = vmul.f32 %v3130_v43, %v1482_v53  ;;  %v1554_v4 = vmul.f32 %v3130_v43, %v1483_v54  ;;  %v1496_v57 = vld [vmem:[#allocation2 + $0x100] sm:$0xff]  ;;  %v1497_v58 = vld [vmem:[#allocation2 + $0xc8] sm:$0xff] }
 0x19f   : > { %2526 = vst [vmem:[%s3380_s4 + $0x30] sm:$0xff] %v2394_v60   ;;  %v2399_v6 = vpack.c.bf16 %v1683_v61, %v1682_v56  ;;  %v1622_v7 = vadd.f32 %v3137_v46, %v1551_v62  ;;  %v1623_v8 = vadd.f32 %v3137_v46, %v1552_v63  ;;  %v1555_v9 = vmul.f32 %v3130_v43, %v1484_v59  ;;  %v1498_v63 = vld [vmem:[#allocation2 + $0x40] sm:$0xff] }
 0x1a0   : > { %v1685_v10 = vmax.f32 %v1621_v1, 0.0  ;;  %v1624_v11 = vadd.f32 %v3137_v46, %v1553_v3  ;;  %v1625_v12 = vadd.f32 %v3137_v46, %v1554_v4  ;;  %v1556_v13 = vmul.f32 %v3130_v43, %v1485_v0  ;;  %v1499_v0 = vld [vmem:[#allocation2 + $0x1f8] sm:$0xff] }
 0x1a1   : > { %2527 = vst [vmem:[%s3380_s4 + $0x38] sm:$0xff] %v2399_v6   ;;  %v1686_v15 = vmax.f32 %v1622_v7, 0.0  ;;  %v1687_v16 = vmax.f32 %v1623_v8, 0.0  ;;  %v1626_v17 = vadd.f32 %v3137_v46, %v1555_v9  ;;  %v1557_v18 = vmul.f32 %v3130_v43, %v1486_v5  ;;  %v1500_v5 = vld [vmem:[#allocation2 + $0x20] sm:$0xff] }
 0x1a2   : > { %v2404_v21 = vpack.c.bf16 %v1685_v10, %v1684_v2  ;;  %v1688_v22 = vmax.f32 %v1624_v11, 0.0  ;;  %v1689_v23 = vmax.f32 %v1625_v12, 0.0  ;;  %v1627_v24 = vadd.f32 %v3137_v46, %v1556_v13  ;;  %v1501_v10 = vld [vmem:[#allocation2 + $0x128] sm:$0xff] }
 0x1a3   : > { %v2409_v27 = vpack.c.bf16 %v1687_v16, %v1686_v15  ;;  %v1690_v28 = vmax.f32 %v1626_v17, 0.0  ;;  %v1558_v29 = vmul.f32 %v3130_v43, %v1487_v14  ;;  %v1628_v30 = vadd.f32 %v3137_v46, %v1557_v18  ;;  %v1502_v15 = vld [vmem:[#allocation2 + $0x1a0] sm:$0xff] }
 0x1a4   : > { %2528 = vst [vmem:[%s3380_s4 + $0x40] sm:$0xff] %v2404_v21   ;;  %v2414_v32 = vpack.c.bf16 %v1689_v23, %v1688_v22  ;;  %v1691_v33 = vmax.f32 %v1627_v24, 0.0  ;;  %v1559_v34 = vmul.f32 %v3130_v43, %v1488_v19  ;;  %v1560_v35 = vmul.f32 %v3130_v43, %v1489_v20  ;;  %v1503_v24 = vld [vmem:[#allocation2 + $0x1f0] sm:$0xff] }
 0x1a5   : > { %2529 = vst [vmem:[%s3380_s4 + $0x48] sm:$0xff] %v2409_v27   ;;  %v1629_v37 = vadd.f32 %v3137_v46, %v1558_v29  ;;  %v1692_v38 = vmax.f32 %v1628_v30, 0.0  ;;  %v1561_v39 = vmul.f32 %v3130_v43, %v1490_v25  ;;  %v1562_v40 = vmul.f32 %v3130_v43, %v1491_v26  ;;  %v1504_v29 = vld [vmem:[#allocation2 + $0xe8] sm:$0xff]  ;;  %v1505_v30 = vld [vmem:[#allocation2 + $0x78] sm:$0xff] }
 0x1a6   : > { %2530 = vst [vmem:[%s3380_s4 + $0x50] sm:$0xff] %v2414_v32   ;;  %v2419_v42 = vpack.c.bf16 %v1691_v33, %v1690_v28  ;;  %v1630_v44 = vadd.f32 %v3137_v46, %v1559_v34  ;;  %v1631_v45 = vadd.f32 %v3137_v46, %v1560_v35  ;;  %v1563_v47 = vmul.f32 %v3130_v43, %v1492_v31  ;;  %v1506_v35 = vld [vmem:[#allocation2 + $0x70] sm:$0xff] }
 0x1a7   : > { %v1693_v48 = vmax.f32 %v1629_v37, 0.0  ;;  %v1632_v49 = vadd.f32 %v3137_v46, %v1561_v39  ;;  %v1633_v50 = vadd.f32 %v3137_v46, %v1562_v40  ;;  %v1564_v51 = vmul.f32 %v3130_v43, %v1493_v36  ;;  %v1507_v36 = vld [vmem:[#allocation2 + $0x90] sm:$0xff] }
 0x1a8   : > { %2531 = vst [vmem:[%s3380_s4 + $0x58] sm:$0xff] %v2419_v42   ;;  %v1694_v53 = vmax.f32 %v1630_v44, 0.0  ;;  %v1695_v54 = vmax.f32 %v1631_v45, 0.0  ;;  %v1634_v55 = vadd.f32 %v3137_v46, %v1563_v47  ;;  %v1565_v56 = vmul.f32 %v3130_v43, %v1494_v41  ;;  %v1508_v41 = vld [vmem:[#allocation2 + $0x1d8] sm:$0xff] }
 0x1a9   : > { %v2424_v59 = vpack.c.bf16 %v1693_v48, %v1692_v38  ;;  %v1696_v60 = vmax.f32 %v1632_v49, 0.0  ;;  %v1697_v61 = vmax.f32 %v1633_v50, 0.0  ;;  %v1635_v62 = vadd.f32 %v3137_v46, %v1564_v51  ;;  %v1509_v48 = vld [vmem:[#allocation2 + $0xd0] sm:$0xff] }
 0x1aa   : > { %v2429_v1 = vpack.c.bf16 %v1695_v54, %v1694_v53  ;;  %v1698_v2 = vmax.f32 %v1634_v55, 0.0  ;;  %v1566_v3 = vmul.f32 %v3130_v43, %v1495_v52  ;;  %v1636_v4 = vadd.f32 %v3137_v46, %v1565_v56  ;;  %v1510_v53 = vld [vmem:[#allocation2 + $0xb8] sm:$0xff] }
 0x1ab   : > { %2532 = vst [vmem:[%s3380_s4 + $0x60] sm:$0xff] %v2424_v59   ;;  %v2434_v6 = vpack.c.bf16 %v1697_v61, %v1696_v60  ;;  %v1699_v7 = vmax.f32 %v1635_v62, 0.0  ;;  %v1567_v8 = vmul.f32 %v3130_v43, %v1496_v57  ;;  %v1568_v9 = vmul.f32 %v3130_v43, %v1497_v58  ;;  %v1511_v62 = vld [vmem:[#allocation2 + $0x88] sm:$0xff] }
 0x1ac   : > { %2533 = vst [vmem:[%s3380_s4 + $0x68] sm:$0xff] %v2429_v1   ;;  %v1637_v11 = vadd.f32 %v3137_v46, %v1566_v3  ;;  %v1700_v12 = vmax.f32 %v1636_v4, 0.0  ;;  %v1569_v13 = vmul.f32 %v3130_v43, %v1498_v63  ;;  %v1570_v14 = vmul.f32 %v3130_v43, %v1499_v0  ;;  %v1512_v3 = vld [vmem:[#allocation2 + $0xa8] sm:$0xff] }
 0x1ad   : > { %2534 = vst [vmem:[%s3380_s4 + $0x70] sm:$0xff] %v2434_v6   ;;  %v2439_v16 = vpack.c.bf16 %v1699_v7, %v1698_v2  ;;  %v1638_v17 = vadd.f32 %v3137_v46, %v1567_v8  ;;  %v1639_v18 = vadd.f32 %v3137_v46, %v1568_v9  ;;  %v1571_v19 = vmul.f32 %v3130_v43, %v1500_v5  ;;  %v1513_v4 = vld [vmem:[#allocation2 + $0x1c8] sm:$0xff]  ;;  %v1514_v9 = vld [vmem:[#allocation2 + $0x170] sm:$0xff] }
 0x1ae   : > { %v1701_v20 = vmax.f32 %v1637_v11, 0.0  ;;  %v1640_v21 = vadd.f32 %v3137_v46, %v1569_v13  ;;  %v1641_v22 = vadd.f32 %v3137_v46, %v1570_v14  ;;  %v1572_v23 = vmul.f32 %v3130_v43, %v1501_v10  ;;  %v1515_v10 = vld [vmem:[#allocation2 + $0x178] sm:$0xff] }
 0x1af   : > { %2535 = vst [vmem:[%s3380_s4 + $0x78] sm:$0xff] %v2439_v16   ;;  %v1702_v25 = vmax.f32 %v1638_v17, 0.0  ;;  %v1703_v26 = vmax.f32 %v1639_v18, 0.0  ;;  %v1642_v27 = vadd.f32 %v3137_v46, %v1571_v19  ;;  %v1573_v28 = vmul.f32 %v3130_v43, %v1502_v15  ;;  %v1516_v15 = vld [vmem:[#allocation2 + $0x68] sm:$0xff] }
 0x1b0   : > { %v2444_v31 = vpack.c.bf16 %v1701_v20, %v1700_v12  ;;  %v1704_v32 = vmax.f32 %v1640_v21, 0.0  ;;  %v1705_v33 = vmax.f32 %v1641_v22, 0.0  ;;  %v1643_v34 = vadd.f32 %v3137_v46, %v1572_v23  ;;  %v1517_v20 = vld [vmem:[#allocation2 + $0x190] sm:$0xff] }
 0x1b1   : > { %v2449_v37 = vpack.c.bf16 %v1703_v26, %v1702_v25  ;;  %v1706_v38 = vmax.f32 %v1642_v27, 0.0  ;;  %v1574_v39 = vmul.f32 %v3130_v43, %v1503_v24  ;;  %v1644_v40 = vadd.f32 %v3137_v46, %v1573_v28  ;;  %v1518_v25 = vld [vmem:[#allocation2 + $0x198] sm:$0xff] }
 0x1b2   : > { %2536 = vst [vmem:[%s3380_s4 + $0x80] sm:$0xff] %v2444_v31   ;;  %v2454_v42 = vpack.c.bf16 %v1705_v33, %v1704_v32  ;;  %v1707_v44 = vmax.f32 %v1643_v34, 0.0  ;;  %v1575_v45 = vmul.f32 %v3130_v43, %v1504_v29  ;;  %v1576_v47 = vmul.f32 %v3130_v43, %v1505_v30  ;;  %v1519_v34 = vld [vmem:[#allocation2 + $0x38] sm:$0xff] }
 0x1b3   : > { %2537 = vst [vmem:[%s3380_s4 + $0x88] sm:$0xff] %v2449_v37   ;;  %v1645_v49 = vadd.f32 %v3137_v46, %v1574_v39  ;;  %v1708_v50 = vmax.f32 %v1644_v40, 0.0  ;;  %v1577_v51 = vmul.f32 %v3130_v43, %v1506_v35  ;;  %v1578_v52 = vmul.f32 %v3130_v43, %v1507_v36  ;;  %v1520_v39 = vld [vmem:[#allocation2 + $0xc0] sm:$0xff] }
 0x1b4   : > { %2538 = vst [vmem:[%s3380_s4 + $0x90] sm:$0xff] %v2454_v42   ;;  %v2459_v54 = vpack.c.bf16 %v1707_v44, %v1706_v38  ;;  %v1646_v55 = vadd.f32 %v3137_v46, %v1575_v45  ;;  %v1647_v56 = vadd.f32 %v3137_v46, %v1576_v47  ;;  %v1579_v57 = vmul.f32 %v3130_v43, %v1508_v41  ;;  %v1521_v40 = vld [vmem:[#allocation2 + $0x1c0] sm:$0xff]  ;;  %v1522_v47 = vld [vmem:[#allocation2 + $0x158] sm:$0xff] }
 0x1b5   : > { %v1709_v58 = vmax.f32 %v1645_v49, 0.0  ;;  %v1648_v59 = vadd.f32 %v3137_v46, %v1577_v51  ;;  %v1649_v60 = vadd.f32 %v3137_v46, %v1578_v52  ;;  %v1580_v61 = vmul.f32 %v3130_v43, %v1509_v48  ;;  %v1523_v48 = vld [vmem:[#allocation2 + $0x10] sm:$0xff] }
 0x1b6   : > { %2539 = vst [vmem:[%s3380_s4 + $0x98] sm:$0xff] %v2459_v54   ;;  %v1710_v63 = vmax.f32 %v1646_v55, 0.0  ;;  %v1711_v0 = vmax.f32 %v1647_v56, 0.0  ;;  %v1650_v1 = vadd.f32 %v3137_v46, %v1579_v57  ;;  %v1581_v2 = vmul.f32 %v3130_v43, %v1510_v53  ;;  %v1524_v53 = vld [vmem:[#allocation2 + $0x58] sm:$0xff] }
 0x1b7   : > { %v2464_v5 = vpack.c.bf16 %v1709_v58, %v1708_v50  ;;  %v1712_v6 = vmax.f32 %v1648_v59, 0.0  ;;  %v1713_v7 = vmax.f32 %v1649_v60, 0.0  ;;  %v1651_v8 = vadd.f32 %v3137_v46, %v1580_v61  ;;  %v1525_v58 = vld [vmem:[#allocation2 + $0xa0] sm:$0xff] }
 0x1b8   : > { %v2469_v11 = vpack.c.bf16 %v1711_v0, %v1710_v63  ;;  %v1714_v12 = vmax.f32 %v1650_v1, 0.0  ;;  %v1582_v13 = vmul.f32 %v3130_v43, %v1511_v62  ;;  %v1652_v14 = vadd.f32 %v3137_v46, %v1581_v2 }
 0x1b9   : > { %2540 = vst [vmem:[%s3380_s4 + $0xa0] sm:$0xff] %v2464_v5   ;;  %v2474_v16 = vpack.c.bf16 %v1713_v7, %v1712_v6  ;;  %v1715_v17 = vmax.f32 %v1651_v8, 0.0  ;;  %v1583_v18 = vmul.f32 %v3130_v43, %v1512_v3  ;;  %v1584_v19 = vmul.f32 %v3130_v43, %v1513_v4 }
 0x1ba   : > { %2541 = vst [vmem:[%s3380_s4 + $0xa8] sm:$0xff] %v2469_v11   ;;  %v1653_v21 = vadd.f32 %v3137_v46, %v1582_v13  ;;  %v1716_v22 = vmax.f32 %v1652_v14, 0.0  ;;  %v1585_v23 = vmul.f32 %v3130_v43, %v1514_v9  ;;  %v1586_v24 = vmul.f32 %v3130_v43, %v1515_v10 }
 0x1bb   : > { %2542 = vst [vmem:[%s3380_s4 + $0xb0] sm:$0xff] %v2474_v16   ;;  %v2479_v26 = vpack.c.bf16 %v1715_v17, %v1714_v12  ;;  %v1654_v27 = vadd.f32 %v3137_v46, %v1583_v18  ;;  %v1655_v28 = vadd.f32 %v3137_v46, %v1584_v19  ;;  %v1587_v29 = vmul.f32 %v3130_v43, %v1516_v15 }
 0x1bc   : > { %v1717_v30 = vmax.f32 %v1653_v21, 0.0  ;;  %v1656_v31 = vadd.f32 %v3137_v46, %v1585_v23  ;;  %v1657_v32 = vadd.f32 %v3137_v46, %v1586_v24  ;;  %v1588_v33 = vmul.f32 %v3130_v43, %v1517_v20 }
 0x1bd   : > { %2543 = vst [vmem:[%s3380_s4 + $0xb8] sm:$0xff] %v2479_v26   ;;  %v1718_v35 = vmax.f32 %v1654_v27, 0.0  ;;  %v1719_v36 = vmax.f32 %v1655_v28, 0.0  ;;  %v1658_v37 = vadd.f32 %v3137_v46, %v1587_v29  ;;  %v1589_v38 = vmul.f32 %v3130_v43, %v1518_v25 }
 0x1be   : > { %v2484_v41 = vpack.c.bf16 %v1717_v30, %v1716_v22  ;;  %v1720_v42 = vmax.f32 %v1656_v31, 0.0  ;;  %v1721_v44 = vmax.f32 %v1657_v32, 0.0  ;;  %v1659_v45 = vadd.f32 %v3137_v46, %v1588_v33 }
 0x1bf   : > { %v2489_v49 = vpack.c.bf16 %v1719_v36, %v1718_v35  ;;  %v1722_v50 = vmax.f32 %v1658_v37, 0.0  ;;  %v1590_v51 = vmul.f32 %v3130_v43, %v1519_v34  ;;  %v1660_v52 = vadd.f32 %v3137_v46, %v1589_v38 }
 0x1c0   : > { %2544 = vst [vmem:[%s3380_s4 + $0xc0] sm:$0xff] %v2484_v41   ;;  %v2494_v54 = vpack.c.bf16 %v1721_v44, %v1720_v42  ;;  %v1723_v55 = vmax.f32 %v1659_v45, 0.0  ;;  %v1591_v56 = vmul.f32 %v3130_v43, %v1520_v39  ;;  %v1592_v57 = vmul.f32 %v3130_v43, %v1521_v40 }
 0x1c1   : > { %2545 = vst [vmem:[%s3380_s4 + $0xc8] sm:$0xff] %v2489_v49   ;;  %v1661_v59 = vadd.f32 %v3137_v46, %v1590_v51  ;;  %v1724_v60 = vmax.f32 %v1660_v52, 0.0  ;;  %v1593_v61 = vmul.f32 %v3130_v43, %v1522_v47  ;;  %v1594_v62 = vmul.f32 %v3130_v43, %v1523_v48 }
 0x1c2   : > { %2546 = vst [vmem:[%s3380_s4 + $0xd0] sm:$0xff] %v2494_v54   ;;  %v2499_v63 = vpack.c.bf16 %v1723_v55, %v1722_v50  ;;  %v1662_v0 = vadd.f32 %v3137_v46, %v1591_v56  ;;  %v1663_v1 = vadd.f32 %v3137_v46, %v1592_v57  ;;  %v1595_v2 = vmul.f32 %v3130_v43, %v1524_v53 }
 0x1c3   : > { %v1725_v3 = vmax.f32 %v1661_v59, 0.0  ;;  %v1664_v4 = vadd.f32 %v3137_v46, %v1593_v61  ;;  %v1665_v5 = vadd.f32 %v3137_v46, %v1594_v62  ;;  %v1596_v6 = vmul.f32 %v3130_v43, %v1525_v58 }
 0x1c4   : > { %2547 = vst [vmem:[%s3380_s4 + $0xd8] sm:$0xff] %v2499_v63   ;;  %v1726_v7 = vmax.f32 %v1662_v0, 0.0  ;;  %v1727_v8 = vmax.f32 %v1663_v1, 0.0  ;;  %v1666_v9 = vadd.f32 %v3137_v46, %v1595_v2 }
 0x1c5   : > { %v2504_v10 = vpack.c.bf16 %v1725_v3, %v1724_v60  ;;  %v1728_v11 = vmax.f32 %v1664_v4, 0.0  ;;  %v1729_v12 = vmax.f32 %v1665_v5, 0.0  ;;  %v1667_v13 = vadd.f32 %v3137_v46, %v1596_v6 }
 0x1c6   : > { %v2509_v14 = vpack.c.bf16 %v1727_v8, %v1726_v7  ;;  %v1730_v15 = vmax.f32 %v1666_v9, 0.0 }
 0x1c7   : > { %2548 = vst [vmem:[%s3380_s4 + $0xe0] sm:$0xff] %v2504_v10   ;;  %v2514_v43 = vpack.c.bf16 %v1729_v12, %v1728_v11  ;;  %v1731_v16 = vmax.f32 %v1667_v13, 0.0 }
 0x1c8   : > { %2549 = vst [vmem:[%s3380_s4 + $0xe8] sm:$0xff] %v2509_v14  }
 0x1c9   : > { %2550 = vst [vmem:[%s3380_s4 + $0xf0] sm:$0xff] %v2514_v43   ;;  %v2519_v17 = vpack.c.bf16 %v1731_v16, %v1730_v15 }
 0x1cb   : > { %2551 = vst [vmem:[%s3380_s4 + $0xf8] sm:$0xff] %v2519_v17  }
 0x1cc PF: > { %s14_s19 = sadd.s32 1, %s2807_s19   ;;  %s3381_s15 = smov %s2795_s16 }
 0x1cd   : > { %p11_p12 = scmp.ge.s32.totalorder %s14_s19, 4   ;;  %s3382_s16 = smov %s2870_s23 }
 0x1ce   : > { %s3383_s17 = smov %s2803_s18  ;;  %s3384_s18 = smov %s3386_s20 }
 0x1cf   :  { %13 = sbr.rel (!%p11_p12) target bundleno = 3 (0x3), region = 129 }

// kernel: resnet50_forward.60
= control target key start
LH: loop header
LB: loop body
LE: loop exit
PB: predicated region body
PF: predicated region fallthrough
CT: control target
= control target key end

     0   :  { %s1275_s15 = smov 0   ;;  %s1277_s16 = smov 0   ;;  %s1446_s0 = inlined_call_operand.vmem [shape: bf16[128,1152], index: 0, kind: input, shape index: {}]   ;;  %s1447_s1 = inlined_call_operand.vmem [shape: bf16[1152,128], index: 1, kind: input, shape index: {}]   ;;  %s1448_s2 = inlined_call_operand.vmem [shape: f32[1,128], index: 2, kind: input, shape index: {}]   ;;  %s1449_s3 = inlined_call_operand.vmem [shape: f32[1,128], index: 3, kind: input, shape index: {}]   ;;  %s1450_s4 = inlined_call_operand.vmem [shape: bf16[128,128], index: 4, kind: output, shape index: {}]  }
   0x1   :  { %s1279_s17 = smov 0   ;;  %s1281_s18 = smov 0  }
   0x2   :  { %s1283_s19 = smov 0  }
   0x3 LB: > { %s26_s20 = sadd.s32 1, %s1243_s18  ;;  %p49_p1 = scmp.ne.s32.totalorder %s1235_s16, %s1231_s15  ;;  %s1247_s19 = sphi %s1283_s19, %s14_s19   ;;  %s1243_s18 = sphi %s1281_s18, %s1454_s18   ;;  %s1239_s17 = sphi %s1279_s17, %s1453_s17   ;;  %s1235_s16 = sphi %s1277_s16, %s1452_s16   ;;  %s1231_s15 = sphi %s1275_s15, %s1451_s15  }
   0x4   : > { %p27_p0 = scmp.ge.s32.totalorder %s26_s20, 9  ;;  %p50_p2 = scmp.eq.s32.totalorder %s1247_s19, 0 }
   0x5   : > { %s42_s22 = sadd.s32 1, %s1235_s16  ;;  %p978_p5 = scmp.ge.s32.totalorder %s1247_s19, 9 }
   0x6   : > { %s1456_s20 = smov (%p27_p0, %s26_s20), 0  ;;  %p51_p3 = por %p50_p2, %p49_p1 }
   0x7   : > { %s38_s21 = ssub.s32 %s1243_s18, %s1456_s20  ;;  %195 = sbr.rel (%p978_p5) target bundleno = 26 (0x1a), region = 24 }
   0x8   : > { %p40_p4 = scmp.eq.s32.totalorder %s38_s21, 0 }
   0xa   : > { %s1310_s23 = scalar_select %p40_p4, %s1235_s16, %s42_s22  }
   0xc   : > { %198 = sbr.rel (!%p51_p3) target bundleno = 26 (0x1a), region = 28  ;;  %s200_s24 = sand.u32 (%p51_p3), 1, %s1235_s16  }
   0xd   : > { %s980_s25 = sshll.u32 (%p51_p3), %s1243_s18, 2  ;;  %s979_s26 = sshll.u32 (%p51_p3), %s200_s24, 6 }
   0xe   : > { %s1318_s29 = scalar_lea.vmem (%p51_p3), %s1446_s0, %s980_s25  ;;  %s202_s30 = scalar_lea.vmem (%p51_p3), [#allocation3], %s979_s26 }
   0xf   : > { %v224_v0 = vld [vmem:[%s1318_s29] sm:$0xf] (%p51_p3)  ;;  %v226_v1 = vld [vmem:[%s1318_s29 + $0x24] sm:$0xf] (%p51_p3)  ;;  %v228_v2 = vld [vmem:[%s1318_s29 + $0x48] sm:$0xf] (%p51_p3) }
  0x10   : > { %225 = vst [vmem:[%s202_s30] sm:$0xf] (%p51_p3), %v224_v0  ;;  %227 = vst [vmem:[%s202_s30 + $0x4] sm:$0xf] (%p51_p3), %v226_v1  ;;  %v230_v3 = vld [vmem:[%s1318_s29 + $0x6c] sm:$0xf] (%p51_p3) }
  0x11   : > { %v232_v4 = vld [vmem:[%s1318_s29 + $0x90] sm:$0xf]  ;;  %229 = vst [vmem:[%s202_s30 + $0x8] sm:$0xf] %v228_v2  ;;  %231 = vst [vmem:[%s202_s30 + $0xc] sm:$0xf] %v230_v3 }
  0x12   : > { %233 = vst [vmem:[%s202_s30 + $0x10] sm:$0xf] %v232_v4  ;;  %v234_v5 = vld [vmem:[%s1318_s29 + $0xb4] sm:$0xf]  ;;  %v236_v6 = vld [vmem:[%s1318_s29 + $0xd8] sm:$0xf] }
  0x13   : > { %v238_v7 = vld [vmem:[%s1318_s29 + $0xfc] sm:$0xf]  ;;  %235 = vst [vmem:[%s202_s30 + $0x14] sm:$0xf] %v234_v5  ;;  %237 = vst [vmem:[%s202_s30 + $0x18] sm:$0xf] %v236_v6 }
  0x14   : > { %239 = vst [vmem:[%s202_s30 + $0x1c] sm:$0xf] %v238_v7  ;;  %v240_v8 = vld [vmem:[%s1318_s29 + $0x120] sm:$0xf]  ;;  %v242_v9 = vld [vmem:[%s1318_s29 + $0x144] sm:$0xf] }
  0x15   : > { %v244_v10 = vld [vmem:[%s1318_s29 + $0x168] sm:$0xf]  ;;  %241 = vst [vmem:[%s202_s30 + $0x20] sm:$0xf] %v240_v8  ;;  %243 = vst [vmem:[%s202_s30 + $0x24] sm:$0xf] %v242_v9 }
  0x16   : > { %245 = vst [vmem:[%s202_s30 + $0x28] sm:$0xf] %v244_v10  ;;  %v246_v11 = vld [vmem:[%s1318_s29 + $0x18c] sm:$0xf]  ;;  %v248_v12 = vld [vmem:[%s1318_s29 + $0x1b0] sm:$0xf] }
  0x17   : > { %v250_v13 = vld [vmem:[%s1318_s29 + $0x1d4] sm:$0xf]  ;;  %247 = vst [vmem:[%s202_s30 + $0x2c] sm:$0xf] %v246_v11  ;;  %249 = vst [vmem:[%s202_s30 + $0x30] sm:$0xf] %v248_v12 }
  0x18   : > { %251 = vst [vmem:[%s202_s30 + $0x34] sm:$0xf] %v250_v13  ;;  %v252_v14 = vld [vmem:[%s1318_s29 + $0x1f8] sm:$0xf]  ;;  %v254_v15 = vld [vmem:[%s1318_s29 + $0x21c] sm:$0xf] }
  0x19   : > { %253 = vst [vmem:[%s202_s30 + $0x38] sm:$0xf] %v252_v14  ;;  %255 = vst [vmem:[%s202_s30 + $0x3c] sm:$0xf] %v254_v15 }
  0x1a PF: > { %p981_p6 = scmp.ge.s32.totalorder %s1247_s19, 1  ;;  %p322_p7 = scmp.lt.s32.totalorder %s1247_s19, 10 }
  0x1c   : > { %p323_p8 = pnand %p981_p6, %p322_p7 }
  0x1d   : > { %s329_s5 = sand.u32 (!%p323_p8), 1, %s1231_s15   ;;  %s983_s6 = sshll.u32 (!%p323_p8), %s1239_s17, 4 }
  0x1e   : > { %326 = sbr.rel (%p323_p8) target bundleno = 313 (0x139), region = 73  ;;  %s982_s7 = sshll.u32 (!%p323_p8), %s329_s5, 6 }
  0x1f   : > { %p373_p9 = scmp.lt.s32.totalorder (!%p323_p8), %s983_s6, 143  ;;  %s1345_s12 = scalar_lea.vmem (!%p323_p8), [#allocation3], %s982_s7 }
  0x20   : > { %p985_p10 = scmp.ne.s32.totalorder (!%p323_p8), %s1239_s17, 0 }
  0x23   : > { %s1458_s6 = smov (!%p373_p9, %s983_s6), 143  ;;  %400 = sbr.rel (%p985_p10) target bundleno = 49 (0x31), region = 81 }
  0x24   : > { %s984_s8 = sshll.u32 %s1458_s6, 2 }
  0x25   : > { %s1343_s11 = scalar_lea.vmem %s1447_s1, %s984_s8 }
  0x28   : > { %v1249_v16 = vmov 0.0  }
  0x29   : > { %401 = vst [vmem:[#allocation2 + $0x30] sm:$0xff] %v1249_v16  ;;  %402 = vst [vmem:[#allocation2] sm:$0xff] %v1249_v16 }
  0x2a   : > { %403 = vst [vmem:[#allocation2 + $0x58] sm:$0xff] %v1249_v16  ;;  %404 = vst [vmem:[#allocation2 + $0x18] sm:$0xff] %v1249_v16 }
  0x2b   : > { %405 = vst [vmem:[#allocation2 + $0x50] sm:$0xff] %v1249_v16  ;;  %406 = vst [vmem:[#allocation2 + $0x68] sm:$0xff] %v1249_v16 }
  0x2c   : > { %407 = vst [vmem:[#allocation2 + $0x8] sm:$0xff] %v1249_v16  ;;  %408 = vst [vmem:[#allocation2 + $0x48] sm:$0xff] %v1249_v16 }
  0x2d   : > { %409 = vst [vmem:[#allocation2 + $0x40] sm:$0xff] %v1249_v16  ;;  %410 = vst [vmem:[#allocation2 + $0x20] sm:$0xff] %v1249_v16 }
  0x2e   : > { %411 = vst [vmem:[#allocation2 + $0x10] sm:$0xff] %v1249_v16  ;;  %412 = vst [vmem:[#allocation2 + $0x38] sm:$0xff] %v1249_v16 }
  0x2f   : > { %413 = vst [vmem:[#allocation2 + $0x60] sm:$0xff] %v1249_v16  ;;  %414 = vst [vmem:[#allocation2 + $0x70] sm:$0xff] %v1249_v16 }
  0x30   : > { %415 = vst [vmem:[#allocation2 + $0x78] sm:$0xff] %v1249_v16  ;;  %416 = vst [vmem:[#allocation2 + $0x28] sm:$0xff] %v1249_v16 }
  0x31 PF: > { %v1193_v17 = vld [vmem:[%s1343_s11 + $0x38] sm:$0xff]   ;;  %v1194_v18 = vld [vmem:[%s1343_s11 + $0x30] sm:$0xff]   ;;  %v1195_v19 = vld [vmem:[%s1343_s11 + $0x28] sm:$0xff]   ;;  %p1002_p11 = scmp.ne.s32.totalorder %s1239_s17, 8 }
  0x32   : > { %1104 = vmatprep.subr.bf16.mxu0 %v1193_v17  ;;  %1136 = vmatprep.subr.bf16.mxu1 %v1193_v17  ;;  %v1196_v20 = vld [vmem:[%s1343_s11 + $0x20] sm:$0xff]   ;;  %v1201_v21 = vld [vmem:[%s1345_s12] sm:$0xff]   ;;  %v1197_v23 = vld [vmem:[%s1343_s11 + $0x18] sm:$0xff]  }
  0x33   : > { %1105 = vmatpush3.bf16.msra.mxu0 %v1193_v17  ;;  %1144 = vmatpush3.bf16.msra.mxu1 %v1193_v17  ;;  %v1202_v22 = vld [vmem:[%s1345_s12 + $0x20] sm:$0xff]   ;;  %v1199_v25 = vld [vmem:[%s1343_s11 + $0x8] sm:$0xff]   ;;  %v1200_v26 = vld [vmem:[%s1343_s11] sm:$0xff]  }
  0x34   : > { %1106 = vmatprep.subr.bf16.mxu0 %v1194_v18  ;;  %1137 = vmatprep.subr.bf16.mxu1 %v1194_v18  ;;  %v1198_v24 = vld [vmem:[%s1343_s11 + $0x10] sm:$0xff]   ;;  %v1203_v27 = vld [vmem:[%s1345_s12 + $0x8] sm:$0xff]   ;;  %v1205_v29 = vld [vmem:[%s1345_s12 + $0x10] sm:$0xff]  }
  0x35   : > { %1120 = vmatprep.mubr.bf16.mxu0 %v1201_v21  ;;  %1128 = vmatprep.mubr.bf16.mxu1 %v1202_v22  ;;  %v1204_v28 = vld [vmem:[%s1345_s12 + $0x28] sm:$0xff]   ;;  %v1206_v30 = vld [vmem:[%s1345_s12 + $0x30] sm:$0xff]   ;;  %v1207_v31 = vld [vmem:[%s1345_s12 + $0x18] sm:$0xff]  }
  0x36   : > { %v1208_v32 = vld [vmem:[%s1345_s12 + $0x38] sm:$0xff]   ;;  %v427_v34 = vld [vmem:[#allocation2 + $0x10] sm:$0xff]  ;;  %v425_v38 = vld [vmem:[#allocation2 + $0x40] sm:$0xff] }
  0x37   : > { %1107 = vmatpush3.bf16.msra.mxu0 %v1194_v18  ;;  %1145 = vmatpush3.bf16.msra.mxu1 %v1194_v18  ;;  %v419_v33 = vld [vmem:[#allocation2 + $0x58] sm:$0xff]  ;;  %v417_v37 = vld [vmem:[#allocation2 + $0x30] sm:$0xff]  ;;  %v418_v49 = vld [vmem:[#allocation2] sm:$0xff] }
  0x38   : > { %1108 = vmatprep.subr.bf16.mxu0 %v1195_v19  ;;  %1138 = vmatprep.subr.bf16.mxu1 %v1195_v19  ;;  %v420_v43 = vld [vmem:[#allocation2 + $0x18] sm:$0xff]  ;;  %v426_v50 = vld [vmem:[#allocation2 + $0x20] sm:$0xff]  ;;  %v423_v55 = vld [vmem:[#allocation2 + $0x8] sm:$0xff] }
  0x39   : > { %v428_v44 = vld [vmem:[#allocation2 + $0x38] sm:$0xff]  ;;  %v421_v61 = vld [vmem:[#allocation2 + $0x50] sm:$0xff]  ;;  %v429_v62 = vld [vmem:[#allocation2 + $0x60] sm:$0xff] }
  0x3a   : > { %v431_v56 = vld [vmem:[#allocation2 + $0x78] sm:$0xff]  ;;  %v424_v3 = vld [vmem:[#allocation2 + $0x48] sm:$0xff]  ;;  %v430_v10 = vld [vmem:[#allocation2 + $0x70] sm:$0xff] }
  0x3b   : > { %1109 = vmatpush3.bf16.msra.mxu0 %v1195_v19  ;;  %1146 = vmatpush3.bf16.msra.mxu1 %v1195_v19  ;;  %v432_v4 = vld [vmem:[#allocation2 + $0x28] sm:$0xff] }
  0x3c   : > { %1110 = vmatprep.subr.bf16.mxu0 %v1196_v20  ;;  %1139 = vmatprep.subr.bf16.mxu1 %v1196_v20  ;;  %v422_v9 = vld [vmem:[#allocation2 + $0x68] sm:$0xff] }
  0x3f   : > { %1111 = vmatpush3.bf16.msra.mxu0 %v1196_v20  ;;  %1147 = vmatpush3.bf16.msra.mxu1 %v1196_v20 }
  0x40   : > { %1112 = vmatprep.subr.bf16.mxu0 %v1197_v23  ;;  %1140 = vmatprep.subr.bf16.mxu1 %v1197_v23 }
  0x43   : > { %1113 = vmatpush3.bf16.msra.mxu0 %v1197_v23  ;;  %1148 = vmatpush3.bf16.msra.mxu1 %v1197_v23 }
  0x44   : > { %1114 = vmatprep.subr.bf16.mxu0 %v1198_v24  ;;  %1141 = vmatprep.subr.bf16.mxu1 %v1198_v24 }
  0x47   : > { %1115 = vmatpush3.bf16.msra.mxu0 %v1198_v24  ;;  %1149 = vmatpush3.bf16.msra.mxu1 %v1198_v24 }
  0x48   : > { %1116 = vmatprep.subr.bf16.mxu0 %v1199_v25  ;;  %1142 = vmatprep.subr.bf16.mxu1 %v1199_v25 }
  0x4b   : > { %1117 = vmatpush3.bf16.msra.mxu0 %v1199_v25  ;;  %1150 = vmatpush3.bf16.msra.mxu1 %v1199_v25 }
  0x4c   : > { %1118 = vmatprep.subr.bf16.mxu0 %v1200_v26  ;;  %1143 = vmatprep.subr.bf16.mxu1 %v1200_v26 }
  0x4f   : > { %1119 = vmatpush3.bf16.msra.mxu0 %v1200_v26  ;;  %1151 = vmatpush3.bf16.msra.mxu1 %v1200_v26 }
  0x52   : > { %1121 = vmatmul.mubr.bf16.vlgmr.msra.gmra.mxu0 %v1203_v27  ;;  %1129 = vmatmul.mubr.bf16.vlgmr.msra.gmra.mxu1 %v1204_v28 }
  0x53   : > { %1124 = vmatprep.mubr.bf16.mxu0 %v1205_v29  ;;  %1132 = vmatprep.mubr.bf16.mxu1 %v1206_v30 }
  0x5a   : > { %1125 = vmatmul.mubr.bf16.gmra.mxu0 %v1207_v31  ;;  %1133 = vmatmul.mubr.bf16.gmra.mxu1 %v1208_v32 }
 0x112   : > { %v1122_v35 = vpop.f32.mrf.mxu0  ;;  %v1130_v36 = vpop.f32.mrf.mxu1 }
 0x113   : > { %v660_v39 = vadd.f32 %v1122_v35, %v419_v33  ;;  %v668_v40 = vadd.f32 %v1130_v36, %v427_v34 }
 0x114   : > { %v595_v41 = vpop.f32.mrf.mxu0  ;;  %v627_v42 = vpop.f32.mrf.mxu1 }
 0x115   : > { %676 = vst [vmem:[#allocation2 + $0x58] sm:$0xff] %v660_v39  ;;  %684 = vst [vmem:[#allocation2 + $0x10] sm:$0xff] %v668_v40  ;;  %v658_v45 = vadd.f32 %v595_v41, %v417_v37  ;;  %v666_v46 = vadd.f32 %v627_v42, %v425_v38 }
 0x116   : > { %v1123_v47 = vpop.f32.mrf.mxu0  ;;  %v1131_v48 = vpop.f32.mrf.mxu1 }
 0x117   : > { %674 = vst [vmem:[#allocation2 + $0x30] sm:$0xff] %v658_v45  ;;  %682 = vst [vmem:[#allocation2 + $0x40] sm:$0xff] %v666_v46  ;;  %v661_v51 = vadd.f32 %v1123_v47, %v420_v43  ;;  %v669_v52 = vadd.f32 %v1131_v48, %v428_v44 }
 0x118   : > { %v598_v53 = vpop.f32.mrf.mxu0  ;;  %v630_v54 = vpop.f32.mrf.mxu1 }
 0x119   : > { %677 = vst [vmem:[#allocation2 + $0x18] sm:$0xff] %v661_v51  ;;  %685 = vst [vmem:[#allocation2 + $0x38] sm:$0xff] %v669_v52  ;;  %v659_v57 = vadd.f32 %v598_v53, %v418_v49  ;;  %v667_v58 = vadd.f32 %v630_v54, %v426_v50 }
 0x11a   : > { %v1126_v59 = vpop.f32.mrf.mxu0  ;;  %v1134_v60 = vpop.f32.mrf.mxu1 }
 0x11b   : > { %675 = vst [vmem:[#allocation2] sm:$0xff] %v659_v57  ;;  %683 = vst [vmem:[#allocation2 + $0x20] sm:$0xff] %v667_v58  ;;  %v664_v63 = vadd.f32 %v1126_v59, %v423_v55  ;;  %v672_v0 = vadd.f32 %v1134_v60, %v431_v56 }
 0x11c   : > { %v611_v1 = vpop.f32.mrf.mxu0  ;;  %v643_v2 = vpop.f32.mrf.mxu1 }
 0x11d   : > { %680 = vst [vmem:[#allocation2 + $0x8] sm:$0xff] %v664_v63  ;;  %688 = vst [vmem:[#allocation2 + $0x78] sm:$0xff] %v672_v0  ;;  %v662_v5 = vadd.f32 %v611_v1, %v421_v61  ;;  %v670_v6 = vadd.f32 %v643_v2, %v429_v62 }
 0x11e   : > { %v1127_v7 = vpop.f32.mrf.mxu0  ;;  %v1135_v8 = vpop.f32.mrf.mxu1 }
 0x11f   : > { %678 = vst [vmem:[#allocation2 + $0x50] sm:$0xff] %v662_v5  ;;  %686 = vst [vmem:[#allocation2 + $0x60] sm:$0xff] %v670_v6  ;;  %v665_v11 = vadd.f32 %v1127_v7, %v424_v3  ;;  %v673_v12 = vadd.f32 %v1135_v8, %v432_v4  ;;  %693 = sbr.rel (%p1002_p11) target bundleno = 313 (0x139), region = 85 }
 0x120   : > { %v614_v13 = vpop.f32.mrf.mxu0  ;;  %v646_v14 = vpop.f32.mrf.mxu1 }
 0x121   : > { %681 = vst [vmem:[#allocation2 + $0x48] sm:$0xff] %v665_v11  ;;  %689 = vst [vmem:[#allocation2 + $0x28] sm:$0xff] %v673_v12  ;;  %v663_v15 = vadd.f32 %v614_v13, %v422_v9  ;;  %v671_v16 = vadd.f32 %v646_v14, %v430_v10 }
 0x123   : > { %679 = vst [vmem:[#allocation2 + $0x68] sm:$0xff] %v663_v15  ;;  %687 = vst [vmem:[#allocation2 + $0x70] sm:$0xff] %v671_v16 }
 0x124   : > { %v694_v17 = vld [vmem:[#allocation2 + $0x30] sm:$0xff]  ;;  %v695_v18 = vld [vmem:[#allocation2] sm:$0xff]  ;;  %v696_v23 = vld [vmem:[#allocation2 + $0x58] sm:$0xff] }
 0x125   : > { %v1368_v19 = vld [vmem:[%s1448_s2] ss:$0 sm:$0xff]  ;;  %v697_v24 = vld [vmem:[#allocation2 + $0x18] sm:$0xff]  ;;  %v700_v29 = vld [vmem:[#allocation2 + $0x8] sm:$0xff] }
 0x126   : > { %v717_v20 = vmul.f32 %v1368_v19, %v694_v17  ;;  %v718_v21 = vmul.f32 %v1368_v19, %v695_v18  ;;  %v1375_v22 = vld [vmem:[%s1449_s3] ss:$0 sm:$0xff]  ;;  %v719_v25 = vmul.f32 %v1368_v19, %v696_v23  ;;  %v720_v26 = vmul.f32 %v1368_v19, %v697_v24  ;;  %v702_v39 = vld [vmem:[#allocation2 + $0x40] sm:$0xff]  ;;  %v705_v50 = vld [vmem:[#allocation2 + $0x38] sm:$0xff] }
 0x127   : > { %v698_v27 = vld [vmem:[#allocation2 + $0x50] sm:$0xff]  ;;  %v723_v37 = vmul.f32 %v1368_v19, %v700_v29  ;;  %v703_v44 = vld [vmem:[#allocation2 + $0x20] sm:$0xff]  ;;  %v725_v54 = vmul.f32 %v1368_v19, %v702_v39  ;;  %v708_v61 = vld [vmem:[#allocation2 + $0x78] sm:$0xff]  ;;  %v728_v1 = vmul.f32 %v1368_v19, %v705_v50 }
 0x128   : > { %v740_v30 = vadd.f32 %v1375_v22, %v717_v20  ;;  %v741_v31 = vadd.f32 %v1375_v22, %v718_v21  ;;  %v721_v32 = vmul.f32 %v1368_v19, %v698_v27  ;;  %v701_v34 = vld [vmem:[#allocation2 + $0x48] sm:$0xff]  ;;  %v742_v35 = vadd.f32 %v1375_v22, %v719_v25  ;;  %v704_v49 = vld [vmem:[#allocation2 + $0x10] sm:$0xff]  ;;  %v706_v55 = vld [vmem:[#allocation2 + $0x60] sm:$0xff] }
 0x129   : > { %v743_v36 = vadd.f32 %v1375_v22, %v720_v26  ;;  %v724_v38 = vmul.f32 %v1368_v19, %v701_v34  ;;  %v746_v47 = vadd.f32 %v1375_v22, %v723_v37  ;;  %v726_v60 = vmul.f32 %v1368_v19, %v703_v44  ;;  %v709_v2 = vld [vmem:[#allocation2 + $0x28] sm:$0xff] }
 0x12a   : > { %v699_v28 = vld [vmem:[#allocation2 + $0x68] sm:$0xff]  ;;  %v756_v40 = vmax.f32 %v740_v30, 0.0  ;;  %v757_v41 = vmax.f32 %v741_v31, 0.0  ;;  %v744_v42 = vadd.f32 %v1375_v22, %v721_v32  ;;  %v758_v45 = vmax.f32 %v742_v35, 0.0  ;;  %v707_v56 = vld [vmem:[#allocation2 + $0x70] sm:$0xff] }
 0x12b   : > { %v722_v33 = vmul.f32 %v1368_v19, %v699_v28  ;;  %v759_v46 = vmax.f32 %v743_v36, 0.0  ;;  %v747_v48 = vadd.f32 %v1375_v22, %v724_v38  ;;  %v762_v58 = vmax.f32 %v746_v47, 0.0 }
 0x12c   : > { %v1044_v51 = vpack.c.bf16 %v757_v41, %v756_v40  ;;  %v760_v52 = vmax.f32 %v744_v42, 0.0  ;;  %v748_v63 = vadd.f32 %v1375_v22, %v725_v54  ;;  %v727_v0 = vmul.f32 %v1368_v19, %v704_v49 }
 0x12d   : > { %v745_v43 = vadd.f32 %v1375_v22, %v722_v33  ;;  %v1049_v57 = vpack.c.bf16 %v759_v46, %v758_v45  ;;  %v763_v59 = vmax.f32 %v747_v48, 0.0  ;;  %v749_v4 = vadd.f32 %v1375_v22, %v726_v60 }
 0x12e   : > { %1045 = vst [vmem:[%s1450_s4] sm:$0xff] %v1044_v51   ;;  %v729_v5 = vmul.f32 %v1368_v19, %v706_v55  ;;  %v730_v6 = vmul.f32 %v1368_v19, %v707_v56  ;;  %v764_v7 = vmax.f32 %v748_v63, 0.0  ;;  %v750_v8 = vadd.f32 %v1375_v22, %v727_v0 }
 0x12f   : > { %v761_v53 = vmax.f32 %v745_v43, 0.0  ;;  %1081 = vst [vmem:[%s1450_s4 + $0x8] sm:$0xff] %v1049_v57   ;;  %v1059_v3 = vpack.c.bf16 %v763_v59, %v762_v58  ;;  %v751_v9 = vadd.f32 %v1375_v22, %v728_v1  ;;  %v731_v10 = vmul.f32 %v1368_v19, %v708_v61 }
 0x130   : > { %v765_v11 = vmax.f32 %v749_v4, 0.0  ;;  %v752_v12 = vadd.f32 %v1375_v22, %v729_v5  ;;  %v753_v13 = vadd.f32 %v1375_v22, %v730_v6  ;;  %v732_v14 = vmul.f32 %v1368_v19, %v709_v2 }
 0x131   : > { %v1054_v62 = vpack.c.bf16 %v761_v53, %v760_v52  ;;  %1083 = vst [vmem:[%s1450_s4 + $0x18] sm:$0xff] %v1059_v3   ;;  %v766_v15 = vmax.f32 %v750_v8, 0.0  ;;  %v767_v16 = vmax.f32 %v751_v9, 0.0  ;;  %v754_v17 = vadd.f32 %v1375_v22, %v731_v10 }
 0x132   : > { %v1064_v18 = vpack.c.bf16 %v765_v11, %v764_v7  ;;  %v768_v20 = vmax.f32 %v752_v12, 0.0  ;;  %v769_v21 = vmax.f32 %v753_v13, 0.0  ;;  %v755_v23 = vadd.f32 %v1375_v22, %v732_v14 }
 0x133   : > { %1082 = vst [vmem:[%s1450_s4 + $0x10] sm:$0xff] %v1054_v62   ;;  %v1069_v24 = vpack.c.bf16 %v767_v16, %v766_v15  ;;  %v770_v25 = vmax.f32 %v754_v17, 0.0 }
 0x134   : > { %1084 = vst [vmem:[%s1450_s4 + $0x20] sm:$0xff] %v1064_v18   ;;  %v1074_v26 = vpack.c.bf16 %v769_v21, %v768_v20  ;;  %v771_v27 = vmax.f32 %v755_v23, 0.0 }
 0x135   : > { %1085 = vst [vmem:[%s1450_s4 + $0x28] sm:$0xff] %v1069_v24  }
 0x136   : > { %1086 = vst [vmem:[%s1450_s4 + $0x30] sm:$0xff] %v1074_v26   ;;  %v1079_v19 = vpack.c.bf16 %v771_v27, %v770_v25 }
 0x138   : > { %1087 = vst [vmem:[%s1450_s4 + $0x38] sm:$0xff] %v1079_v19  }
 0x139 PF: > { %s14_s19 = sadd.s32 1, %s1247_s19   ;;  %s1451_s15 = smov %s1235_s16 }
 0x13a   : > { %p11_p12 = scmp.ge.s32.totalorder %s14_s19, 11   ;;  %s1452_s16 = smov %s1310_s23 }
 0x13b   : > { %s1453_s17 = smov %s1243_s18  ;;  %s1454_s18 = smov %s1456_s20 }
 0x13c   :  { %13 = sbr.rel (!%p11_p12) target bundleno = 3 (0x3), region = 129 }

// kernel: resnet50_forward.58
= control target key start
LH: loop header
LB: loop body
LE: loop exit
PB: predicated region body
PF: predicated region fallthrough
CT: control target
= control target key end

     0   :  { %v767_v1 = vmov 0   ;;  %v460_v25 = vlaneseq  ;;  %s999_s1 = inlined_call_operand.vmem [shape: bf16[128,256], index: 1, kind: input, shape index: {}]   ;;  %s1000_s0 = inlined_call_operand.vmem [shape: bf16[128,128], index: 0, kind: input, shape index: {}]   ;;  %s1001_s2 = inlined_call_operand.vmem [shape: f32[1,256], index: 2, kind: input, shape index: {}]   ;;  %s1002_s3 = inlined_call_operand.vmem [shape: f32[1,256], index: 3, kind: input, shape index: {}]   ;;  %s1003_s4 = inlined_call_operand.vmem [shape: bf16[128,256], index: 4, kind: output, shape index: {}]  }
   0x1   :  { %v735_v0 = vld [vmem:[%s999_s1 + $0x74] ss:$8 sps:$4 sm:$0xff]   ;;  %278 = vmatprep.mubr.bf16.mxu0 %v767_v1  ;;  %318 = vmatprep.mubr.bf16.mxu1 %v767_v1  ;;  %v737_v2 = vld [vmem:[%s999_s1 + $0x70] ss:$8 sps:$4 sm:$0xff]   ;;  %v738_v3 = vld [vmem:[%s999_s1 + $0x64] ss:$8 sps:$4 sm:$0xff]  }
   0x2   :  { %246 = vmatprep.subr.bf16.mxu0 %v735_v0  ;;  %718 = vmatprep.subr.bf16.mxu1 %v735_v0  ;;  %v740_v4 = vld [vmem:[%s999_s1 + $0x60] ss:$8 sps:$4 sm:$0xff]   ;;  %v741_v5 = vld [vmem:[%s999_s1 + $0x54] ss:$8 sps:$4 sm:$0xff]   ;;  %v743_v6 = vld [vmem:[%s999_s1 + $0x50] ss:$8 sps:$4 sm:$0xff]  }
   0x3   :  { %247 = vmatpush1.bf16.msra.mxu0 %v737_v2  ;;  %726 = vmatpush1.bf16.msra.mxu1 %v737_v2  ;;  %v744_v7 = vld [vmem:[%s999_s1 + $0x44] ss:$8 sps:$4 sm:$0xff]   ;;  %v746_v8 = vld [vmem:[%s999_s1 + $0x40] ss:$8 sps:$4 sm:$0xff]   ;;  %v747_v9 = vld [vmem:[%s999_s1 + $0x34] ss:$8 sps:$4 sm:$0xff]  }
   0x4   :  { %248 = vmatprep.subr.bf16.mxu0 %v738_v3  ;;  %719 = vmatprep.subr.bf16.mxu1 %v738_v3  ;;  %v749_v10 = vld [vmem:[%s999_s1 + $0x30] ss:$8 sps:$4 sm:$0xff]   ;;  %v750_v11 = vld [vmem:[%s999_s1 + $0x24] ss:$8 sps:$4 sm:$0xff]   ;;  %v752_v12 = vld [vmem:[%s999_s1 + $0x20] ss:$8 sps:$4 sm:$0xff]  }
   0x5   :  { %v753_v13 = vld [vmem:[%s999_s1 + $0x14] ss:$8 sps:$4 sm:$0xff]   ;;  %v755_v14 = vld [vmem:[%s999_s1 + $0x10] ss:$8 sps:$4 sm:$0xff]   ;;  %v756_v15 = vld [vmem:[%s999_s1 + $0x4] ss:$8 sps:$4 sm:$0xff]  }
   0x6   :  { %v758_v16 = vld [vmem:[%s999_s1] ss:$8 sps:$4 sm:$0xff]   ;;  %v763_v21 = vld [vmem:[%s1000_s0 + $0x10] sm:$0xff]   ;;  %v765_v23 = vld [vmem:[%s1000_s0 + $0x18] sm:$0xff]   ;;  %v461_v26 = vshrl.u32 %v460_v25, 7 }
   0x7   :  { %249 = vmatpush1.bf16.msra.mxu0 %v740_v4  ;;  %727 = vmatpush1.bf16.msra.mxu1 %v740_v4  ;;  %v759_v17 = vld [vmem:[%s1000_s0] sm:$0xff]   ;;  %v761_v19 = vld [vmem:[%s1000_s0 + $0x8] sm:$0xff]   ;;  %v764_v22 = vld [vmem:[%s1000_s0 + $0x30] sm:$0xff]  }
   0x8   :  { %250 = vmatprep.subr.bf16.mxu0 %v741_v5  ;;  %720 = vmatprep.subr.bf16.mxu1 %v741_v5  ;;  %v760_v18 = vld [vmem:[%s1000_s0 + $0x20] sm:$0xff]   ;;  %v762_v20 = vld [vmem:[%s1000_s0 + $0x28] sm:$0xff]   ;;  %v766_v24 = vld [vmem:[%s1000_s0 + $0x38] sm:$0xff]   ;;  %v462_v27 = vsub.s32 0, %v461_v26  ;;  %v466_v29 = vsub.s32 1, %v461_v26 }
   0x9   :  { %v458_v28 = vld [vmem:[%s1001_s2] sm:$0x3] }
   0xa   :  { %v876_v30 = vrot.slane %v458_v28, %v462_v27  ;;  %v502_v31 = vld [vmem:[%s1002_s3] sm:$0x3]  ;;  %v881_v32 = vrot.slane %v458_v28, %v466_v29 }
   0xb   :  { %251 = vmatpush1.bf16.msra.mxu0 %v743_v6  ;;  %728 = vmatpush1.bf16.msra.mxu1 %v743_v6  ;;  %v884_v36 = vrot.slane %v502_v31, %v462_v27  ;;  %v887_v38 = vrot.slane %v502_v31, %v466_v29 }
   0xc   :  { %252 = vmatprep.subr.bf16.mxu0 %v744_v7  ;;  %721 = vmatprep.subr.bf16.mxu1 %v744_v7 }
   0xf   :  { %253 = vmatpush1.bf16.msra.mxu0 %v746_v8  ;;  %729 = vmatpush1.bf16.msra.mxu1 %v746_v8 }
  0x10   :  { %254 = vmatprep.subr.bf16.mxu0 %v747_v9  ;;  %722 = vmatprep.subr.bf16.mxu1 %v747_v9 }
  0x13   :  { %255 = vmatpush1.bf16.msra.mxu0 %v749_v10  ;;  %730 = vmatpush1.bf16.msra.mxu1 %v749_v10 }
  0x14   :  { %256 = vmatprep.subr.bf16.mxu0 %v750_v11  ;;  %723 = vmatprep.subr.bf16.mxu1 %v750_v11 }
  0x17   :  { %257 = vmatpush1.bf16.msra.mxu0 %v752_v12  ;;  %731 = vmatpush1.bf16.msra.mxu1 %v752_v12 }
  0x18   :  { %258 = vmatprep.subr.bf16.mxu0 %v753_v13  ;;  %724 = vmatprep.subr.bf16.mxu1 %v753_v13 }
  0x1b   :  { %259 = vmatpush1.bf16.msra.mxu0 %v755_v14  ;;  %732 = vmatpush1.bf16.msra.mxu1 %v755_v14 }
  0x1c   :  { %260 = vmatprep.subr.bf16.mxu0 %v756_v15  ;;  %725 = vmatprep.subr.bf16.mxu1 %v756_v15 }
  0x1f   :  { %261 = vmatpush1.bf16.msra.mxu0 %v758_v16  ;;  %733 = vmatpush1.bf16.msra.mxu1 %v758_v16 }
  0x22   :  { %279 = vmatmul.mubr.bf16.vlgmr.msra.gmra.mxu0 %v759_v17  ;;  %319 = vmatmul.mubr.bf16.vlgmr.msra.gmra.mxu1 %v760_v18 }
  0x23   :  { %288 = vmatprep.mubr.bf16.mxu0 %v767_v1  ;;  %328 = vmatprep.mubr.bf16.mxu1 %v767_v1 }
  0x2a   :  { %289 = vmatmul.mubr.bf16.gmra.mxu0 %v761_v19  ;;  %329 = vmatmul.mubr.bf16.gmra.mxu1 %v762_v20 }
  0x2b   :  { %298 = vmatprep.mubr.bf16.mxu0 %v767_v1  ;;  %338 = vmatprep.mubr.bf16.mxu1 %v767_v1 }
  0x32   :  { %299 = vmatmul.mubr.bf16.gmra.mxu0 %v763_v21  ;;  %339 = vmatmul.mubr.bf16.gmra.mxu1 %v764_v22 }
  0x33   :  { %308 = vmatprep.mubr.bf16.mxu0 %v767_v1  ;;  %348 = vmatprep.mubr.bf16.mxu1 %v767_v1 }
  0x3a   :  { %309 = vmatmul.mubr.bf16.gmra.mxu0 %v765_v23  ;;  %349 = vmatmul.mubr.bf16.gmra.mxu1 %v766_v24 }
  0xe2   :  { %v280_v33 = vpop.f32.mrf.mxu0  ;;  %v320_v34 = vpop.f32.mrf.mxu1 }
  0xe3   :  { %v470_v35 = vmul.f32 %v876_v30, %v280_v33  ;;  %v486_v37 = vmul.f32 %v876_v30, %v320_v34 }
  0xe4   :  { %v282_v39 = vpop.f32.mrf.mxu0  ;;  %v322_v40 = vpop.f32.mrf.mxu1 }
  0xe5   :  { %v471_v41 = vmul.f32 %v881_v32, %v282_v39  ;;  %v487_v42 = vmul.f32 %v881_v32, %v322_v40  ;;  %v514_v45 = vadd.f32 %v884_v36, %v470_v35  ;;  %v530_v46 = vadd.f32 %v884_v36, %v486_v37 }
  0xe6   :  { %v284_v43 = vpop.f32.mrf.mxu0  ;;  %v324_v44 = vpop.f32.mrf.mxu1 }
  0xe7   :  { %v515_v47 = vadd.f32 %v887_v38, %v471_v41  ;;  %v531_v48 = vadd.f32 %v887_v38, %v487_v42  ;;  %v472_v49 = vmul.f32 %v876_v30, %v284_v43  ;;  %v488_v50 = vmul.f32 %v876_v30, %v324_v44 }
  0xe8   :  { %v286_v51 = vpop.f32.mrf.mxu0  ;;  %v326_v52 = vpop.f32.mrf.mxu1 }
  0xe9   :  { %v702_v53 = vpack.c.bf16 %v515_v47, %v514_v45  ;;  %v710_v54 = vpack.c.bf16 %v531_v48, %v530_v46  ;;  %v473_v55 = vmul.f32 %v881_v32, %v286_v51  ;;  %v489_v56 = vmul.f32 %v881_v32, %v326_v52 }
  0xea   :  { %v290_v57 = vpop.f32.mrf.mxu0  ;;  %v330_v58 = vpop.f32.mrf.mxu1  ;;  %v516_v61 = vadd.f32 %v884_v36, %v472_v49  ;;  %v532_v62 = vadd.f32 %v884_v36, %v488_v50 }
  0xeb   :  { %642 = vst [vmem:[%s1003_s4] sm:$0xff] %v702_v53  ;;  %650 = vst [vmem:[%s1003_s4 + $0x40] sm:$0xff] %v710_v54  ;;  %v474_v59 = vmul.f32 %v876_v30, %v290_v57  ;;  %v490_v60 = vmul.f32 %v876_v30, %v330_v58  ;;  %v517_v63 = vadd.f32 %v887_v38, %v473_v55 }
  0xec   :  { %v533_v0 = vadd.f32 %v887_v38, %v489_v56  ;;  %v292_v1 = vpop.f32.mrf.mxu0  ;;  %v332_v2 = vpop.f32.mrf.mxu1 }
  0xed   :  { %v475_v3 = vmul.f32 %v881_v32, %v292_v1  ;;  %v491_v4 = vmul.f32 %v881_v32, %v332_v2  ;;  %v703_v5 = vpack.c.bf16 %v517_v63, %v516_v61  ;;  %v518_v9 = vadd.f32 %v884_v36, %v474_v59 }
  0xee   :  { %v711_v6 = vpack.c.bf16 %v533_v0, %v532_v62  ;;  %v294_v7 = vpop.f32.mrf.mxu0  ;;  %v334_v8 = vpop.f32.mrf.mxu1  ;;  %v534_v10 = vadd.f32 %v884_v36, %v490_v60 }
  0xef   :  { %v519_v11 = vadd.f32 %v887_v38, %v475_v3  ;;  %v535_v12 = vadd.f32 %v887_v38, %v491_v4  ;;  %643 = vst [vmem:[%s1003_s4 + $0x8] sm:$0xff] %v703_v5  ;;  %v476_v13 = vmul.f32 %v876_v30, %v294_v7  ;;  %v492_v14 = vmul.f32 %v876_v30, %v334_v8 }
  0xf0   :  { %651 = vst [vmem:[%s1003_s4 + $0x48] sm:$0xff] %v711_v6  ;;  %v296_v15 = vpop.f32.mrf.mxu0  ;;  %v336_v16 = vpop.f32.mrf.mxu1 }
  0xf1   :  { %v704_v17 = vpack.c.bf16 %v519_v11, %v518_v9  ;;  %v712_v18 = vpack.c.bf16 %v535_v12, %v534_v10  ;;  %v477_v19 = vmul.f32 %v881_v32, %v296_v15  ;;  %v493_v20 = vmul.f32 %v881_v32, %v336_v16 }
  0xf2   :  { %v300_v21 = vpop.f32.mrf.mxu0  ;;  %v340_v22 = vpop.f32.mrf.mxu1  ;;  %v520_v25 = vadd.f32 %v884_v36, %v476_v13  ;;  %v536_v26 = vadd.f32 %v884_v36, %v492_v14 }
  0xf3   :  { %644 = vst [vmem:[%s1003_s4 + $0x10] sm:$0xff] %v704_v17  ;;  %652 = vst [vmem:[%s1003_s4 + $0x50] sm:$0xff] %v712_v18  ;;  %v478_v23 = vmul.f32 %v876_v30, %v300_v21  ;;  %v494_v24 = vmul.f32 %v876_v30, %v340_v22  ;;  %v521_v27 = vadd.f32 %v887_v38, %v477_v19 }
  0xf4   :  { %v537_v28 = vadd.f32 %v887_v38, %v493_v20  ;;  %v302_v29 = vpop.f32.mrf.mxu0  ;;  %v342_v31 = vpop.f32.mrf.mxu1 }
  0xf5   :  { %v479_v33 = vmul.f32 %v881_v32, %v302_v29  ;;  %v495_v34 = vmul.f32 %v881_v32, %v342_v31  ;;  %v705_v35 = vpack.c.bf16 %v521_v27, %v520_v25  ;;  %v522_v41 = vadd.f32 %v884_v36, %v478_v23 }
  0xf6   :  { %v713_v37 = vpack.c.bf16 %v537_v28, %v536_v26  ;;  %v304_v39 = vpop.f32.mrf.mxu0  ;;  %v344_v40 = vpop.f32.mrf.mxu1  ;;  %v538_v42 = vadd.f32 %v884_v36, %v494_v24 }
  0xf7   :  { %v523_v43 = vadd.f32 %v887_v38, %v479_v33  ;;  %v539_v44 = vadd.f32 %v887_v38, %v495_v34  ;;  %645 = vst [vmem:[%s1003_s4 + $0x18] sm:$0xff] %v705_v35  ;;  %v480_v45 = vmul.f32 %v876_v30, %v304_v39  ;;  %v496_v46 = vmul.f32 %v876_v30, %v344_v40 }
  0xf8   :  { %653 = vst [vmem:[%s1003_s4 + $0x58] sm:$0xff] %v713_v37  ;;  %v306_v47 = vpop.f32.mrf.mxu0  ;;  %v346_v48 = vpop.f32.mrf.mxu1 }
  0xf9   :  { %v706_v49 = vpack.c.bf16 %v523_v43, %v522_v41  ;;  %v714_v50 = vpack.c.bf16 %v539_v44, %v538_v42  ;;  %v481_v51 = vmul.f32 %v881_v32, %v306_v47  ;;  %v497_v52 = vmul.f32 %v881_v32, %v346_v48 }
  0xfa   :  { %v310_v53 = vpop.f32.mrf.mxu0  ;;  %v350_v54 = vpop.f32.mrf.mxu1  ;;  %v524_v57 = vadd.f32 %v884_v36, %v480_v45  ;;  %v540_v58 = vadd.f32 %v884_v36, %v496_v46 }
  0xfb   :  { %646 = vst [vmem:[%s1003_s4 + $0x20] sm:$0xff] %v706_v49  ;;  %654 = vst [vmem:[%s1003_s4 + $0x60] sm:$0xff] %v714_v50  ;;  %v482_v55 = vmul.f32 %v876_v30, %v310_v53  ;;  %v498_v56 = vmul.f32 %v876_v30, %v350_v54  ;;  %v525_v59 = vadd.f32 %v887_v38, %v481_v51 }
  0xfc   :  { %v541_v60 = vadd.f32 %v887_v38, %v497_v52  ;;  %v312_v61 = vpop.f32.mrf.mxu0  ;;  %v352_v62 = vpop.f32.mrf.mxu1 }
  0xfd   :  { %v483_v63 = vmul.f32 %v881_v32, %v312_v61  ;;  %v499_v0 = vmul.f32 %v881_v32, %v352_v62  ;;  %v707_v1 = vpack.c.bf16 %v525_v59, %v524_v57  ;;  %v526_v5 = vadd.f32 %v884_v36, %v482_v55 }
  0xfe   :  { %v715_v2 = vpack.c.bf16 %v541_v60, %v540_v58  ;;  %v314_v3 = vpop.f32.mrf.mxu0  ;;  %v354_v4 = vpop.f32.mrf.mxu1  ;;  %v542_v6 = vadd.f32 %v884_v36, %v498_v56 }
  0xff   :  { %v527_v7 = vadd.f32 %v887_v38, %v483_v63  ;;  %v543_v8 = vadd.f32 %v887_v38, %v499_v0  ;;  %647 = vst [vmem:[%s1003_s4 + $0x28] sm:$0xff] %v707_v1  ;;  %v484_v9 = vmul.f32 %v876_v30, %v314_v3  ;;  %v500_v10 = vmul.f32 %v876_v30, %v354_v4 }
 0x100   :  { %655 = vst [vmem:[%s1003_s4 + $0x68] sm:$0xff] %v715_v2  ;;  %v316_v11 = vpop.f32.mrf.mxu0  ;;  %v356_v12 = vpop.f32.mrf.mxu1 }
 0x101   :  { %v708_v13 = vpack.c.bf16 %v527_v7, %v526_v5  ;;  %v716_v14 = vpack.c.bf16 %v543_v8, %v542_v6  ;;  %v485_v15 = vmul.f32 %v881_v32, %v316_v11  ;;  %v501_v16 = vmul.f32 %v881_v32, %v356_v12 }
 0x102   :  { %v528_v17 = vadd.f32 %v884_v36, %v484_v9  ;;  %v544_v30 = vadd.f32 %v884_v36, %v500_v10 }
 0x103   :  { %648 = vst [vmem:[%s1003_s4 + $0x30] sm:$0xff] %v708_v13  ;;  %656 = vst [vmem:[%s1003_s4 + $0x70] sm:$0xff] %v716_v14  ;;  %v529_v18 = vadd.f32 %v887_v38, %v485_v15  ;;  %v545_v19 = vadd.f32 %v887_v38, %v501_v16 }
 0x105   :  { %v709_v20 = vpack.c.bf16 %v529_v18, %v528_v17  ;;  %v717_v21 = vpack.c.bf16 %v545_v19, %v544_v30 }
 0x107   :  { %649 = vst [vmem:[%s1003_s4 + $0x38] sm:$0xff] %v709_v20  ;;  %657 = vst [vmem:[%s1003_s4 + $0x78] sm:$0xff] %v717_v21 }

// kernel: resnet50_forward.61
= control target key start
LH: loop header
LB: loop body
LE: loop exit
PB: predicated region body
PF: predicated region fallthrough
CT: control target
= control target key end

     0   :  { %v882_v1 = vmov 0   ;;  %v463_v25 = vlaneseq  ;;  %s1283_s1 = inlined_call_operand.vmem [shape: bf16[128,256], index: 1, kind: input, shape index: {}]   ;;  %s1284_s0 = inlined_call_operand.vmem [shape: bf16[128,128], index: 0, kind: input, shape index: {}]   ;;  %s1285_s2 = inlined_call_operand.vmem [shape: f32[1,256], index: 2, kind: input, shape index: {}]   ;;  %s1286_s3 = inlined_call_operand.vmem [shape: f32[1,256], index: 3, kind: input, shape index: {}]   ;;  %s1287_s4 = inlined_call_operand.vmem [shape: bf16[128,256], index: 4, kind: input, shape index: {}]   ;;  %s1288_s5 = inlined_call_operand.vmem [shape: bf16[128,256], index: 5, kind: output, shape index: {}]  }
   0x1   :  { %v850_v0 = vld [vmem:[%s1283_s1 + $0x74] ss:$8 sps:$4 sm:$0xff]   ;;  %281 = vmatprep.mubr.bf16.mxu0 %v882_v1  ;;  %321 = vmatprep.mubr.bf16.mxu1 %v882_v1  ;;  %v852_v2 = vld [vmem:[%s1283_s1 + $0x70] ss:$8 sps:$4 sm:$0xff]   ;;  %v853_v3 = vld [vmem:[%s1283_s1 + $0x64] ss:$8 sps:$4 sm:$0xff]  }
   0x2   :  { %249 = vmatprep.subr.bf16.mxu0 %v850_v0  ;;  %833 = vmatprep.subr.bf16.mxu1 %v850_v0  ;;  %v855_v4 = vld [vmem:[%s1283_s1 + $0x60] ss:$8 sps:$4 sm:$0xff]   ;;  %v856_v5 = vld [vmem:[%s1283_s1 + $0x54] ss:$8 sps:$4 sm:$0xff]   ;;  %v858_v6 = vld [vmem:[%s1283_s1 + $0x50] ss:$8 sps:$4 sm:$0xff]  }
   0x3   :  { %250 = vmatpush1.bf16.msra.mxu0 %v852_v2  ;;  %841 = vmatpush1.bf16.msra.mxu1 %v852_v2  ;;  %v859_v7 = vld [vmem:[%s1283_s1 + $0x44] ss:$8 sps:$4 sm:$0xff]   ;;  %v861_v8 = vld [vmem:[%s1283_s1 + $0x40] ss:$8 sps:$4 sm:$0xff]   ;;  %v862_v9 = vld [vmem:[%s1283_s1 + $0x34] ss:$8 sps:$4 sm:$0xff]  }
   0x4   :  { %251 = vmatprep.subr.bf16.mxu0 %v853_v3  ;;  %834 = vmatprep.subr.bf16.mxu1 %v853_v3  ;;  %v864_v10 = vld [vmem:[%s1283_s1 + $0x30] ss:$8 sps:$4 sm:$0xff]   ;;  %v865_v11 = vld [vmem:[%s1283_s1 + $0x24] ss:$8 sps:$4 sm:$0xff]   ;;  %v867_v12 = vld [vmem:[%s1283_s1 + $0x20] ss:$8 sps:$4 sm:$0xff]  }
   0x5   :  { %v868_v13 = vld [vmem:[%s1283_s1 + $0x14] ss:$8 sps:$4 sm:$0xff]   ;;  %v870_v14 = vld [vmem:[%s1283_s1 + $0x10] ss:$8 sps:$4 sm:$0xff]   ;;  %v871_v15 = vld [vmem:[%s1283_s1 + $0x4] ss:$8 sps:$4 sm:$0xff]  }
   0x6   :  { %v873_v16 = vld [vmem:[%s1283_s1] ss:$8 sps:$4 sm:$0xff]   ;;  %v878_v21 = vld [vmem:[%s1284_s0 + $0x10] sm:$0xff]   ;;  %v880_v23 = vld [vmem:[%s1284_s0 + $0x18] sm:$0xff]   ;;  %v464_v26 = vshrl.u32 %v463_v25, 7 }
   0x7   :  { %252 = vmatpush1.bf16.msra.mxu0 %v855_v4  ;;  %842 = vmatpush1.bf16.msra.mxu1 %v855_v4  ;;  %v874_v17 = vld [vmem:[%s1284_s0] sm:$0xff]   ;;  %v876_v19 = vld [vmem:[%s1284_s0 + $0x8] sm:$0xff]   ;;  %v879_v22 = vld [vmem:[%s1284_s0 + $0x30] sm:$0xff]  }
   0x8   :  { %253 = vmatprep.subr.bf16.mxu0 %v856_v5  ;;  %835 = vmatprep.subr.bf16.mxu1 %v856_v5  ;;  %v875_v18 = vld [vmem:[%s1284_s0 + $0x20] sm:$0xff]   ;;  %v877_v20 = vld [vmem:[%s1284_s0 + $0x28] sm:$0xff]   ;;  %v881_v24 = vld [vmem:[%s1284_s0 + $0x38] sm:$0xff]   ;;  %v465_v27 = vsub.s32 0, %v464_v26  ;;  %v469_v30 = vsub.s32 1, %v464_v26 }
   0x9   :  { %v461_v28 = vld [vmem:[%s1285_s2] sm:$0x3]  ;;  %v1012_v33 = vld [vmem:[%s1287_s4 + $0x8] sm:$0xff]  ;;  %v1026_v37 = vld [vmem:[%s1287_s4 + $0x10] sm:$0xff] }
   0xa   :  { %v505_v29 = vld [vmem:[%s1286_s3] sm:$0x3]  ;;  %v1017_v34 = vld [vmem:[%s1287_s4 + $0x48] sm:$0xff]  ;;  %v1019_v35 = vrot.slane %v461_v28, %v465_v27  ;;  %v1031_v38 = vld [vmem:[%s1287_s4 + $0x50] sm:$0xff]  ;;  %v1035_v41 = vrot.slane %v461_v28, %v469_v30  ;;  %v567_v47 = vunpack.c.l.bf16 %v1012_v33  ;;  %v568_v51 = vunpack.c.h.bf16 %v1012_v33 }
   0xb   :  { %254 = vmatpush1.bf16.msra.mxu0 %v858_v6  ;;  %843 = vmatpush1.bf16.msra.mxu1 %v858_v6  ;;  %v1002_v31 = vld [vmem:[%s1287_s4] sm:$0xff]  ;;  %v1021_v36 = vrot.slane %v505_v29, %v465_v27  ;;  %v1037_v42 = vrot.slane %v505_v29, %v469_v30  ;;  %v1042_v43 = vld [vmem:[%s1287_s4 + $0x18] sm:$0xff]  ;;  %v583_v48 = vunpack.c.l.bf16 %v1017_v34  ;;  %v584_v52 = vunpack.c.h.bf16 %v1017_v34  ;;  %v1074_v59 = vld [vmem:[%s1287_s4 + $0x28] sm:$0xff] }
   0xc   :  { %255 = vmatprep.subr.bf16.mxu0 %v859_v7  ;;  %836 = vmatprep.subr.bf16.mxu1 %v859_v7  ;;  %v1007_v32 = vld [vmem:[%s1287_s4 + $0x40] sm:$0xff]  ;;  %v565_v39 = vunpack.c.l.bf16 %v1002_v31  ;;  %v1047_v44 = vld [vmem:[%s1287_s4 + $0x58] sm:$0xff]  ;;  %v566_v45 = vunpack.c.h.bf16 %v1002_v31  ;;  %v569_v53 = vunpack.c.l.bf16 %v1026_v37  ;;  %v585_v54 = vunpack.c.l.bf16 %v1031_v38  ;;  %v1079_v60 = vld [vmem:[%s1287_s4 + $0x68] sm:$0xff] }
   0xd   :  { %v581_v40 = vunpack.c.l.bf16 %v1007_v32  ;;  %v582_v46 = vunpack.c.h.bf16 %v1007_v32  ;;  %v1056_v49 = vld [vmem:[%s1287_s4 + $0x20] sm:$0xff]  ;;  %v570_v55 = vunpack.c.h.bf16 %v1026_v37  ;;  %v586_v56 = vunpack.c.h.bf16 %v1031_v38  ;;  %v1092_v7 = vld [vmem:[%s1287_s4 + $0x30] sm:$0xff] }
   0xe   :  { %v1061_v50 = vld [vmem:[%s1287_s4 + $0x60] sm:$0xff]  ;;  %v571_v57 = vunpack.c.l.bf16 %v1042_v43  ;;  %v587_v58 = vunpack.c.l.bf16 %v1047_v44  ;;  %v572_v63 = vunpack.c.h.bf16 %v1042_v43  ;;  %v588_v0 = vunpack.c.h.bf16 %v1047_v44 }
   0xf   :  { %256 = vmatpush1.bf16.msra.mxu0 %v861_v8  ;;  %844 = vmatpush1.bf16.msra.mxu1 %v861_v8  ;;  %v589_v2 = vunpack.c.l.bf16 %v1061_v50  ;;  %v574_v5 = vunpack.c.h.bf16 %v1056_v49  ;;  %v590_v6 = vunpack.c.h.bf16 %v1061_v50  ;;  %v1097_v8 = vld [vmem:[%s1287_s4 + $0x70] sm:$0xff] }
  0x10   :  { %257 = vmatprep.subr.bf16.mxu0 %v862_v9  ;;  %837 = vmatprep.subr.bf16.mxu1 %v862_v9 }
  0x13   :  { %258 = vmatpush1.bf16.msra.mxu0 %v864_v10  ;;  %845 = vmatpush1.bf16.msra.mxu1 %v864_v10 }
  0x14   :  { %259 = vmatprep.subr.bf16.mxu0 %v865_v11  ;;  %838 = vmatprep.subr.bf16.mxu1 %v865_v11  ;;  %v575_v11 = vunpack.c.l.bf16 %v1074_v59 }
  0x17   :  { %260 = vmatpush1.bf16.msra.mxu0 %v867_v12  ;;  %846 = vmatpush1.bf16.msra.mxu1 %v867_v12  ;;  %v591_v12 = vunpack.c.l.bf16 %v1079_v60 }
  0x18   :  { %261 = vmatprep.subr.bf16.mxu0 %v868_v13  ;;  %839 = vmatprep.subr.bf16.mxu1 %v868_v13  ;;  %v576_v13 = vunpack.c.h.bf16 %v1074_v59 }
  0x1b   :  { %262 = vmatpush1.bf16.msra.mxu0 %v870_v14  ;;  %847 = vmatpush1.bf16.msra.mxu1 %v870_v14  ;;  %v592_v14 = vunpack.c.h.bf16 %v1079_v60 }
  0x1c   :  { %263 = vmatprep.subr.bf16.mxu0 %v871_v15  ;;  %840 = vmatprep.subr.bf16.mxu1 %v871_v15 }
  0x1f   :  { %264 = vmatpush1.bf16.msra.mxu0 %v873_v16  ;;  %848 = vmatpush1.bf16.msra.mxu1 %v873_v16 }
  0x22   :  { %282 = vmatmul.mubr.bf16.vlgmr.msra.gmra.mxu0 %v874_v17  ;;  %322 = vmatmul.mubr.bf16.vlgmr.msra.gmra.mxu1 %v875_v18 }
  0x23   :  { %291 = vmatprep.mubr.bf16.mxu0 %v882_v1  ;;  %331 = vmatprep.mubr.bf16.mxu1 %v882_v1 }
  0x2a   :  { %292 = vmatmul.mubr.bf16.gmra.mxu0 %v876_v19  ;;  %332 = vmatmul.mubr.bf16.gmra.mxu1 %v877_v20  ;;  %v1110_v19 = vld [vmem:[%s1287_s4 + $0x38] sm:$0xff] }
  0x2b   :  { %301 = vmatprep.mubr.bf16.mxu0 %v882_v1  ;;  %341 = vmatprep.mubr.bf16.mxu1 %v882_v1  ;;  %v1115_v20 = vld [vmem:[%s1287_s4 + $0x78] sm:$0xff] }
  0x32   :  { %302 = vmatmul.mubr.bf16.gmra.mxu0 %v878_v21  ;;  %342 = vmatmul.mubr.bf16.gmra.mxu1 %v879_v22 }
  0x33   :  { %311 = vmatprep.mubr.bf16.mxu0 %v882_v1  ;;  %351 = vmatprep.mubr.bf16.mxu1 %v882_v1  ;;  %v573_v1 = vunpack.c.l.bf16 %v1056_v49 }
  0x3a   :  { %312 = vmatmul.mubr.bf16.gmra.mxu0 %v880_v23  ;;  %352 = vmatmul.mubr.bf16.gmra.mxu1 %v881_v24  ;;  %v577_v23 = vunpack.c.l.bf16 %v1092_v7  ;;  %v593_v24 = vunpack.c.l.bf16 %v1097_v8 }
  0xe2   :  { %v283_v61 = vpop.f32.mrf.mxu0  ;;  %v323_v62 = vpop.f32.mrf.mxu1 }
  0xe3   :  { %v473_v3 = vmul.f32 %v1019_v35, %v283_v61  ;;  %v489_v4 = vmul.f32 %v1019_v35, %v323_v62 }
  0xe4   :  { %v285_v9 = vpop.f32.mrf.mxu0  ;;  %v325_v10 = vpop.f32.mrf.mxu1 }
  0xe5   :  { %v517_v15 = vadd.f32 %v1021_v36, %v473_v3  ;;  %v533_v16 = vadd.f32 %v1021_v36, %v489_v4  ;;  %v474_v17 = vmul.f32 %v1035_v41, %v285_v9  ;;  %v490_v18 = vmul.f32 %v1035_v41, %v325_v10 }
  0xe6   :  { %v287_v21 = vpop.f32.mrf.mxu0  ;;  %v327_v22 = vpop.f32.mrf.mxu1 }
  0xe7   :  { %v597_v27 = vadd.f32 %v565_v39, %v517_v15  ;;  %v613_v28 = vadd.f32 %v581_v40, %v533_v16  ;;  %v518_v29 = vadd.f32 %v1037_v42, %v474_v17  ;;  %v534_v30 = vadd.f32 %v1037_v42, %v490_v18 }
  0xe8   :  { %v475_v31 = vmul.f32 %v1019_v35, %v287_v21  ;;  %v491_v32 = vmul.f32 %v1019_v35, %v327_v22  ;;  %v289_v61 = vpop.f32.mrf.mxu0  ;;  %v329_v62 = vpop.f32.mrf.mxu1 }
  0xe9   :  { %v629_v9 = vmax.f32 %v597_v27, 0.0  ;;  %v645_v10 = vmax.f32 %v613_v28, 0.0  ;;  %v598_v25 = vadd.f32 %v566_v45, %v518_v29  ;;  %v614_v26 = vadd.f32 %v582_v46, %v534_v30 }
  0xea   :  { %v519_v39 = vadd.f32 %v1021_v36, %v475_v31  ;;  %v535_v40 = vadd.f32 %v1021_v36, %v491_v32  ;;  %v476_v15 = vmul.f32 %v1035_v41, %v289_v61  ;;  %v492_v16 = vmul.f32 %v1035_v41, %v329_v62  ;;  %v293_v17 = vpop.f32.mrf.mxu0  ;;  %v333_v18 = vpop.f32.mrf.mxu1 }
  0xeb   :  { %v630_v21 = vmax.f32 %v598_v25, 0.0  ;;  %v646_v22 = vmax.f32 %v614_v26, 0.0  ;;  %v477_v3 = vmul.f32 %v1019_v35, %v293_v17  ;;  %v493_v4 = vmul.f32 %v1019_v35, %v333_v18 }
  0xec   :  { %v599_v45 = vadd.f32 %v567_v47, %v519_v39  ;;  %v615_v46 = vadd.f32 %v583_v48, %v535_v40  ;;  %v520_v27 = vadd.f32 %v1037_v42, %v476_v15  ;;  %v536_v28 = vadd.f32 %v1037_v42, %v492_v16  ;;  %v295_v29 = vpop.f32.mrf.mxu0  ;;  %v335_v30 = vpop.f32.mrf.mxu1 }
  0xed   :  { %v817_v31 = vpack.c.bf16 %v630_v21, %v629_v9  ;;  %v825_v32 = vpack.c.bf16 %v646_v22, %v645_v10  ;;  %v521_v25 = vadd.f32 %v1021_v36, %v477_v3  ;;  %v537_v26 = vadd.f32 %v1021_v36, %v493_v4 }
  0xee   :  { %v631_v61 = vmax.f32 %v599_v45, 0.0  ;;  %v647_v62 = vmax.f32 %v615_v46, 0.0  ;;  %v600_v47 = vadd.f32 %v568_v51, %v520_v27  ;;  %v616_v48 = vadd.f32 %v584_v52, %v536_v28  ;;  %v297_v39 = vpop.f32.mrf.mxu0  ;;  %v337_v40 = vpop.f32.mrf.mxu1 }
  0xef   :  { %757 = vst [vmem:[%s1288_s5] sm:$0xff] %v817_v31  ;;  %765 = vst [vmem:[%s1288_s5 + $0x40] sm:$0xff] %v825_v32  ;;  %v601_v3 = vadd.f32 %v569_v53, %v521_v25  ;;  %v617_v33 = vadd.f32 %v585_v54, %v537_v26  ;;  %v478_v51 = vmul.f32 %v1035_v41, %v295_v29 }
  0xf0   :  { %v494_v34 = vmul.f32 %v1035_v41, %v335_v30  ;;  %v632_v52 = vmax.f32 %v600_v47, 0.0  ;;  %v648_v4 = vmax.f32 %v616_v48, 0.0  ;;  %v479_v9 = vmul.f32 %v1019_v35, %v297_v39  ;;  %v299_v15 = vpop.f32.mrf.mxu0  ;;  %v339_v16 = vpop.f32.mrf.mxu1 }
  0xf1   :  { %v495_v10 = vmul.f32 %v1019_v35, %v337_v40  ;;  %v633_v17 = vmax.f32 %v601_v3, 0.0  ;;  %v649_v18 = vmax.f32 %v617_v33, 0.0  ;;  %v522_v21 = vadd.f32 %v1037_v42, %v478_v51 }
  0xf2   :  { %v538_v53 = vadd.f32 %v1037_v42, %v494_v34  ;;  %v818_v22 = vpack.c.bf16 %v632_v52, %v631_v61  ;;  %v826_v54 = vpack.c.bf16 %v648_v4, %v647_v62  ;;  %v523_v45 = vadd.f32 %v1021_v36, %v479_v9  ;;  %v303_v27 = vpop.f32.mrf.mxu0  ;;  %v343_v28 = vpop.f32.mrf.mxu1 }
  0xf3   :  { %v539_v46 = vadd.f32 %v1021_v36, %v495_v10  ;;  %v602_v29 = vadd.f32 %v570_v55, %v522_v21  ;;  %v480_v31 = vmul.f32 %v1035_v41, %v299_v15  ;;  %v496_v32 = vmul.f32 %v1035_v41, %v339_v16 }
  0xf4   :  { %v618_v30 = vadd.f32 %v586_v56, %v538_v53  ;;  %758 = vst [vmem:[%s1288_s5 + $0x8] sm:$0xff] %v818_v22  ;;  %766 = vst [vmem:[%s1288_s5 + $0x48] sm:$0xff] %v826_v54  ;;  %v603_v25 = vadd.f32 %v571_v57, %v523_v45  ;;  %v481_v38 = vmul.f32 %v1019_v35, %v303_v27  ;;  %v305_v56 = vpop.f32.mrf.mxu0  ;;  %v345_v26 = vpop.f32.mrf.mxu1 }
  0xf5   :  { %v619_v37 = vadd.f32 %v587_v58, %v539_v46  ;;  %v497_v55 = vmul.f32 %v1019_v35, %v343_v28  ;;  %v634_v61 = vmax.f32 %v602_v29, 0.0  ;;  %v524_v47 = vadd.f32 %v1037_v42, %v480_v31 }
  0xf6   :  { %v650_v62 = vmax.f32 %v618_v30, 0.0  ;;  %v540_v48 = vadd.f32 %v1037_v42, %v496_v32  ;;  %v635_v39 = vmax.f32 %v603_v25, 0.0  ;;  %v525_v3 = vadd.f32 %v1021_v36, %v481_v38  ;;  %v307_v33 = vpop.f32.mrf.mxu0  ;;  %v347_v58 = vpop.f32.mrf.mxu1 }
  0xf7   :  { %v651_v40 = vmax.f32 %v619_v37, 0.0  ;;  %v541_v57 = vadd.f32 %v1021_v36, %v497_v55  ;;  %v819_v51 = vpack.c.bf16 %v634_v61, %v633_v17  ;;  %v604_v52 = vadd.f32 %v572_v63, %v524_v47 }
  0xf8   :  { %v827_v34 = vpack.c.bf16 %v650_v62, %v649_v18  ;;  %v620_v4 = vadd.f32 %v588_v0, %v540_v48  ;;  %v605_v9 = vadd.f32 %v573_v1, %v525_v3  ;;  %v482_v15 = vmul.f32 %v1035_v41, %v305_v56  ;;  %v309_v21 = vpop.f32.mrf.mxu0  ;;  %v349_v53 = vpop.f32.mrf.mxu1 }
  0xf9   :  { %v621_v10 = vadd.f32 %v589_v2, %v541_v57  ;;  %v498_v16 = vmul.f32 %v1035_v41, %v345_v26  ;;  %759 = vst [vmem:[%s1288_s5 + $0x10] sm:$0xff] %v819_v51  ;;  %v636_v43 = vmax.f32 %v604_v52, 0.0  ;;  %v483_v63 = vmul.f32 %v1019_v35, %v307_v33 }
  0xfa   :  { %767 = vst [vmem:[%s1288_s5 + $0x50] sm:$0xff] %v827_v34  ;;  %v652_v44 = vmax.f32 %v620_v4, 0.0  ;;  %v499_v0 = vmul.f32 %v1019_v35, %v347_v58  ;;  %v637_v1 = vmax.f32 %v605_v9, 0.0  ;;  %v526_v17 = vadd.f32 %v1037_v42, %v482_v15  ;;  %v313_v22 = vpop.f32.mrf.mxu0  ;;  %v353_v54 = vpop.f32.mrf.mxu1 }
  0xfb   :  { %v653_v2 = vmax.f32 %v621_v10, 0.0  ;;  %v542_v18 = vadd.f32 %v1037_v42, %v498_v16  ;;  %v820_v45 = vpack.c.bf16 %v636_v43, %v635_v39  ;;  %v527_v27 = vadd.f32 %v1021_v36, %v483_v63 }
  0xfc   :  { %v828_v46 = vpack.c.bf16 %v652_v44, %v651_v40  ;;  %v543_v28 = vadd.f32 %v1021_v36, %v499_v0  ;;  %v606_v29 = vadd.f32 %v574_v5, %v526_v17  ;;  %v484_v31 = vmul.f32 %v1035_v41, %v309_v21  ;;  %v315_v25 = vpop.f32.mrf.mxu0  ;;  %v355_v37 = vpop.f32.mrf.mxu1 }
  0xfd   :  { %v622_v30 = vadd.f32 %v590_v6, %v542_v18  ;;  %v500_v32 = vmul.f32 %v1035_v41, %v349_v53  ;;  %760 = vst [vmem:[%s1288_s5 + $0x18] sm:$0xff] %v820_v45  ;;  %v607_v49 = vadd.f32 %v575_v11, %v527_v27  ;;  %v485_v5 = vmul.f32 %v1019_v35, %v313_v22 }
  0xfe   :  { %768 = vst [vmem:[%s1288_s5 + $0x58] sm:$0xff] %v828_v46  ;;  %v623_v50 = vadd.f32 %v591_v12, %v543_v28  ;;  %v501_v6 = vmul.f32 %v1019_v35, %v353_v54  ;;  %v638_v38 = vmax.f32 %v606_v29, 0.0  ;;  %v528_v56 = vadd.f32 %v1037_v42, %v484_v31  ;;  %v317_v61 = vpop.f32.mrf.mxu0  ;;  %v357_v62 = vpop.f32.mrf.mxu1 }
  0xff   :  { %v654_v55 = vmax.f32 %v622_v30, 0.0  ;;  %v544_v26 = vadd.f32 %v1037_v42, %v500_v32  ;;  %v639_v47 = vmax.f32 %v607_v49, 0.0  ;;  %v529_v39 = vadd.f32 %v1021_v36, %v485_v5 }
 0x100   :  { %v655_v48 = vmax.f32 %v623_v50, 0.0  ;;  %v545_v11 = vadd.f32 %v1021_v36, %v501_v6  ;;  %v821_v40 = vpack.c.bf16 %v638_v38, %v637_v1  ;;  %v608_v3 = vadd.f32 %v576_v13, %v528_v56 }
 0x101   :  { %v829_v12 = vpack.c.bf16 %v654_v55, %v653_v2  ;;  %v624_v57 = vadd.f32 %v592_v14, %v544_v26  ;;  %v609_v33 = vadd.f32 %v577_v23, %v529_v39  ;;  %v486_v51 = vmul.f32 %v1035_v41, %v315_v25  ;;  %v319_v23 = vpop.f32.mrf.mxu0 }
 0x102   :  { %v625_v58 = vadd.f32 %v593_v24, %v545_v11  ;;  %v502_v34 = vmul.f32 %v1035_v41, %v355_v37  ;;  %761 = vst [vmem:[%s1288_s5 + $0x20] sm:$0xff] %v821_v40  ;;  %v640_v59 = vmax.f32 %v608_v3, 0.0  ;;  %v487_v13 = vmul.f32 %v1019_v35, %v317_v61  ;;  %v359_v24 = vpop.f32.mrf.mxu1 }
 0x103   :  { %769 = vst [vmem:[%s1288_s5 + $0x60] sm:$0xff] %v829_v12  ;;  %v656_v60 = vmax.f32 %v624_v57, 0.0  ;;  %v503_v14 = vmul.f32 %v1019_v35, %v357_v62  ;;  %v530_v52 = vadd.f32 %v1037_v42, %v486_v51  ;;  %v580_v9 = vunpack.c.h.bf16 %v1110_v19 }
 0x104   :  { %v546_v4 = vadd.f32 %v1037_v42, %v502_v34  ;;  %v596_v10 = vunpack.c.h.bf16 %v1115_v20  ;;  %v822_v15 = vpack.c.bf16 %v640_v59, %v639_v47  ;;  %v531_v21 = vadd.f32 %v1021_v36, %v487_v13 }
 0x105   :  { %v830_v16 = vpack.c.bf16 %v656_v60, %v655_v48  ;;  %v547_v53 = vadd.f32 %v1021_v36, %v503_v14  ;;  %v1289_v43 = vunpack.c.h.bf16 %v1092_v7  ;;  %v1290_v35 = vunpack.c.h.bf16 %v1097_v8 }
 0x106   :  { %v488_v0 = vmul.f32 %v1035_v41, %v319_v23  ;;  %v504_v1 = vmul.f32 %v1035_v41, %v359_v24  ;;  %762 = vst [vmem:[%s1288_s5 + $0x28] sm:$0xff] %v822_v15  ;;  %v641_v2 = vmax.f32 %v609_v33, 0.0  ;;  %v657_v36 = vmax.f32 %v625_v58, 0.0 }
 0x107   :  { %v610_v44 = vadd.f32 %v1289_v43, %v530_v52  ;;  %v626_v63 = vadd.f32 %v1290_v35, %v546_v4  ;;  %770 = vst [vmem:[%s1288_s5 + $0x68] sm:$0xff] %v830_v16  ;;  %v1291_v7 = vunpack.c.l.bf16 %v1110_v19  ;;  %v1292_v8 = vunpack.c.l.bf16 %v1115_v20 }
 0x108   :  { %v532_v41 = vadd.f32 %v1037_v42, %v488_v0  ;;  %v548_v45 = vadd.f32 %v1037_v42, %v504_v1 }
 0x109   :  { %v611_v17 = vadd.f32 %v1291_v7, %v531_v21  ;;  %v627_v18 = vadd.f32 %v1292_v8, %v547_v53  ;;  %v642_v22 = vmax.f32 %v610_v44, 0.0  ;;  %v658_v54 = vmax.f32 %v626_v63, 0.0 }
 0x10a   :  { %v612_v28 = vadd.f32 %v580_v9, %v532_v41  ;;  %v628_v29 = vadd.f32 %v596_v10, %v548_v45 }
 0x10b   :  { %v823_v46 = vpack.c.bf16 %v642_v22, %v641_v2  ;;  %v831_v27 = vpack.c.bf16 %v658_v54, %v657_v36  ;;  %v643_v19 = vmax.f32 %v611_v17, 0.0  ;;  %v659_v20 = vmax.f32 %v627_v18, 0.0 }
 0x10c   :  { %v644_v30 = vmax.f32 %v612_v28, 0.0  ;;  %v660_v31 = vmax.f32 %v628_v29, 0.0 }
 0x10d   :  { %763 = vst [vmem:[%s1288_s5 + $0x30] sm:$0xff] %v823_v46  ;;  %771 = vst [vmem:[%s1288_s5 + $0x70] sm:$0xff] %v831_v27 }
 0x10e   :  { %v824_v32 = vpack.c.bf16 %v644_v30, %v643_v19  ;;  %v832_v25 = vpack.c.bf16 %v660_v31, %v659_v20 }
 0x110   :  { %764 = vst [vmem:[%s1288_s5 + $0x38] sm:$0xff] %v824_v32  ;;  %772 = vst [vmem:[%s1288_s5 + $0x78] sm:$0xff] %v832_v25 }

// kernel: resnet50_forward.62
= control target key start
LH: loop header
LB: loop body
LE: loop exit
PB: predicated region body
PF: predicated region fallthrough
CT: control target
= control target key end

     0   :  { %s1275_s15 = smov 0   ;;  %s1277_s16 = smov 0   ;;  %s1446_s0 = inlined_call_operand.vmem [shape: bf16[128,256], index: 0, kind: input, shape index: {}]   ;;  %s1447_s1 = inlined_call_operand.vmem [shape: bf16[256,128], index: 1, kind: input, shape index: {}]   ;;  %s1448_s2 = inlined_call_operand.vmem [shape: f32[1,128], index: 2, kind: input, shape index: {}]   ;;  %s1449_s3 = inlined_call_operand.vmem [shape: f32[1,128], index: 3, kind: input, shape index: {}]   ;;  %s1450_s4 = inlined_call_operand.vmem [shape: bf16[128,128], index: 4, kind: output, shape index: {}]  }
   0x1   :  { %s1279_s17 = smov 0   ;;  %s1281_s18 = smov 0  }
   0x2   :  { %s1283_s19 = smov 0  }
   0x3 LB: > { %s26_s20 = sadd.s32 1, %s1243_s18  ;;  %p49_p1 = scmp.ne.s32.totalorder %s1235_s16, %s1231_s15  ;;  %s1247_s19 = sphi %s1283_s19, %s14_s19   ;;  %s1243_s18 = sphi %s1281_s18, %s1454_s18   ;;  %s1239_s17 = sphi %s1279_s17, %s1453_s17   ;;  %s1235_s16 = sphi %s1277_s16, %s1452_s16   ;;  %s1231_s15 = sphi %s1275_s15, %s1451_s15  }
   0x4   : > { %p27_p0 = scmp.ge.s32.totalorder %s26_s20, 2  ;;  %p50_p2 = scmp.eq.s32.totalorder %s1247_s19, 0 }
   0x5   : > { %s42_s22 = sadd.s32 1, %s1235_s16  ;;  %p978_p5 = scmp.ge.s32.totalorder %s1247_s19, 2 }
   0x6   : > { %s1456_s20 = smov (%p27_p0, %s26_s20), 0  ;;  %p51_p3 = por %p50_p2, %p49_p1 }
   0x7   : > { %s38_s21 = ssub.s32 %s1243_s18, %s1456_s20  ;;  %195 = sbr.rel (%p978_p5) target bundleno = 26 (0x1a), region = 24 }
   0x8   : > { %p40_p4 = scmp.eq.s32.totalorder %s38_s21, 0 }
   0xa   : > { %s1310_s23 = scalar_select %p40_p4, %s1235_s16, %s42_s22  }
   0xc   : > { %198 = sbr.rel (!%p51_p3) target bundleno = 26 (0x1a), region = 28  ;;  %s200_s24 = sand.u32 (%p51_p3), 1, %s1235_s16  }
   0xd   : > { %s980_s25 = sshll.u32 (%p51_p3), %s1243_s18, 2  ;;  %s979_s26 = sshll.u32 (%p51_p3), %s200_s24, 6 }
   0xe   : > { %s1318_s29 = scalar_lea.vmem (%p51_p3), %s1446_s0, %s980_s25  ;;  %s202_s30 = scalar_lea.vmem (%p51_p3), [#allocation3], %s979_s26 }
   0xf   : > { %v224_v0 = vld [vmem:[%s1318_s29] sm:$0xf] (%p51_p3)  ;;  %v226_v1 = vld [vmem:[%s1318_s29 + $0x8] sm:$0xf] (%p51_p3)  ;;  %v228_v2 = vld [vmem:[%s1318_s29 + $0x10] sm:$0xf] (%p51_p3) }
  0x10   : > { %225 = vst [vmem:[%s202_s30] sm:$0xf] (%p51_p3), %v224_v0  ;;  %227 = vst [vmem:[%s202_s30 + $0x4] sm:$0xf] (%p51_p3), %v226_v1  ;;  %v230_v3 = vld [vmem:[%s1318_s29 + $0x18] sm:$0xf] (%p51_p3) }
  0x11   : > { %v232_v4 = vld [vmem:[%s1318_s29 + $0x20] sm:$0xf]  ;;  %229 = vst [vmem:[%s202_s30 + $0x8] sm:$0xf] %v228_v2  ;;  %231 = vst [vmem:[%s202_s30 + $0xc] sm:$0xf] %v230_v3 }
  0x12   : > { %233 = vst [vmem:[%s202_s30 + $0x10] sm:$0xf] %v232_v4  ;;  %v234_v5 = vld [vmem:[%s1318_s29 + $0x28] sm:$0xf]  ;;  %v236_v6 = vld [vmem:[%s1318_s29 + $0x30] sm:$0xf] }
  0x13   : > { %v238_v7 = vld [vmem:[%s1318_s29 + $0x38] sm:$0xf]  ;;  %235 = vst [vmem:[%s202_s30 + $0x14] sm:$0xf] %v234_v5  ;;  %237 = vst [vmem:[%s202_s30 + $0x18] sm:$0xf] %v236_v6 }
  0x14   : > { %239 = vst [vmem:[%s202_s30 + $0x1c] sm:$0xf] %v238_v7  ;;  %v240_v8 = vld [vmem:[%s1318_s29 + $0x40] sm:$0xf]  ;;  %v242_v9 = vld [vmem:[%s1318_s29 + $0x48] sm:$0xf] }
  0x15   : > { %v244_v10 = vld [vmem:[%s1318_s29 + $0x50] sm:$0xf]  ;;  %241 = vst [vmem:[%s202_s30 + $0x20] sm:$0xf] %v240_v8  ;;  %243 = vst [vmem:[%s202_s30 + $0x24] sm:$0xf] %v242_v9 }
  0x16   : > { %245 = vst [vmem:[%s202_s30 + $0x28] sm:$0xf] %v244_v10  ;;  %v246_v11 = vld [vmem:[%s1318_s29 + $0x58] sm:$0xf]  ;;  %v248_v12 = vld [vmem:[%s1318_s29 + $0x60] sm:$0xf] }
  0x17   : > { %v250_v13 = vld [vmem:[%s1318_s29 + $0x68] sm:$0xf]  ;;  %247 = vst [vmem:[%s202_s30 + $0x2c] sm:$0xf] %v246_v11  ;;  %249 = vst [vmem:[%s202_s30 + $0x30] sm:$0xf] %v248_v12 }
  0x18   : > { %251 = vst [vmem:[%s202_s30 + $0x34] sm:$0xf] %v250_v13  ;;  %v252_v14 = vld [vmem:[%s1318_s29 + $0x70] sm:$0xf]  ;;  %v254_v15 = vld [vmem:[%s1318_s29 + $0x78] sm:$0xf] }
  0x19   : > { %253 = vst [vmem:[%s202_s30 + $0x38] sm:$0xf] %v252_v14  ;;  %255 = vst [vmem:[%s202_s30 + $0x3c] sm:$0xf] %v254_v15 }
  0x1a PF: > { %p981_p6 = scmp.ge.s32.totalorder %s1247_s19, 1  ;;  %p322_p7 = scmp.lt.s32.totalorder %s1247_s19, 3 }
  0x1c   : > { %p323_p8 = pnand %p981_p6, %p322_p7 }
  0x1d   : > { %s329_s5 = sand.u32 (!%p323_p8), 1, %s1231_s15   ;;  %s983_s6 = sshll.u32 (!%p323_p8), %s1239_s17, 4 }
  0x1e   : > { %326 = sbr.rel (%p323_p8) target bundleno = 313 (0x139), region = 73  ;;  %s982_s7 = sshll.u32 (!%p323_p8), %s329_s5, 6 }
  0x1f   : > { %p373_p9 = scmp.lt.s32.totalorder (!%p323_p8), %s983_s6, 31  ;;  %s1345_s12 = scalar_lea.vmem (!%p323_p8), [#allocation3], %s982_s7 }
  0x20   : > { %p985_p10 = scmp.ne.s32.totalorder (!%p323_p8), %s1239_s17, 0 }
  0x23   : > { %s1458_s6 = smov (!%p373_p9, %s983_s6), 31  ;;  %400 = sbr.rel (%p985_p10) target bundleno = 49 (0x31), region = 81 }
  0x24   : > { %s984_s8 = sshll.u32 %s1458_s6, 2 }
  0x25   : > { %s1343_s11 = scalar_lea.vmem %s1447_s1, %s984_s8 }
  0x28   : > { %v1249_v16 = vmov 0.0  }
  0x29   : > { %401 = vst [vmem:[#allocation2 + $0x30] sm:$0xff] %v1249_v16  ;;  %402 = vst [vmem:[#allocation2] sm:$0xff] %v1249_v16 }
  0x2a   : > { %403 = vst [vmem:[#allocation2 + $0x58] sm:$0xff] %v1249_v16  ;;  %404 = vst [vmem:[#allocation2 + $0x18] sm:$0xff] %v1249_v16 }
  0x2b   : > { %405 = vst [vmem:[#allocation2 + $0x50] sm:$0xff] %v1249_v16  ;;  %406 = vst [vmem:[#allocation2 + $0x68] sm:$0xff] %v1249_v16 }
  0x2c   : > { %407 = vst [vmem:[#allocation2 + $0x8] sm:$0xff] %v1249_v16  ;;  %408 = vst [vmem:[#allocation2 + $0x48] sm:$0xff] %v1249_v16 }
  0x2d   : > { %409 = vst [vmem:[#allocation2 + $0x40] sm:$0xff] %v1249_v16  ;;  %410 = vst [vmem:[#allocation2 + $0x20] sm:$0xff] %v1249_v16 }
  0x2e   : > { %411 = vst [vmem:[#allocation2 + $0x10] sm:$0xff] %v1249_v16  ;;  %412 = vst [vmem:[#allocation2 + $0x38] sm:$0xff] %v1249_v16 }
  0x2f   : > { %413 = vst [vmem:[#allocation2 + $0x60] sm:$0xff] %v1249_v16  ;;  %414 = vst [vmem:[#allocation2 + $0x70] sm:$0xff] %v1249_v16 }
  0x30   : > { %415 = vst [vmem:[#allocation2 + $0x78] sm:$0xff] %v1249_v16  ;;  %416 = vst [vmem:[#allocation2 + $0x28] sm:$0xff] %v1249_v16 }
  0x31 PF: > { %v1193_v17 = vld [vmem:[%s1343_s11 + $0x38] sm:$0xff]   ;;  %v1194_v18 = vld [vmem:[%s1343_s11 + $0x30] sm:$0xff]   ;;  %v1195_v19 = vld [vmem:[%s1343_s11 + $0x28] sm:$0xff]   ;;  %p1002_p11 = scmp.ne.s32.totalorder %s1239_s17, 1 }
  0x32   : > { %1104 = vmatprep.subr.bf16.mxu0 %v1193_v17  ;;  %1136 = vmatprep.subr.bf16.mxu1 %v1193_v17  ;;  %v1196_v20 = vld [vmem:[%s1343_s11 + $0x20] sm:$0xff]   ;;  %v1201_v21 = vld [vmem:[%s1345_s12] sm:$0xff]   ;;  %v1197_v23 = vld [vmem:[%s1343_s11 + $0x18] sm:$0xff]  }
  0x33   : > { %1105 = vmatpush3.bf16.msra.mxu0 %v1193_v17  ;;  %1144 = vmatpush3.bf16.msra.mxu1 %v1193_v17  ;;  %v1202_v22 = vld [vmem:[%s1345_s12 + $0x20] sm:$0xff]   ;;  %v1199_v25 = vld [vmem:[%s1343_s11 + $0x8] sm:$0xff]   ;;  %v1200_v26 = vld [vmem:[%s1343_s11] sm:$0xff]  }
  0x34   : > { %1106 = vmatprep.subr.bf16.mxu0 %v1194_v18  ;;  %1137 = vmatprep.subr.bf16.mxu1 %v1194_v18  ;;  %v1198_v24 = vld [vmem:[%s1343_s11 + $0x10] sm:$0xff]   ;;  %v1203_v27 = vld [vmem:[%s1345_s12 + $0x8] sm:$0xff]   ;;  %v1205_v29 = vld [vmem:[%s1345_s12 + $0x10] sm:$0xff]  }
  0x35   : > { %1120 = vmatprep.mubr.bf16.mxu0 %v1201_v21  ;;  %1128 = vmatprep.mubr.bf16.mxu1 %v1202_v22  ;;  %v1204_v28 = vld [vmem:[%s1345_s12 + $0x28] sm:$0xff]   ;;  %v1206_v30 = vld [vmem:[%s1345_s12 + $0x30] sm:$0xff]   ;;  %v1207_v31 = vld [vmem:[%s1345_s12 + $0x18] sm:$0xff]  }
  0x36   : > { %v1208_v32 = vld [vmem:[%s1345_s12 + $0x38] sm:$0xff]   ;;  %v427_v34 = vld [vmem:[#allocation2 + $0x10] sm:$0xff]  ;;  %v425_v38 = vld [vmem:[#allocation2 + $0x40] sm:$0xff] }
  0x37   : > { %1107 = vmatpush3.bf16.msra.mxu0 %v1194_v18  ;;  %1145 = vmatpush3.bf16.msra.mxu1 %v1194_v18  ;;  %v419_v33 = vld [vmem:[#allocation2 + $0x58] sm:$0xff]  ;;  %v417_v37 = vld [vmem:[#allocation2 + $0x30] sm:$0xff]  ;;  %v418_v49 = vld [vmem:[#allocation2] sm:$0xff] }
  0x38   : > { %1108 = vmatprep.subr.bf16.mxu0 %v1195_v19  ;;  %1138 = vmatprep.subr.bf16.mxu1 %v1195_v19  ;;  %v420_v43 = vld [vmem:[#allocation2 + $0x18] sm:$0xff]  ;;  %v426_v50 = vld [vmem:[#allocation2 + $0x20] sm:$0xff]  ;;  %v423_v55 = vld [vmem:[#allocation2 + $0x8] sm:$0xff] }
  0x39   : > { %v428_v44 = vld [vmem:[#allocation2 + $0x38] sm:$0xff]  ;;  %v421_v61 = vld [vmem:[#allocation2 + $0x50] sm:$0xff]  ;;  %v429_v62 = vld [vmem:[#allocation2 + $0x60] sm:$0xff] }
  0x3a   : > { %v431_v56 = vld [vmem:[#allocation2 + $0x78] sm:$0xff]  ;;  %v424_v3 = vld [vmem:[#allocation2 + $0x48] sm:$0xff]  ;;  %v430_v10 = vld [vmem:[#allocation2 + $0x70] sm:$0xff] }
  0x3b   : > { %1109 = vmatpush3.bf16.msra.mxu0 %v1195_v19  ;;  %1146 = vmatpush3.bf16.msra.mxu1 %v1195_v19  ;;  %v432_v4 = vld [vmem:[#allocation2 + $0x28] sm:$0xff] }
  0x3c   : > { %1110 = vmatprep.subr.bf16.mxu0 %v1196_v20  ;;  %1139 = vmatprep.subr.bf16.mxu1 %v1196_v20  ;;  %v422_v9 = vld [vmem:[#allocation2 + $0x68] sm:$0xff] }
  0x3f   : > { %1111 = vmatpush3.bf16.msra.mxu0 %v1196_v20  ;;  %1147 = vmatpush3.bf16.msra.mxu1 %v1196_v20 }
  0x40   : > { %1112 = vmatprep.subr.bf16.mxu0 %v1197_v23  ;;  %1140 = vmatprep.subr.bf16.mxu1 %v1197_v23 }
  0x43   : > { %1113 = vmatpush3.bf16.msra.mxu0 %v1197_v23  ;;  %1148 = vmatpush3.bf16.msra.mxu1 %v1197_v23 }
  0x44   : > { %1114 = vmatprep.subr.bf16.mxu0 %v1198_v24  ;;  %1141 = vmatprep.subr.bf16.mxu1 %v1198_v24 }
  0x47   : > { %1115 = vmatpush3.bf16.msra.mxu0 %v1198_v24  ;;  %1149 = vmatpush3.bf16.msra.mxu1 %v1198_v24 }
  0x48   : > { %1116 = vmatprep.subr.bf16.mxu0 %v1199_v25  ;;  %1142 = vmatprep.subr.bf16.mxu1 %v1199_v25 }
  0x4b   : > { %1117 = vmatpush3.bf16.msra.mxu0 %v1199_v25  ;;  %1150 = vmatpush3.bf16.msra.mxu1 %v1199_v25 }
  0x4c   : > { %1118 = vmatprep.subr.bf16.mxu0 %v1200_v26  ;;  %1143 = vmatprep.subr.bf16.mxu1 %v1200_v26 }
  0x4f   : > { %1119 = vmatpush3.bf16.msra.mxu0 %v1200_v26  ;;  %1151 = vmatpush3.bf16.msra.mxu1 %v1200_v26 }
  0x52   : > { %1121 = vmatmul.mubr.bf16.vlgmr.msra.gmra.mxu0 %v1203_v27  ;;  %1129 = vmatmul.mubr.bf16.vlgmr.msra.gmra.mxu1 %v1204_v28 }
  0x53   : > { %1124 = vmatprep.mubr.bf16.mxu0 %v1205_v29  ;;  %1132 = vmatprep.mubr.bf16.mxu1 %v1206_v30 }
  0x5a   : > { %1125 = vmatmul.mubr.bf16.gmra.mxu0 %v1207_v31  ;;  %1133 = vmatmul.mubr.bf16.gmra.mxu1 %v1208_v32 }
 0x112   : > { %v1122_v35 = vpop.f32.mrf.mxu0  ;;  %v1130_v36 = vpop.f32.mrf.mxu1 }
 0x113   : > { %v660_v39 = vadd.f32 %v1122_v35, %v419_v33  ;;  %v668_v40 = vadd.f32 %v1130_v36, %v427_v34 }
 0x114   : > { %v595_v41 = vpop.f32.mrf.mxu0  ;;  %v627_v42 = vpop.f32.mrf.mxu1 }
 0x115   : > { %676 = vst [vmem:[#allocation2 + $0x58] sm:$0xff] %v660_v39  ;;  %684 = vst [vmem:[#allocation2 + $0x10] sm:$0xff] %v668_v40  ;;  %v658_v45 = vadd.f32 %v595_v41, %v417_v37  ;;  %v666_v46 = vadd.f32 %v627_v42, %v425_v38 }
 0x116   : > { %v1123_v47 = vpop.f32.mrf.mxu0  ;;  %v1131_v48 = vpop.f32.mrf.mxu1 }
 0x117   : > { %674 = vst [vmem:[#allocation2 + $0x30] sm:$0xff] %v658_v45  ;;  %682 = vst [vmem:[#allocation2 + $0x40] sm:$0xff] %v666_v46  ;;  %v661_v51 = vadd.f32 %v1123_v47, %v420_v43  ;;  %v669_v52 = vadd.f32 %v1131_v48, %v428_v44 }
 0x118   : > { %v598_v53 = vpop.f32.mrf.mxu0  ;;  %v630_v54 = vpop.f32.mrf.mxu1 }
 0x119   : > { %677 = vst [vmem:[#allocation2 + $0x18] sm:$0xff] %v661_v51  ;;  %685 = vst [vmem:[#allocation2 + $0x38] sm:$0xff] %v669_v52  ;;  %v659_v57 = vadd.f32 %v598_v53, %v418_v49  ;;  %v667_v58 = vadd.f32 %v630_v54, %v426_v50 }
 0x11a   : > { %v1126_v59 = vpop.f32.mrf.mxu0  ;;  %v1134_v60 = vpop.f32.mrf.mxu1 }
 0x11b   : > { %675 = vst [vmem:[#allocation2] sm:$0xff] %v659_v57  ;;  %683 = vst [vmem:[#allocation2 + $0x20] sm:$0xff] %v667_v58  ;;  %v664_v63 = vadd.f32 %v1126_v59, %v423_v55  ;;  %v672_v0 = vadd.f32 %v1134_v60, %v431_v56 }
 0x11c   : > { %v611_v1 = vpop.f32.mrf.mxu0  ;;  %v643_v2 = vpop.f32.mrf.mxu1 }
 0x11d   : > { %680 = vst [vmem:[#allocation2 + $0x8] sm:$0xff] %v664_v63  ;;  %688 = vst [vmem:[#allocation2 + $0x78] sm:$0xff] %v672_v0  ;;  %v662_v5 = vadd.f32 %v611_v1, %v421_v61  ;;  %v670_v6 = vadd.f32 %v643_v2, %v429_v62 }
 0x11e   : > { %v1127_v7 = vpop.f32.mrf.mxu0  ;;  %v1135_v8 = vpop.f32.mrf.mxu1 }
 0x11f   : > { %678 = vst [vmem:[#allocation2 + $0x50] sm:$0xff] %v662_v5  ;;  %686 = vst [vmem:[#allocation2 + $0x60] sm:$0xff] %v670_v6  ;;  %v665_v11 = vadd.f32 %v1127_v7, %v424_v3  ;;  %v673_v12 = vadd.f32 %v1135_v8, %v432_v4  ;;  %693 = sbr.rel (%p1002_p11) target bundleno = 313 (0x139), region = 85 }
 0x120   : > { %v614_v13 = vpop.f32.mrf.mxu0  ;;  %v646_v14 = vpop.f32.mrf.mxu1 }
 0x121   : > { %681 = vst [vmem:[#allocation2 + $0x48] sm:$0xff] %v665_v11  ;;  %689 = vst [vmem:[#allocation2 + $0x28] sm:$0xff] %v673_v12  ;;  %v663_v15 = vadd.f32 %v614_v13, %v422_v9  ;;  %v671_v16 = vadd.f32 %v646_v14, %v430_v10 }
 0x123   : > { %679 = vst [vmem:[#allocation2 + $0x68] sm:$0xff] %v663_v15  ;;  %687 = vst [vmem:[#allocation2 + $0x70] sm:$0xff] %v671_v16 }
 0x124   : > { %v694_v17 = vld [vmem:[#allocation2 + $0x30] sm:$0xff]  ;;  %v695_v18 = vld [vmem:[#allocation2] sm:$0xff]  ;;  %v696_v23 = vld [vmem:[#allocation2 + $0x58] sm:$0xff] }
 0x125   : > { %v1368_v19 = vld [vmem:[%s1448_s2] ss:$0 sm:$0xff]  ;;  %v697_v24 = vld [vmem:[#allocation2 + $0x18] sm:$0xff]  ;;  %v700_v29 = vld [vmem:[#allocation2 + $0x8] sm:$0xff] }
 0x126   : > { %v717_v20 = vmul.f32 %v1368_v19, %v694_v17  ;;  %v718_v21 = vmul.f32 %v1368_v19, %v695_v18  ;;  %v1375_v22 = vld [vmem:[%s1449_s3] ss:$0 sm:$0xff]  ;;  %v719_v25 = vmul.f32 %v1368_v19, %v696_v23  ;;  %v720_v26 = vmul.f32 %v1368_v19, %v697_v24  ;;  %v702_v39 = vld [vmem:[#allocation2 + $0x40] sm:$0xff]  ;;  %v705_v50 = vld [vmem:[#allocation2 + $0x38] sm:$0xff] }
 0x127   : > { %v698_v27 = vld [vmem:[#allocation2 + $0x50] sm:$0xff]  ;;  %v723_v37 = vmul.f32 %v1368_v19, %v700_v29  ;;  %v703_v44 = vld [vmem:[#allocation2 + $0x20] sm:$0xff]  ;;  %v725_v54 = vmul.f32 %v1368_v19, %v702_v39  ;;  %v708_v61 = vld [vmem:[#allocation2 + $0x78] sm:$0xff]  ;;  %v728_v1 = vmul.f32 %v1368_v19, %v705_v50 }
 0x128   : > { %v740_v30 = vadd.f32 %v1375_v22, %v717_v20  ;;  %v741_v31 = vadd.f32 %v1375_v22, %v718_v21  ;;  %v721_v32 = vmul.f32 %v1368_v19, %v698_v27  ;;  %v701_v34 = vld [vmem:[#allocation2 + $0x48] sm:$0xff]  ;;  %v742_v35 = vadd.f32 %v1375_v22, %v719_v25  ;;  %v704_v49 = vld [vmem:[#allocation2 + $0x10] sm:$0xff]  ;;  %v706_v55 = vld [vmem:[#allocation2 + $0x60] sm:$0xff] }
 0x129   : > { %v743_v36 = vadd.f32 %v1375_v22, %v720_v26  ;;  %v724_v38 = vmul.f32 %v1368_v19, %v701_v34  ;;  %v746_v47 = vadd.f32 %v1375_v22, %v723_v37  ;;  %v726_v60 = vmul.f32 %v1368_v19, %v703_v44  ;;  %v709_v2 = vld [vmem:[#allocation2 + $0x28] sm:$0xff] }
 0x12a   : > { %v699_v28 = vld [vmem:[#allocation2 + $0x68] sm:$0xff]  ;;  %v756_v40 = vmax.f32 %v740_v30, 0.0  ;;  %v757_v41 = vmax.f32 %v741_v31, 0.0  ;;  %v744_v42 = vadd.f32 %v1375_v22, %v721_v32  ;;  %v758_v45 = vmax.f32 %v742_v35, 0.0  ;;  %v707_v56 = vld [vmem:[#allocation2 + $0x70] sm:$0xff] }
 0x12b   : > { %v722_v33 = vmul.f32 %v1368_v19, %v699_v28  ;;  %v759_v46 = vmax.f32 %v743_v36, 0.0  ;;  %v747_v48 = vadd.f32 %v1375_v22, %v724_v38  ;;  %v762_v58 = vmax.f32 %v746_v47, 0.0 }
 0x12c   : > { %v1044_v51 = vpack.c.bf16 %v757_v41, %v756_v40  ;;  %v760_v52 = vmax.f32 %v744_v42, 0.0  ;;  %v748_v63 = vadd.f32 %v1375_v22, %v725_v54  ;;  %v727_v0 = vmul.f32 %v1368_v19, %v704_v49 }
 0x12d   : > { %v745_v43 = vadd.f32 %v1375_v22, %v722_v33  ;;  %v1049_v57 = vpack.c.bf16 %v759_v46, %v758_v45  ;;  %v763_v59 = vmax.f32 %v747_v48, 0.0  ;;  %v749_v4 = vadd.f32 %v1375_v22, %v726_v60 }
 0x12e   : > { %1045 = vst [vmem:[%s1450_s4] sm:$0xff] %v1044_v51   ;;  %v729_v5 = vmul.f32 %v1368_v19, %v706_v55  ;;  %v730_v6 = vmul.f32 %v1368_v19, %v707_v56  ;;  %v764_v7 = vmax.f32 %v748_v63, 0.0  ;;  %v750_v8 = vadd.f32 %v1375_v22, %v727_v0 }
 0x12f   : > { %v761_v53 = vmax.f32 %v745_v43, 0.0  ;;  %1081 = vst [vmem:[%s1450_s4 + $0x8] sm:$0xff] %v1049_v57   ;;  %v1059_v3 = vpack.c.bf16 %v763_v59, %v762_v58  ;;  %v751_v9 = vadd.f32 %v1375_v22, %v728_v1  ;;  %v731_v10 = vmul.f32 %v1368_v19, %v708_v61 }
 0x130   : > { %v765_v11 = vmax.f32 %v749_v4, 0.0  ;;  %v752_v12 = vadd.f32 %v1375_v22, %v729_v5  ;;  %v753_v13 = vadd.f32 %v1375_v22, %v730_v6  ;;  %v732_v14 = vmul.f32 %v1368_v19, %v709_v2 }
 0x131   : > { %v1054_v62 = vpack.c.bf16 %v761_v53, %v760_v52  ;;  %1083 = vst [vmem:[%s1450_s4 + $0x18] sm:$0xff] %v1059_v3   ;;  %v766_v15 = vmax.f32 %v750_v8, 0.0  ;;  %v767_v16 = vmax.f32 %v751_v9, 0.0  ;;  %v754_v17 = vadd.f32 %v1375_v22, %v731_v10 }
 0x132   : > { %v1064_v18 = vpack.c.bf16 %v765_v11, %v764_v7  ;;  %v768_v20 = vmax.f32 %v752_v12, 0.0  ;;  %v769_v21 = vmax.f32 %v753_v13, 0.0  ;;  %v755_v23 = vadd.f32 %v1375_v22, %v732_v14 }
 0x133   : > { %1082 = vst [vmem:[%s1450_s4 + $0x10] sm:$0xff] %v1054_v62   ;;  %v1069_v24 = vpack.c.bf16 %v767_v16, %v766_v15  ;;  %v770_v25 = vmax.f32 %v754_v17, 0.0 }
 0x134   : > { %1084 = vst [vmem:[%s1450_s4 + $0x20] sm:$0xff] %v1064_v18   ;;  %v1074_v26 = vpack.c.bf16 %v769_v21, %v768_v20  ;;  %v771_v27 = vmax.f32 %v755_v23, 0.0 }
 0x135   : > { %1085 = vst [vmem:[%s1450_s4 + $0x28] sm:$0xff] %v1069_v24  }
 0x136   : > { %1086 = vst [vmem:[%s1450_s4 + $0x30] sm:$0xff] %v1074_v26   ;;  %v1079_v19 = vpack.c.bf16 %v771_v27, %v770_v25 }
 0x138   : > { %1087 = vst [vmem:[%s1450_s4 + $0x38] sm:$0xff] %v1079_v19  }
 0x139 PF: > { %s14_s19 = sadd.s32 1, %s1247_s19   ;;  %s1451_s15 = smov %s1235_s16 }
 0x13a   : > { %p11_p12 = scmp.ge.s32.totalorder %s14_s19, 4   ;;  %s1452_s16 = smov %s1310_s23 }
 0x13b   : > { %s1453_s17 = smov %s1243_s18  ;;  %s1454_s18 = smov %s1456_s20 }
 0x13c   :  { %13 = sbr.rel (!%p11_p12) target bundleno = 3 (0x3), region = 129 }

// kernel: resnet50_forward.70
= control target key start
LH: loop header
LB: loop body
LE: loop exit
PB: predicated region body
PF: predicated region fallthrough
CT: control target
= control target key end

     0   :  { %s869_s15 = smov 0   ;;  %s871_s16 = smov 0   ;;  %s965_s0 = inlined_call_operand.vmem [shape: bf16[32,1152], index: 0, kind: input, shape index: {}]   ;;  %s966_s1 = inlined_call_operand.vmem [shape: bf16[1152,128], index: 1, kind: input, shape index: {}]   ;;  %s967_s2 = inlined_call_operand.vmem [shape: f32[1,128], index: 2, kind: input, shape index: {}]   ;;  %s968_s3 = inlined_call_operand.vmem [shape: f32[1,128], index: 3, kind: input, shape index: {}]   ;;  %s969_s4 = inlined_call_operand.vmem [shape: bf16[32,128], index: 4, kind: output, shape index: {}]  }
   0x1   :  { %s873_s17 = smov 0   ;;  %s875_s18 = smov 0  }
   0x2   :  { %s877_s19 = smov 0  }
   0x3 LB: > { %s26_s20 = sadd.s32 1, %s837_s18  ;;  %p49_p1 = scmp.ne.s32.totalorder %s829_s16, %s825_s15  ;;  %s841_s19 = sphi %s877_s19, %s14_s19   ;;  %s837_s18 = sphi %s875_s18, %s973_s18   ;;  %s833_s17 = sphi %s873_s17, %s972_s17   ;;  %s829_s16 = sphi %s871_s16, %s971_s16   ;;  %s825_s15 = sphi %s869_s15, %s970_s15  }
   0x4   : > { %p27_p0 = scmp.ge.s32.totalorder %s26_s20, 9  ;;  %p50_p2 = scmp.eq.s32.totalorder %s841_s19, 0 }
   0x5   : > { %s42_s22 = sadd.s32 1, %s829_s16  ;;  %p678_p5 = scmp.ge.s32.totalorder %s841_s19, 9 }
   0x6   : > { %s975_s20 = smov (%p27_p0, %s26_s20), 0  ;;  %p51_p3 = por %p50_p2, %p49_p1 }
   0x7   : > { %s38_s21 = ssub.s32 %s837_s18, %s975_s20  ;;  %195 = sbr.rel (%p678_p5) target bundleno = 18 (0x12), region = 24 }
   0x8   : > { %p40_p4 = scmp.eq.s32.totalorder %s38_s21, 0 }
   0xa   : > { %s904_s23 = scalar_select %p40_p4, %s829_s16, %s42_s22  }
   0xc   : > { %198 = sbr.rel (!%p51_p3) target bundleno = 18 (0x12), region = 28  ;;  %s200_s24 = sand.u32 (%p51_p3), 1, %s829_s16  }
   0xd   : > { %s680_s25 = sshll.u32 (%p51_p3), %s837_s18, 2  ;;  %s679_s26 = sshll.u32 (%p51_p3), %s200_s24, 4 }
   0xe   : > { %s207_s29 = scalar_lea.vmem (%p51_p3), %s965_s0, %s680_s25  ;;  %s202_s30 = scalar_lea.vmem (%p51_p3), [#allocation3], %s679_s26 }
   0xf   : > { %v224_v0 = vld [vmem:[%s207_s29] sm:$0xf] (%p51_p3)  ;;  %v226_v1 = vld [vmem:[%s207_s29 + $0x24] sm:$0xf] (%p51_p3)  ;;  %v228_v2 = vld [vmem:[%s207_s29 + $0x48] sm:$0xf] (%p51_p3) }
  0x10   : > { %225 = vst [vmem:[%s202_s30] sm:$0xf] (%p51_p3), %v224_v0  ;;  %227 = vst [vmem:[%s202_s30 + $0x4] sm:$0xf] (%p51_p3), %v226_v1  ;;  %v230_v3 = vld [vmem:[%s207_s29 + $0x6c] sm:$0xf] (%p51_p3) }
  0x11   : > { %229 = vst [vmem:[%s202_s30 + $0x8] sm:$0xf] %v228_v2  ;;  %231 = vst [vmem:[%s202_s30 + $0xc] sm:$0xf] %v230_v3 }
  0x12 PF: > { %p681_p6 = scmp.ge.s32.totalorder %s841_s19, 1  ;;  %p274_p7 = scmp.lt.s32.totalorder %s841_s19, 10 }
  0x14   : > { %p275_p8 = pnand %p681_p6, %p274_p7 }
  0x15   : > { %s281_s5 = sand.u32 (!%p275_p8), 1, %s825_s15   ;;  %s683_s6 = sshll.u32 (!%p275_p8), %s833_s17, 4 }
  0x16   : > { %278 = sbr.rel (%p275_p8) target bundleno = 286 (0x11e), region = 73  ;;  %s916_s7 = sshll.u32 (!%p275_p8), %s281_s5, 4 }
  0x17   : > { %p325_p9 = scmp.lt.s32.totalorder (!%p275_p8), %s683_s6, 143  ;;  %s283_s12 = scalar_lea.vmem (!%p275_p8), [#allocation3], %s916_s7 }
  0x18   : > { %p685_p10 = scmp.ne.s32.totalorder (!%p275_p8), %s833_s17, 0 }
  0x1b   : > { %s977_s6 = smov (!%p325_p9, %s683_s6), 143  ;;  %352 = sbr.rel (%p685_p10) target bundleno = 35 (0x23), region = 81 }
  0x1c   : > { %s684_s8 = sshll.u32 %s977_s6, 2 }
  0x1d   : > { %s921_s11 = scalar_lea.vmem %s966_s1, %s684_s8 }
  0x20   : > { %v843_v4 = vmov 0.0  }
  0x21   : > { %353 = vst [vmem:[#allocation2 + $0x10] sm:$0xff] %v843_v4  ;;  %354 = vst [vmem:[#allocation2] sm:$0xff] %v843_v4 }
  0x22   : > { %355 = vst [vmem:[#allocation2 + $0x18] sm:$0xff] %v843_v4  ;;  %356 = vst [vmem:[#allocation2 + $0x8] sm:$0xff] %v843_v4 }
  0x23 PF: > { %v793_v5 = vld [vmem:[%s921_s11 + $0x38] sm:$0xff]   ;;  %v794_v6 = vld [vmem:[%s921_s11 + $0x30] sm:$0xff]   ;;  %v795_v7 = vld [vmem:[%s921_s11 + $0x28] sm:$0xff]   ;;  %p696_p11 = scmp.ne.s32.totalorder %s833_s17, 8 }
  0x24   : > { %732 = vmatprep.subr.bf16.mxu0 %v793_v5  ;;  %v796_v8 = vld [vmem:[%s921_s11 + $0x20] sm:$0xff]   ;;  %v797_v10 = vld [vmem:[%s921_s11 + $0x18] sm:$0xff]   ;;  %v798_v11 = vld [vmem:[%s921_s11 + $0x10] sm:$0xff]  }
  0x25   : > { %733 = vmatpush3.bf16.msra.mxu0 %v793_v5  ;;  %v801_v9 = vld [vmem:[%s283_s12] sm:$0xff]   ;;  %v799_v12 = vld [vmem:[%s921_s11 + $0x8] sm:$0xff]  }
  0x26   : > { %734 = vmatprep.subr.bf16.mxu0 %v794_v6  ;;  %748 = vmatprep.mubr.bf16.mxu0 %v801_v9  ;;  %v800_v13 = vld [vmem:[%s921_s11] sm:$0xff]   ;;  %v802_v14 = vld [vmem:[%s283_s12 + $0x8] sm:$0xff]  }
  0x28   : > { %v357_v17 = vld [vmem:[#allocation2 + $0x10] sm:$0xff]  ;;  %v358_v23 = vld [vmem:[#allocation2] sm:$0xff] }
  0x29   : > { %735 = vmatpush3.bf16.msra.mxu0 %v794_v6  ;;  %v359_v15 = vld [vmem:[#allocation2 + $0x18] sm:$0xff]  ;;  %v360_v20 = vld [vmem:[#allocation2 + $0x8] sm:$0xff] }
  0x2a   : > { %736 = vmatprep.subr.bf16.mxu0 %v795_v7 }
  0x2d   : > { %737 = vmatpush3.bf16.msra.mxu0 %v795_v7 }
  0x2e   : > { %738 = vmatprep.subr.bf16.mxu0 %v796_v8 }
  0x31   : > { %739 = vmatpush3.bf16.msra.mxu0 %v796_v8 }
  0x32   : > { %740 = vmatprep.subr.bf16.mxu0 %v797_v10 }
  0x35   : > { %741 = vmatpush3.bf16.msra.mxu0 %v797_v10 }
  0x36   : > { %742 = vmatprep.subr.bf16.mxu0 %v798_v11 }
  0x39   : > { %743 = vmatpush3.bf16.msra.mxu0 %v798_v11 }
  0x3a   : > { %744 = vmatprep.subr.bf16.mxu0 %v799_v12 }
  0x3d   : > { %745 = vmatpush3.bf16.msra.mxu0 %v799_v12 }
  0x3e   : > { %746 = vmatprep.subr.bf16.mxu0 %v800_v13 }
  0x41   : > { %747 = vmatpush3.bf16.msra.mxu0 %v800_v13 }
  0x44   : > { %749 = vmatmul.mubr.bf16.vlgmr.msra.gmra.mxu0 %v802_v14 }
 0x104   : > { %v750_v16 = vpop.f32.mrf.mxu0 }
 0x105   : > { %v492_v18 = vadd.f32 %v750_v16, %v359_v15 }
 0x106   : > { %v475_v19 = vpop.f32.mrf.mxu0 }
 0x107   : > { %496 = vst [vmem:[#allocation2 + $0x18] sm:$0xff] %v492_v18  ;;  %v490_v21 = vadd.f32 %v475_v19, %v357_v17 }
 0x108   : > { %v751_v22 = vpop.f32.mrf.mxu0 }
 0x109   : > { %494 = vst [vmem:[#allocation2 + $0x10] sm:$0xff] %v490_v21  ;;  %v493_v24 = vadd.f32 %v751_v22, %v360_v20  ;;  %501 = sbr.rel (%p696_p11) target bundleno = 286 (0x11e), region = 85 }
 0x10a   : > { %v478_v25 = vpop.f32.mrf.mxu0 }
 0x10b   : > { %497 = vst [vmem:[#allocation2 + $0x8] sm:$0xff] %v493_v24  ;;  %v491_v26 = vadd.f32 %v478_v25, %v358_v23 }
 0x10d   : > { %495 = vst [vmem:[#allocation2] sm:$0xff] %v491_v26 }
 0x10e   : > { %v697_v29 = vld [vmem:[%s967_s2] ss:$0 sm:$0xff]  ;;  %v504_v33 = vld [vmem:[#allocation2 + $0x18] sm:$0xff] }
 0x10f   : > { %v698_v32 = vld [vmem:[%s968_s3] ss:$0 sm:$0xff]  ;;  %v515_v35 = vmul.f32 %v697_v29, %v504_v33 }
 0x110   : > { %v502_v27 = vld [vmem:[#allocation2 + $0x10] sm:$0xff] }
 0x111   : > { %v513_v30 = vmul.f32 %v697_v29, %v502_v27  ;;  %v526_v39 = vadd.f32 %v698_v32, %v515_v35 }
 0x112   : > { %v505_v34 = vld [vmem:[#allocation2 + $0x8] sm:$0xff] }
 0x113   : > { %v516_v36 = vmul.f32 %v697_v29, %v505_v34  ;;  %v524_v37 = vadd.f32 %v698_v32, %v513_v30  ;;  %v530_v43 = vmax.f32 %v526_v39, 0.0 }
 0x114   : > { %v503_v28 = vld [vmem:[#allocation2] sm:$0xff] }
 0x115   : > { %v514_v31 = vmul.f32 %v697_v29, %v503_v28  ;;  %v527_v40 = vadd.f32 %v698_v32, %v516_v36  ;;  %v528_v41 = vmax.f32 %v524_v37, 0.0 }
 0x117   : > { %v525_v38 = vadd.f32 %v698_v32, %v514_v31  ;;  %v531_v44 = vmax.f32 %v527_v40, 0.0 }
 0x119   : > { %v529_v42 = vmax.f32 %v525_v38, 0.0  ;;  %v719_v46 = vpack.c.bf16 %v531_v44, %v530_v43 }
 0x11b   : > { %v714_v45 = vpack.c.bf16 %v529_v42, %v528_v41  ;;  %721 = vst [vmem:[%s969_s4 + $0x8] sm:$0xff] %v719_v46  }
 0x11d   : > { %715 = vst [vmem:[%s969_s4] sm:$0xff] %v714_v45  }
 0x11e PF: > { %s14_s19 = sadd.s32 1, %s841_s19   ;;  %s970_s15 = smov %s829_s16 }
 0x11f   : > { %p11_p12 = scmp.ge.s32.totalorder %s14_s19, 11   ;;  %s971_s16 = smov %s904_s23 }
 0x120   : > { %s972_s17 = smov %s837_s18  ;;  %s973_s18 = smov %s975_s20 }
 0x121   :  { %13 = sbr.rel (!%p11_p12) target bundleno = 3 (0x3), region = 129 }

// kernel: resnet50_forward.68
= control target key start
LH: loop header
LB: loop body
LE: loop exit
PB: predicated region body
PF: predicated region fallthrough
CT: control target
= control target key end

     0   :  { %s1425_s0 = inlined_call_operand.vmem [shape: bf16[32,256], index: 0, kind: input, shape index: {}]   ;;  %s1426_s1 = inlined_call_operand.vmem [shape: bf16[256,512], index: 1, kind: input, shape index: {}]   ;;  %s1427_s2 = inlined_call_operand.vmem [shape: f32[1,512], index: 2, kind: input, shape index: {}]   ;;  %s1428_s3 = inlined_call_operand.vmem [shape: f32[1,512], index: 3, kind: input, shape index: {}]   ;;  %s1429_s4 = inlined_call_operand.vmem [shape: bf16[32,512], index: 4, kind: output, shape index: {}]  }
   0x1   :  { %1432 = sst [smem:[#allocation8_spill]] %s1425_s0 }
   0x2   :  { %s1191_s15 = smov 0   ;;  %s1193_s16 = smov 0  }
   0x3   :  { %s1195_s17 = smov 0   ;;  %s1197_s18 = smov 0  }
   0x4   :  { %s1199_s19 = smov 0   ;;  %s1201_s20 = smov 0  }
   0x5   :  { %s1203_s21 = smov 0   ;;  %s1205_s22 = smov 0  }
   0x6   :  { %s1207_s23 = smov 0   ;;  %s1209_s24 = smov 0  }
   0x7   :  { %s1211_s25 = smov 0  }
   0x8 LB: > { %s892_s26 = sadd.s32 4294967295, %s1162_s25   ;;  %s26_s27 = sadd.s32 1, %s1154_s23  ;;  %s1162_s25 = sphi %s1211_s25, %s14_s25   ;;  %s1158_s24 = sphi %s1209_s24, %s1450_s24   ;;  %s1154_s23 = sphi %s1207_s23, %s1449_s23   ;;  %s1150_s22 = sphi %s1205_s22, %s1448_s22   ;;  %s1146_s21 = sphi %s1203_s21, %s1447_s21   ;;  %s1142_s20 = sphi %s1201_s20, %s1446_s20   ;;  %s1138_s19 = sphi %s1199_s19, %s1445_s19   ;;  %s1134_s18 = sphi %s1197_s18, %s1444_s18   ;;  %s1130_s17 = sphi %s1195_s17, %s1443_s17   ;;  %s1126_s16 = sphi %s1193_s16, %s1442_s16   ;;  %s1122_s15 = sphi %s1191_s15, %s1441_s15  }
   0x9   : > { %p27_p0 = scmp.ge.s32.totalorder %s26_s27, 2  ;;  %s29_s28 = sadd.s32 1, %s1158_s24 }
   0xa   : > { %s42_s29 = sadd.s32 1, %s1142_s20  ;;  %p49_p1 = scmp.ne.s32.totalorder %s1142_s20, %s1138_s19 }
   0xb   : > { %s1452_s27 = smov (%p27_p0, %s26_s27), 0  ;;  %s1454_s28 = smov (!%p27_p0, %s29_s28), %s1158_s24 }
   0xc   : > { %1433 = sst [smem:[#allocation6_spill]] %s1452_s27  ;;  %s38_s30 = ssub.s32 %s1154_s23, %s1452_s27 }
   0xd   : > { %p50_p2 = scmp.eq.s32.totalorder %s1162_s25, 0  ;;  %p31_p3 = scmp.ge.s32.totalorder %s1454_s28, 2 }
   0xe   : > { %p40_p4 = scmp.eq.s32.totalorder %s38_s30, 0  ;;  %s70_s6 = sadd.s32 1, %s1134_s18 }
   0xf   : > { %p1258_p5 = por %p50_p2, %p49_p1  ;;  %s1456_s28 = smov (%p31_p3, %s1454_s28), 0 }
  0x10   : > { %1435 = sst [smem:[#allocation7_spill]] %s1456_s28  ;;  %s66_s8 = ssub.s32 %s1158_s24, %s1456_s28 }
  0x11   : > { %s1266_s7 = scalar_select %p40_p4, %s1142_s20, %s42_s29  }
  0x12   : > { %p77_p6 = scmp.ne.s32.totalorder %s1134_s18, %s1130_s17  ;;  %s67_s9 = sor.u32 %s66_s8, %s38_s30 }
  0x13   : > { %p148_p7 = scmp.eq.s32.totalorder %s66_s8, 0  ;;  %p68_p8 = scmp.eq.s32.totalorder %s67_s9, 0 }
  0x14   : > { %p1272_p9 = por %p77_p6, %p50_p2  ;;  %s150_s11 = sadd.s32 1, %s1126_s16 }
  0x15   : > { %p160_p10 = scmp.ne.s32.totalorder %s1126_s16, %s1122_s15  ;;  %p161_p11 = scmp.eq.s32.totalorder %s892_s26, 3 }
  0x16   : > { %s1280_s12 = scalar_select %p68_p8, %s1134_s18, %s70_s6  }
  0x17   : > { %s1283_s13 = scalar_select %p148_p7, %s1126_s16, %s150_s11  }
  0x18   : > { %p1285_p12 = por %p161_p11, %p160_p10  ;;  %p895_p13 = scmp.ge.s32.totalorder %s1162_s25, 4 }
  0x1a   : > { %183 = sbr.rel (%p895_p13) target bundleno = 58 (0x3a), region = 16 }
  0x1f   : > { %186 = sbr.rel (!%p1258_p5) target bundleno = 43 (0x2b), region = 20  ;;  %s188_s29 = sand.u32 (%p1258_p5), 1, %s1142_s20  }
  0x20   : > { %s897_s30 = sshll.u32 (%p1258_p5), %s1154_s23, 2  ;;  %s896_s8 = sshll.u32 (%p1258_p5), %s188_s29, 4 }
  0x21   : > { %s1438_s0 = sld [smem:[#allocation8_spill]] (%p1258_p5)  ;;  %s190_s26 = scalar_lea.vmem (%p1258_p5), [#allocation3], %s896_s8 }
  0x27   : > { %s195_s11 = scalar_lea.vmem %s1438_s0, %s897_s30 }
  0x28   : > { %v212_v0 = vld [vmem:[%s195_s11] sm:$0xf]  ;;  %v214_v1 = vld [vmem:[%s195_s11 + $0x8] sm:$0xf]  ;;  %v216_v2 = vld [vmem:[%s195_s11 + $0x10] sm:$0xf] }
  0x29   : > { %213 = vst [vmem:[%s190_s26] sm:$0xf] %v212_v0  ;;  %215 = vst [vmem:[%s190_s26 + $0x4] sm:$0xf] %v214_v1  ;;  %v218_v3 = vld [vmem:[%s195_s11 + $0x18] sm:$0xf] }
  0x2a   : > { %217 = vst [vmem:[%s190_s26 + $0x8] sm:$0xf] %v216_v2  ;;  %219 = vst [vmem:[%s190_s26 + $0xc] sm:$0xf] %v218_v3 }
  0x2b PF: > { %251 = sbr.rel (!%p1272_p9) target bundleno = 58 (0x3a), region = 61  ;;  %s253_s5 = sand.u32 (%p1272_p9), 1, %s1134_s18  }
  0x2c   : > { %s900_s29 = sshll.u32 (%p1272_p9), %s1158_s24, 1  ;;  %s898_s6 = sshll.u32 (%p1272_p9), %s253_s5, 7 }
  0x2d   : > { %s938_s30 = sshll.u32 (%p1272_p9), %s1154_s23, 6  ;;  %s255_s10 = scalar_lea.vmem (%p1272_p9), [#allocation4], %s898_s6 }
  0x2e   : > { %s259_s9 = sadd.s32 (%p1272_p9), %s938_s30, %s900_s29 }
  0x2f   : > { %s902_s0 = sshll.u32 (%p1272_p9), %s259_s9, 2 }
  0x30   : > { %s1305_s27 = scalar_lea.vmem %s1426_s1, %s902_s0 }
  0x31   : > { %v320_v4 = vld [vmem:[%s1305_s27] sm:$0xff]  ;;  %v322_v5 = vld [vmem:[%s1305_s27 + $0x10] sm:$0xff] }
  0x32   : > { %v324_v6 = vld [vmem:[%s1305_s27 + $0x20] sm:$0xff]  ;;  %321 = vst [vmem:[%s255_s10] sm:$0xff] %v320_v4  ;;  %323 = vst [vmem:[%s255_s10 + $0x8] sm:$0xff] %v322_v5  ;;  %v326_v7 = vld [vmem:[%s1305_s27 + $0x30] sm:$0xff] }
  0x33   : > { %325 = vst [vmem:[%s255_s10 + $0x10] sm:$0xff] %v324_v6  ;;  %v328_v8 = vld [vmem:[%s1305_s27 + $0x40] sm:$0xff]  ;;  %v330_v9 = vld [vmem:[%s1305_s27 + $0x50] sm:$0xff]  ;;  %327 = vst [vmem:[%s255_s10 + $0x18] sm:$0xff] %v326_v7 }
  0x34   : > { %329 = vst [vmem:[%s255_s10 + $0x20] sm:$0xff] %v328_v8  ;;  %331 = vst [vmem:[%s255_s10 + $0x28] sm:$0xff] %v330_v9  ;;  %v332_v10 = vld [vmem:[%s1305_s27 + $0x60] sm:$0xff]  ;;  %v334_v11 = vld [vmem:[%s1305_s27 + $0x70] sm:$0xff] }
  0x35   : > { %v336_v12 = vld [vmem:[%s1305_s27 + $0x80] sm:$0xff]  ;;  %333 = vst [vmem:[%s255_s10 + $0x30] sm:$0xff] %v332_v10  ;;  %335 = vst [vmem:[%s255_s10 + $0x38] sm:$0xff] %v334_v11  ;;  %v338_v13 = vld [vmem:[%s1305_s27 + $0x90] sm:$0xff] }
  0x36   : > { %337 = vst [vmem:[%s255_s10 + $0x40] sm:$0xff] %v336_v12  ;;  %v340_v14 = vld [vmem:[%s1305_s27 + $0xa0] sm:$0xff]  ;;  %v342_v15 = vld [vmem:[%s1305_s27 + $0xb0] sm:$0xff]  ;;  %339 = vst [vmem:[%s255_s10 + $0x48] sm:$0xff] %v338_v13 }
  0x37   : > { %341 = vst [vmem:[%s255_s10 + $0x50] sm:$0xff] %v340_v14  ;;  %343 = vst [vmem:[%s255_s10 + $0x58] sm:$0xff] %v342_v15  ;;  %v344_v16 = vld [vmem:[%s1305_s27 + $0xc0] sm:$0xff]  ;;  %v346_v17 = vld [vmem:[%s1305_s27 + $0xd0] sm:$0xff] }
  0x38   : > { %v348_v18 = vld [vmem:[%s1305_s27 + $0xe0] sm:$0xff]  ;;  %345 = vst [vmem:[%s255_s10 + $0x60] sm:$0xff] %v344_v16  ;;  %347 = vst [vmem:[%s255_s10 + $0x68] sm:$0xff] %v346_v17  ;;  %v350_v19 = vld [vmem:[%s1305_s27 + $0xf0] sm:$0xff] }
  0x39   : > { %349 = vst [vmem:[%s255_s10 + $0x70] sm:$0xff] %v348_v18  ;;  %351 = vst [vmem:[%s255_s10 + $0x78] sm:$0xff] %v350_v19 }
  0x3a PF: > { %p903_p0 = scmp.ge.s32.totalorder %s1162_s25, 1  ;;  %p372_p1 = scmp.lt.s32.totalorder %s1162_s25, 5 }
  0x3c   : > { %p373_p2 = pnand %p903_p0, %p372_p1 }
  0x3d   : > { %s379_s0 = sand.u32 (!%p373_p2), 1, %s1138_s19   ;;  %s386_s28 = sand.u32 (!%p373_p2), 1, %s1130_s17  }
  0x3e   : > { %376 = sbr.rel (%p373_p2) target bundleno = 339 (0x153), region = 107  ;;  %s1327_s11 = sshll.u32 (!%p373_p2), %s379_s0, 4 }
  0x3f   : > { %s905_s26 = sshll.u32 (!%p373_p2), %s386_s28, 7  ;;  %s419_s27 = sand.u32 (!%p373_p2), 1, %s1122_s15  }
  0x40   : > { %s907_s5 = sshll.u32 (!%p373_p2), %s1150_s22, 1  ;;  %s906_s29 = sshll.u32 (!%p373_p2), %s419_s27, 5 }
  0x41   : > { %p426_p3 = scmp.lt.s32.totalorder (!%p373_p2), %s907_s5, 3  ;;  %s381_s19 = scalar_lea.vmem (!%p373_p2), [#allocation3], %s1327_s11 }
  0x42   : > { %s1342_s0 = scalar_lea.vmem (!%p373_p2), [#allocation4], %s905_s26  ;;  %s1344_s28 = scalar_lea.vmem (!%p373_p2), [#allocation5], %s906_s29 }
  0x43   : > { %s1458_s5 = smov (!%p426_p3, %s907_s5), 3  ;;  %p909_p4 = scmp.ne.s32.totalorder %s1146_s21, 0 }
  0x44   : > { %s428_s9 = scalar_lea.vmem %s1427_s2, %s1458_s5  ;;  %s433_s17 = scalar_lea.vmem %s1428_s3, %s1458_s5 }
  0x45   : > { %441 = sbr.rel (%p909_p4) target bundleno = 79 (0x4f), region = 119 }
  0x4a   : > { %v1164_v20 = vmov 0.0  }
  0x4b   : > { %442 = vst [vmem:[#allocation2 + $0x30] sm:$0xff] %v1164_v20  ;;  %443 = vst [vmem:[#allocation2] sm:$0xff] %v1164_v20 }
  0x4c   : > { %444 = vst [vmem:[#allocation2 + $0x18] sm:$0xff] %v1164_v20  ;;  %445 = vst [vmem:[#allocation2 + $0x10] sm:$0xff] %v1164_v20 }
  0x4d   : > { %446 = vst [vmem:[#allocation2 + $0x8] sm:$0xff] %v1164_v20  ;;  %447 = vst [vmem:[#allocation2 + $0x20] sm:$0xff] %v1164_v20 }
  0x4e   : > { %448 = vst [vmem:[#allocation2 + $0x28] sm:$0xff] %v1164_v20  ;;  %449 = vst [vmem:[#allocation2 + $0x38] sm:$0xff] %v1164_v20 }
  0x4f PF: > { %v1050_v21 = vld [vmem:[%s1342_s0 + $0x74] ss:$8 sps:$4 sm:$0xff]   ;;  %v1052_v22 = vld [vmem:[%s1342_s0 + $0x70] ss:$8 sps:$4 sm:$0xff]   ;;  %v1165_v23 = vmov 0   ;;  %p928_p5 = scmp.ne.s32.totalorder %s1146_s21, 1 }
  0x50   : > { %602 = vmatprep.mubr.bf16.mxu0 %v1165_v23  ;;  %612 = vmatprep.mubr.bf16.mxu1 %v1165_v23  ;;  %v1053_v24 = vld [vmem:[%s1342_s0 + $0x64] ss:$8 sps:$4 sm:$0xff]   ;;  %v1055_v25 = vld [vmem:[%s1342_s0 + $0x60] ss:$8 sps:$4 sm:$0xff]   ;;  %v1056_v26 = vld [vmem:[%s1342_s0 + $0x54] ss:$8 sps:$4 sm:$0xff]  }
  0x51   : > { %570 = vmatprep.subr.bf16.mxu0 %v1050_v21  ;;  %944 = vmatprep.subr.bf16.mxu1 %v1050_v21  ;;  %v1058_v27 = vld [vmem:[%s1342_s0 + $0x50] ss:$8 sps:$4 sm:$0xff]   ;;  %v1059_v28 = vld [vmem:[%s1342_s0 + $0x44] ss:$8 sps:$4 sm:$0xff]   ;;  %v1061_v29 = vld [vmem:[%s1342_s0 + $0x40] ss:$8 sps:$4 sm:$0xff]  }
  0x52   : > { %571 = vmatpush1.bf16.msra.mxu0 %v1052_v22  ;;  %952 = vmatpush1.bf16.msra.mxu1 %v1052_v22  ;;  %v1062_v30 = vld [vmem:[%s1342_s0 + $0x34] ss:$8 sps:$4 sm:$0xff]   ;;  %v1064_v31 = vld [vmem:[%s1342_s0 + $0x30] ss:$8 sps:$4 sm:$0xff]   ;;  %v1065_v32 = vld [vmem:[%s1342_s0 + $0x24] ss:$8 sps:$4 sm:$0xff]  }
  0x53   : > { %572 = vmatprep.subr.bf16.mxu0 %v1053_v24  ;;  %945 = vmatprep.subr.bf16.mxu1 %v1053_v24  ;;  %v1067_v33 = vld [vmem:[%s1342_s0 + $0x20] ss:$8 sps:$4 sm:$0xff]   ;;  %v1068_v34 = vld [vmem:[%s1342_s0 + $0x14] ss:$8 sps:$4 sm:$0xff]   ;;  %v1070_v35 = vld [vmem:[%s1342_s0 + $0x10] ss:$8 sps:$4 sm:$0xff]  }
  0x54   : > { %v1071_v36 = vld [vmem:[%s1342_s0 + $0x4] ss:$8 sps:$4 sm:$0xff]   ;;  %v1073_v37 = vld [vmem:[%s1342_s0] ss:$8 sps:$4 sm:$0xff]   ;;  %v450_v40 = vld [vmem:[#allocation2 + $0x30] sm:$0xff] }
  0x55   : > { %v1074_v38 = vld [vmem:[%s381_s19] sm:$0xff]   ;;  %v1075_v39 = vld [vmem:[%s381_s19 + $0x8] sm:$0xff]  }
  0x56   : > { %573 = vmatpush1.bf16.msra.mxu0 %v1055_v25  ;;  %953 = vmatpush1.bf16.msra.mxu1 %v1055_v25  ;;  %v454_v41 = vld [vmem:[#allocation2 + $0x8] sm:$0xff]  ;;  %v451_v44 = vld [vmem:[#allocation2] sm:$0xff]  ;;  %v452_v50 = vld [vmem:[#allocation2 + $0x18] sm:$0xff] }
  0x57   : > { %574 = vmatprep.subr.bf16.mxu0 %v1056_v26  ;;  %946 = vmatprep.subr.bf16.mxu1 %v1056_v26  ;;  %v455_v45 = vld [vmem:[#allocation2 + $0x20] sm:$0xff]  ;;  %v456_v51 = vld [vmem:[#allocation2 + $0x28] sm:$0xff]  ;;  %v453_v56 = vld [vmem:[#allocation2 + $0x10] sm:$0xff] }
  0x58   : > { %v457_v57 = vld [vmem:[#allocation2 + $0x38] sm:$0xff] }
  0x5a   : > { %575 = vmatpush1.bf16.msra.mxu0 %v1058_v27  ;;  %954 = vmatpush1.bf16.msra.mxu1 %v1058_v27 }
  0x5b   : > { %576 = vmatprep.subr.bf16.mxu0 %v1059_v28  ;;  %947 = vmatprep.subr.bf16.mxu1 %v1059_v28 }
  0x5e   : > { %577 = vmatpush1.bf16.msra.mxu0 %v1061_v29  ;;  %955 = vmatpush1.bf16.msra.mxu1 %v1061_v29 }
  0x5f   : > { %578 = vmatprep.subr.bf16.mxu0 %v1062_v30  ;;  %948 = vmatprep.subr.bf16.mxu1 %v1062_v30 }
  0x62   : > { %579 = vmatpush1.bf16.msra.mxu0 %v1064_v31  ;;  %956 = vmatpush1.bf16.msra.mxu1 %v1064_v31 }
  0x63   : > { %580 = vmatprep.subr.bf16.mxu0 %v1065_v32  ;;  %949 = vmatprep.subr.bf16.mxu1 %v1065_v32 }
  0x66   : > { %581 = vmatpush1.bf16.msra.mxu0 %v1067_v33  ;;  %957 = vmatpush1.bf16.msra.mxu1 %v1067_v33 }
  0x67   : > { %582 = vmatprep.subr.bf16.mxu0 %v1068_v34  ;;  %950 = vmatprep.subr.bf16.mxu1 %v1068_v34 }
  0x6a   : > { %583 = vmatpush1.bf16.msra.mxu0 %v1070_v35  ;;  %958 = vmatpush1.bf16.msra.mxu1 %v1070_v35 }
  0x6b   : > { %584 = vmatprep.subr.bf16.mxu0 %v1071_v36  ;;  %951 = vmatprep.subr.bf16.mxu1 %v1071_v36 }
  0x6e   : > { %585 = vmatpush1.bf16.msra.mxu0 %v1073_v37  ;;  %959 = vmatpush1.bf16.msra.mxu1 %v1073_v37 }
  0x71   : > { %603 = vmatmul.mubr.bf16.vlgmr.msra.gmra.mxu0 %v1074_v38  ;;  %613 = vmatmul.mubr.bf16.vlgmr.msra.gmra.mxu1 %v1075_v39 }
 0x131   : > { %v604_v42 = vpop.f32.mrf.mxu0  ;;  %v614_v43 = vpop.f32.mrf.mxu1 }
 0x132   : > { %v623_v46 = vadd.f32 %v604_v42, %v450_v40  ;;  %v627_v47 = vadd.f32 %v614_v43, %v454_v41 }
 0x133   : > { %v606_v48 = vpop.f32.mrf.mxu0  ;;  %v616_v49 = vpop.f32.mrf.mxu1 }
 0x134   : > { %631 = vst [vmem:[#allocation2 + $0x30] sm:$0xff] %v623_v46  ;;  %635 = vst [vmem:[#allocation2 + $0x8] sm:$0xff] %v627_v47  ;;  %v624_v52 = vadd.f32 %v606_v48, %v451_v44  ;;  %v628_v53 = vadd.f32 %v616_v49, %v455_v45 }
 0x135   : > { %v608_v54 = vpop.f32.mrf.mxu0  ;;  %v618_v55 = vpop.f32.mrf.mxu1 }
 0x136   : > { %632 = vst [vmem:[#allocation2] sm:$0xff] %v624_v52  ;;  %636 = vst [vmem:[#allocation2 + $0x20] sm:$0xff] %v628_v53  ;;  %v625_v58 = vadd.f32 %v608_v54, %v452_v50  ;;  %v629_v59 = vadd.f32 %v618_v55, %v456_v51  ;;  %642 = sbr.rel (%p928_p5) target bundleno = 331 (0x14b), region = 123 }
 0x137   : > { %v610_v60 = vpop.f32.mrf.mxu0  ;;  %v620_v61 = vpop.f32.mrf.mxu1 }
 0x138   : > { %633 = vst [vmem:[#allocation2 + $0x18] sm:$0xff] %v625_v58  ;;  %637 = vst [vmem:[#allocation2 + $0x28] sm:$0xff] %v629_v59  ;;  %v626_v62 = vadd.f32 %v610_v60, %v453_v56  ;;  %v630_v63 = vadd.f32 %v620_v61, %v457_v57 }
 0x13a   : > { %634 = vst [vmem:[#allocation2 + $0x10] sm:$0xff] %v626_v62  ;;  %638 = vst [vmem:[#allocation2 + $0x38] sm:$0xff] %v630_v63 }
 0x13b   : > { %v653_v0 = vlaneseq  ;;  %v651_v2 = vld [vmem:[%s428_s9] sm:$0x3]  ;;  %v647_v10 = vld [vmem:[#allocation2 + $0x8] sm:$0xff] }
 0x13c   : > { %v671_v3 = vld [vmem:[%s433_s17] sm:$0x3] }
 0x13d   : > { %v654_v1 = vshrl.u32 %v653_v0, 7  ;;  %v643_v4 = vld [vmem:[#allocation2 + $0x30] sm:$0xff]  ;;  %v644_v5 = vld [vmem:[#allocation2] sm:$0xff] }
 0x13e   : > { %v648_v15 = vld [vmem:[#allocation2 + $0x20] sm:$0xff] }
 0x13f   : > { %v655_v6 = vsub.s32 0, %v654_v1  ;;  %v659_v7 = vsub.s32 1, %v654_v1  ;;  %v645_v8 = vld [vmem:[#allocation2 + $0x18] sm:$0xff]  ;;  %v649_v16 = vld [vmem:[#allocation2 + $0x28] sm:$0xff] }
 0x141   : > { %v646_v9 = vld [vmem:[#allocation2 + $0x10] sm:$0xff]  ;;  %v656_v11 = vrot.slane %v651_v2, %v655_v6  ;;  %v660_v12 = vrot.slane %v651_v2, %v659_v7  ;;  %v676_v13 = vrot.slane %v671_v3, %v655_v6  ;;  %v680_v14 = vrot.slane %v671_v3, %v659_v7  ;;  %v650_v17 = vld [vmem:[#allocation2 + $0x38] sm:$0xff] }
 0x143   : > { %v663_v18 = vmul.f32 %v656_v11, %v643_v4  ;;  %v664_v19 = vmul.f32 %v660_v12, %v644_v5  ;;  %v665_v20 = vmul.f32 %v656_v11, %v645_v8  ;;  %v666_v21 = vmul.f32 %v660_v12, %v646_v9 }
 0x144   : > { %v667_v22 = vmul.f32 %v656_v11, %v647_v10  ;;  %v668_v23 = vmul.f32 %v660_v12, %v648_v15  ;;  %v669_v24 = vmul.f32 %v656_v11, %v649_v16  ;;  %v670_v25 = vmul.f32 %v660_v12, %v650_v17 }
 0x145   : > { %v683_v26 = vadd.f32 %v676_v13, %v663_v18  ;;  %v684_v27 = vadd.f32 %v680_v14, %v664_v19  ;;  %v685_v28 = vadd.f32 %v676_v13, %v665_v20  ;;  %v686_v29 = vadd.f32 %v680_v14, %v666_v21 }
 0x146   : > { %v687_v30 = vadd.f32 %v676_v13, %v667_v22  ;;  %v688_v31 = vadd.f32 %v680_v14, %v668_v23  ;;  %v689_v32 = vadd.f32 %v676_v13, %v669_v24  ;;  %v690_v33 = vadd.f32 %v680_v14, %v670_v25 }
 0x147   : > { %v939_v34 = vpack.c.bf16 %v684_v27, %v683_v26  ;;  %v940_v35 = vpack.c.bf16 %v686_v29, %v685_v28 }
 0x148   : > { %v941_v36 = vpack.c.bf16 %v688_v31, %v687_v30  ;;  %v942_v37 = vpack.c.bf16 %v690_v33, %v689_v32 }
 0x149   : > { %715 = vst [vmem:[%s1344_s28] sm:$0xff] %v939_v34  ;;  %716 = vst [vmem:[%s1344_s28 + $0x8] sm:$0xff] %v940_v35 }
 0x14a   : > { %717 = vst [vmem:[%s1344_s28 + $0x10] sm:$0xff] %v941_v36  ;;  %718 = vst [vmem:[%s1344_s28 + $0x18] sm:$0xff] %v942_v37 }
 0x14b PF: > { %725 = sbr.rel (!%p1285_p12) target bundleno = 339 (0x153), region = 127  ;;  %s943_s21 = sshll.u32 (%p1285_p12), %s1150_s22, 3 }
 0x14c   : > { %s731_s6 = scalar_lea.vmem (%p1285_p12), %s1429_s4, %s943_s21 }
 0x150   : > { %v766_v38 = vld [vmem:[%s1344_s28] sm:$0xff]  ;;  %v768_v39 = vld [vmem:[%s1344_s28 + $0x8] sm:$0xff] }
 0x151   : > { %v770_v40 = vld [vmem:[%s1344_s28 + $0x10] sm:$0xff]  ;;  %v772_v41 = vld [vmem:[%s1344_s28 + $0x18] sm:$0xff]  ;;  %767 = vst [vmem:[%s731_s6] sm:$0xff] %v766_v38  ;;  %769 = vst [vmem:[%s731_s6 + $0x10] sm:$0xff] %v768_v39 }
 0x152   : > { %771 = vst [vmem:[%s731_s6 + $0x20] sm:$0xff] %v770_v40  ;;  %773 = vst [vmem:[%s731_s6 + $0x30] sm:$0xff] %v772_v41 }
 0x153 PF: > { %s14_s25 = sadd.s32 1, %s1162_s25   ;;  %s1439_s14 = sld [smem:[#allocation6_spill]] }
 0x154   : > { %p11_p6 = scmp.ge.s32.totalorder %s14_s25, 6   ;;  %s1440_s30 = sld [smem:[#allocation7_spill]] }
 0x155   : > { %s1441_s15 = smov %s1126_s16  ;;  %s1442_s16 = smov %s1283_s13 }
 0x156   : > { %s1443_s17 = smov %s1134_s18  ;;  %s1444_s18 = smov %s1280_s12 }
 0x157   : > { %s1445_s19 = smov %s1142_s20  ;;  %s1446_s20 = smov %s1266_s7 }
 0x158   : > { %s1447_s21 = smov %s1154_s23  ;;  %s1448_s22 = smov %s1158_s24 }
 0x159   : > { %s1449_s23 = smov %s1439_s14  ;;  %13 = sbr.rel (!%p11_p6) target bundleno = 8 (0x8), region = 210 }
 0x15a   : > { %s1450_s24 = smov %s1440_s30 }

// kernel: resnet50_forward.72
= control target key start
LH: loop header
LB: loop body
LE: loop exit
PB: predicated region body
PF: predicated region fallthrough
CT: control target
= control target key end

     0   :  { %s869_s15 = smov 0   ;;  %s871_s16 = smov 0   ;;  %s965_s0 = inlined_call_operand.vmem [shape: bf16[32,512], index: 0, kind: input, shape index: {}]   ;;  %s966_s1 = inlined_call_operand.vmem [shape: bf16[512,128], index: 1, kind: input, shape index: {}]   ;;  %s967_s2 = inlined_call_operand.vmem [shape: f32[1,128], index: 2, kind: input, shape index: {}]   ;;  %s968_s3 = inlined_call_operand.vmem [shape: f32[1,128], index: 3, kind: input, shape index: {}]   ;;  %s969_s4 = inlined_call_operand.vmem [shape: bf16[32,128], index: 4, kind: output, shape index: {}]  }
   0x1   :  { %s873_s17 = smov 0   ;;  %s875_s18 = smov 0  }
   0x2   :  { %s877_s19 = smov 0  }
   0x3 LB: > { %s26_s20 = sadd.s32 1, %s837_s18  ;;  %p49_p1 = scmp.ne.s32.totalorder %s829_s16, %s825_s15  ;;  %s841_s19 = sphi %s877_s19, %s14_s19   ;;  %s837_s18 = sphi %s875_s18, %s973_s18   ;;  %s833_s17 = sphi %s873_s17, %s972_s17   ;;  %s829_s16 = sphi %s871_s16, %s971_s16   ;;  %s825_s15 = sphi %s869_s15, %s970_s15  }
   0x4   : > { %p27_p0 = scmp.ge.s32.totalorder %s26_s20, 4  ;;  %p50_p2 = scmp.eq.s32.totalorder %s841_s19, 0 }
   0x5   : > { %s42_s22 = sadd.s32 1, %s829_s16  ;;  %p678_p5 = scmp.ge.s32.totalorder %s841_s19, 4 }
   0x6   : > { %s975_s20 = smov (%p27_p0, %s26_s20), 0  ;;  %p51_p3 = por %p50_p2, %p49_p1 }
   0x7   : > { %s38_s21 = ssub.s32 %s837_s18, %s975_s20  ;;  %195 = sbr.rel (%p678_p5) target bundleno = 19 (0x13), region = 24 }
   0x8   : > { %p40_p4 = scmp.eq.s32.totalorder %s38_s21, 0 }
   0xa   : > { %s904_s23 = scalar_select %p40_p4, %s829_s16, %s42_s22  }
   0xc   : > { %198 = sbr.rel (!%p51_p3) target bundleno = 19 (0x13), region = 28  ;;  %s200_s24 = sand.u32 (%p51_p3), 1, %s829_s16  }
   0xd   : > { %s680_s25 = sshll.u32 (%p51_p3), %s837_s18, 2  ;;  %s679_s26 = sshll.u32 (%p51_p3), %s200_s24, 4 }
   0xe   : > { %s207_s29 = scalar_lea.vmem (%p51_p3), %s965_s0, %s680_s25  ;;  %s202_s30 = scalar_lea.vmem (%p51_p3), [#allocation3], %s679_s26 }
   0xf   : > { %v224_v0 = vld [vmem:[%s207_s29] sm:$0xf] (%p51_p3)  ;;  %v226_v1 = vld [vmem:[%s207_s29 + $0x10] sm:$0xf] (%p51_p3) }
  0x10   : > { %225 = vst [vmem:[%s202_s30] sm:$0xf] (%p51_p3), %v224_v0  ;;  %227 = vst [vmem:[%s202_s30 + $0x4] sm:$0xf] (%p51_p3), %v226_v1  ;;  %v228_v2 = vld [vmem:[%s207_s29 + $0x20] sm:$0xf] (%p51_p3) }
  0x11   : > { %v230_v3 = vld [vmem:[%s207_s29 + $0x30] sm:$0xf]  ;;  %229 = vst [vmem:[%s202_s30 + $0x8] sm:$0xf] %v228_v2 }
  0x12   : > { %231 = vst [vmem:[%s202_s30 + $0xc] sm:$0xf] %v230_v3 }
  0x13 PF: > { %p681_p6 = scmp.ge.s32.totalorder %s841_s19, 1  ;;  %p274_p7 = scmp.lt.s32.totalorder %s841_s19, 5 }
  0x15   : > { %p275_p8 = pnand %p681_p6, %p274_p7 }
  0x16   : > { %s281_s5 = sand.u32 (!%p275_p8), 1, %s825_s15   ;;  %s683_s6 = sshll.u32 (!%p275_p8), %s833_s17, 4 }
  0x17   : > { %278 = sbr.rel (%p275_p8) target bundleno = 287 (0x11f), region = 73  ;;  %s916_s7 = sshll.u32 (!%p275_p8), %s281_s5, 4 }
  0x18   : > { %p325_p9 = scmp.lt.s32.totalorder (!%p275_p8), %s683_s6, 63  ;;  %s283_s12 = scalar_lea.vmem (!%p275_p8), [#allocation3], %s916_s7 }
  0x19   : > { %p685_p10 = scmp.ne.s32.totalorder (!%p275_p8), %s833_s17, 0 }
  0x1c   : > { %s977_s6 = smov (!%p325_p9, %s683_s6), 63  ;;  %352 = sbr.rel (%p685_p10) target bundleno = 36 (0x24), region = 81 }
  0x1d   : > { %s684_s8 = sshll.u32 %s977_s6, 2 }
  0x1e   : > { %s921_s11 = scalar_lea.vmem %s966_s1, %s684_s8 }
  0x21   : > { %v843_v4 = vmov 0.0  }
  0x22   : > { %353 = vst [vmem:[#allocation2 + $0x10] sm:$0xff] %v843_v4  ;;  %354 = vst [vmem:[#allocation2] sm:$0xff] %v843_v4 }
  0x23   : > { %355 = vst [vmem:[#allocation2 + $0x18] sm:$0xff] %v843_v4  ;;  %356 = vst [vmem:[#allocation2 + $0x8] sm:$0xff] %v843_v4 }
  0x24 PF: > { %v793_v5 = vld [vmem:[%s921_s11 + $0x38] sm:$0xff]   ;;  %v794_v6 = vld [vmem:[%s921_s11 + $0x30] sm:$0xff]   ;;  %v795_v7 = vld [vmem:[%s921_s11 + $0x28] sm:$0xff]   ;;  %p696_p11 = scmp.ne.s32.totalorder %s833_s17, 3 }
  0x25   : > { %732 = vmatprep.subr.bf16.mxu0 %v793_v5  ;;  %v796_v8 = vld [vmem:[%s921_s11 + $0x20] sm:$0xff]   ;;  %v797_v10 = vld [vmem:[%s921_s11 + $0x18] sm:$0xff]   ;;  %v798_v11 = vld [vmem:[%s921_s11 + $0x10] sm:$0xff]  }
  0x26   : > { %733 = vmatpush3.bf16.msra.mxu0 %v793_v5  ;;  %v801_v9 = vld [vmem:[%s283_s12] sm:$0xff]   ;;  %v799_v12 = vld [vmem:[%s921_s11 + $0x8] sm:$0xff]  }
  0x27   : > { %734 = vmatprep.subr.bf16.mxu0 %v794_v6  ;;  %748 = vmatprep.mubr.bf16.mxu0 %v801_v9  ;;  %v800_v13 = vld [vmem:[%s921_s11] sm:$0xff]   ;;  %v802_v14 = vld [vmem:[%s283_s12 + $0x8] sm:$0xff]  }
  0x29   : > { %v357_v17 = vld [vmem:[#allocation2 + $0x10] sm:$0xff]  ;;  %v358_v23 = vld [vmem:[#allocation2] sm:$0xff] }
  0x2a   : > { %735 = vmatpush3.bf16.msra.mxu0 %v794_v6  ;;  %v359_v15 = vld [vmem:[#allocation2 + $0x18] sm:$0xff]  ;;  %v360_v20 = vld [vmem:[#allocation2 + $0x8] sm:$0xff] }
  0x2b   : > { %736 = vmatprep.subr.bf16.mxu0 %v795_v7 }
  0x2e   : > { %737 = vmatpush3.bf16.msra.mxu0 %v795_v7 }
  0x2f   : > { %738 = vmatprep.subr.bf16.mxu0 %v796_v8 }
  0x32   : > { %739 = vmatpush3.bf16.msra.mxu0 %v796_v8 }
  0x33   : > { %740 = vmatprep.subr.bf16.mxu0 %v797_v10 }
  0x36   : > { %741 = vmatpush3.bf16.msra.mxu0 %v797_v10 }
  0x37   : > { %742 = vmatprep.subr.bf16.mxu0 %v798_v11 }
  0x3a   : > { %743 = vmatpush3.bf16.msra.mxu0 %v798_v11 }
  0x3b   : > { %744 = vmatprep.subr.bf16.mxu0 %v799_v12 }
  0x3e   : > { %745 = vmatpush3.bf16.msra.mxu0 %v799_v12 }
  0x3f   : > { %746 = vmatprep.subr.bf16.mxu0 %v800_v13 }
  0x42   : > { %747 = vmatpush3.bf16.msra.mxu0 %v800_v13 }
  0x45   : > { %749 = vmatmul.mubr.bf16.vlgmr.msra.gmra.mxu0 %v802_v14 }
 0x105   : > { %v750_v16 = vpop.f32.mrf.mxu0 }
 0x106   : > { %v492_v18 = vadd.f32 %v750_v16, %v359_v15 }
 0x107   : > { %v475_v19 = vpop.f32.mrf.mxu0 }
 0x108   : > { %496 = vst [vmem:[#allocation2 + $0x18] sm:$0xff] %v492_v18  ;;  %v490_v21 = vadd.f32 %v475_v19, %v357_v17 }
 0x109   : > { %v751_v22 = vpop.f32.mrf.mxu0 }
 0x10a   : > { %494 = vst [vmem:[#allocation2 + $0x10] sm:$0xff] %v490_v21  ;;  %v493_v24 = vadd.f32 %v751_v22, %v360_v20  ;;  %501 = sbr.rel (%p696_p11) target bundleno = 287 (0x11f), region = 85 }
 0x10b   : > { %v478_v25 = vpop.f32.mrf.mxu0 }
 0x10c   : > { %497 = vst [vmem:[#allocation2 + $0x8] sm:$0xff] %v493_v24  ;;  %v491_v26 = vadd.f32 %v478_v25, %v358_v23 }
 0x10e   : > { %495 = vst [vmem:[#allocation2] sm:$0xff] %v491_v26 }
 0x10f   : > { %v697_v29 = vld [vmem:[%s967_s2] ss:$0 sm:$0xff]  ;;  %v504_v33 = vld [vmem:[#allocation2 + $0x18] sm:$0xff] }
 0x110   : > { %v698_v32 = vld [vmem:[%s968_s3] ss:$0 sm:$0xff]  ;;  %v515_v35 = vmul.f32 %v697_v29, %v504_v33 }
 0x111   : > { %v502_v27 = vld [vmem:[#allocation2 + $0x10] sm:$0xff] }
 0x112   : > { %v513_v30 = vmul.f32 %v697_v29, %v502_v27  ;;  %v526_v39 = vadd.f32 %v698_v32, %v515_v35 }
 0x113   : > { %v505_v34 = vld [vmem:[#allocation2 + $0x8] sm:$0xff] }
 0x114   : > { %v516_v36 = vmul.f32 %v697_v29, %v505_v34  ;;  %v524_v37 = vadd.f32 %v698_v32, %v513_v30  ;;  %v530_v43 = vmax.f32 %v526_v39, 0.0 }
 0x115   : > { %v503_v28 = vld [vmem:[#allocation2] sm:$0xff] }
 0x116   : > { %v514_v31 = vmul.f32 %v697_v29, %v503_v28  ;;  %v527_v40 = vadd.f32 %v698_v32, %v516_v36  ;;  %v528_v41 = vmax.f32 %v524_v37, 0.0 }
 0x118   : > { %v525_v38 = vadd.f32 %v698_v32, %v514_v31  ;;  %v531_v44 = vmax.f32 %v527_v40, 0.0 }
 0x11a   : > { %v529_v42 = vmax.f32 %v525_v38, 0.0  ;;  %v719_v46 = vpack.c.bf16 %v531_v44, %v530_v43 }
 0x11c   : > { %v714_v45 = vpack.c.bf16 %v529_v42, %v528_v41  ;;  %721 = vst [vmem:[%s969_s4 + $0x8] sm:$0xff] %v719_v46  }
 0x11e   : > { %715 = vst [vmem:[%s969_s4] sm:$0xff] %v714_v45  }
 0x11f PF: > { %s14_s19 = sadd.s32 1, %s841_s19   ;;  %s970_s15 = smov %s829_s16 }
 0x120   : > { %p11_p12 = scmp.ge.s32.totalorder %s14_s19, 6   ;;  %s971_s16 = smov %s904_s23 }
 0x121   : > { %s972_s17 = smov %s837_s18  ;;  %s973_s18 = smov %s975_s20 }
 0x122   :  { %13 = sbr.rel (!%p11_p12) target bundleno = 3 (0x3), region = 129 }

// kernel: resnet50_forward.71
= control target key start
LH: loop header
LB: loop body
LE: loop exit
PB: predicated region body
PF: predicated region fallthrough
CT: control target
= control target key end

     0   :  { %s1194_s18 = smov 0   ;;  %s1196_s19 = smov 0   ;;  %s1336_s0 = inlined_call_operand.vmem [shape: bf16[32,128], index: 0, kind: input, shape index: {}]   ;;  %s1337_s1 = inlined_call_operand.vmem [shape: bf16[128,512], index: 1, kind: input, shape index: {}]   ;;  %s1338_s2 = inlined_call_operand.vmem [shape: f32[1,512], index: 2, kind: input, shape index: {}]   ;;  %s1339_s3 = inlined_call_operand.vmem [shape: f32[1,512], index: 3, kind: input, shape index: {}]   ;;  %s1340_s4 = inlined_call_operand.vmem [shape: bf16[32,512], index: 4, kind: input, shape index: {}]   ;;  %s1341_s5 = inlined_call_operand.vmem [shape: bf16[32,512], index: 5, kind: output, shape index: {}]  }
   0x1   :  { %s1198_s20 = smov 0   ;;  %s1200_s21 = smov 0  }
   0x2   :  { %s1202_s22 = smov 0  }
   0x3 LB: > { %s30_s23 = sadd.s32 1, %s1157_s21  ;;  %s989_s24 = sadd.s32 4294967295, %s1161_s22   ;;  %s1161_s22 = sphi %s1202_s22, %s15_s22   ;;  %s1157_s21 = sphi %s1200_s21, %s1347_s21   ;;  %s1153_s20 = sphi %s1198_s20, %s1346_s20   ;;  %s1149_s19 = sphi %s1196_s19, %s1345_s19   ;;  %s1145_s18 = sphi %s1194_s18, %s1344_s18  }
   0x4   : > { %p32_p0 = scmp.ge.s32.totalorder %s30_s23, 2  ;;  %p78_p1 = scmp.ne.s32.totalorder %s1149_s19, %s1145_s18 }
   0x5   : > { %p79_p2 = scmp.eq.s32.totalorder %s1161_s22, 0  ;;  %p190_p4 = scmp.eq.s32.totalorder %s989_s24, 1 }
   0x6   : > { %s1349_s23 = smov (%p32_p0, %s30_s23), 0  ;;  %s71_s27 = sadd.s32 1, %s1149_s19 }
   0x7   : > { %p1226_p3 = por %p79_p2, %p78_p1  ;;  %s67_s26 = ssub.s32 %s1157_s21, %s1349_s23 }
   0x8   : > { %p69_p5 = scmp.eq.s32.totalorder %s67_s26, 0  ;;  %p1233_p6 = por %p190_p4, %p78_p1 }
   0x9   : > { %p993_p7 = scmp.ge.s32.totalorder %s1161_s22, 2 }
   0xa   : > { %s1238_s29 = scalar_select %p69_p5, %s1149_s19, %s71_s27  }
   0xb   : > { %224 = sbr.rel (%p993_p7) target bundleno = 34 (0x22), region = 20 }
  0x10   : > { %227 = sbr.rel (!%p1226_p3) target bundleno = 28 (0x1c), region = 24  ;;  %s229_s30 = sand.u32 (%p1226_p3), 1, %s1149_s19  }
  0x11   : > { %s1033_s6 = sshll.u32 (%p1226_p3), %s1157_s21, 3  ;;  %s994_s7 = sshll.u32 (%p1226_p3), %s229_s30, 7 }
  0x12   : > { %s1248_s10 = scalar_lea.vmem (%p1226_p3), %s1337_s1, %s1033_s6  ;;  %s231_s11 = scalar_lea.vmem (%p1226_p3), [#allocation3], %s994_s7 }
  0x13   : > { %v296_v0 = vld [vmem:[%s1248_s10] sm:$0xff] (%p1226_p3)  ;;  %v298_v1 = vld [vmem:[%s1248_s10 + $0x10] sm:$0xff] (%p1226_p3) }
  0x14   : > { %v300_v2 = vld [vmem:[%s1248_s10 + $0x20] sm:$0xff] (%p1226_p3)  ;;  %297 = vst [vmem:[%s231_s11] sm:$0xff] (%p1226_p3), %v296_v0  ;;  %299 = vst [vmem:[%s231_s11 + $0x8] sm:$0xff] (%p1226_p3), %v298_v1  ;;  %v302_v3 = vld [vmem:[%s1248_s10 + $0x30] sm:$0xff] (%p1226_p3) }
  0x15   : > { %301 = vst [vmem:[%s231_s11 + $0x10] sm:$0xff] %v300_v2  ;;  %v304_v4 = vld [vmem:[%s1248_s10 + $0x40] sm:$0xff]  ;;  %v306_v5 = vld [vmem:[%s1248_s10 + $0x50] sm:$0xff]  ;;  %303 = vst [vmem:[%s231_s11 + $0x18] sm:$0xff] %v302_v3 }
  0x16   : > { %305 = vst [vmem:[%s231_s11 + $0x20] sm:$0xff] %v304_v4  ;;  %307 = vst [vmem:[%s231_s11 + $0x28] sm:$0xff] %v306_v5  ;;  %v308_v6 = vld [vmem:[%s1248_s10 + $0x60] sm:$0xff]  ;;  %v310_v7 = vld [vmem:[%s1248_s10 + $0x70] sm:$0xff] }
  0x17   : > { %v312_v8 = vld [vmem:[%s1248_s10 + $0x80] sm:$0xff]  ;;  %309 = vst [vmem:[%s231_s11 + $0x30] sm:$0xff] %v308_v6  ;;  %311 = vst [vmem:[%s231_s11 + $0x38] sm:$0xff] %v310_v7  ;;  %v314_v9 = vld [vmem:[%s1248_s10 + $0x90] sm:$0xff] }
  0x18   : > { %313 = vst [vmem:[%s231_s11 + $0x40] sm:$0xff] %v312_v8  ;;  %v316_v10 = vld [vmem:[%s1248_s10 + $0xa0] sm:$0xff]  ;;  %v318_v11 = vld [vmem:[%s1248_s10 + $0xb0] sm:$0xff]  ;;  %315 = vst [vmem:[%s231_s11 + $0x48] sm:$0xff] %v314_v9 }
  0x19   : > { %317 = vst [vmem:[%s231_s11 + $0x50] sm:$0xff] %v316_v10  ;;  %319 = vst [vmem:[%s231_s11 + $0x58] sm:$0xff] %v318_v11  ;;  %v320_v12 = vld [vmem:[%s1248_s10 + $0xc0] sm:$0xff]  ;;  %v322_v13 = vld [vmem:[%s1248_s10 + $0xd0] sm:$0xff] }
  0x1a   : > { %v324_v14 = vld [vmem:[%s1248_s10 + $0xe0] sm:$0xff]  ;;  %321 = vst [vmem:[%s231_s11 + $0x60] sm:$0xff] %v320_v12  ;;  %323 = vst [vmem:[%s231_s11 + $0x68] sm:$0xff] %v322_v13  ;;  %v326_v15 = vld [vmem:[%s1248_s10 + $0xf0] sm:$0xff] }
  0x1b   : > { %325 = vst [vmem:[%s231_s11 + $0x70] sm:$0xff] %v324_v14  ;;  %327 = vst [vmem:[%s231_s11 + $0x78] sm:$0xff] %v326_v15 }
  0x1c PF: > { %349 = sbr.rel (!%p1226_p3) target bundleno = 34 (0x22), region = 70  ;;  %s351_s12 = sand.u32 (%p1226_p3), 1, %s1149_s19  }
  0x1d   : > { %s1034_s13 = sshll.u32 (%p1226_p3), %s1157_s21, 3  ;;  %s997_s14 = sshll.u32 (%p1226_p3), %s351_s12, 5 }
  0x1e   : > { %s359_s17 = scalar_lea.vmem (%p1226_p3), %s1340_s4, %s1034_s13  ;;  %s353_s24 = scalar_lea.vmem (%p1226_p3), [#allocation4], %s997_s14 }
  0x1f   : > { %v394_v16 = vld [vmem:[%s359_s17] sm:$0xff] (%p1226_p3)  ;;  %v396_v17 = vld [vmem:[%s359_s17 + $0x10] sm:$0xff] (%p1226_p3) }
  0x20   : > { %v398_v18 = vld [vmem:[%s359_s17 + $0x20] sm:$0xff] (%p1226_p3)  ;;  %395 = vst [vmem:[%s353_s24] sm:$0xff] (%p1226_p3), %v394_v16  ;;  %397 = vst [vmem:[%s353_s24 + $0x8] sm:$0xff] (%p1226_p3), %v396_v17  ;;  %v400_v19 = vld [vmem:[%s359_s17 + $0x30] sm:$0xff] (%p1226_p3) }
  0x21   : > { %399 = vst [vmem:[%s353_s24 + $0x10] sm:$0xff] %v398_v18  ;;  %401 = vst [vmem:[%s353_s24 + $0x18] sm:$0xff] %v400_v19 }
  0x22 PF: > { %p1000_p8 = scmp.ge.s32.totalorder %s1161_s22, 1  ;;  %p406_p9 = scmp.lt.s32.totalorder %s1161_s22, 3 }
  0x24   : > { %p407_p10 = pnand %p1000_p8, %p406_p9 }
  0x25   : > { %s413_s25 = sand.u32 (!%p407_p10), 1, %s1145_s18   ;;  %s1004_s9 = sshll.u32 (!%p407_p10), %s1153_s20, 1 }
  0x26   : > { %410 = sbr.rel (%p407_p10) target bundleno = 295 (0x127), region = 108  ;;  %s1001_s26 = sshll.u32 (!%p407_p10), %s413_s25, 7 }
  0x27   : > { %s1278_s27 = scalar_lea.vmem (!%p407_p10), [#allocation3], %s1001_s26  ;;  %p478_p11 = scmp.lt.s32.totalorder (!%p407_p10), %s1004_s9, 3 }
  0x28   : > { %s1305_s10 = sshll.u32 (!%p407_p10), %s413_s25, 5 }
  0x29   : > { %s422_s17 = scalar_lea.vmem (!%p407_p10), [#allocation4], %s1305_s10  ;;  %s465_s18 = scalar_lea.vmem (!%p407_p10), [#allocation5], %s1305_s10 }
  0x2b   : > { %v1163_v20 = vmov 0   ;;  %v1097_v21 = vld [vmem:[%s1278_s27 + $0x74] ss:$8 sps:$4 sm:$0xff]   ;;  %v1099_v22 = vld [vmem:[%s1278_s27 + $0x70] ss:$8 sps:$4 sm:$0xff]   ;;  %v706_v39 = vlaneseq  ;;  %s1351_s9 = smov (!%p478_p11, %s1004_s9), 3 }
  0x2c   : > { %656 = vmatprep.mubr.bf16.mxu0 %v1163_v20  ;;  %666 = vmatprep.mubr.bf16.mxu1 %v1163_v20  ;;  %v1100_v23 = vld [vmem:[%s1278_s27 + $0x64] ss:$8 sps:$4 sm:$0xff]   ;;  %v1102_v24 = vld [vmem:[%s1278_s27 + $0x60] ss:$8 sps:$4 sm:$0xff]   ;;  %v1103_v25 = vld [vmem:[%s1278_s27 + $0x54] ss:$8 sps:$4 sm:$0xff]   ;;  %s480_s13 = scalar_lea.vmem %s1338_s2, %s1351_s9  ;;  %s485_s16 = scalar_lea.vmem %s1339_s3, %s1351_s9 }
  0x2d   : > { %624 = vmatprep.subr.bf16.mxu0 %v1097_v21  ;;  %1040 = vmatprep.subr.bf16.mxu1 %v1097_v21  ;;  %v1105_v26 = vld [vmem:[%s1278_s27 + $0x50] ss:$8 sps:$4 sm:$0xff]   ;;  %v1106_v27 = vld [vmem:[%s1278_s27 + $0x44] ss:$8 sps:$4 sm:$0xff]   ;;  %v1108_v28 = vld [vmem:[%s1278_s27 + $0x40] ss:$8 sps:$4 sm:$0xff]  }
  0x2e   : > { %625 = vmatpush1.bf16.msra.mxu0 %v1099_v22  ;;  %1048 = vmatpush1.bf16.msra.mxu1 %v1099_v22  ;;  %v1109_v29 = vld [vmem:[%s1278_s27 + $0x34] ss:$8 sps:$4 sm:$0xff]   ;;  %v1111_v30 = vld [vmem:[%s1278_s27 + $0x30] ss:$8 sps:$4 sm:$0xff]   ;;  %v1112_v31 = vld [vmem:[%s1278_s27 + $0x24] ss:$8 sps:$4 sm:$0xff]  }
  0x2f   : > { %626 = vmatprep.subr.bf16.mxu0 %v1100_v23  ;;  %1041 = vmatprep.subr.bf16.mxu1 %v1100_v23  ;;  %v1114_v32 = vld [vmem:[%s1278_s27 + $0x20] ss:$8 sps:$4 sm:$0xff]   ;;  %v1115_v33 = vld [vmem:[%s1278_s27 + $0x14] ss:$8 sps:$4 sm:$0xff]   ;;  %v1117_v34 = vld [vmem:[%s1278_s27 + $0x10] ss:$8 sps:$4 sm:$0xff]  }
  0x30   : > { %v1118_v35 = vld [vmem:[%s1278_s27 + $0x4] ss:$8 sps:$4 sm:$0xff]   ;;  %v1120_v36 = vld [vmem:[%s1278_s27] ss:$8 sps:$4 sm:$0xff]   ;;  %v1121_v37 = vld [vmem:[%s1336_s0] sm:$0xff]   ;;  %v707_v40 = vshrl.u32 %v706_v39, 7 }
  0x31   : > { %v1122_v38 = vld [vmem:[%s1336_s0 + $0x8] sm:$0xff]   ;;  %v704_v42 = vld [vmem:[%s480_s13] sm:$0x3]  ;;  %v744_v46 = vld [vmem:[%s422_s17] sm:$0xff]  ;;  %s1039_s24 = sshll.u32 (%p1233_p6), %s1153_s20, 3 }
  0x32   : > { %627 = vmatpush1.bf16.msra.mxu0 %v1102_v24  ;;  %1049 = vmatpush1.bf16.msra.mxu1 %v1102_v24  ;;  %v708_v41 = vsub.s32 0, %v707_v40  ;;  %v712_v43 = vsub.s32 1, %v707_v40  ;;  %v724_v44 = vld [vmem:[%s485_s16] sm:$0x3]  ;;  %v748_v51 = vunpack.c.l.bf16 %v744_v46  ;;  %v749_v58 = vunpack.c.h.bf16 %v744_v46  ;;  %v745_v1 = vld [vmem:[%s422_s17 + $0x8] sm:$0xff]  ;;  %v747_v2 = vld [vmem:[%s422_s17 + $0x18] sm:$0xff]  ;;  %s812_s27 = scalar_lea.vmem (%p1233_p6), %s1341_s5, %s1039_s24 }
  0x33   : > { %628 = vmatprep.subr.bf16.mxu0 %v1103_v25  ;;  %1042 = vmatprep.subr.bf16.mxu1 %v1103_v25  ;;  %v746_v47 = vld [vmem:[%s422_s17 + $0x10] sm:$0xff]  ;;  %v750_v10 = vunpack.c.l.bf16 %v745_v1  ;;  %v754_v12 = vunpack.c.l.bf16 %v747_v2  ;;  %v751_v17 = vunpack.c.h.bf16 %v745_v1  ;;  %v755_v18 = vunpack.c.h.bf16 %v747_v2 }
  0x34   : > { %v709_v45 = vrot.slane %v704_v42, %v708_v41  ;;  %v729_v48 = vrot.slane %v724_v44, %v708_v41  ;;  %v713_v49 = vrot.slane %v704_v42, %v712_v43  ;;  %v752_v55 = vunpack.c.l.bf16 %v746_v47 }
  0x35   : > { %v733_v56 = vrot.slane %v724_v44, %v712_v43  ;;  %v753_v60 = vunpack.c.h.bf16 %v746_v47 }
  0x36   : > { %629 = vmatpush1.bf16.msra.mxu0 %v1105_v26  ;;  %1050 = vmatpush1.bf16.msra.mxu1 %v1105_v26 }
  0x37   : > { %630 = vmatprep.subr.bf16.mxu0 %v1106_v27  ;;  %1043 = vmatprep.subr.bf16.mxu1 %v1106_v27 }
  0x3a   : > { %631 = vmatpush1.bf16.msra.mxu0 %v1108_v28  ;;  %1051 = vmatpush1.bf16.msra.mxu1 %v1108_v28 }
  0x3b   : > { %632 = vmatprep.subr.bf16.mxu0 %v1109_v29  ;;  %1044 = vmatprep.subr.bf16.mxu1 %v1109_v29 }
  0x3e   : > { %633 = vmatpush1.bf16.msra.mxu0 %v1111_v30  ;;  %1052 = vmatpush1.bf16.msra.mxu1 %v1111_v30 }
  0x3f   : > { %634 = vmatprep.subr.bf16.mxu0 %v1112_v31  ;;  %1045 = vmatprep.subr.bf16.mxu1 %v1112_v31 }
  0x42   : > { %635 = vmatpush1.bf16.msra.mxu0 %v1114_v32  ;;  %1053 = vmatpush1.bf16.msra.mxu1 %v1114_v32 }
  0x43   : > { %636 = vmatprep.subr.bf16.mxu0 %v1115_v33  ;;  %1046 = vmatprep.subr.bf16.mxu1 %v1115_v33 }
  0x46   : > { %637 = vmatpush1.bf16.msra.mxu0 %v1117_v34  ;;  %1054 = vmatpush1.bf16.msra.mxu1 %v1117_v34 }
  0x47   : > { %638 = vmatprep.subr.bf16.mxu0 %v1118_v35  ;;  %1047 = vmatprep.subr.bf16.mxu1 %v1118_v35 }
  0x4a   : > { %639 = vmatpush1.bf16.msra.mxu0 %v1120_v36  ;;  %1055 = vmatpush1.bf16.msra.mxu1 %v1120_v36 }
  0x4d   : > { %657 = vmatmul.mubr.bf16.vlgmr.msra.gmra.mxu0 %v1121_v37  ;;  %667 = vmatmul.mubr.bf16.vlgmr.msra.gmra.mxu1 %v1122_v38 }
 0x10d   : > { %v658_v50 = vpop.f32.mrf.mxu0  ;;  %v668_v52 = vpop.f32.mrf.mxu1 }
 0x10e   : > { %v716_v53 = vmul.f32 %v709_v45, %v658_v50  ;;  %v720_v54 = vmul.f32 %v709_v45, %v668_v52 }
 0x10f   : > { %v660_v57 = vpop.f32.mrf.mxu0  ;;  %v670_v59 = vpop.f32.mrf.mxu1 }
 0x110   : > { %v736_v61 = vadd.f32 %v729_v48, %v716_v53  ;;  %v740_v62 = vadd.f32 %v729_v48, %v720_v54  ;;  %v717_v63 = vmul.f32 %v713_v49, %v660_v57  ;;  %v721_v0 = vmul.f32 %v713_v49, %v670_v59 }
 0x111   : > { %v662_v3 = vpop.f32.mrf.mxu0  ;;  %v672_v4 = vpop.f32.mrf.mxu1 }
 0x112   : > { %v756_v5 = vadd.f32 %v748_v51, %v736_v61  ;;  %v760_v6 = vadd.f32 %v752_v55, %v740_v62  ;;  %v737_v7 = vadd.f32 %v733_v56, %v717_v63  ;;  %v741_v8 = vadd.f32 %v733_v56, %v721_v0 }
 0x113   : > { %v718_v9 = vmul.f32 %v709_v45, %v662_v3  ;;  %v722_v11 = vmul.f32 %v709_v45, %v672_v4  ;;  %v664_v13 = vpop.f32.mrf.mxu0  ;;  %v674_v14 = vpop.f32.mrf.mxu1 }
 0x114   : > { %v757_v15 = vadd.f32 %v749_v58, %v737_v7  ;;  %v761_v16 = vadd.f32 %v753_v60, %v741_v8  ;;  %v719_v21 = vmul.f32 %v713_v49, %v664_v13  ;;  %v723_v22 = vmul.f32 %v713_v49, %v674_v14 }
 0x115   : > { %v738_v19 = vadd.f32 %v729_v48, %v718_v9  ;;  %v742_v20 = vadd.f32 %v729_v48, %v722_v11  ;;  %v764_v23 = vmax.f32 %v756_v5, 0.0  ;;  %v768_v24 = vmax.f32 %v760_v6, 0.0 }
 0x116   : > { %v765_v25 = vmax.f32 %v757_v15, 0.0  ;;  %v769_v26 = vmax.f32 %v761_v16, 0.0  ;;  %v739_v29 = vadd.f32 %v733_v56, %v719_v21  ;;  %v743_v30 = vadd.f32 %v733_v56, %v723_v22 }
 0x117   : > { %v758_v27 = vadd.f32 %v750_v10, %v738_v19  ;;  %v762_v28 = vadd.f32 %v754_v12, %v742_v20 }
 0x118   : > { %v1035_v31 = vpack.c.bf16 %v765_v25, %v764_v23  ;;  %v1037_v32 = vpack.c.bf16 %v769_v26, %v768_v24  ;;  %v759_v33 = vadd.f32 %v751_v17, %v739_v29  ;;  %v763_v34 = vadd.f32 %v755_v18, %v743_v30 }
 0x119   : > { %v766_v35 = vmax.f32 %v758_v27, 0.0  ;;  %v770_v36 = vmax.f32 %v762_v28, 0.0 }
 0x11a   : > { %796 = vst [vmem:[%s465_s18] sm:$0xff] %v1035_v31  ;;  %798 = vst [vmem:[%s465_s18 + $0x10] sm:$0xff] %v1037_v32  ;;  %v767_v37 = vmax.f32 %v759_v33, 0.0  ;;  %v771_v38 = vmax.f32 %v763_v34, 0.0  ;;  %806 = sbr.rel (!%p1233_p6) target bundleno = 295 (0x127), region = 128 }
 0x11c   : > { %v1036_v39 = vpack.c.bf16 %v767_v37, %v766_v35  ;;  %v1038_v40 = vpack.c.bf16 %v771_v38, %v770_v36 }
 0x11e   : > { %797 = vst [vmem:[%s465_s18 + $0x8] sm:$0xff] %v1036_v39  ;;  %799 = vst [vmem:[%s465_s18 + $0x18] sm:$0xff] %v1038_v40 }
 0x121   : > { %v847_v41 = vld [vmem:[%s465_s18] sm:$0xff]  ;;  %v851_v43 = vld [vmem:[%s465_s18 + $0x10] sm:$0xff] }
 0x122   : > { %848 = vst [vmem:[%s812_s27] sm:$0xff] %v847_v41  ;;  %852 = vst [vmem:[%s812_s27 + $0x20] sm:$0xff] %v851_v43 }
 0x125   : > { %v849_v42 = vld [vmem:[%s465_s18 + $0x8] sm:$0xff]  ;;  %v853_v44 = vld [vmem:[%s465_s18 + $0x18] sm:$0xff] }
 0x126   : > { %850 = vst [vmem:[%s812_s27 + $0x10] sm:$0xff] %v849_v42  ;;  %854 = vst [vmem:[%s812_s27 + $0x30] sm:$0xff] %v853_v44 }
 0x127 PF: > { %s15_s22 = sadd.s32 1, %s1161_s22   ;;  %s1344_s18 = smov %s1149_s19 }
 0x128   : > { %p12_p12 = scmp.ge.s32.totalorder %s15_s22, 4   ;;  %s1345_s19 = smov %s1238_s29 }
 0x129   : > { %s1346_s20 = smov %s1157_s21  ;;  %s1347_s21 = smov %s1349_s23 }
 0x12a   :  { %14 = sbr.rel (!%p12_p12) target bundleno = 3 (0x3), region = 214 }

// kernel: resnet50_forward.82
= control target key start
LH: loop header
LB: loop body
LE: loop exit
PB: predicated region body
PF: predicated region fallthrough
CT: control target
= control target key end

     0   :  { %s991_s15 = smov 0   ;;  %s993_s16 = smov 0   ;;  %s1101_s0 = inlined_call_operand.vmem [shape: bf16[32,512], index: 0, kind: input, shape index: {}]   ;;  %s1102_s1 = inlined_call_operand.vmem [shape: bf16[512,256], index: 1, kind: input, shape index: {}]   ;;  %s1103_s2 = inlined_call_operand.vmem [shape: f32[1,256], index: 2, kind: input, shape index: {}]   ;;  %s1104_s3 = inlined_call_operand.vmem [shape: f32[1,256], index: 3, kind: input, shape index: {}]   ;;  %s1105_s4 = inlined_call_operand.vmem [shape: bf16[32,256], index: 4, kind: output, shape index: {}]  }
   0x1   :  { %s995_s17 = smov 0   ;;  %s997_s18 = smov 0  }
   0x2   :  { %s999_s19 = smov 0  }
   0x3 LB: > { %s26_s20 = sadd.s32 1, %s958_s18  ;;  %p49_p1 = scmp.ne.s32.totalorder %s950_s16, %s946_s15  ;;  %s962_s19 = sphi %s999_s19, %s14_s19   ;;  %s958_s18 = sphi %s997_s18, %s1109_s18   ;;  %s954_s17 = sphi %s995_s17, %s1108_s17   ;;  %s950_s16 = sphi %s993_s16, %s1107_s16   ;;  %s946_s15 = sphi %s991_s15, %s1106_s15  }
   0x4   : > { %p27_p0 = scmp.ge.s32.totalorder %s26_s20, 4  ;;  %p50_p2 = scmp.eq.s32.totalorder %s962_s19, 0 }
   0x5   : > { %s42_s22 = sadd.s32 1, %s950_s16  ;;  %p799_p5 = scmp.ge.s32.totalorder %s962_s19, 4 }
   0x6   : > { %s1111_s20 = smov (%p27_p0, %s26_s20), 0  ;;  %p51_p3 = por %p50_p2, %p49_p1 }
   0x7   : > { %s38_s21 = ssub.s32 %s958_s18, %s1111_s20  ;;  %199 = sbr.rel (%p799_p5) target bundleno = 19 (0x13), region = 24 }
   0x8   : > { %p40_p4 = scmp.eq.s32.totalorder %s38_s21, 0 }
   0xa   : > { %s1026_s23 = scalar_select %p40_p4, %s950_s16, %s42_s22  }
   0xc   : > { %202 = sbr.rel (!%p51_p3) target bundleno = 19 (0x13), region = 28  ;;  %s204_s24 = sand.u32 (%p51_p3), 1, %s950_s16  }
   0xd   : > { %s801_s25 = sshll.u32 (%p51_p3), %s958_s18, 2  ;;  %s800_s26 = sshll.u32 (%p51_p3), %s204_s24, 4 }
   0xe   : > { %s211_s29 = scalar_lea.vmem (%p51_p3), %s1101_s0, %s801_s25  ;;  %s206_s30 = scalar_lea.vmem (%p51_p3), [#allocation3], %s800_s26 }
   0xf   : > { %v228_v0 = vld [vmem:[%s211_s29] sm:$0xf] (%p51_p3)  ;;  %v230_v1 = vld [vmem:[%s211_s29 + $0x10] sm:$0xf] (%p51_p3) }
  0x10   : > { %229 = vst [vmem:[%s206_s30] sm:$0xf] (%p51_p3), %v228_v0  ;;  %231 = vst [vmem:[%s206_s30 + $0x4] sm:$0xf] (%p51_p3), %v230_v1  ;;  %v232_v2 = vld [vmem:[%s211_s29 + $0x20] sm:$0xf] (%p51_p3) }
  0x11   : > { %v234_v3 = vld [vmem:[%s211_s29 + $0x30] sm:$0xf]  ;;  %233 = vst [vmem:[%s206_s30 + $0x8] sm:$0xf] %v232_v2 }
  0x12   : > { %235 = vst [vmem:[%s206_s30 + $0xc] sm:$0xf] %v234_v3 }
  0x13 PF: > { %p802_p6 = scmp.ge.s32.totalorder %s962_s19, 1  ;;  %p281_p7 = scmp.lt.s32.totalorder %s962_s19, 5 }
  0x15   : > { %p282_p8 = pnand %p802_p6, %p281_p7 }
  0x16   : > { %s288_s5 = sand.u32 (!%p282_p8), 1, %s946_s15   ;;  %s804_s6 = sshll.u32 (!%p282_p8), %s954_s17, 4 }
  0x17   : > { %285 = sbr.rel (%p282_p8) target bundleno = 292 (0x124), region = 73  ;;  %s1038_s7 = sshll.u32 (!%p282_p8), %s288_s5, 4 }
  0x18   : > { %p339_p9 = scmp.lt.s32.totalorder (!%p282_p8), %s804_s6, 63  ;;  %s290_s12 = scalar_lea.vmem (!%p282_p8), [#allocation3], %s1038_s7 }
  0x19   : > { %p807_p10 = scmp.ne.s32.totalorder (!%p282_p8), %s954_s17, 0 }
  0x1c   : > { %s1113_s6 = smov (!%p339_p9, %s804_s6), 63  ;;  %375 = sbr.rel (%p807_p10) target bundleno = 38 (0x26), region = 81 }
  0x1d   : > { %s835_s8 = sshll.u32 %s1113_s6, 3 }
  0x1e   : > { %s1043_s11 = scalar_lea.vmem %s1102_s1, %s835_s8 }
  0x21   : > { %v964_v4 = vmov 0.0  }
  0x22   : > { %376 = vst [vmem:[#allocation2 + $0x30] sm:$0xff] %v964_v4  ;;  %377 = vst [vmem:[#allocation2] sm:$0xff] %v964_v4 }
  0x23   : > { %378 = vst [vmem:[#allocation2 + $0x18] sm:$0xff] %v964_v4  ;;  %379 = vst [vmem:[#allocation2 + $0x10] sm:$0xff] %v964_v4 }
  0x24   : > { %380 = vst [vmem:[#allocation2 + $0x8] sm:$0xff] %v964_v4  ;;  %381 = vst [vmem:[#allocation2 + $0x20] sm:$0xff] %v964_v4 }
  0x25   : > { %382 = vst [vmem:[#allocation2 + $0x28] sm:$0xff] %v964_v4  ;;  %383 = vst [vmem:[#allocation2 + $0x38] sm:$0xff] %v964_v4 }
  0x26 PF: > { %v898_v5 = vld [vmem:[%s1043_s11 + $0x74] ss:$8 sps:$4 sm:$0xff]   ;;  %v900_v6 = vld [vmem:[%s1043_s11 + $0x70] ss:$8 sps:$4 sm:$0xff]   ;;  %v965_v7 = vmov 0   ;;  %p826_p11 = scmp.ne.s32.totalorder %s954_s17, 3 }
  0x27   : > { %536 = vmatprep.mubr.bf16.mxu0 %v965_v7  ;;  %546 = vmatprep.mubr.bf16.mxu1 %v965_v7  ;;  %v901_v8 = vld [vmem:[%s1043_s11 + $0x64] ss:$8 sps:$4 sm:$0xff]   ;;  %v903_v9 = vld [vmem:[%s1043_s11 + $0x60] ss:$8 sps:$4 sm:$0xff]   ;;  %v904_v10 = vld [vmem:[%s1043_s11 + $0x54] ss:$8 sps:$4 sm:$0xff]  }
  0x28   : > { %504 = vmatprep.subr.bf16.mxu0 %v898_v5  ;;  %840 = vmatprep.subr.bf16.mxu1 %v898_v5  ;;  %v906_v11 = vld [vmem:[%s1043_s11 + $0x50] ss:$8 sps:$4 sm:$0xff]   ;;  %v907_v12 = vld [vmem:[%s1043_s11 + $0x44] ss:$8 sps:$4 sm:$0xff]   ;;  %v909_v13 = vld [vmem:[%s1043_s11 + $0x40] ss:$8 sps:$4 sm:$0xff]  }
  0x29   : > { %505 = vmatpush1.bf16.msra.mxu0 %v900_v6  ;;  %848 = vmatpush1.bf16.msra.mxu1 %v900_v6  ;;  %v910_v14 = vld [vmem:[%s1043_s11 + $0x34] ss:$8 sps:$4 sm:$0xff]   ;;  %v912_v15 = vld [vmem:[%s1043_s11 + $0x30] ss:$8 sps:$4 sm:$0xff]   ;;  %v913_v16 = vld [vmem:[%s1043_s11 + $0x24] ss:$8 sps:$4 sm:$0xff]  }
  0x2a   : > { %506 = vmatprep.subr.bf16.mxu0 %v901_v8  ;;  %841 = vmatprep.subr.bf16.mxu1 %v901_v8  ;;  %v915_v17 = vld [vmem:[%s1043_s11 + $0x20] ss:$8 sps:$4 sm:$0xff]   ;;  %v916_v18 = vld [vmem:[%s1043_s11 + $0x14] ss:$8 sps:$4 sm:$0xff]   ;;  %v918_v19 = vld [vmem:[%s1043_s11 + $0x10] ss:$8 sps:$4 sm:$0xff]  }
  0x2b   : > { %v919_v20 = vld [vmem:[%s1043_s11 + $0x4] ss:$8 sps:$4 sm:$0xff]   ;;  %v921_v21 = vld [vmem:[%s1043_s11] ss:$8 sps:$4 sm:$0xff]   ;;  %v388_v25 = vld [vmem:[#allocation2 + $0x8] sm:$0xff] }
  0x2c   : > { %v922_v22 = vld [vmem:[%s290_s12] sm:$0xff]   ;;  %v923_v23 = vld [vmem:[%s290_s12 + $0x8] sm:$0xff]  }
  0x2d   : > { %507 = vmatpush1.bf16.msra.mxu0 %v903_v9  ;;  %849 = vmatpush1.bf16.msra.mxu1 %v903_v9  ;;  %v384_v24 = vld [vmem:[#allocation2 + $0x30] sm:$0xff]  ;;  %v385_v28 = vld [vmem:[#allocation2] sm:$0xff]  ;;  %v386_v34 = vld [vmem:[#allocation2 + $0x18] sm:$0xff] }
  0x2e   : > { %508 = vmatprep.subr.bf16.mxu0 %v904_v10  ;;  %842 = vmatprep.subr.bf16.mxu1 %v904_v10  ;;  %v389_v29 = vld [vmem:[#allocation2 + $0x20] sm:$0xff]  ;;  %v390_v35 = vld [vmem:[#allocation2 + $0x28] sm:$0xff]  ;;  %v387_v40 = vld [vmem:[#allocation2 + $0x10] sm:$0xff] }
  0x2f   : > { %v391_v41 = vld [vmem:[#allocation2 + $0x38] sm:$0xff] }
  0x31   : > { %509 = vmatpush1.bf16.msra.mxu0 %v906_v11  ;;  %850 = vmatpush1.bf16.msra.mxu1 %v906_v11 }
  0x32   : > { %510 = vmatprep.subr.bf16.mxu0 %v907_v12  ;;  %843 = vmatprep.subr.bf16.mxu1 %v907_v12 }
  0x35   : > { %511 = vmatpush1.bf16.msra.mxu0 %v909_v13  ;;  %851 = vmatpush1.bf16.msra.mxu1 %v909_v13 }
  0x36   : > { %512 = vmatprep.subr.bf16.mxu0 %v910_v14  ;;  %844 = vmatprep.subr.bf16.mxu1 %v910_v14 }
  0x39   : > { %513 = vmatpush1.bf16.msra.mxu0 %v912_v15  ;;  %852 = vmatpush1.bf16.msra.mxu1 %v912_v15 }
  0x3a   : > { %514 = vmatprep.subr.bf16.mxu0 %v913_v16  ;;  %845 = vmatprep.subr.bf16.mxu1 %v913_v16 }
  0x3d   : > { %515 = vmatpush1.bf16.msra.mxu0 %v915_v17  ;;  %853 = vmatpush1.bf16.msra.mxu1 %v915_v17 }
  0x3e   : > { %516 = vmatprep.subr.bf16.mxu0 %v916_v18  ;;  %846 = vmatprep.subr.bf16.mxu1 %v916_v18 }
  0x41   : > { %517 = vmatpush1.bf16.msra.mxu0 %v918_v19  ;;  %854 = vmatpush1.bf16.msra.mxu1 %v918_v19 }
  0x42   : > { %518 = vmatprep.subr.bf16.mxu0 %v919_v20  ;;  %847 = vmatprep.subr.bf16.mxu1 %v919_v20 }
  0x45   : > { %519 = vmatpush1.bf16.msra.mxu0 %v921_v21  ;;  %855 = vmatpush1.bf16.msra.mxu1 %v921_v21 }
  0x48   : > { %537 = vmatmul.mubr.bf16.vlgmr.msra.gmra.mxu0 %v922_v22  ;;  %547 = vmatmul.mubr.bf16.vlgmr.msra.gmra.mxu1 %v923_v23 }
 0x108   : > { %v538_v26 = vpop.f32.mrf.mxu0  ;;  %v548_v27 = vpop.f32.mrf.mxu1 }
 0x109   : > { %v557_v30 = vadd.f32 %v538_v26, %v384_v24  ;;  %v561_v31 = vadd.f32 %v548_v27, %v388_v25 }
 0x10a   : > { %v540_v32 = vpop.f32.mrf.mxu0  ;;  %v550_v33 = vpop.f32.mrf.mxu1 }
 0x10b   : > { %565 = vst [vmem:[#allocation2 + $0x30] sm:$0xff] %v557_v30  ;;  %569 = vst [vmem:[#allocation2 + $0x8] sm:$0xff] %v561_v31  ;;  %v558_v36 = vadd.f32 %v540_v32, %v385_v28  ;;  %v562_v37 = vadd.f32 %v550_v33, %v389_v29 }
 0x10c   : > { %v542_v38 = vpop.f32.mrf.mxu0  ;;  %v552_v39 = vpop.f32.mrf.mxu1 }
 0x10d   : > { %566 = vst [vmem:[#allocation2] sm:$0xff] %v558_v36  ;;  %570 = vst [vmem:[#allocation2 + $0x20] sm:$0xff] %v562_v37  ;;  %v559_v42 = vadd.f32 %v542_v38, %v386_v34  ;;  %v563_v43 = vadd.f32 %v552_v39, %v390_v35  ;;  %576 = sbr.rel (%p826_p11) target bundleno = 292 (0x124), region = 85 }
 0x10e   : > { %v544_v44 = vpop.f32.mrf.mxu0  ;;  %v554_v45 = vpop.f32.mrf.mxu1 }
 0x10f   : > { %567 = vst [vmem:[#allocation2 + $0x18] sm:$0xff] %v559_v42  ;;  %571 = vst [vmem:[#allocation2 + $0x28] sm:$0xff] %v563_v43  ;;  %v560_v46 = vadd.f32 %v544_v44, %v387_v40  ;;  %v564_v47 = vadd.f32 %v554_v45, %v391_v41 }
 0x111   : > { %568 = vst [vmem:[#allocation2 + $0x10] sm:$0xff] %v560_v46  ;;  %572 = vst [vmem:[#allocation2 + $0x38] sm:$0xff] %v564_v47 }
 0x112   : > { %v587_v48 = vlaneseq  ;;  %v585_v50 = vld [vmem:[%s1103_s2] sm:$0x3]  ;;  %v581_v58 = vld [vmem:[#allocation2 + $0x8] sm:$0xff] }
 0x113   : > { %v605_v51 = vld [vmem:[%s1104_s3] sm:$0x3] }
 0x114   : > { %v588_v49 = vshrl.u32 %v587_v48, 7  ;;  %v577_v52 = vld [vmem:[#allocation2 + $0x30] sm:$0xff]  ;;  %v578_v53 = vld [vmem:[#allocation2] sm:$0xff] }
 0x115   : > { %v582_v63 = vld [vmem:[#allocation2 + $0x20] sm:$0xff] }
 0x116   : > { %v589_v54 = vsub.s32 0, %v588_v49  ;;  %v593_v55 = vsub.s32 1, %v588_v49  ;;  %v579_v56 = vld [vmem:[#allocation2 + $0x18] sm:$0xff]  ;;  %v583_v0 = vld [vmem:[#allocation2 + $0x28] sm:$0xff] }
 0x118   : > { %v580_v57 = vld [vmem:[#allocation2 + $0x10] sm:$0xff]  ;;  %v590_v59 = vrot.slane %v585_v50, %v589_v54  ;;  %v594_v60 = vrot.slane %v585_v50, %v593_v55  ;;  %v610_v61 = vrot.slane %v605_v51, %v589_v54  ;;  %v614_v62 = vrot.slane %v605_v51, %v593_v55  ;;  %v584_v1 = vld [vmem:[#allocation2 + $0x38] sm:$0xff] }
 0x11a   : > { %v597_v2 = vmul.f32 %v590_v59, %v577_v52  ;;  %v598_v3 = vmul.f32 %v594_v60, %v578_v53  ;;  %v599_v4 = vmul.f32 %v590_v59, %v579_v56  ;;  %v600_v5 = vmul.f32 %v594_v60, %v580_v57 }
 0x11b   : > { %v601_v6 = vmul.f32 %v590_v59, %v581_v58  ;;  %v602_v7 = vmul.f32 %v594_v60, %v582_v63  ;;  %v603_v8 = vmul.f32 %v590_v59, %v583_v0  ;;  %v604_v9 = vmul.f32 %v594_v60, %v584_v1 }
 0x11c   : > { %v617_v10 = vadd.f32 %v610_v61, %v597_v2  ;;  %v618_v11 = vadd.f32 %v614_v62, %v598_v3  ;;  %v619_v12 = vadd.f32 %v610_v61, %v599_v4  ;;  %v620_v13 = vadd.f32 %v614_v62, %v600_v5 }
 0x11d   : > { %v621_v14 = vadd.f32 %v610_v61, %v601_v6  ;;  %v622_v15 = vadd.f32 %v614_v62, %v602_v7  ;;  %v623_v16 = vadd.f32 %v610_v61, %v603_v8  ;;  %v624_v17 = vadd.f32 %v614_v62, %v604_v9 }
 0x11e   : > { %v625_v18 = vmax.f32 %v617_v10, 0.0  ;;  %v626_v19 = vmax.f32 %v618_v11, 0.0  ;;  %v627_v20 = vmax.f32 %v619_v12, 0.0  ;;  %v628_v21 = vmax.f32 %v620_v13, 0.0 }
 0x11f   : > { %v629_v22 = vmax.f32 %v621_v14, 0.0  ;;  %v630_v23 = vmax.f32 %v622_v15, 0.0  ;;  %v631_v24 = vmax.f32 %v623_v16, 0.0  ;;  %v632_v25 = vmax.f32 %v624_v17, 0.0 }
 0x120   : > { %v836_v26 = vpack.c.bf16 %v626_v19, %v625_v18  ;;  %v837_v27 = vpack.c.bf16 %v628_v21, %v627_v20 }
 0x121   : > { %v838_v28 = vpack.c.bf16 %v630_v23, %v629_v22  ;;  %v839_v29 = vpack.c.bf16 %v632_v25, %v631_v24 }
 0x122   : > { %657 = vst [vmem:[%s1105_s4] sm:$0xff] %v836_v26  ;;  %658 = vst [vmem:[%s1105_s4 + $0x8] sm:$0xff] %v837_v27 }
 0x123   : > { %659 = vst [vmem:[%s1105_s4 + $0x10] sm:$0xff] %v838_v28  ;;  %660 = vst [vmem:[%s1105_s4 + $0x18] sm:$0xff] %v839_v29 }
 0x124 PF: > { %s14_s19 = sadd.s32 1, %s962_s19   ;;  %s1106_s15 = smov %s950_s16 }
 0x125   : > { %p11_p12 = scmp.ge.s32.totalorder %s14_s19, 6   ;;  %s1107_s16 = smov %s1026_s23 }
 0x126   : > { %s1108_s17 = smov %s958_s18  ;;  %s1109_s18 = smov %s1111_s20 }
 0x127   :  { %13 = sbr.rel (!%p11_p12) target bundleno = 3 (0x3), region = 129 }

// kernel: resnet50_forward.83
= control target key start
LH: loop header
LB: loop body
LE: loop exit
PB: predicated region body
PF: predicated region fallthrough
CT: control target
= control target key end

     0   :  { %s779_s15 = smov 0   ;;  %s781_s16 = smov 0   ;;  %s849_s0 = inlined_call_operand.vmem [shape: bf16[8,2304], index: 0, kind: input, shape index: {}]   ;;  %s850_s1 = inlined_call_operand.vmem [shape: bf16[2304,256], index: 1, kind: input, shape index: {}]   ;;  %s851_s2 = inlined_call_operand.vmem [shape: f32[1,256], index: 2, kind: input, shape index: {}]   ;;  %s852_s3 = inlined_call_operand.vmem [shape: f32[1,256], index: 3, kind: input, shape index: {}]   ;;  %s853_s4 = inlined_call_operand.vmem [shape: bf16[8,256], index: 4, kind: output, shape index: {}]  }
   0x1   :  { %s783_s17 = smov 0  }
   0x2 LB: > { %s26_s18 = sadd.s32 1, %s746_s16  ;;  %p648_p0 = scmp.ge.s32.totalorder %s750_s17, 1  ;;  %s750_s17 = sphi %s783_s17, %s14_s17   ;;  %s746_s16 = sphi %s781_s16, %s855_s16   ;;  %s742_s15 = sphi %s779_s15, %s854_s15  }
   0x3   : > { %p27_p1 = scmp.ge.s32.totalorder %s26_s18, 18  ;;  %p227_p2 = scmp.lt.s32.totalorder %s750_s17, 19 }
   0x5   : > { %s857_s18 = smov (%p27_p1, %s26_s18), 0  ;;  %p228_p3 = pnand %p648_p0, %p227_p2 }
   0x6   : > { %p280_p4 = scmp.lt.s32.totalorder (!%p228_p3), %s742_s15, 17  ;;  %s650_s19 = sshll.u32 (!%p228_p3), %s742_s15, 4 }
   0x7   : > { %231 = sbr.rel (%p228_p3) target bundleno = 269 (0x10d), region = 36  ;;  %p288_p5 = scmp.lt.s32.totalorder (!%p228_p3), %s650_s19, 287 }
   0x8   : > { %p653_p6 = scmp.ne.s32.totalorder (!%p228_p3), %s742_s15, 0 }
   0xc   : > { %s281_s20 = scalar_select %p280_p4, %s742_s15, 17 }
   0xd   : > { %s859_s19 = smov (!%p288_p5, %s650_s19), 287  ;;  %322 = sbr.rel (%p653_p6) target bundleno = 20 (0x14), region = 40 }
   0xe   : > { %s649_s21 = sshll.u32 %s281_s20, 2  ;;  %s676_s25 = sshll.u32 %s859_s19, 3 }
   0xf   : > { %s805_s24 = scalar_lea.vmem %s849_s0, %s649_s21  ;;  %s810_s28 = scalar_lea.vmem %s850_s1, %s676_s25 }
  0x12   : > { %v752_v0 = vmov 0.0  }
  0x13   : > { %323 = vst [vmem:[#allocation2] sm:$0xff] %v752_v0  ;;  %324 = vst [vmem:[#allocation2 + $0x8] sm:$0xff] %v752_v0 }
  0x14 PF: > { %v704_v1 = vld [vmem:[%s810_s28 + $0x74] ss:$8 sps:$4 sm:$0xff]   ;;  %v706_v2 = vld [vmem:[%s810_s28 + $0x70] ss:$8 sps:$4 sm:$0xff]   ;;  %v753_v3 = vmov 0   ;;  %p670_p7 = scmp.ne.s32.totalorder %s742_s15, 17 }
  0x15   : > { %456 = vmatprep.mubr.bf16.mxu0 %v753_v3  ;;  %424 = vmatprep.subr.bf16.mxu0 %v704_v1  ;;  %v707_v4 = vld [vmem:[%s810_s28 + $0x64] ss:$8 sps:$4 sm:$0xff]   ;;  %v709_v5 = vld [vmem:[%s810_s28 + $0x60] ss:$8 sps:$4 sm:$0xff]   ;;  %v710_v6 = vld [vmem:[%s810_s28 + $0x54] ss:$8 sps:$4 sm:$0xff]  }
  0x16   : > { %425 = vmatpush1.bf16.msra.mxu0 %v706_v2  ;;  %v712_v7 = vld [vmem:[%s810_s28 + $0x50] ss:$8 sps:$4 sm:$0xff]   ;;  %v713_v8 = vld [vmem:[%s810_s28 + $0x44] ss:$8 sps:$4 sm:$0xff]   ;;  %v715_v9 = vld [vmem:[%s810_s28 + $0x40] ss:$8 sps:$4 sm:$0xff]  }
  0x17   : > { %426 = vmatprep.subr.bf16.mxu0 %v707_v4  ;;  %v716_v10 = vld [vmem:[%s810_s28 + $0x34] ss:$8 sps:$4 sm:$0xff]   ;;  %v718_v11 = vld [vmem:[%s810_s28 + $0x30] ss:$8 sps:$4 sm:$0xff]   ;;  %v719_v12 = vld [vmem:[%s810_s28 + $0x24] ss:$8 sps:$4 sm:$0xff]  }
  0x18   : > { %v721_v13 = vld [vmem:[%s810_s28 + $0x20] ss:$8 sps:$4 sm:$0xff]   ;;  %v722_v14 = vld [vmem:[%s810_s28 + $0x14] ss:$8 sps:$4 sm:$0xff]   ;;  %v724_v15 = vld [vmem:[%s810_s28 + $0x10] ss:$8 sps:$4 sm:$0xff]  }
  0x19   : > { %v725_v16 = vld [vmem:[%s810_s28 + $0x4] ss:$8 sps:$4 sm:$0xff]   ;;  %v727_v17 = vld [vmem:[%s810_s28] ss:$8 sps:$4 sm:$0xff]  }
  0x1a   : > { %427 = vmatpush1.bf16.msra.mxu0 %v709_v5  ;;  %v327_v18 = vld [vmem:[%s805_s24] sm:$0xf]  ;;  %v325_v19 = vld [vmem:[#allocation2] sm:$0xff]  ;;  %v326_v21 = vld [vmem:[#allocation2 + $0x8] sm:$0xff] }
  0x1b   : > { %428 = vmatprep.subr.bf16.mxu0 %v710_v6 }
  0x1e   : > { %429 = vmatpush1.bf16.msra.mxu0 %v712_v7 }
  0x1f   : > { %430 = vmatprep.subr.bf16.mxu0 %v713_v8 }
  0x22   : > { %431 = vmatpush1.bf16.msra.mxu0 %v715_v9 }
  0x23   : > { %432 = vmatprep.subr.bf16.mxu0 %v716_v10 }
  0x26   : > { %433 = vmatpush1.bf16.msra.mxu0 %v718_v11 }
  0x27   : > { %434 = vmatprep.subr.bf16.mxu0 %v719_v12 }
  0x2a   : > { %435 = vmatpush1.bf16.msra.mxu0 %v721_v13 }
  0x2b   : > { %436 = vmatprep.subr.bf16.mxu0 %v722_v14 }
  0x2e   : > { %437 = vmatpush1.bf16.msra.mxu0 %v724_v15 }
  0x2f   : > { %438 = vmatprep.subr.bf16.mxu0 %v725_v16 }
  0x32   : > { %439 = vmatpush1.bf16.msra.mxu0 %v727_v17 }
  0x35   : > { %457 = vmatmul.mubr.bf16.vlgmr.msra.gmra.mxu0 %v327_v18 }
  0xf5   : > { %v458_v20 = vpop.f32.mrf.mxu0 }
  0xf6   : > { %v465_v22 = vadd.f32 %v458_v20, %v325_v19 }
  0xf7   : > { %v460_v23 = vpop.f32.mrf.mxu0  ;;  %472 = sbr.rel (%p670_p7) target bundleno = 269 (0x10d), region = 44 }
  0xf8   : > { %467 = vst [vmem:[#allocation2] sm:$0xff] %v465_v22  ;;  %v466_v24 = vadd.f32 %v460_v23, %v326_v21 }
  0xf9   : > { %v462_v25 = vpop.f32.mrf.mxu0 }
  0xfa   : > { %468 = vst [vmem:[#allocation2 + $0x8] sm:$0xff] %v466_v24 }
  0xfb   : > { %v463_v26 = vpop.f32.mrf.mxu0 }
  0xfc   : > { %v477_v27 = vlaneseq  ;;  %v475_v29 = vld [vmem:[%s851_s2] sm:$0x3] }
  0xfd   : > { %v489_v30 = vld [vmem:[%s852_s3] sm:$0x3] }
  0xfe   : > { %v478_v28 = vshrl.u32 %v477_v27, 7 }
  0xff   : > { %v473_v33 = vld [vmem:[#allocation2] sm:$0xff] }
 0x100   : > { %v479_v31 = vsub.s32 0, %v478_v28  ;;  %v483_v32 = vsub.s32 1, %v478_v28 }
 0x101   : > { %v474_v34 = vld [vmem:[#allocation2 + $0x8] sm:$0xff] }
 0x102   : > { %v480_v35 = vrot.slane %v475_v29, %v479_v31  ;;  %v484_v36 = vrot.slane %v475_v29, %v483_v32  ;;  %v494_v37 = vrot.slane %v489_v30, %v479_v31  ;;  %v498_v38 = vrot.slane %v489_v30, %v483_v32 }
 0x104   : > { %v487_v39 = vmul.f32 %v480_v35, %v473_v33  ;;  %v488_v40 = vmul.f32 %v484_v36, %v474_v34 }
 0x106   : > { %v501_v41 = vadd.f32 %v494_v37, %v487_v39  ;;  %v502_v42 = vadd.f32 %v498_v38, %v488_v40 }
 0x108   : > { %v503_v43 = vmax.f32 %v501_v41, 0.0  ;;  %v504_v44 = vmax.f32 %v502_v42, 0.0 }
 0x10a   : > { %v677_v45 = vpack.c.bf16 %v504_v44, %v503_v43 }
 0x10c   : > { %513 = vst [vmem:[%s853_s4] sm:$0xff] %v677_v45 }
 0x10d PF: > { %s14_s17 = sadd.s32 1, %s750_s17   ;;  %s854_s15 = smov %s746_s16 }
 0x10e   : > { %p11_p8 = scmp.ge.s32.totalorder %s14_s17, 20   ;;  %s855_s16 = smov %s857_s18 }
 0x110   :  { %13 = sbr.rel (!%p11_p8) target bundleno = 2 (0x2), region = 83 }

// kernel: resnet50_forward.85
= control target key start
LH: loop header
LB: loop body
LE: loop exit
PB: predicated region body
PF: predicated region fallthrough
CT: control target
= control target key end

     0   :  { %s779_s15 = smov 0   ;;  %s781_s16 = smov 0   ;;  %s849_s0 = inlined_call_operand.vmem [shape: bf16[8,1024], index: 0, kind: input, shape index: {}]   ;;  %s850_s1 = inlined_call_operand.vmem [shape: bf16[1024,256], index: 1, kind: input, shape index: {}]   ;;  %s851_s2 = inlined_call_operand.vmem [shape: f32[1,256], index: 2, kind: input, shape index: {}]   ;;  %s852_s3 = inlined_call_operand.vmem [shape: f32[1,256], index: 3, kind: input, shape index: {}]   ;;  %s853_s4 = inlined_call_operand.vmem [shape: bf16[8,256], index: 4, kind: output, shape index: {}]  }
   0x1   :  { %s783_s17 = smov 0  }
   0x2 LB: > { %s26_s18 = sadd.s32 1, %s746_s16  ;;  %p648_p0 = scmp.ge.s32.totalorder %s750_s17, 1  ;;  %s750_s17 = sphi %s783_s17, %s14_s17   ;;  %s746_s16 = sphi %s781_s16, %s855_s16   ;;  %s742_s15 = sphi %s779_s15, %s854_s15  }
   0x3   : > { %p27_p1 = scmp.ge.s32.totalorder %s26_s18, 8  ;;  %p227_p2 = scmp.lt.s32.totalorder %s750_s17, 9 }
   0x5   : > { %s857_s18 = smov (%p27_p1, %s26_s18), 0  ;;  %p228_p3 = pnand %p648_p0, %p227_p2 }
   0x6   : > { %p280_p4 = scmp.lt.s32.totalorder (!%p228_p3), %s742_s15, 7  ;;  %s650_s19 = sshll.u32 (!%p228_p3), %s742_s15, 4 }
   0x7   : > { %231 = sbr.rel (%p228_p3) target bundleno = 269 (0x10d), region = 36  ;;  %p288_p5 = scmp.lt.s32.totalorder (!%p228_p3), %s650_s19, 127 }
   0x8   : > { %p653_p6 = scmp.ne.s32.totalorder (!%p228_p3), %s742_s15, 0 }
   0xc   : > { %s281_s20 = scalar_select %p280_p4, %s742_s15, 7 }
   0xd   : > { %s859_s19 = smov (!%p288_p5, %s650_s19), 127  ;;  %322 = sbr.rel (%p653_p6) target bundleno = 20 (0x14), region = 40 }
   0xe   : > { %s649_s21 = sshll.u32 %s281_s20, 2  ;;  %s676_s25 = sshll.u32 %s859_s19, 3 }
   0xf   : > { %s805_s24 = scalar_lea.vmem %s849_s0, %s649_s21  ;;  %s810_s28 = scalar_lea.vmem %s850_s1, %s676_s25 }
  0x12   : > { %v752_v0 = vmov 0.0  }
  0x13   : > { %323 = vst [vmem:[#allocation2] sm:$0xff] %v752_v0  ;;  %324 = vst [vmem:[#allocation2 + $0x8] sm:$0xff] %v752_v0 }
  0x14 PF: > { %v704_v1 = vld [vmem:[%s810_s28 + $0x74] ss:$8 sps:$4 sm:$0xff]   ;;  %v706_v2 = vld [vmem:[%s810_s28 + $0x70] ss:$8 sps:$4 sm:$0xff]   ;;  %v753_v3 = vmov 0   ;;  %p670_p7 = scmp.ne.s32.totalorder %s742_s15, 7 }
  0x15   : > { %456 = vmatprep.mubr.bf16.mxu0 %v753_v3  ;;  %424 = vmatprep.subr.bf16.mxu0 %v704_v1  ;;  %v707_v4 = vld [vmem:[%s810_s28 + $0x64] ss:$8 sps:$4 sm:$0xff]   ;;  %v709_v5 = vld [vmem:[%s810_s28 + $0x60] ss:$8 sps:$4 sm:$0xff]   ;;  %v710_v6 = vld [vmem:[%s810_s28 + $0x54] ss:$8 sps:$4 sm:$0xff]  }
  0x16   : > { %425 = vmatpush1.bf16.msra.mxu0 %v706_v2  ;;  %v712_v7 = vld [vmem:[%s810_s28 + $0x50] ss:$8 sps:$4 sm:$0xff]   ;;  %v713_v8 = vld [vmem:[%s810_s28 + $0x44] ss:$8 sps:$4 sm:$0xff]   ;;  %v715_v9 = vld [vmem:[%s810_s28 + $0x40] ss:$8 sps:$4 sm:$0xff]  }
  0x17   : > { %426 = vmatprep.subr.bf16.mxu0 %v707_v4  ;;  %v716_v10 = vld [vmem:[%s810_s28 + $0x34] ss:$8 sps:$4 sm:$0xff]   ;;  %v718_v11 = vld [vmem:[%s810_s28 + $0x30] ss:$8 sps:$4 sm:$0xff]   ;;  %v719_v12 = vld [vmem:[%s810_s28 + $0x24] ss:$8 sps:$4 sm:$0xff]  }
  0x18   : > { %v721_v13 = vld [vmem:[%s810_s28 + $0x20] ss:$8 sps:$4 sm:$0xff]   ;;  %v722_v14 = vld [vmem:[%s810_s28 + $0x14] ss:$8 sps:$4 sm:$0xff]   ;;  %v724_v15 = vld [vmem:[%s810_s28 + $0x10] ss:$8 sps:$4 sm:$0xff]  }
  0x19   : > { %v725_v16 = vld [vmem:[%s810_s28 + $0x4] ss:$8 sps:$4 sm:$0xff]   ;;  %v727_v17 = vld [vmem:[%s810_s28] ss:$8 sps:$4 sm:$0xff]  }
  0x1a   : > { %427 = vmatpush1.bf16.msra.mxu0 %v709_v5  ;;  %v327_v18 = vld [vmem:[%s805_s24] sm:$0xf]  ;;  %v325_v19 = vld [vmem:[#allocation2] sm:$0xff]  ;;  %v326_v21 = vld [vmem:[#allocation2 + $0x8] sm:$0xff] }
  0x1b   : > { %428 = vmatprep.subr.bf16.mxu0 %v710_v6 }
  0x1e   : > { %429 = vmatpush1.bf16.msra.mxu0 %v712_v7 }
  0x1f   : > { %430 = vmatprep.subr.bf16.mxu0 %v713_v8 }
  0x22   : > { %431 = vmatpush1.bf16.msra.mxu0 %v715_v9 }
  0x23   : > { %432 = vmatprep.subr.bf16.mxu0 %v716_v10 }
  0x26   : > { %433 = vmatpush1.bf16.msra.mxu0 %v718_v11 }
  0x27   : > { %434 = vmatprep.subr.bf16.mxu0 %v719_v12 }
  0x2a   : > { %435 = vmatpush1.bf16.msra.mxu0 %v721_v13 }
  0x2b   : > { %436 = vmatprep.subr.bf16.mxu0 %v722_v14 }
  0x2e   : > { %437 = vmatpush1.bf16.msra.mxu0 %v724_v15 }
  0x2f   : > { %438 = vmatprep.subr.bf16.mxu0 %v725_v16 }
  0x32   : > { %439 = vmatpush1.bf16.msra.mxu0 %v727_v17 }
  0x35   : > { %457 = vmatmul.mubr.bf16.vlgmr.msra.gmra.mxu0 %v327_v18 }
  0xf5   : > { %v458_v20 = vpop.f32.mrf.mxu0 }
  0xf6   : > { %v465_v22 = vadd.f32 %v458_v20, %v325_v19 }
  0xf7   : > { %v460_v23 = vpop.f32.mrf.mxu0  ;;  %472 = sbr.rel (%p670_p7) target bundleno = 269 (0x10d), region = 44 }
  0xf8   : > { %467 = vst [vmem:[#allocation2] sm:$0xff] %v465_v22  ;;  %v466_v24 = vadd.f32 %v460_v23, %v326_v21 }
  0xf9   : > { %v462_v25 = vpop.f32.mrf.mxu0 }
  0xfa   : > { %468 = vst [vmem:[#allocation2 + $0x8] sm:$0xff] %v466_v24 }
  0xfb   : > { %v463_v26 = vpop.f32.mrf.mxu0 }
  0xfc   : > { %v477_v27 = vlaneseq  ;;  %v475_v29 = vld [vmem:[%s851_s2] sm:$0x3] }
  0xfd   : > { %v489_v30 = vld [vmem:[%s852_s3] sm:$0x3] }
  0xfe   : > { %v478_v28 = vshrl.u32 %v477_v27, 7 }
  0xff   : > { %v473_v33 = vld [vmem:[#allocation2] sm:$0xff] }
 0x100   : > { %v479_v31 = vsub.s32 0, %v478_v28  ;;  %v483_v32 = vsub.s32 1, %v478_v28 }
 0x101   : > { %v474_v34 = vld [vmem:[#allocation2 + $0x8] sm:$0xff] }
 0x102   : > { %v480_v35 = vrot.slane %v475_v29, %v479_v31  ;;  %v484_v36 = vrot.slane %v475_v29, %v483_v32  ;;  %v494_v37 = vrot.slane %v489_v30, %v479_v31  ;;  %v498_v38 = vrot.slane %v489_v30, %v483_v32 }
 0x104   : > { %v487_v39 = vmul.f32 %v480_v35, %v473_v33  ;;  %v488_v40 = vmul.f32 %v484_v36, %v474_v34 }
 0x106   : > { %v501_v41 = vadd.f32 %v494_v37, %v487_v39  ;;  %v502_v42 = vadd.f32 %v498_v38, %v488_v40 }
 0x108   : > { %v503_v43 = vmax.f32 %v501_v41, 0.0  ;;  %v504_v44 = vmax.f32 %v502_v42, 0.0 }
 0x10a   : > { %v677_v45 = vpack.c.bf16 %v504_v44, %v503_v43 }
 0x10c   : > { %513 = vst [vmem:[%s853_s4] sm:$0xff] %v677_v45 }
 0x10d PF: > { %s14_s17 = sadd.s32 1, %s750_s17   ;;  %s854_s15 = smov %s746_s16 }
 0x10e   : > { %p11_p8 = scmp.ge.s32.totalorder %s14_s17, 10   ;;  %s855_s16 = smov %s857_s18 }
 0x110   :  { %13 = sbr.rel (!%p11_p8) target bundleno = 2 (0x2), region = 83 }

// kernel: resnet50_forward.84
= control target key start
LH: loop header
LB: loop body
LE: loop exit
PB: predicated region body
PF: predicated region fallthrough
CT: control target
= control target key end

     0   :  { %s1189_s0 = inlined_call_operand.vmem [shape: bf16[8,256], index: 0, kind: input, shape index: {}]   ;;  %s1190_s1 = inlined_call_operand.vmem [shape: bf16[256,1024], index: 1, kind: input, shape index: {}]   ;;  %s1191_s2 = inlined_call_operand.vmem [shape: f32[1,1024], index: 2, kind: input, shape index: {}]   ;;  %s1192_s3 = inlined_call_operand.vmem [shape: f32[1,1024], index: 3, kind: input, shape index: {}]   ;;  %s1193_s4 = inlined_call_operand.vmem [shape: bf16[8,1024], index: 4, kind: input, shape index: {}]   ;;  %s1194_s5 = inlined_call_operand.vmem [shape: bf16[8,1024], index: 5, kind: output, shape index: {}]  }
   0x1   :  { %1195 = sst [smem:[#allocation4_spill]] %s1190_s1 }
   0x2   :  { %s1025_s18 = smov 0   ;;  %s1027_s19 = smov 0  }
   0x3   :  { %s1029_s20 = smov 0   ;;  %s1031_s21 = smov 0  }
   0x4   :  { %s1033_s22 = smov 0   ;;  %s1035_s23 = smov 0  }
   0x5   :  { %s1037_s24 = smov 0  }
   0x6 LB: > { %s27_s25 = sadd.s32 1, %s983_s22  ;;  %s30_s26 = sadd.s32 1, %s987_s23  ;;  %s991_s24 = sphi %s1037_s24, %s15_s24   ;;  %s987_s23 = sphi %s1035_s23, %s1202_s23   ;;  %s983_s22 = sphi %s1033_s22, %s1201_s22   ;;  %s979_s21 = sphi %s1031_s21, %s1200_s21   ;;  %s975_s20 = sphi %s1029_s20, %s1199_s20   ;;  %s971_s19 = sphi %s1027_s19, %s1198_s19   ;;  %s967_s18 = sphi %s1025_s18, %s1197_s18  }
   0x7   : > { %p28_p0 = scmp.ge.s32.totalorder %s27_s25, 2  ;;  %p78_p1 = scmp.ne.s32.totalorder %s971_s19, %s967_s18 }
   0x8   : > { %p79_p2 = scmp.eq.s32.totalorder %s991_s24, 0  ;;  %s71_s30 = sadd.s32 1, %s971_s19 }
   0x9   : > { %s1204_s25 = smov (%p28_p0, %s27_s25), 0  ;;  %s1206_s26 = smov (!%p28_p0, %s30_s26), %s987_s23 }
   0xa   : > { %p80_p3 = por %p79_p2, %p78_p1  ;;  %p32_p4 = scmp.ge.s32.totalorder %s1206_s26, 4 }
   0xb   : > { %s66_s27 = ssub.s32 %s983_s22, %s1204_s25  ;;  %p817_p6 = scmp.ge.s32.totalorder %s991_s24, 8 }
   0xc   : > { %s1208_s26 = smov (%p32_p4, %s1206_s26), 0 }
   0xd   : > { %s67_s28 = ssub.s32 %s987_s23, %s1208_s26  ;;  %212 = sbr.rel (%p817_p6) target bundleno = 44 (0x2c), region = 16 }
   0xe   : > { %s68_s29 = sor.u32 %s67_s28, %s66_s27 }
   0xf   : > { %p69_p5 = scmp.eq.s32.totalorder %s68_s29, 0 }
  0x11   : > { %s1076_s6 = scalar_select %p69_p5, %s971_s19, %s71_s30  }
  0x12   : > { %226 = sbr.rel (!%p80_p3) target bundleno = 44 (0x2c), region = 24  ;;  %s228_s7 = sand.u32 (%p80_p3), 1, %s971_s19  }
  0x13   : > { %s820_s8 = sshll.u32 (%p80_p3), %s987_s23, 1  ;;  %s818_s9 = sshll.u32 (%p80_p3), %s228_s7, 7 }
  0x14   : > { %s853_s10 = sshll.u32 (%p80_p3), %s983_s22, 7  ;;  %s1196_s1 = sld [smem:[#allocation4_spill]] (%p80_p3) }
  0x15   : > { %s234_s11 = sadd.s32 (%p80_p3), %s853_s10, %s820_s8  ;;  %s230_s16 = scalar_lea.vmem (%p80_p3), [#allocation3], %s818_s9 }
  0x16   : > { %s822_s12 = sshll.u32 (%p80_p3), %s234_s11, 2 }
  0x1a   : > { %s1085_s15 = scalar_lea.vmem %s1196_s1, %s822_s12 }
  0x1b   : > { %v295_v0 = vld [vmem:[%s1085_s15] sm:$0xff] }
  0x1c   : > { %v297_v1 = vld [vmem:[%s1085_s15 + $0x20] sm:$0xff]  ;;  %296 = vst [vmem:[%s230_s16] sm:$0xff] %v295_v0 }
  0x1d   : > { %v299_v2 = vld [vmem:[%s1085_s15 + $0x40] sm:$0xff]  ;;  %298 = vst [vmem:[%s230_s16 + $0x8] sm:$0xff] %v297_v1 }
  0x1e   : > { %300 = vst [vmem:[%s230_s16 + $0x10] sm:$0xff] %v299_v2  ;;  %v301_v3 = vld [vmem:[%s1085_s15 + $0x60] sm:$0xff] }
  0x1f   : > { %v303_v4 = vld [vmem:[%s1085_s15 + $0x80] sm:$0xff]  ;;  %302 = vst [vmem:[%s230_s16 + $0x18] sm:$0xff] %v301_v3 }
  0x20   : > { %v305_v5 = vld [vmem:[%s1085_s15 + $0xa0] sm:$0xff]  ;;  %304 = vst [vmem:[%s230_s16 + $0x20] sm:$0xff] %v303_v4 }
  0x21   : > { %306 = vst [vmem:[%s230_s16 + $0x28] sm:$0xff] %v305_v5  ;;  %v307_v6 = vld [vmem:[%s1085_s15 + $0xc0] sm:$0xff] }
  0x22   : > { %v309_v7 = vld [vmem:[%s1085_s15 + $0xe0] sm:$0xff]  ;;  %308 = vst [vmem:[%s230_s16 + $0x30] sm:$0xff] %v307_v6 }
  0x23   : > { %v311_v8 = vld [vmem:[%s1085_s15 + $0x100] sm:$0xff]  ;;  %310 = vst [vmem:[%s230_s16 + $0x38] sm:$0xff] %v309_v7 }
  0x24   : > { %312 = vst [vmem:[%s230_s16 + $0x40] sm:$0xff] %v311_v8  ;;  %v313_v9 = vld [vmem:[%s1085_s15 + $0x120] sm:$0xff] }
  0x25   : > { %v315_v10 = vld [vmem:[%s1085_s15 + $0x140] sm:$0xff]  ;;  %314 = vst [vmem:[%s230_s16 + $0x48] sm:$0xff] %v313_v9 }
  0x26   : > { %v317_v11 = vld [vmem:[%s1085_s15 + $0x160] sm:$0xff]  ;;  %316 = vst [vmem:[%s230_s16 + $0x50] sm:$0xff] %v315_v10 }
  0x27   : > { %318 = vst [vmem:[%s230_s16 + $0x58] sm:$0xff] %v317_v11  ;;  %v319_v12 = vld [vmem:[%s1085_s15 + $0x180] sm:$0xff] }
  0x28   : > { %v321_v13 = vld [vmem:[%s1085_s15 + $0x1a0] sm:$0xff]  ;;  %320 = vst [vmem:[%s230_s16 + $0x60] sm:$0xff] %v319_v12 }
  0x29   : > { %v323_v14 = vld [vmem:[%s1085_s15 + $0x1c0] sm:$0xff]  ;;  %322 = vst [vmem:[%s230_s16 + $0x68] sm:$0xff] %v321_v13 }
  0x2a   : > { %324 = vst [vmem:[%s230_s16 + $0x70] sm:$0xff] %v323_v14  ;;  %v325_v15 = vld [vmem:[%s1085_s15 + $0x1e0] sm:$0xff] }
  0x2b   : > { %326 = vst [vmem:[%s230_s16 + $0x78] sm:$0xff] %v325_v15 }
  0x2c PF: > { %p823_p7 = scmp.ge.s32.totalorder %s991_s24, 1  ;;  %p360_p8 = scmp.lt.s32.totalorder %s991_s24, 9 }
  0x2e   : > { %p361_p9 = pnand %p823_p7, %p360_p8 }
  0x2f   : > { %s367_s17 = sand.u32 (!%p361_p9), 1, %s967_s18   ;;  %p425_p10 = scmp.lt.s32.totalorder (!%p361_p9), %s975_s20, 1 }
  0x30   : > { %364 = sbr.rel (%p361_p9) target bundleno = 312 (0x138), region = 74  ;;  %s824_s27 = sshll.u32 (!%p361_p9), %s367_s17, 7 }
  0x31   : > { %s826_s28 = sshll.u32 (!%p361_p9), %s979_s21, 1  ;;  %p832_p12 = scmp.ne.s32.totalorder (!%p361_p9), %s975_s20, 0 }
  0x32   : > { %p434_p11 = scmp.lt.s32.totalorder (!%p361_p9), %s826_s28, 7 }
  0x35   : > { %s426_s29 = scalar_select %p425_p10, %s975_s20, 1 }
  0x36   : > { %s1210_s28 = smov (!%p434_p11, %s826_s28), 7  ;;  %467 = sbr.rel (%p832_p12) target bundleno = 61 (0x3d), region = 82 }
  0x37   : > { %s825_s30 = sshll.u32 %s426_s29, 2  ;;  %s436_s18 = scalar_lea.vmem %s1191_s2, %s1210_s28 }
  0x38   : > { %s1114_s9 = scalar_lea.vmem %s1189_s0, %s825_s30  ;;  %s441_s21 = scalar_lea.vmem %s1192_s3, %s1210_s28 }
  0x39   : > { %s829_s14 = sshll.u32 %s1210_s28, 2  ;;  %s1135_s30 = scalar_lea.vmem [#allocation3], %s824_s27 }
  0x3a   : > { %s1128_s17 = scalar_lea.vmem %s1193_s4, %s829_s14  ;;  %s1133_s7 = scalar_lea.vmem %s1194_s5, %s829_s14 }
  0x3b   : > { %v993_v16 = vmov 0.0  }
  0x3c   : > { %468 = vst [vmem:[#allocation2] sm:$0xff] %v993_v16  ;;  %469 = vst [vmem:[#allocation2 + $0x8] sm:$0xff] %v993_v16 }
  0x3d PF: > { %v913_v17 = vld [vmem:[%s1135_s30 + $0x74] ss:$8 sps:$4 sm:$0xff]   ;;  %v915_v18 = vld [vmem:[%s1135_s30 + $0x70] ss:$8 sps:$4 sm:$0xff]   ;;  %v994_v19 = vmov 0   ;;  %p849_p13 = scmp.ne.s32.totalorder %s975_s20, 1 }
  0x3e   : > { %601 = vmatprep.mubr.bf16.mxu0 %v994_v19  ;;  %569 = vmatprep.subr.bf16.mxu0 %v913_v17  ;;  %v916_v20 = vld [vmem:[%s1135_s30 + $0x64] ss:$8 sps:$4 sm:$0xff]   ;;  %v918_v21 = vld [vmem:[%s1135_s30 + $0x60] ss:$8 sps:$4 sm:$0xff]   ;;  %v919_v22 = vld [vmem:[%s1135_s30 + $0x54] ss:$8 sps:$4 sm:$0xff]  }
  0x3f   : > { %570 = vmatpush1.bf16.msra.mxu0 %v915_v18  ;;  %v921_v23 = vld [vmem:[%s1135_s30 + $0x50] ss:$8 sps:$4 sm:$0xff]   ;;  %v922_v24 = vld [vmem:[%s1135_s30 + $0x44] ss:$8 sps:$4 sm:$0xff]   ;;  %v924_v25 = vld [vmem:[%s1135_s30 + $0x40] ss:$8 sps:$4 sm:$0xff]  }
  0x40   : > { %571 = vmatprep.subr.bf16.mxu0 %v916_v20  ;;  %v925_v26 = vld [vmem:[%s1135_s30 + $0x34] ss:$8 sps:$4 sm:$0xff]   ;;  %v927_v27 = vld [vmem:[%s1135_s30 + $0x30] ss:$8 sps:$4 sm:$0xff]   ;;  %v928_v28 = vld [vmem:[%s1135_s30 + $0x24] ss:$8 sps:$4 sm:$0xff]  }
  0x41   : > { %v930_v29 = vld [vmem:[%s1135_s30 + $0x20] ss:$8 sps:$4 sm:$0xff]   ;;  %v931_v30 = vld [vmem:[%s1135_s30 + $0x14] ss:$8 sps:$4 sm:$0xff]   ;;  %v933_v31 = vld [vmem:[%s1135_s30 + $0x10] ss:$8 sps:$4 sm:$0xff]  }
  0x42   : > { %v934_v32 = vld [vmem:[%s1135_s30 + $0x4] ss:$8 sps:$4 sm:$0xff]   ;;  %v936_v33 = vld [vmem:[%s1135_s30] ss:$8 sps:$4 sm:$0xff]  }
  0x43   : > { %572 = vmatpush1.bf16.msra.mxu0 %v918_v21  ;;  %v472_v34 = vld [vmem:[%s1114_s9] sm:$0xf]  ;;  %v470_v35 = vld [vmem:[#allocation2] sm:$0xff]  ;;  %v471_v37 = vld [vmem:[#allocation2 + $0x8] sm:$0xff] }
  0x44   : > { %573 = vmatprep.subr.bf16.mxu0 %v919_v22 }
  0x47   : > { %574 = vmatpush1.bf16.msra.mxu0 %v921_v23 }
  0x48   : > { %575 = vmatprep.subr.bf16.mxu0 %v922_v24 }
  0x4b   : > { %576 = vmatpush1.bf16.msra.mxu0 %v924_v25 }
  0x4c   : > { %577 = vmatprep.subr.bf16.mxu0 %v925_v26 }
  0x4f   : > { %578 = vmatpush1.bf16.msra.mxu0 %v927_v27 }
  0x50   : > { %579 = vmatprep.subr.bf16.mxu0 %v928_v28 }
  0x53   : > { %580 = vmatpush1.bf16.msra.mxu0 %v930_v29 }
  0x54   : > { %581 = vmatprep.subr.bf16.mxu0 %v931_v30 }
  0x57   : > { %582 = vmatpush1.bf16.msra.mxu0 %v933_v31 }
  0x58   : > { %583 = vmatprep.subr.bf16.mxu0 %v934_v32 }
  0x5b   : > { %584 = vmatpush1.bf16.msra.mxu0 %v936_v33 }
  0x5e   : > { %602 = vmatmul.mubr.bf16.vlgmr.msra.gmra.mxu0 %v472_v34 }
 0x11e   : > { %v603_v36 = vpop.f32.mrf.mxu0 }
 0x11f   : > { %v610_v38 = vadd.f32 %v603_v36, %v470_v35 }
 0x120   : > { %v605_v39 = vpop.f32.mrf.mxu0  ;;  %617 = sbr.rel (%p849_p13) target bundleno = 312 (0x138), region = 86 }
 0x121   : > { %612 = vst [vmem:[#allocation2] sm:$0xff] %v610_v38  ;;  %v611_v40 = vadd.f32 %v605_v39, %v471_v37 }
 0x122   : > { %v607_v41 = vpop.f32.mrf.mxu0 }
 0x123   : > { %613 = vst [vmem:[#allocation2 + $0x8] sm:$0xff] %v611_v40 }
 0x124   : > { %v608_v42 = vpop.f32.mrf.mxu0 }
 0x125   : > { %v622_v43 = vlaneseq  ;;  %v620_v45 = vld [vmem:[%s436_s18] sm:$0x3] }
 0x126   : > { %v634_v46 = vld [vmem:[%s441_s21] sm:$0x3] }
 0x127   : > { %v623_v44 = vshrl.u32 %v622_v43, 7  ;;  %v648_v51 = vld [vmem:[%s1128_s17] sm:$0xff] }
 0x128   : > { %v618_v49 = vld [vmem:[#allocation2] sm:$0xff]  ;;  %v649_v58 = vunpack.c.l.bf16 %v648_v51  ;;  %v650_v59 = vunpack.c.h.bf16 %v648_v51 }
 0x129   : > { %v624_v47 = vsub.s32 0, %v623_v44  ;;  %v628_v48 = vsub.s32 1, %v623_v44 }
 0x12a   : > { %v619_v50 = vld [vmem:[#allocation2 + $0x8] sm:$0xff] }
 0x12b   : > { %v625_v52 = vrot.slane %v620_v45, %v624_v47  ;;  %v629_v53 = vrot.slane %v620_v45, %v628_v48  ;;  %v639_v54 = vrot.slane %v634_v46, %v624_v47  ;;  %v643_v55 = vrot.slane %v634_v46, %v628_v48 }
 0x12d   : > { %v632_v56 = vmul.f32 %v625_v52, %v618_v49  ;;  %v633_v57 = vmul.f32 %v629_v53, %v619_v50 }
 0x12f   : > { %v646_v60 = vadd.f32 %v639_v54, %v632_v56  ;;  %v647_v61 = vadd.f32 %v643_v55, %v633_v57 }
 0x131   : > { %v651_v62 = vadd.f32 %v649_v58, %v646_v60  ;;  %v652_v63 = vadd.f32 %v650_v59, %v647_v61 }
 0x133   : > { %v653_v0 = vmax.f32 %v651_v62, 0.0  ;;  %v654_v1 = vmax.f32 %v652_v63, 0.0 }
 0x135   : > { %v854_v2 = vpack.c.bf16 %v654_v1, %v653_v0 }
 0x137   : > { %663 = vst [vmem:[%s1133_s7] sm:$0xff] %v854_v2 }
 0x138 PF: > { %s15_s24 = sadd.s32 1, %s991_s24   ;;  %s1197_s18 = smov %s971_s19 }
 0x139   : > { %p12_p0 = scmp.ge.s32.totalorder %s15_s24, 10   ;;  %s1198_s19 = smov %s1076_s6 }
 0x13a   : > { %s1199_s20 = smov %s983_s22  ;;  %s1200_s21 = smov %s987_s23 }
 0x13b   : > { %s1201_s22 = smov %s1204_s25  ;;  %s1202_s23 = smov %s1208_s26 }
 0x13c   :  { %14 = sbr.rel (!%p12_p0) target bundleno = 6 (0x6), region = 133 }

// kernel: resnet50_forward.81
= control target key start
LH: loop header
LB: loop body
LE: loop exit
PB: predicated region body
PF: predicated region fallthrough
CT: control target
= control target key end

     0   :  { %s930_s15 = smov 0   ;;  %s932_s16 = smov 0   ;;  %s1088_s0 = inlined_call_operand.vmem [shape: bf16[8,512], index: 0, kind: input, shape index: {}]   ;;  %s1089_s1 = inlined_call_operand.vmem [shape: bf16[512,1024], index: 1, kind: input, shape index: {}]   ;;  %s1090_s2 = inlined_call_operand.vmem [shape: f32[1,1024], index: 2, kind: input, shape index: {}]   ;;  %s1091_s3 = inlined_call_operand.vmem [shape: f32[1,1024], index: 3, kind: input, shape index: {}]   ;;  %s1092_s4 = inlined_call_operand.vmem [shape: bf16[8,1024], index: 4, kind: output, shape index: {}]  }
   0x1   :  { %s934_s17 = smov 0   ;;  %s936_s18 = smov 0  }
   0x2   :  { %s938_s19 = smov 0   ;;  %s940_s20 = smov 0  }
   0x3   :  { %s942_s21 = smov 0  }
   0x4 LB: > { %s26_s22 = sadd.s32 1, %s893_s19  ;;  %s29_s23 = sadd.s32 1, %s897_s20  ;;  %s901_s21 = sphi %s942_s21, %s14_s21   ;;  %s897_s20 = sphi %s940_s20, %s1098_s20   ;;  %s893_s19 = sphi %s938_s19, %s1097_s19   ;;  %s889_s18 = sphi %s936_s18, %s1096_s18   ;;  %s885_s17 = sphi %s934_s17, %s1095_s17   ;;  %s881_s16 = sphi %s932_s16, %s1094_s16   ;;  %s877_s15 = sphi %s930_s15, %s1093_s15  }
   0x5   : > { %p27_p0 = scmp.ge.s32.totalorder %s26_s22, 4  ;;  %p77_p1 = scmp.ne.s32.totalorder %s881_s16, %s877_s15 }
   0x6   : > { %p78_p2 = scmp.eq.s32.totalorder %s901_s21, 0  ;;  %s70_s27 = sadd.s32 1, %s881_s16 }
   0x7   : > { %s1100_s22 = smov (%p27_p0, %s26_s22), 0  ;;  %s1102_s23 = smov (!%p27_p0, %s29_s23), %s897_s20 }
   0x8   : > { %p79_p3 = por %p78_p2, %p77_p1  ;;  %p31_p4 = scmp.ge.s32.totalorder %s1102_s23, 4 }
   0x9   : > { %s65_s24 = ssub.s32 %s893_s19, %s1100_s22  ;;  %p729_p6 = scmp.ge.s32.totalorder %s901_s21, 16 }
   0xa   : > { %s1104_s23 = smov (%p31_p4, %s1102_s23), 0 }
   0xb   : > { %s66_s25 = ssub.s32 %s897_s20, %s1104_s23  ;;  %183 = sbr.rel (%p729_p6) target bundleno = 39 (0x27), region = 16 }
   0xc   : > { %s67_s26 = sor.u32 %s66_s25, %s65_s24 }
   0xd   : > { %p68_p5 = scmp.eq.s32.totalorder %s67_s26, 0 }
   0xf   : > { %s981_s28 = scalar_select %p68_p5, %s881_s16, %s70_s27  }
  0x10   : > { %197 = sbr.rel (!%p79_p3) target bundleno = 39 (0x27), region = 24  ;;  %s199_s29 = sand.u32 (%p79_p3), 1, %s881_s16  }
  0x11   : > { %s732_s30 = sshll.u32 (%p79_p3), %s897_s20, 1  ;;  %s730_s5 = sshll.u32 (%p79_p3), %s199_s29, 7 }
  0x12   : > { %s763_s6 = sshll.u32 (%p79_p3), %s893_s19, 7  ;;  %s201_s12 = scalar_lea.vmem (%p79_p3), [#allocation3], %s730_s5 }
  0x13   : > { %s205_s7 = sadd.s32 (%p79_p3), %s763_s6, %s732_s30 }
  0x14   : > { %s734_s8 = sshll.u32 (%p79_p3), %s205_s7, 2 }
  0x15   : > { %s990_s11 = scalar_lea.vmem %s1089_s1, %s734_s8 }
  0x16   : > { %v266_v0 = vld [vmem:[%s990_s11] sm:$0xff] }
  0x17   : > { %v268_v1 = vld [vmem:[%s990_s11 + $0x20] sm:$0xff]  ;;  %267 = vst [vmem:[%s201_s12] sm:$0xff] %v266_v0 }
  0x18   : > { %v270_v2 = vld [vmem:[%s990_s11 + $0x40] sm:$0xff]  ;;  %269 = vst [vmem:[%s201_s12 + $0x8] sm:$0xff] %v268_v1 }
  0x19   : > { %271 = vst [vmem:[%s201_s12 + $0x10] sm:$0xff] %v270_v2  ;;  %v272_v3 = vld [vmem:[%s990_s11 + $0x60] sm:$0xff] }
  0x1a   : > { %v274_v4 = vld [vmem:[%s990_s11 + $0x80] sm:$0xff]  ;;  %273 = vst [vmem:[%s201_s12 + $0x18] sm:$0xff] %v272_v3 }
  0x1b   : > { %v276_v5 = vld [vmem:[%s990_s11 + $0xa0] sm:$0xff]  ;;  %275 = vst [vmem:[%s201_s12 + $0x20] sm:$0xff] %v274_v4 }
  0x1c   : > { %277 = vst [vmem:[%s201_s12 + $0x28] sm:$0xff] %v276_v5  ;;  %v278_v6 = vld [vmem:[%s990_s11 + $0xc0] sm:$0xff] }
  0x1d   : > { %v280_v7 = vld [vmem:[%s990_s11 + $0xe0] sm:$0xff]  ;;  %279 = vst [vmem:[%s201_s12 + $0x30] sm:$0xff] %v278_v6 }
  0x1e   : > { %v282_v8 = vld [vmem:[%s990_s11 + $0x100] sm:$0xff]  ;;  %281 = vst [vmem:[%s201_s12 + $0x38] sm:$0xff] %v280_v7 }
  0x1f   : > { %283 = vst [vmem:[%s201_s12 + $0x40] sm:$0xff] %v282_v8  ;;  %v284_v9 = vld [vmem:[%s990_s11 + $0x120] sm:$0xff] }
  0x20   : > { %v286_v10 = vld [vmem:[%s990_s11 + $0x140] sm:$0xff]  ;;  %285 = vst [vmem:[%s201_s12 + $0x48] sm:$0xff] %v284_v9 }
  0x21   : > { %v288_v11 = vld [vmem:[%s990_s11 + $0x160] sm:$0xff]  ;;  %287 = vst [vmem:[%s201_s12 + $0x50] sm:$0xff] %v286_v10 }
  0x22   : > { %289 = vst [vmem:[%s201_s12 + $0x58] sm:$0xff] %v288_v11  ;;  %v290_v12 = vld [vmem:[%s990_s11 + $0x180] sm:$0xff] }
  0x23   : > { %v292_v13 = vld [vmem:[%s990_s11 + $0x1a0] sm:$0xff]  ;;  %291 = vst [vmem:[%s201_s12 + $0x60] sm:$0xff] %v290_v12 }
  0x24   : > { %v294_v14 = vld [vmem:[%s990_s11 + $0x1c0] sm:$0xff]  ;;  %293 = vst [vmem:[%s201_s12 + $0x68] sm:$0xff] %v292_v13 }
  0x25   : > { %295 = vst [vmem:[%s201_s12 + $0x70] sm:$0xff] %v294_v14  ;;  %v296_v15 = vld [vmem:[%s990_s11 + $0x1e0] sm:$0xff] }
  0x26   : > { %297 = vst [vmem:[%s201_s12 + $0x78] sm:$0xff] %v296_v15 }
  0x27 PF: > { %p735_p7 = scmp.ge.s32.totalorder %s901_s21, 1  ;;  %p318_p8 = scmp.lt.s32.totalorder %s901_s21, 17 }
  0x29   : > { %p319_p9 = pnand %p735_p7, %p318_p8 }
  0x2a   : > { %s325_s13 = sand.u32 (!%p319_p9), 1, %s877_s15   ;;  %p372_p10 = scmp.lt.s32.totalorder (!%p319_p9), %s885_s17, 3 }
  0x2b   : > { %322 = sbr.rel (%p319_p9) target bundleno = 303 (0x12f), region = 70  ;;  %s736_s14 = sshll.u32 (!%p319_p9), %s325_s13, 7 }
  0x2c   : > { %s738_s24 = sshll.u32 (!%p319_p9), %s889_s18, 1  ;;  %s1035_s13 = scalar_lea.vmem (!%p319_p9), [#allocation3], %s736_s14 }
  0x2d   : > { %p381_p11 = scmp.lt.s32.totalorder (!%p319_p9), %s738_s24, 7  ;;  %p742_p12 = scmp.ne.s32.totalorder (!%p319_p9), %s885_s17, 0 }
  0x30   : > { %s373_s25 = scalar_select %p372_p10, %s885_s17, 3 }
  0x31   : > { %s1106_s24 = smov (!%p381_p11, %s738_s24), 7  ;;  %404 = sbr.rel (%p742_p12) target bundleno = 56 (0x38), region = 78 }
  0x32   : > { %s737_s26 = sshll.u32 %s373_s25, 2  ;;  %s383_s15 = scalar_lea.vmem %s1090_s2, %s1106_s24 }
  0x33   : > { %s1019_s30 = scalar_lea.vmem %s1088_s0, %s737_s26  ;;  %s388_s18 = scalar_lea.vmem %s1091_s3, %s1106_s24 }
  0x34   : > { %s741_s9 = sshll.u32 %s1106_s24, 2 }
  0x35   : > { %s1033_s12 = scalar_lea.vmem %s1092_s4, %s741_s9 }
  0x36   : > { %v903_v16 = vmov 0.0  }
  0x37   : > { %405 = vst [vmem:[#allocation2] sm:$0xff] %v903_v16  ;;  %406 = vst [vmem:[#allocation2 + $0x8] sm:$0xff] %v903_v16 }
  0x38 PF: > { %v823_v17 = vld [vmem:[%s1035_s13 + $0x74] ss:$8 sps:$4 sm:$0xff]   ;;  %v825_v18 = vld [vmem:[%s1035_s13 + $0x70] ss:$8 sps:$4 sm:$0xff]   ;;  %v904_v19 = vmov 0   ;;  %p759_p13 = scmp.ne.s32.totalorder %s885_s17, 3 }
  0x39   : > { %538 = vmatprep.mubr.bf16.mxu0 %v904_v19  ;;  %506 = vmatprep.subr.bf16.mxu0 %v823_v17  ;;  %v826_v20 = vld [vmem:[%s1035_s13 + $0x64] ss:$8 sps:$4 sm:$0xff]   ;;  %v828_v21 = vld [vmem:[%s1035_s13 + $0x60] ss:$8 sps:$4 sm:$0xff]   ;;  %v829_v22 = vld [vmem:[%s1035_s13 + $0x54] ss:$8 sps:$4 sm:$0xff]  }
  0x3a   : > { %507 = vmatpush1.bf16.msra.mxu0 %v825_v18  ;;  %v831_v23 = vld [vmem:[%s1035_s13 + $0x50] ss:$8 sps:$4 sm:$0xff]   ;;  %v832_v24 = vld [vmem:[%s1035_s13 + $0x44] ss:$8 sps:$4 sm:$0xff]   ;;  %v834_v25 = vld [vmem:[%s1035_s13 + $0x40] ss:$8 sps:$4 sm:$0xff]  }
  0x3b   : > { %508 = vmatprep.subr.bf16.mxu0 %v826_v20  ;;  %v835_v26 = vld [vmem:[%s1035_s13 + $0x34] ss:$8 sps:$4 sm:$0xff]   ;;  %v837_v27 = vld [vmem:[%s1035_s13 + $0x30] ss:$8 sps:$4 sm:$0xff]   ;;  %v838_v28 = vld [vmem:[%s1035_s13 + $0x24] ss:$8 sps:$4 sm:$0xff]  }
  0x3c   : > { %v840_v29 = vld [vmem:[%s1035_s13 + $0x20] ss:$8 sps:$4 sm:$0xff]   ;;  %v841_v30 = vld [vmem:[%s1035_s13 + $0x14] ss:$8 sps:$4 sm:$0xff]   ;;  %v843_v31 = vld [vmem:[%s1035_s13 + $0x10] ss:$8 sps:$4 sm:$0xff]  }
  0x3d   : > { %v844_v32 = vld [vmem:[%s1035_s13 + $0x4] ss:$8 sps:$4 sm:$0xff]   ;;  %v846_v33 = vld [vmem:[%s1035_s13] ss:$8 sps:$4 sm:$0xff]  }
  0x3e   : > { %509 = vmatpush1.bf16.msra.mxu0 %v828_v21  ;;  %v409_v34 = vld [vmem:[%s1019_s30] sm:$0xf]  ;;  %v407_v35 = vld [vmem:[#allocation2] sm:$0xff]  ;;  %v408_v37 = vld [vmem:[#allocation2 + $0x8] sm:$0xff] }
  0x3f   : > { %510 = vmatprep.subr.bf16.mxu0 %v829_v22 }
  0x42   : > { %511 = vmatpush1.bf16.msra.mxu0 %v831_v23 }
  0x43   : > { %512 = vmatprep.subr.bf16.mxu0 %v832_v24 }
  0x46   : > { %513 = vmatpush1.bf16.msra.mxu0 %v834_v25 }
  0x47   : > { %514 = vmatprep.subr.bf16.mxu0 %v835_v26 }
  0x4a   : > { %515 = vmatpush1.bf16.msra.mxu0 %v837_v27 }
  0x4b   : > { %516 = vmatprep.subr.bf16.mxu0 %v838_v28 }
  0x4e   : > { %517 = vmatpush1.bf16.msra.mxu0 %v840_v29 }
  0x4f   : > { %518 = vmatprep.subr.bf16.mxu0 %v841_v30 }
  0x52   : > { %519 = vmatpush1.bf16.msra.mxu0 %v843_v31 }
  0x53   : > { %520 = vmatprep.subr.bf16.mxu0 %v844_v32 }
  0x56   : > { %521 = vmatpush1.bf16.msra.mxu0 %v846_v33 }
  0x59   : > { %539 = vmatmul.mubr.bf16.vlgmr.msra.gmra.mxu0 %v409_v34 }
 0x119   : > { %v540_v36 = vpop.f32.mrf.mxu0 }
 0x11a   : > { %v547_v38 = vadd.f32 %v540_v36, %v407_v35 }
 0x11b   : > { %v542_v39 = vpop.f32.mrf.mxu0  ;;  %554 = sbr.rel (%p759_p13) target bundleno = 303 (0x12f), region = 82 }
 0x11c   : > { %549 = vst [vmem:[#allocation2] sm:$0xff] %v547_v38  ;;  %v548_v40 = vadd.f32 %v542_v39, %v408_v37 }
 0x11d   : > { %v544_v41 = vpop.f32.mrf.mxu0 }
 0x11e   : > { %550 = vst [vmem:[#allocation2 + $0x8] sm:$0xff] %v548_v40 }
 0x11f   : > { %v545_v42 = vpop.f32.mrf.mxu0 }
 0x120   : > { %v559_v43 = vlaneseq  ;;  %v557_v45 = vld [vmem:[%s383_s15] sm:$0x3] }
 0x121   : > { %v571_v46 = vld [vmem:[%s388_s18] sm:$0x3] }
 0x122   : > { %v560_v44 = vshrl.u32 %v559_v43, 7 }
 0x123   : > { %v555_v49 = vld [vmem:[#allocation2] sm:$0xff] }
 0x124   : > { %v561_v47 = vsub.s32 0, %v560_v44  ;;  %v565_v48 = vsub.s32 1, %v560_v44 }
 0x125   : > { %v556_v50 = vld [vmem:[#allocation2 + $0x8] sm:$0xff] }
 0x126   : > { %v562_v51 = vrot.slane %v557_v45, %v561_v47  ;;  %v566_v52 = vrot.slane %v557_v45, %v565_v48  ;;  %v576_v53 = vrot.slane %v571_v46, %v561_v47  ;;  %v580_v54 = vrot.slane %v571_v46, %v565_v48 }
 0x128   : > { %v569_v55 = vmul.f32 %v562_v51, %v555_v49  ;;  %v570_v56 = vmul.f32 %v566_v52, %v556_v50 }
 0x12a   : > { %v583_v57 = vadd.f32 %v576_v53, %v569_v55  ;;  %v584_v58 = vadd.f32 %v580_v54, %v570_v56 }
 0x12c   : > { %v764_v59 = vpack.c.bf16 %v584_v58, %v583_v57 }
 0x12e   : > { %593 = vst [vmem:[%s1033_s12] sm:$0xff] %v764_v59 }
 0x12f PF: > { %s14_s21 = sadd.s32 1, %s901_s21   ;;  %s1093_s15 = smov %s881_s16 }
 0x130   : > { %p11_p0 = scmp.ge.s32.totalorder %s14_s21, 18   ;;  %s1094_s16 = smov %s981_s28 }
 0x131   : > { %s1095_s17 = smov %s893_s19  ;;  %s1096_s18 = smov %s897_s20 }
 0x132   : > { %s1097_s19 = smov %s1100_s22  ;;  %s1098_s20 = smov %s1104_s23 }
 0x133   :  { %13 = sbr.rel (!%p11_p0) target bundleno = 4 (0x4), region = 126 }

// kernel: resnet50_forward.101
= control target key start
LH: loop header
LB: loop body
LE: loop exit
PB: predicated region body
PF: predicated region fallthrough
CT: control target
= control target key end

     0   :  { %s932_s15 = smov 0   ;;  %s934_s16 = smov 0   ;;  %s1090_s0 = inlined_call_operand.vmem [shape: bf16[8,1024], index: 0, kind: input, shape index: {}]   ;;  %s1091_s1 = inlined_call_operand.vmem [shape: bf16[1024,512], index: 1, kind: input, shape index: {}]   ;;  %s1092_s2 = inlined_call_operand.vmem [shape: f32[1,512], index: 2, kind: input, shape index: {}]   ;;  %s1093_s3 = inlined_call_operand.vmem [shape: f32[1,512], index: 3, kind: input, shape index: {}]   ;;  %s1094_s4 = inlined_call_operand.vmem [shape: bf16[8,512], index: 4, kind: output, shape index: {}]  }
   0x1   :  { %s936_s17 = smov 0   ;;  %s938_s18 = smov 0  }
   0x2   :  { %s940_s19 = smov 0   ;;  %s942_s20 = smov 0  }
   0x3   :  { %s944_s21 = smov 0  }
   0x4 LB: > { %s26_s22 = sadd.s32 1, %s895_s19  ;;  %s29_s23 = sadd.s32 1, %s899_s20  ;;  %s903_s21 = sphi %s944_s21, %s14_s21   ;;  %s899_s20 = sphi %s942_s20, %s1100_s20   ;;  %s895_s19 = sphi %s940_s19, %s1099_s19   ;;  %s891_s18 = sphi %s938_s18, %s1098_s18   ;;  %s887_s17 = sphi %s936_s17, %s1097_s17   ;;  %s883_s16 = sphi %s934_s16, %s1096_s16   ;;  %s879_s15 = sphi %s932_s15, %s1095_s15  }
   0x5   : > { %p27_p0 = scmp.ge.s32.totalorder %s26_s22, 8  ;;  %p77_p1 = scmp.ne.s32.totalorder %s883_s16, %s879_s15 }
   0x6   : > { %p78_p2 = scmp.eq.s32.totalorder %s903_s21, 0  ;;  %s70_s27 = sadd.s32 1, %s883_s16 }
   0x7   : > { %s1102_s22 = smov (%p27_p0, %s26_s22), 0  ;;  %s1104_s23 = smov (!%p27_p0, %s29_s23), %s899_s20 }
   0x8   : > { %p79_p3 = por %p78_p2, %p77_p1  ;;  %p31_p4 = scmp.ge.s32.totalorder %s1104_s23, 2 }
   0x9   : > { %s65_s24 = ssub.s32 %s895_s19, %s1102_s22  ;;  %p731_p6 = scmp.ge.s32.totalorder %s903_s21, 16 }
   0xa   : > { %s1106_s23 = smov (%p31_p4, %s1104_s23), 0 }
   0xb   : > { %s66_s25 = ssub.s32 %s899_s20, %s1106_s23  ;;  %183 = sbr.rel (%p731_p6) target bundleno = 31 (0x1f), region = 16 }
   0xc   : > { %s67_s26 = sor.u32 %s66_s25, %s65_s24 }
   0xd   : > { %p68_p5 = scmp.eq.s32.totalorder %s67_s26, 0 }
   0xf   : > { %s983_s28 = scalar_select %p68_p5, %s883_s16, %s70_s27  }
  0x10   : > { %197 = sbr.rel (!%p79_p3) target bundleno = 31 (0x1f), region = 24  ;;  %s199_s29 = sand.u32 (%p79_p3), 1, %s883_s16  }
  0x11   : > { %s734_s30 = sshll.u32 (%p79_p3), %s899_s20, 1  ;;  %s732_s5 = sshll.u32 (%p79_p3), %s199_s29, 7 }
  0x12   : > { %s765_s6 = sshll.u32 (%p79_p3), %s895_s19, 6  ;;  %s201_s12 = scalar_lea.vmem (%p79_p3), [#allocation3], %s732_s5 }
  0x13   : > { %s205_s7 = sadd.s32 (%p79_p3), %s765_s6, %s734_s30 }
  0x14   : > { %s736_s8 = sshll.u32 (%p79_p3), %s205_s7, 2 }
  0x15   : > { %s992_s11 = scalar_lea.vmem %s1091_s1, %s736_s8 }
  0x16   : > { %v266_v0 = vld [vmem:[%s992_s11] sm:$0xff]  ;;  %v268_v1 = vld [vmem:[%s992_s11 + $0x10] sm:$0xff] }
  0x17   : > { %v270_v2 = vld [vmem:[%s992_s11 + $0x20] sm:$0xff]  ;;  %267 = vst [vmem:[%s201_s12] sm:$0xff] %v266_v0  ;;  %269 = vst [vmem:[%s201_s12 + $0x8] sm:$0xff] %v268_v1  ;;  %v272_v3 = vld [vmem:[%s992_s11 + $0x30] sm:$0xff] }
  0x18   : > { %271 = vst [vmem:[%s201_s12 + $0x10] sm:$0xff] %v270_v2  ;;  %v274_v4 = vld [vmem:[%s992_s11 + $0x40] sm:$0xff]  ;;  %v276_v5 = vld [vmem:[%s992_s11 + $0x50] sm:$0xff]  ;;  %273 = vst [vmem:[%s201_s12 + $0x18] sm:$0xff] %v272_v3 }
  0x19   : > { %275 = vst [vmem:[%s201_s12 + $0x20] sm:$0xff] %v274_v4  ;;  %277 = vst [vmem:[%s201_s12 + $0x28] sm:$0xff] %v276_v5  ;;  %v278_v6 = vld [vmem:[%s992_s11 + $0x60] sm:$0xff]  ;;  %v280_v7 = vld [vmem:[%s992_s11 + $0x70] sm:$0xff] }
  0x1a   : > { %v282_v8 = vld [vmem:[%s992_s11 + $0x80] sm:$0xff]  ;;  %279 = vst [vmem:[%s201_s12 + $0x30] sm:$0xff] %v278_v6  ;;  %281 = vst [vmem:[%s201_s12 + $0x38] sm:$0xff] %v280_v7  ;;  %v284_v9 = vld [vmem:[%s992_s11 + $0x90] sm:$0xff] }
  0x1b   : > { %283 = vst [vmem:[%s201_s12 + $0x40] sm:$0xff] %v282_v8  ;;  %v286_v10 = vld [vmem:[%s992_s11 + $0xa0] sm:$0xff]  ;;  %v288_v11 = vld [vmem:[%s992_s11 + $0xb0] sm:$0xff]  ;;  %285 = vst [vmem:[%s201_s12 + $0x48] sm:$0xff] %v284_v9 }
  0x1c   : > { %287 = vst [vmem:[%s201_s12 + $0x50] sm:$0xff] %v286_v10  ;;  %289 = vst [vmem:[%s201_s12 + $0x58] sm:$0xff] %v288_v11  ;;  %v290_v12 = vld [vmem:[%s992_s11 + $0xc0] sm:$0xff]  ;;  %v292_v13 = vld [vmem:[%s992_s11 + $0xd0] sm:$0xff] }
  0x1d   : > { %v294_v14 = vld [vmem:[%s992_s11 + $0xe0] sm:$0xff]  ;;  %291 = vst [vmem:[%s201_s12 + $0x60] sm:$0xff] %v290_v12  ;;  %293 = vst [vmem:[%s201_s12 + $0x68] sm:$0xff] %v292_v13  ;;  %v296_v15 = vld [vmem:[%s992_s11 + $0xf0] sm:$0xff] }
  0x1e   : > { %295 = vst [vmem:[%s201_s12 + $0x70] sm:$0xff] %v294_v14  ;;  %297 = vst [vmem:[%s201_s12 + $0x78] sm:$0xff] %v296_v15 }
  0x1f PF: > { %p737_p7 = scmp.ge.s32.totalorder %s903_s21, 1  ;;  %p318_p8 = scmp.lt.s32.totalorder %s903_s21, 17 }
  0x21   : > { %p319_p9 = pnand %p737_p7, %p318_p8 }
  0x22   : > { %s325_s13 = sand.u32 (!%p319_p9), 1, %s879_s15   ;;  %p372_p10 = scmp.lt.s32.totalorder (!%p319_p9), %s887_s17, 7 }
  0x23   : > { %322 = sbr.rel (%p319_p9) target bundleno = 297 (0x129), region = 70  ;;  %s738_s14 = sshll.u32 (!%p319_p9), %s325_s13, 7 }
  0x24   : > { %s740_s24 = sshll.u32 (!%p319_p9), %s891_s18, 1  ;;  %s1037_s13 = scalar_lea.vmem (!%p319_p9), [#allocation3], %s738_s14 }
  0x25   : > { %p381_p11 = scmp.lt.s32.totalorder (!%p319_p9), %s740_s24, 3  ;;  %p744_p12 = scmp.ne.s32.totalorder (!%p319_p9), %s887_s17, 0 }
  0x28   : > { %s373_s25 = scalar_select %p372_p10, %s887_s17, 7 }
  0x29   : > { %s1108_s24 = smov (!%p381_p11, %s740_s24), 3  ;;  %404 = sbr.rel (%p744_p12) target bundleno = 48 (0x30), region = 78 }
  0x2a   : > { %s739_s26 = sshll.u32 %s373_s25, 2  ;;  %s383_s15 = scalar_lea.vmem %s1092_s2, %s1108_s24 }
  0x2b   : > { %s1021_s30 = scalar_lea.vmem %s1090_s0, %s739_s26  ;;  %s388_s18 = scalar_lea.vmem %s1093_s3, %s1108_s24 }
  0x2c   : > { %s743_s9 = sshll.u32 %s1108_s24, 2 }
  0x2d   : > { %s1035_s12 = scalar_lea.vmem %s1094_s4, %s743_s9 }
  0x2e   : > { %v905_v16 = vmov 0.0  }
  0x2f   : > { %405 = vst [vmem:[#allocation2] sm:$0xff] %v905_v16  ;;  %406 = vst [vmem:[#allocation2 + $0x8] sm:$0xff] %v905_v16 }
  0x30 PF: > { %v825_v17 = vld [vmem:[%s1037_s13 + $0x74] ss:$8 sps:$4 sm:$0xff]   ;;  %v827_v18 = vld [vmem:[%s1037_s13 + $0x70] ss:$8 sps:$4 sm:$0xff]   ;;  %v906_v19 = vmov 0   ;;  %p761_p13 = scmp.ne.s32.totalorder %s887_s17, 7 }
  0x31   : > { %538 = vmatprep.mubr.bf16.mxu0 %v906_v19  ;;  %506 = vmatprep.subr.bf16.mxu0 %v825_v17  ;;  %v828_v20 = vld [vmem:[%s1037_s13 + $0x64] ss:$8 sps:$4 sm:$0xff]   ;;  %v830_v21 = vld [vmem:[%s1037_s13 + $0x60] ss:$8 sps:$4 sm:$0xff]   ;;  %v831_v22 = vld [vmem:[%s1037_s13 + $0x54] ss:$8 sps:$4 sm:$0xff]  }
  0x32   : > { %507 = vmatpush1.bf16.msra.mxu0 %v827_v18  ;;  %v833_v23 = vld [vmem:[%s1037_s13 + $0x50] ss:$8 sps:$4 sm:$0xff]   ;;  %v834_v24 = vld [vmem:[%s1037_s13 + $0x44] ss:$8 sps:$4 sm:$0xff]   ;;  %v836_v25 = vld [vmem:[%s1037_s13 + $0x40] ss:$8 sps:$4 sm:$0xff]  }
  0x33   : > { %508 = vmatprep.subr.bf16.mxu0 %v828_v20  ;;  %v837_v26 = vld [vmem:[%s1037_s13 + $0x34] ss:$8 sps:$4 sm:$0xff]   ;;  %v839_v27 = vld [vmem:[%s1037_s13 + $0x30] ss:$8 sps:$4 sm:$0xff]   ;;  %v840_v28 = vld [vmem:[%s1037_s13 + $0x24] ss:$8 sps:$4 sm:$0xff]  }
  0x34   : > { %v842_v29 = vld [vmem:[%s1037_s13 + $0x20] ss:$8 sps:$4 sm:$0xff]   ;;  %v843_v30 = vld [vmem:[%s1037_s13 + $0x14] ss:$8 sps:$4 sm:$0xff]   ;;  %v845_v31 = vld [vmem:[%s1037_s13 + $0x10] ss:$8 sps:$4 sm:$0xff]  }
  0x35   : > { %v846_v32 = vld [vmem:[%s1037_s13 + $0x4] ss:$8 sps:$4 sm:$0xff]   ;;  %v848_v33 = vld [vmem:[%s1037_s13] ss:$8 sps:$4 sm:$0xff]  }
  0x36   : > { %509 = vmatpush1.bf16.msra.mxu0 %v830_v21  ;;  %v409_v34 = vld [vmem:[%s1021_s30] sm:$0xf]  ;;  %v407_v35 = vld [vmem:[#allocation2] sm:$0xff]  ;;  %v408_v37 = vld [vmem:[#allocation2 + $0x8] sm:$0xff] }
  0x37   : > { %510 = vmatprep.subr.bf16.mxu0 %v831_v22 }
  0x3a   : > { %511 = vmatpush1.bf16.msra.mxu0 %v833_v23 }
  0x3b   : > { %512 = vmatprep.subr.bf16.mxu0 %v834_v24 }
  0x3e   : > { %513 = vmatpush1.bf16.msra.mxu0 %v836_v25 }
  0x3f   : > { %514 = vmatprep.subr.bf16.mxu0 %v837_v26 }
  0x42   : > { %515 = vmatpush1.bf16.msra.mxu0 %v839_v27 }
  0x43   : > { %516 = vmatprep.subr.bf16.mxu0 %v840_v28 }
  0x46   : > { %517 = vmatpush1.bf16.msra.mxu0 %v842_v29 }
  0x47   : > { %518 = vmatprep.subr.bf16.mxu0 %v843_v30 }
  0x4a   : > { %519 = vmatpush1.bf16.msra.mxu0 %v845_v31 }
  0x4b   : > { %520 = vmatprep.subr.bf16.mxu0 %v846_v32 }
  0x4e   : > { %521 = vmatpush1.bf16.msra.mxu0 %v848_v33 }
  0x51   : > { %539 = vmatmul.mubr.bf16.vlgmr.msra.gmra.mxu0 %v409_v34 }
 0x111   : > { %v540_v36 = vpop.f32.mrf.mxu0 }
 0x112   : > { %v547_v38 = vadd.f32 %v540_v36, %v407_v35 }
 0x113   : > { %v542_v39 = vpop.f32.mrf.mxu0  ;;  %554 = sbr.rel (%p761_p13) target bundleno = 297 (0x129), region = 82 }
 0x114   : > { %549 = vst [vmem:[#allocation2] sm:$0xff] %v547_v38  ;;  %v548_v40 = vadd.f32 %v542_v39, %v408_v37 }
 0x115   : > { %v544_v41 = vpop.f32.mrf.mxu0 }
 0x116   : > { %550 = vst [vmem:[#allocation2 + $0x8] sm:$0xff] %v548_v40 }
 0x117   : > { %v545_v42 = vpop.f32.mrf.mxu0 }
 0x118   : > { %v559_v43 = vlaneseq  ;;  %v557_v45 = vld [vmem:[%s383_s15] sm:$0x3] }
 0x119   : > { %v571_v46 = vld [vmem:[%s388_s18] sm:$0x3] }
 0x11a   : > { %v560_v44 = vshrl.u32 %v559_v43, 7 }
 0x11b   : > { %v555_v49 = vld [vmem:[#allocation2] sm:$0xff] }
 0x11c   : > { %v561_v47 = vsub.s32 0, %v560_v44  ;;  %v565_v48 = vsub.s32 1, %v560_v44 }
 0x11d   : > { %v556_v50 = vld [vmem:[#allocation2 + $0x8] sm:$0xff] }
 0x11e   : > { %v562_v51 = vrot.slane %v557_v45, %v561_v47  ;;  %v566_v52 = vrot.slane %v557_v45, %v565_v48  ;;  %v576_v53 = vrot.slane %v571_v46, %v561_v47  ;;  %v580_v54 = vrot.slane %v571_v46, %v565_v48 }
 0x120   : > { %v569_v55 = vmul.f32 %v562_v51, %v555_v49  ;;  %v570_v56 = vmul.f32 %v566_v52, %v556_v50 }
 0x122   : > { %v583_v57 = vadd.f32 %v576_v53, %v569_v55  ;;  %v584_v58 = vadd.f32 %v580_v54, %v570_v56 }
 0x124   : > { %v585_v59 = vmax.f32 %v583_v57, 0.0  ;;  %v586_v60 = vmax.f32 %v584_v58, 0.0 }
 0x126   : > { %v766_v61 = vpack.c.bf16 %v586_v60, %v585_v59 }
 0x128   : > { %595 = vst [vmem:[%s1035_s12] sm:$0xff] %v766_v61 }
 0x129 PF: > { %s14_s21 = sadd.s32 1, %s903_s21   ;;  %s1095_s15 = smov %s883_s16 }
 0x12a   : > { %p11_p0 = scmp.ge.s32.totalorder %s14_s21, 18   ;;  %s1096_s16 = smov %s983_s28 }
 0x12b   : > { %s1097_s17 = smov %s895_s19  ;;  %s1098_s18 = smov %s899_s20 }
 0x12c   : > { %s1099_s19 = smov %s1102_s22  ;;  %s1100_s20 = smov %s1106_s23 }
 0x12d   :  { %13 = sbr.rel (!%p11_p0) target bundleno = 4 (0x4), region = 126 }

// kernel: resnet50_forward.102
= control target key start
LH: loop header
LB: loop body
LE: loop exit
PB: predicated region body
PF: predicated region fallthrough
CT: control target
= control target key end

     0   :  { %s932_s15 = smov 0   ;;  %s934_s16 = smov 0   ;;  %s1090_s0 = inlined_call_operand.vmem [shape: bf16[8,4608], index: 0, kind: input, shape index: {}]   ;;  %s1091_s1 = inlined_call_operand.vmem [shape: bf16[4608,512], index: 1, kind: input, shape index: {}]   ;;  %s1092_s2 = inlined_call_operand.vmem [shape: f32[1,512], index: 2, kind: input, shape index: {}]   ;;  %s1093_s3 = inlined_call_operand.vmem [shape: f32[1,512], index: 3, kind: input, shape index: {}]   ;;  %s1094_s4 = inlined_call_operand.vmem [shape: bf16[8,512], index: 4, kind: output, shape index: {}]  }
   0x1   :  { %s936_s17 = smov 0   ;;  %s938_s18 = smov 0  }
   0x2   :  { %s940_s19 = smov 0   ;;  %s942_s20 = smov 0  }
   0x3   :  { %s944_s21 = smov 0  }
   0x4 LB: > { %s26_s22 = sadd.s32 1, %s895_s19  ;;  %s29_s23 = sadd.s32 1, %s899_s20  ;;  %s903_s21 = sphi %s944_s21, %s14_s21   ;;  %s899_s20 = sphi %s942_s20, %s1100_s20   ;;  %s895_s19 = sphi %s940_s19, %s1099_s19   ;;  %s891_s18 = sphi %s938_s18, %s1098_s18   ;;  %s887_s17 = sphi %s936_s17, %s1097_s17   ;;  %s883_s16 = sphi %s934_s16, %s1096_s16   ;;  %s879_s15 = sphi %s932_s15, %s1095_s15  }
   0x5   : > { %p27_p0 = scmp.ge.s32.totalorder %s26_s22, 36  ;;  %p77_p1 = scmp.ne.s32.totalorder %s883_s16, %s879_s15 }
   0x6   : > { %p78_p2 = scmp.eq.s32.totalorder %s903_s21, 0  ;;  %s70_s27 = sadd.s32 1, %s883_s16 }
   0x7   : > { %s1102_s22 = smov (%p27_p0, %s26_s22), 0  ;;  %s1104_s23 = smov (!%p27_p0, %s29_s23), %s899_s20 }
   0x8   : > { %p79_p3 = por %p78_p2, %p77_p1  ;;  %p31_p4 = scmp.ge.s32.totalorder %s1104_s23, 2 }
   0x9   : > { %s65_s24 = ssub.s32 %s895_s19, %s1102_s22  ;;  %p731_p6 = scmp.ge.s32.totalorder %s903_s21, 72 }
   0xa   : > { %s1106_s23 = smov (%p31_p4, %s1104_s23), 0 }
   0xb   : > { %s66_s25 = ssub.s32 %s899_s20, %s1106_s23  ;;  %183 = sbr.rel (%p731_p6) target bundleno = 31 (0x1f), region = 16 }
   0xc   : > { %s67_s26 = sor.u32 %s66_s25, %s65_s24 }
   0xd   : > { %p68_p5 = scmp.eq.s32.totalorder %s67_s26, 0 }
   0xf   : > { %s983_s28 = scalar_select %p68_p5, %s883_s16, %s70_s27  }
  0x10   : > { %197 = sbr.rel (!%p79_p3) target bundleno = 31 (0x1f), region = 24  ;;  %s199_s29 = sand.u32 (%p79_p3), 1, %s883_s16  }
  0x11   : > { %s734_s30 = sshll.u32 (%p79_p3), %s899_s20, 1  ;;  %s732_s5 = sshll.u32 (%p79_p3), %s199_s29, 7 }
  0x12   : > { %s765_s6 = sshll.u32 (%p79_p3), %s895_s19, 6  ;;  %s201_s12 = scalar_lea.vmem (%p79_p3), [#allocation3], %s732_s5 }
  0x13   : > { %s205_s7 = sadd.s32 (%p79_p3), %s765_s6, %s734_s30 }
  0x14   : > { %s736_s8 = sshll.u32 (%p79_p3), %s205_s7, 2 }
  0x15   : > { %s992_s11 = scalar_lea.vmem %s1091_s1, %s736_s8 }
  0x16   : > { %v266_v0 = vld [vmem:[%s992_s11] sm:$0xff]  ;;  %v268_v1 = vld [vmem:[%s992_s11 + $0x10] sm:$0xff] }
  0x17   : > { %v270_v2 = vld [vmem:[%s992_s11 + $0x20] sm:$0xff]  ;;  %267 = vst [vmem:[%s201_s12] sm:$0xff] %v266_v0  ;;  %269 = vst [vmem:[%s201_s12 + $0x8] sm:$0xff] %v268_v1  ;;  %v272_v3 = vld [vmem:[%s992_s11 + $0x30] sm:$0xff] }
  0x18   : > { %271 = vst [vmem:[%s201_s12 + $0x10] sm:$0xff] %v270_v2  ;;  %v274_v4 = vld [vmem:[%s992_s11 + $0x40] sm:$0xff]  ;;  %v276_v5 = vld [vmem:[%s992_s11 + $0x50] sm:$0xff]  ;;  %273 = vst [vmem:[%s201_s12 + $0x18] sm:$0xff] %v272_v3 }
  0x19   : > { %275 = vst [vmem:[%s201_s12 + $0x20] sm:$0xff] %v274_v4  ;;  %277 = vst [vmem:[%s201_s12 + $0x28] sm:$0xff] %v276_v5  ;;  %v278_v6 = vld [vmem:[%s992_s11 + $0x60] sm:$0xff]  ;;  %v280_v7 = vld [vmem:[%s992_s11 + $0x70] sm:$0xff] }
  0x1a   : > { %v282_v8 = vld [vmem:[%s992_s11 + $0x80] sm:$0xff]  ;;  %279 = vst [vmem:[%s201_s12 + $0x30] sm:$0xff] %v278_v6  ;;  %281 = vst [vmem:[%s201_s12 + $0x38] sm:$0xff] %v280_v7  ;;  %v284_v9 = vld [vmem:[%s992_s11 + $0x90] sm:$0xff] }
  0x1b   : > { %283 = vst [vmem:[%s201_s12 + $0x40] sm:$0xff] %v282_v8  ;;  %v286_v10 = vld [vmem:[%s992_s11 + $0xa0] sm:$0xff]  ;;  %v288_v11 = vld [vmem:[%s992_s11 + $0xb0] sm:$0xff]  ;;  %285 = vst [vmem:[%s201_s12 + $0x48] sm:$0xff] %v284_v9 }
  0x1c   : > { %287 = vst [vmem:[%s201_s12 + $0x50] sm:$0xff] %v286_v10  ;;  %289 = vst [vmem:[%s201_s12 + $0x58] sm:$0xff] %v288_v11  ;;  %v290_v12 = vld [vmem:[%s992_s11 + $0xc0] sm:$0xff]  ;;  %v292_v13 = vld [vmem:[%s992_s11 + $0xd0] sm:$0xff] }
  0x1d   : > { %v294_v14 = vld [vmem:[%s992_s11 + $0xe0] sm:$0xff]  ;;  %291 = vst [vmem:[%s201_s12 + $0x60] sm:$0xff] %v290_v12  ;;  %293 = vst [vmem:[%s201_s12 + $0x68] sm:$0xff] %v292_v13  ;;  %v296_v15 = vld [vmem:[%s992_s11 + $0xf0] sm:$0xff] }
  0x1e   : > { %295 = vst [vmem:[%s201_s12 + $0x70] sm:$0xff] %v294_v14  ;;  %297 = vst [vmem:[%s201_s12 + $0x78] sm:$0xff] %v296_v15 }
  0x1f PF: > { %p737_p7 = scmp.ge.s32.totalorder %s903_s21, 1  ;;  %p318_p8 = scmp.lt.s32.totalorder %s903_s21, 73 }
  0x21   : > { %p319_p9 = pnand %p737_p7, %p318_p8 }
  0x22   : > { %s325_s13 = sand.u32 (!%p319_p9), 1, %s879_s15   ;;  %p372_p10 = scmp.lt.s32.totalorder (!%p319_p9), %s887_s17, 35 }
  0x23   : > { %322 = sbr.rel (%p319_p9) target bundleno = 297 (0x129), region = 70  ;;  %s738_s14 = sshll.u32 (!%p319_p9), %s325_s13, 7 }
  0x24   : > { %s740_s24 = sshll.u32 (!%p319_p9), %s891_s18, 1  ;;  %s1037_s13 = scalar_lea.vmem (!%p319_p9), [#allocation3], %s738_s14 }
  0x25   : > { %p381_p11 = scmp.lt.s32.totalorder (!%p319_p9), %s740_s24, 3  ;;  %p744_p12 = scmp.ne.s32.totalorder (!%p319_p9), %s887_s17, 0 }
  0x28   : > { %s373_s25 = scalar_select %p372_p10, %s887_s17, 35 }
  0x29   : > { %s1108_s24 = smov (!%p381_p11, %s740_s24), 3  ;;  %404 = sbr.rel (%p744_p12) target bundleno = 48 (0x30), region = 78 }
  0x2a   : > { %s739_s26 = sshll.u32 %s373_s25, 2  ;;  %s383_s15 = scalar_lea.vmem %s1092_s2, %s1108_s24 }
  0x2b   : > { %s1021_s30 = scalar_lea.vmem %s1090_s0, %s739_s26  ;;  %s388_s18 = scalar_lea.vmem %s1093_s3, %s1108_s24 }
  0x2c   : > { %s743_s9 = sshll.u32 %s1108_s24, 2 }
  0x2d   : > { %s1035_s12 = scalar_lea.vmem %s1094_s4, %s743_s9 }
  0x2e   : > { %v905_v16 = vmov 0.0  }
  0x2f   : > { %405 = vst [vmem:[#allocation2] sm:$0xff] %v905_v16  ;;  %406 = vst [vmem:[#allocation2 + $0x8] sm:$0xff] %v905_v16 }
  0x30 PF: > { %v825_v17 = vld [vmem:[%s1037_s13 + $0x74] ss:$8 sps:$4 sm:$0xff]   ;;  %v827_v18 = vld [vmem:[%s1037_s13 + $0x70] ss:$8 sps:$4 sm:$0xff]   ;;  %v906_v19 = vmov 0   ;;  %p761_p13 = scmp.ne.s32.totalorder %s887_s17, 35 }
  0x31   : > { %538 = vmatprep.mubr.bf16.mxu0 %v906_v19  ;;  %506 = vmatprep.subr.bf16.mxu0 %v825_v17  ;;  %v828_v20 = vld [vmem:[%s1037_s13 + $0x64] ss:$8 sps:$4 sm:$0xff]   ;;  %v830_v21 = vld [vmem:[%s1037_s13 + $0x60] ss:$8 sps:$4 sm:$0xff]   ;;  %v831_v22 = vld [vmem:[%s1037_s13 + $0x54] ss:$8 sps:$4 sm:$0xff]  }
  0x32   : > { %507 = vmatpush1.bf16.msra.mxu0 %v827_v18  ;;  %v833_v23 = vld [vmem:[%s1037_s13 + $0x50] ss:$8 sps:$4 sm:$0xff]   ;;  %v834_v24 = vld [vmem:[%s1037_s13 + $0x44] ss:$8 sps:$4 sm:$0xff]   ;;  %v836_v25 = vld [vmem:[%s1037_s13 + $0x40] ss:$8 sps:$4 sm:$0xff]  }
  0x33   : > { %508 = vmatprep.subr.bf16.mxu0 %v828_v20  ;;  %v837_v26 = vld [vmem:[%s1037_s13 + $0x34] ss:$8 sps:$4 sm:$0xff]   ;;  %v839_v27 = vld [vmem:[%s1037_s13 + $0x30] ss:$8 sps:$4 sm:$0xff]   ;;  %v840_v28 = vld [vmem:[%s1037_s13 + $0x24] ss:$8 sps:$4 sm:$0xff]  }
  0x34   : > { %v842_v29 = vld [vmem:[%s1037_s13 + $0x20] ss:$8 sps:$4 sm:$0xff]   ;;  %v843_v30 = vld [vmem:[%s1037_s13 + $0x14] ss:$8 sps:$4 sm:$0xff]   ;;  %v845_v31 = vld [vmem:[%s1037_s13 + $0x10] ss:$8 sps:$4 sm:$0xff]  }
  0x35   : > { %v846_v32 = vld [vmem:[%s1037_s13 + $0x4] ss:$8 sps:$4 sm:$0xff]   ;;  %v848_v33 = vld [vmem:[%s1037_s13] ss:$8 sps:$4 sm:$0xff]  }
  0x36   : > { %509 = vmatpush1.bf16.msra.mxu0 %v830_v21  ;;  %v409_v34 = vld [vmem:[%s1021_s30] sm:$0xf]  ;;  %v407_v35 = vld [vmem:[#allocation2] sm:$0xff]  ;;  %v408_v37 = vld [vmem:[#allocation2 + $0x8] sm:$0xff] }
  0x37   : > { %510 = vmatprep.subr.bf16.mxu0 %v831_v22 }
  0x3a   : > { %511 = vmatpush1.bf16.msra.mxu0 %v833_v23 }
  0x3b   : > { %512 = vmatprep.subr.bf16.mxu0 %v834_v24 }
  0x3e   : > { %513 = vmatpush1.bf16.msra.mxu0 %v836_v25 }
  0x3f   : > { %514 = vmatprep.subr.bf16.mxu0 %v837_v26 }
  0x42   : > { %515 = vmatpush1.bf16.msra.mxu0 %v839_v27 }
  0x43   : > { %516 = vmatprep.subr.bf16.mxu0 %v840_v28 }
  0x46   : > { %517 = vmatpush1.bf16.msra.mxu0 %v842_v29 }
  0x47   : > { %518 = vmatprep.subr.bf16.mxu0 %v843_v30 }
  0x4a   : > { %519 = vmatpush1.bf16.msra.mxu0 %v845_v31 }
  0x4b   : > { %520 = vmatprep.subr.bf16.mxu0 %v846_v32 }
  0x4e   : > { %521 = vmatpush1.bf16.msra.mxu0 %v848_v33 }
  0x51   : > { %539 = vmatmul.mubr.bf16.vlgmr.msra.gmra.mxu0 %v409_v34 }
 0x111   : > { %v540_v36 = vpop.f32.mrf.mxu0 }
 0x112   : > { %v547_v38 = vadd.f32 %v540_v36, %v407_v35 }
 0x113   : > { %v542_v39 = vpop.f32.mrf.mxu0  ;;  %554 = sbr.rel (%p761_p13) target bundleno = 297 (0x129), region = 82 }
 0x114   : > { %549 = vst [vmem:[#allocation2] sm:$0xff] %v547_v38  ;;  %v548_v40 = vadd.f32 %v542_v39, %v408_v37 }
 0x115   : > { %v544_v41 = vpop.f32.mrf.mxu0 }
 0x116   : > { %550 = vst [vmem:[#allocation2 + $0x8] sm:$0xff] %v548_v40 }
 0x117   : > { %v545_v42 = vpop.f32.mrf.mxu0 }
 0x118   : > { %v559_v43 = vlaneseq  ;;  %v557_v45 = vld [vmem:[%s383_s15] sm:$0x3] }
 0x119   : > { %v571_v46 = vld [vmem:[%s388_s18] sm:$0x3] }
 0x11a   : > { %v560_v44 = vshrl.u32 %v559_v43, 7 }
 0x11b   : > { %v555_v49 = vld [vmem:[#allocation2] sm:$0xff] }
 0x11c   : > { %v561_v47 = vsub.s32 0, %v560_v44  ;;  %v565_v48 = vsub.s32 1, %v560_v44 }
 0x11d   : > { %v556_v50 = vld [vmem:[#allocation2 + $0x8] sm:$0xff] }
 0x11e   : > { %v562_v51 = vrot.slane %v557_v45, %v561_v47  ;;  %v566_v52 = vrot.slane %v557_v45, %v565_v48  ;;  %v576_v53 = vrot.slane %v571_v46, %v561_v47  ;;  %v580_v54 = vrot.slane %v571_v46, %v565_v48 }
 0x120   : > { %v569_v55 = vmul.f32 %v562_v51, %v555_v49  ;;  %v570_v56 = vmul.f32 %v566_v52, %v556_v50 }
 0x122   : > { %v583_v57 = vadd.f32 %v576_v53, %v569_v55  ;;  %v584_v58 = vadd.f32 %v580_v54, %v570_v56 }
 0x124   : > { %v585_v59 = vmax.f32 %v583_v57, 0.0  ;;  %v586_v60 = vmax.f32 %v584_v58, 0.0 }
 0x126   : > { %v766_v61 = vpack.c.bf16 %v586_v60, %v585_v59 }
 0x128   : > { %595 = vst [vmem:[%s1035_s12] sm:$0xff] %v766_v61 }
 0x129 PF: > { %s14_s21 = sadd.s32 1, %s903_s21   ;;  %s1095_s15 = smov %s883_s16 }
 0x12a   : > { %p11_p0 = scmp.ge.s32.totalorder %s14_s21, 74   ;;  %s1096_s16 = smov %s983_s28 }
 0x12b   : > { %s1097_s17 = smov %s895_s19  ;;  %s1098_s18 = smov %s899_s20 }
 0x12c   : > { %s1099_s19 = smov %s1102_s22  ;;  %s1100_s20 = smov %s1106_s23 }
 0x12d   :  { %13 = sbr.rel (!%p11_p0) target bundleno = 4 (0x4), region = 126 }

// kernel: resnet50_forward.100
= control target key start
LH: loop header
LB: loop body
LE: loop exit
PB: predicated region body
PF: predicated region fallthrough
CT: control target
= control target key end

     0   :  { %s930_s15 = smov 0   ;;  %s932_s16 = smov 0   ;;  %s1088_s0 = inlined_call_operand.vmem [shape: bf16[8,1024], index: 0, kind: input, shape index: {}]   ;;  %s1089_s1 = inlined_call_operand.vmem [shape: bf16[1024,2048], index: 1, kind: input, shape index: {}]   ;;  %s1090_s2 = inlined_call_operand.vmem [shape: f32[1,2048], index: 2, kind: input, shape index: {}]   ;;  %s1091_s3 = inlined_call_operand.vmem [shape: f32[1,2048], index: 3, kind: input, shape index: {}]   ;;  %s1092_s4 = inlined_call_operand.vmem [shape: bf16[8,2048], index: 4, kind: output, shape index: {}]  }
   0x1   :  { %s934_s17 = smov 0   ;;  %s936_s18 = smov 0  }
   0x2   :  { %s938_s19 = smov 0   ;;  %s940_s20 = smov 0  }
   0x3   :  { %s942_s21 = smov 0  }
   0x4 LB: > { %s26_s22 = sadd.s32 1, %s893_s19  ;;  %s29_s23 = sadd.s32 1, %s897_s20  ;;  %s901_s21 = sphi %s942_s21, %s14_s21   ;;  %s897_s20 = sphi %s940_s20, %s1098_s20   ;;  %s893_s19 = sphi %s938_s19, %s1097_s19   ;;  %s889_s18 = sphi %s936_s18, %s1096_s18   ;;  %s885_s17 = sphi %s934_s17, %s1095_s17   ;;  %s881_s16 = sphi %s932_s16, %s1094_s16   ;;  %s877_s15 = sphi %s930_s15, %s1093_s15  }
   0x5   : > { %p27_p0 = scmp.ge.s32.totalorder %s26_s22, 8  ;;  %p77_p1 = scmp.ne.s32.totalorder %s881_s16, %s877_s15 }
   0x6   : > { %p78_p2 = scmp.eq.s32.totalorder %s901_s21, 0  ;;  %s70_s27 = sadd.s32 1, %s881_s16 }
   0x7   : > { %s1100_s22 = smov (%p27_p0, %s26_s22), 0  ;;  %s1102_s23 = smov (!%p27_p0, %s29_s23), %s897_s20 }
   0x8   : > { %p79_p3 = por %p78_p2, %p77_p1  ;;  %p31_p4 = scmp.ge.s32.totalorder %s1102_s23, 8 }
   0x9   : > { %s65_s24 = ssub.s32 %s893_s19, %s1100_s22  ;;  %p729_p6 = scmp.ge.s32.totalorder %s901_s21, 64 }
   0xa   : > { %s1104_s23 = smov (%p31_p4, %s1102_s23), 0 }
   0xb   : > { %s66_s25 = ssub.s32 %s897_s20, %s1104_s23  ;;  %183 = sbr.rel (%p729_p6) target bundleno = 39 (0x27), region = 16 }
   0xc   : > { %s67_s26 = sor.u32 %s66_s25, %s65_s24 }
   0xd   : > { %p68_p5 = scmp.eq.s32.totalorder %s67_s26, 0 }
   0xf   : > { %s981_s28 = scalar_select %p68_p5, %s881_s16, %s70_s27  }
  0x10   : > { %197 = sbr.rel (!%p79_p3) target bundleno = 39 (0x27), region = 24  ;;  %s199_s29 = sand.u32 (%p79_p3), 1, %s881_s16  }
  0x11   : > { %s732_s30 = sshll.u32 (%p79_p3), %s897_s20, 1  ;;  %s730_s5 = sshll.u32 (%p79_p3), %s199_s29, 7 }
  0x12   : > { %s763_s6 = sshll.u32 (%p79_p3), %s893_s19, 8  ;;  %s201_s12 = scalar_lea.vmem (%p79_p3), [#allocation3], %s730_s5 }
  0x13   : > { %s205_s7 = sadd.s32 (%p79_p3), %s763_s6, %s732_s30 }
  0x14   : > { %s734_s8 = sshll.u32 (%p79_p3), %s205_s7, 2 }
  0x15   : > { %s990_s11 = scalar_lea.vmem %s1089_s1, %s734_s8 }
  0x16   : > { %v266_v0 = vld [vmem:[%s990_s11] sm:$0xff] }
  0x17   : > { %v268_v1 = vld [vmem:[%s990_s11 + $0x40] sm:$0xff]  ;;  %267 = vst [vmem:[%s201_s12] sm:$0xff] %v266_v0 }
  0x18   : > { %v270_v2 = vld [vmem:[%s990_s11 + $0x80] sm:$0xff]  ;;  %269 = vst [vmem:[%s201_s12 + $0x8] sm:$0xff] %v268_v1 }
  0x19   : > { %271 = vst [vmem:[%s201_s12 + $0x10] sm:$0xff] %v270_v2  ;;  %v272_v3 = vld [vmem:[%s990_s11 + $0xc0] sm:$0xff] }
  0x1a   : > { %v274_v4 = vld [vmem:[%s990_s11 + $0x100] sm:$0xff]  ;;  %273 = vst [vmem:[%s201_s12 + $0x18] sm:$0xff] %v272_v3 }
  0x1b   : > { %v276_v5 = vld [vmem:[%s990_s11 + $0x140] sm:$0xff]  ;;  %275 = vst [vmem:[%s201_s12 + $0x20] sm:$0xff] %v274_v4 }
  0x1c   : > { %277 = vst [vmem:[%s201_s12 + $0x28] sm:$0xff] %v276_v5  ;;  %v278_v6 = vld [vmem:[%s990_s11 + $0x180] sm:$0xff] }
  0x1d   : > { %v280_v7 = vld [vmem:[%s990_s11 + $0x1c0] sm:$0xff]  ;;  %279 = vst [vmem:[%s201_s12 + $0x30] sm:$0xff] %v278_v6 }
  0x1e   : > { %v282_v8 = vld [vmem:[%s990_s11 + $0x200] sm:$0xff]  ;;  %281 = vst [vmem:[%s201_s12 + $0x38] sm:$0xff] %v280_v7 }
  0x1f   : > { %283 = vst [vmem:[%s201_s12 + $0x40] sm:$0xff] %v282_v8  ;;  %v284_v9 = vld [vmem:[%s990_s11 + $0x240] sm:$0xff] }
  0x20   : > { %v286_v10 = vld [vmem:[%s990_s11 + $0x280] sm:$0xff]  ;;  %285 = vst [vmem:[%s201_s12 + $0x48] sm:$0xff] %v284_v9 }
  0x21   : > { %v288_v11 = vld [vmem:[%s990_s11 + $0x2c0] sm:$0xff]  ;;  %287 = vst [vmem:[%s201_s12 + $0x50] sm:$0xff] %v286_v10 }
  0x22   : > { %289 = vst [vmem:[%s201_s12 + $0x58] sm:$0xff] %v288_v11  ;;  %v290_v12 = vld [vmem:[%s990_s11 + $0x300] sm:$0xff] }
  0x23   : > { %v292_v13 = vld [vmem:[%s990_s11 + $0x340] sm:$0xff]  ;;  %291 = vst [vmem:[%s201_s12 + $0x60] sm:$0xff] %v290_v12 }
  0x24   : > { %v294_v14 = vld [vmem:[%s990_s11 + $0x380] sm:$0xff]  ;;  %293 = vst [vmem:[%s201_s12 + $0x68] sm:$0xff] %v292_v13 }
  0x25   : > { %295 = vst [vmem:[%s201_s12 + $0x70] sm:$0xff] %v294_v14  ;;  %v296_v15 = vld [vmem:[%s990_s11 + $0x3c0] sm:$0xff] }
  0x26   : > { %297 = vst [vmem:[%s201_s12 + $0x78] sm:$0xff] %v296_v15 }
  0x27 PF: > { %p735_p7 = scmp.ge.s32.totalorder %s901_s21, 1  ;;  %p318_p8 = scmp.lt.s32.totalorder %s901_s21, 65 }
  0x29   : > { %p319_p9 = pnand %p735_p7, %p318_p8 }
  0x2a   : > { %s325_s13 = sand.u32 (!%p319_p9), 1, %s877_s15   ;;  %p372_p10 = scmp.lt.s32.totalorder (!%p319_p9), %s885_s17, 7 }
  0x2b   : > { %322 = sbr.rel (%p319_p9) target bundleno = 303 (0x12f), region = 70  ;;  %s736_s14 = sshll.u32 (!%p319_p9), %s325_s13, 7 }
  0x2c   : > { %s738_s24 = sshll.u32 (!%p319_p9), %s889_s18, 1  ;;  %s1035_s13 = scalar_lea.vmem (!%p319_p9), [#allocation3], %s736_s14 }
  0x2d   : > { %p381_p11 = scmp.lt.s32.totalorder (!%p319_p9), %s738_s24, 15  ;;  %p742_p12 = scmp.ne.s32.totalorder (!%p319_p9), %s885_s17, 0 }
  0x30   : > { %s373_s25 = scalar_select %p372_p10, %s885_s17, 7 }
  0x31   : > { %s1106_s24 = smov (!%p381_p11, %s738_s24), 15  ;;  %404 = sbr.rel (%p742_p12) target bundleno = 56 (0x38), region = 78 }
  0x32   : > { %s737_s26 = sshll.u32 %s373_s25, 2  ;;  %s383_s15 = scalar_lea.vmem %s1090_s2, %s1106_s24 }
  0x33   : > { %s1019_s30 = scalar_lea.vmem %s1088_s0, %s737_s26  ;;  %s388_s18 = scalar_lea.vmem %s1091_s3, %s1106_s24 }
  0x34   : > { %s741_s9 = sshll.u32 %s1106_s24, 2 }
  0x35   : > { %s1033_s12 = scalar_lea.vmem %s1092_s4, %s741_s9 }
  0x36   : > { %v903_v16 = vmov 0.0  }
  0x37   : > { %405 = vst [vmem:[#allocation2] sm:$0xff] %v903_v16  ;;  %406 = vst [vmem:[#allocation2 + $0x8] sm:$0xff] %v903_v16 }
  0x38 PF: > { %v823_v17 = vld [vmem:[%s1035_s13 + $0x74] ss:$8 sps:$4 sm:$0xff]   ;;  %v825_v18 = vld [vmem:[%s1035_s13 + $0x70] ss:$8 sps:$4 sm:$0xff]   ;;  %v904_v19 = vmov 0   ;;  %p759_p13 = scmp.ne.s32.totalorder %s885_s17, 7 }
  0x39   : > { %538 = vmatprep.mubr.bf16.mxu0 %v904_v19  ;;  %506 = vmatprep.subr.bf16.mxu0 %v823_v17  ;;  %v826_v20 = vld [vmem:[%s1035_s13 + $0x64] ss:$8 sps:$4 sm:$0xff]   ;;  %v828_v21 = vld [vmem:[%s1035_s13 + $0x60] ss:$8 sps:$4 sm:$0xff]   ;;  %v829_v22 = vld [vmem:[%s1035_s13 + $0x54] ss:$8 sps:$4 sm:$0xff]  }
  0x3a   : > { %507 = vmatpush1.bf16.msra.mxu0 %v825_v18  ;;  %v831_v23 = vld [vmem:[%s1035_s13 + $0x50] ss:$8 sps:$4 sm:$0xff]   ;;  %v832_v24 = vld [vmem:[%s1035_s13 + $0x44] ss:$8 sps:$4 sm:$0xff]   ;;  %v834_v25 = vld [vmem:[%s1035_s13 + $0x40] ss:$8 sps:$4 sm:$0xff]  }
  0x3b   : > { %508 = vmatprep.subr.bf16.mxu0 %v826_v20  ;;  %v835_v26 = vld [vmem:[%s1035_s13 + $0x34] ss:$8 sps:$4 sm:$0xff]   ;;  %v837_v27 = vld [vmem:[%s1035_s13 + $0x30] ss:$8 sps:$4 sm:$0xff]   ;;  %v838_v28 = vld [vmem:[%s1035_s13 + $0x24] ss:$8 sps:$4 sm:$0xff]  }
  0x3c   : > { %v840_v29 = vld [vmem:[%s1035_s13 + $0x20] ss:$8 sps:$4 sm:$0xff]   ;;  %v841_v30 = vld [vmem:[%s1035_s13 + $0x14] ss:$8 sps:$4 sm:$0xff]   ;;  %v843_v31 = vld [vmem:[%s1035_s13 + $0x10] ss:$8 sps:$4 sm:$0xff]  }
  0x3d   : > { %v844_v32 = vld [vmem:[%s1035_s13 + $0x4] ss:$8 sps:$4 sm:$0xff]   ;;  %v846_v33 = vld [vmem:[%s1035_s13] ss:$8 sps:$4 sm:$0xff]  }
  0x3e   : > { %509 = vmatpush1.bf16.msra.mxu0 %v828_v21  ;;  %v409_v34 = vld [vmem:[%s1019_s30] sm:$0xf]  ;;  %v407_v35 = vld [vmem:[#allocation2] sm:$0xff]  ;;  %v408_v37 = vld [vmem:[#allocation2 + $0x8] sm:$0xff] }
  0x3f   : > { %510 = vmatprep.subr.bf16.mxu0 %v829_v22 }
  0x42   : > { %511 = vmatpush1.bf16.msra.mxu0 %v831_v23 }
  0x43   : > { %512 = vmatprep.subr.bf16.mxu0 %v832_v24 }
  0x46   : > { %513 = vmatpush1.bf16.msra.mxu0 %v834_v25 }
  0x47   : > { %514 = vmatprep.subr.bf16.mxu0 %v835_v26 }
  0x4a   : > { %515 = vmatpush1.bf16.msra.mxu0 %v837_v27 }
  0x4b   : > { %516 = vmatprep.subr.bf16.mxu0 %v838_v28 }
  0x4e   : > { %517 = vmatpush1.bf16.msra.mxu0 %v840_v29 }
  0x4f   : > { %518 = vmatprep.subr.bf16.mxu0 %v841_v30 }
  0x52   : > { %519 = vmatpush1.bf16.msra.mxu0 %v843_v31 }
  0x53   : > { %520 = vmatprep.subr.bf16.mxu0 %v844_v32 }
  0x56   : > { %521 = vmatpush1.bf16.msra.mxu0 %v846_v33 }
  0x59   : > { %539 = vmatmul.mubr.bf16.vlgmr.msra.gmra.mxu0 %v409_v34 }
 0x119   : > { %v540_v36 = vpop.f32.mrf.mxu0 }
 0x11a   : > { %v547_v38 = vadd.f32 %v540_v36, %v407_v35 }
 0x11b   : > { %v542_v39 = vpop.f32.mrf.mxu0  ;;  %554 = sbr.rel (%p759_p13) target bundleno = 303 (0x12f), region = 82 }
 0x11c   : > { %549 = vst [vmem:[#allocation2] sm:$0xff] %v547_v38  ;;  %v548_v40 = vadd.f32 %v542_v39, %v408_v37 }
 0x11d   : > { %v544_v41 = vpop.f32.mrf.mxu0 }
 0x11e   : > { %550 = vst [vmem:[#allocation2 + $0x8] sm:$0xff] %v548_v40 }
 0x11f   : > { %v545_v42 = vpop.f32.mrf.mxu0 }
 0x120   : > { %v559_v43 = vlaneseq  ;;  %v557_v45 = vld [vmem:[%s383_s15] sm:$0x3] }
 0x121   : > { %v571_v46 = vld [vmem:[%s388_s18] sm:$0x3] }
 0x122   : > { %v560_v44 = vshrl.u32 %v559_v43, 7 }
 0x123   : > { %v555_v49 = vld [vmem:[#allocation2] sm:$0xff] }
 0x124   : > { %v561_v47 = vsub.s32 0, %v560_v44  ;;  %v565_v48 = vsub.s32 1, %v560_v44 }
 0x125   : > { %v556_v50 = vld [vmem:[#allocation2 + $0x8] sm:$0xff] }
 0x126   : > { %v562_v51 = vrot.slane %v557_v45, %v561_v47  ;;  %v566_v52 = vrot.slane %v557_v45, %v565_v48  ;;  %v576_v53 = vrot.slane %v571_v46, %v561_v47  ;;  %v580_v54 = vrot.slane %v571_v46, %v565_v48 }
 0x128   : > { %v569_v55 = vmul.f32 %v562_v51, %v555_v49  ;;  %v570_v56 = vmul.f32 %v566_v52, %v556_v50 }
 0x12a   : > { %v583_v57 = vadd.f32 %v576_v53, %v569_v55  ;;  %v584_v58 = vadd.f32 %v580_v54, %v570_v56 }
 0x12c   : > { %v764_v59 = vpack.c.bf16 %v584_v58, %v583_v57 }
 0x12e   : > { %593 = vst [vmem:[%s1033_s12] sm:$0xff] %v764_v59 }
 0x12f PF: > { %s14_s21 = sadd.s32 1, %s901_s21   ;;  %s1093_s15 = smov %s881_s16 }
 0x130   : > { %p11_p0 = scmp.ge.s32.totalorder %s14_s21, 66   ;;  %s1094_s16 = smov %s981_s28 }
 0x131   : > { %s1095_s17 = smov %s893_s19  ;;  %s1096_s18 = smov %s897_s20 }
 0x132   : > { %s1097_s19 = smov %s1100_s22  ;;  %s1098_s20 = smov %s1104_s23 }
 0x133   :  { %13 = sbr.rel (!%p11_p0) target bundleno = 4 (0x4), region = 126 }

// kernel: resnet50_forward.104
= control target key start
LH: loop header
LB: loop body
LE: loop exit
PB: predicated region body
PF: predicated region fallthrough
CT: control target
= control target key end

     0   :  { %s932_s15 = smov 0   ;;  %s934_s16 = smov 0   ;;  %s1090_s0 = inlined_call_operand.vmem [shape: bf16[8,2048], index: 0, kind: input, shape index: {}]   ;;  %s1091_s1 = inlined_call_operand.vmem [shape: bf16[2048,512], index: 1, kind: input, shape index: {}]   ;;  %s1092_s2 = inlined_call_operand.vmem [shape: f32[1,512], index: 2, kind: input, shape index: {}]   ;;  %s1093_s3 = inlined_call_operand.vmem [shape: f32[1,512], index: 3, kind: input, shape index: {}]   ;;  %s1094_s4 = inlined_call_operand.vmem [shape: bf16[8,512], index: 4, kind: output, shape index: {}]  }
   0x1   :  { %s936_s17 = smov 0   ;;  %s938_s18 = smov 0  }
   0x2   :  { %s940_s19 = smov 0   ;;  %s942_s20 = smov 0  }
   0x3   :  { %s944_s21 = smov 0  }
   0x4 LB: > { %s26_s22 = sadd.s32 1, %s895_s19  ;;  %s29_s23 = sadd.s32 1, %s899_s20  ;;  %s903_s21 = sphi %s944_s21, %s14_s21   ;;  %s899_s20 = sphi %s942_s20, %s1100_s20   ;;  %s895_s19 = sphi %s940_s19, %s1099_s19   ;;  %s891_s18 = sphi %s938_s18, %s1098_s18   ;;  %s887_s17 = sphi %s936_s17, %s1097_s17   ;;  %s883_s16 = sphi %s934_s16, %s1096_s16   ;;  %s879_s15 = sphi %s932_s15, %s1095_s15  }
   0x5   : > { %p27_p0 = scmp.ge.s32.totalorder %s26_s22, 16  ;;  %p77_p1 = scmp.ne.s32.totalorder %s883_s16, %s879_s15 }
   0x6   : > { %p78_p2 = scmp.eq.s32.totalorder %s903_s21, 0  ;;  %s70_s27 = sadd.s32 1, %s883_s16 }
   0x7   : > { %s1102_s22 = smov (%p27_p0, %s26_s22), 0  ;;  %s1104_s23 = smov (!%p27_p0, %s29_s23), %s899_s20 }
   0x8   : > { %p79_p3 = por %p78_p2, %p77_p1  ;;  %p31_p4 = scmp.ge.s32.totalorder %s1104_s23, 2 }
   0x9   : > { %s65_s24 = ssub.s32 %s895_s19, %s1102_s22  ;;  %p731_p6 = scmp.ge.s32.totalorder %s903_s21, 32 }
   0xa   : > { %s1106_s23 = smov (%p31_p4, %s1104_s23), 0 }
   0xb   : > { %s66_s25 = ssub.s32 %s899_s20, %s1106_s23  ;;  %183 = sbr.rel (%p731_p6) target bundleno = 31 (0x1f), region = 16 }
   0xc   : > { %s67_s26 = sor.u32 %s66_s25, %s65_s24 }
   0xd   : > { %p68_p5 = scmp.eq.s32.totalorder %s67_s26, 0 }
   0xf   : > { %s983_s28 = scalar_select %p68_p5, %s883_s16, %s70_s27  }
  0x10   : > { %197 = sbr.rel (!%p79_p3) target bundleno = 31 (0x1f), region = 24  ;;  %s199_s29 = sand.u32 (%p79_p3), 1, %s883_s16  }
  0x11   : > { %s734_s30 = sshll.u32 (%p79_p3), %s899_s20, 1  ;;  %s732_s5 = sshll.u32 (%p79_p3), %s199_s29, 7 }
  0x12   : > { %s765_s6 = sshll.u32 (%p79_p3), %s895_s19, 6  ;;  %s201_s12 = scalar_lea.vmem (%p79_p3), [#allocation3], %s732_s5 }
  0x13   : > { %s205_s7 = sadd.s32 (%p79_p3), %s765_s6, %s734_s30 }
  0x14   : > { %s736_s8 = sshll.u32 (%p79_p3), %s205_s7, 2 }
  0x15   : > { %s992_s11 = scalar_lea.vmem %s1091_s1, %s736_s8 }
  0x16   : > { %v266_v0 = vld [vmem:[%s992_s11] sm:$0xff]  ;;  %v268_v1 = vld [vmem:[%s992_s11 + $0x10] sm:$0xff] }
  0x17   : > { %v270_v2 = vld [vmem:[%s992_s11 + $0x20] sm:$0xff]  ;;  %267 = vst [vmem:[%s201_s12] sm:$0xff] %v266_v0  ;;  %269 = vst [vmem:[%s201_s12 + $0x8] sm:$0xff] %v268_v1  ;;  %v272_v3 = vld [vmem:[%s992_s11 + $0x30] sm:$0xff] }
  0x18   : > { %271 = vst [vmem:[%s201_s12 + $0x10] sm:$0xff] %v270_v2  ;;  %v274_v4 = vld [vmem:[%s992_s11 + $0x40] sm:$0xff]  ;;  %v276_v5 = vld [vmem:[%s992_s11 + $0x50] sm:$0xff]  ;;  %273 = vst [vmem:[%s201_s12 + $0x18] sm:$0xff] %v272_v3 }
  0x19   : > { %275 = vst [vmem:[%s201_s12 + $0x20] sm:$0xff] %v274_v4  ;;  %277 = vst [vmem:[%s201_s12 + $0x28] sm:$0xff] %v276_v5  ;;  %v278_v6 = vld [vmem:[%s992_s11 + $0x60] sm:$0xff]  ;;  %v280_v7 = vld [vmem:[%s992_s11 + $0x70] sm:$0xff] }
  0x1a   : > { %v282_v8 = vld [vmem:[%s992_s11 + $0x80] sm:$0xff]  ;;  %279 = vst [vmem:[%s201_s12 + $0x30] sm:$0xff] %v278_v6  ;;  %281 = vst [vmem:[%s201_s12 + $0x38] sm:$0xff] %v280_v7  ;;  %v284_v9 = vld [vmem:[%s992_s11 + $0x90] sm:$0xff] }
  0x1b   : > { %283 = vst [vmem:[%s201_s12 + $0x40] sm:$0xff] %v282_v8  ;;  %v286_v10 = vld [vmem:[%s992_s11 + $0xa0] sm:$0xff]  ;;  %v288_v11 = vld [vmem:[%s992_s11 + $0xb0] sm:$0xff]  ;;  %285 = vst [vmem:[%s201_s12 + $0x48] sm:$0xff] %v284_v9 }
  0x1c   : > { %287 = vst [vmem:[%s201_s12 + $0x50] sm:$0xff] %v286_v10  ;;  %289 = vst [vmem:[%s201_s12 + $0x58] sm:$0xff] %v288_v11  ;;  %v290_v12 = vld [vmem:[%s992_s11 + $0xc0] sm:$0xff]  ;;  %v292_v13 = vld [vmem:[%s992_s11 + $0xd0] sm:$0xff] }
  0x1d   : > { %v294_v14 = vld [vmem:[%s992_s11 + $0xe0] sm:$0xff]  ;;  %291 = vst [vmem:[%s201_s12 + $0x60] sm:$0xff] %v290_v12  ;;  %293 = vst [vmem:[%s201_s12 + $0x68] sm:$0xff] %v292_v13  ;;  %v296_v15 = vld [vmem:[%s992_s11 + $0xf0] sm:$0xff] }
  0x1e   : > { %295 = vst [vmem:[%s201_s12 + $0x70] sm:$0xff] %v294_v14  ;;  %297 = vst [vmem:[%s201_s12 + $0x78] sm:$0xff] %v296_v15 }
  0x1f PF: > { %p737_p7 = scmp.ge.s32.totalorder %s903_s21, 1  ;;  %p318_p8 = scmp.lt.s32.totalorder %s903_s21, 33 }
  0x21   : > { %p319_p9 = pnand %p737_p7, %p318_p8 }
  0x22   : > { %s325_s13 = sand.u32 (!%p319_p9), 1, %s879_s15   ;;  %p372_p10 = scmp.lt.s32.totalorder (!%p319_p9), %s887_s17, 15 }
  0x23   : > { %322 = sbr.rel (%p319_p9) target bundleno = 297 (0x129), region = 70  ;;  %s738_s14 = sshll.u32 (!%p319_p9), %s325_s13, 7 }
  0x24   : > { %s740_s24 = sshll.u32 (!%p319_p9), %s891_s18, 1  ;;  %s1037_s13 = scalar_lea.vmem (!%p319_p9), [#allocation3], %s738_s14 }
  0x25   : > { %p381_p11 = scmp.lt.s32.totalorder (!%p319_p9), %s740_s24, 3  ;;  %p744_p12 = scmp.ne.s32.totalorder (!%p319_p9), %s887_s17, 0 }
  0x28   : > { %s373_s25 = scalar_select %p372_p10, %s887_s17, 15 }
  0x29   : > { %s1108_s24 = smov (!%p381_p11, %s740_s24), 3  ;;  %404 = sbr.rel (%p744_p12) target bundleno = 48 (0x30), region = 78 }
  0x2a   : > { %s739_s26 = sshll.u32 %s373_s25, 2  ;;  %s383_s15 = scalar_lea.vmem %s1092_s2, %s1108_s24 }
  0x2b   : > { %s1021_s30 = scalar_lea.vmem %s1090_s0, %s739_s26  ;;  %s388_s18 = scalar_lea.vmem %s1093_s3, %s1108_s24 }
  0x2c   : > { %s743_s9 = sshll.u32 %s1108_s24, 2 }
  0x2d   : > { %s1035_s12 = scalar_lea.vmem %s1094_s4, %s743_s9 }
  0x2e   : > { %v905_v16 = vmov 0.0  }
  0x2f   : > { %405 = vst [vmem:[#allocation2] sm:$0xff] %v905_v16  ;;  %406 = vst [vmem:[#allocation2 + $0x8] sm:$0xff] %v905_v16 }
  0x30 PF: > { %v825_v17 = vld [vmem:[%s1037_s13 + $0x74] ss:$8 sps:$4 sm:$0xff]   ;;  %v827_v18 = vld [vmem:[%s1037_s13 + $0x70] ss:$8 sps:$4 sm:$0xff]   ;;  %v906_v19 = vmov 0   ;;  %p761_p13 = scmp.ne.s32.totalorder %s887_s17, 15 }
  0x31   : > { %538 = vmatprep.mubr.bf16.mxu0 %v906_v19  ;;  %506 = vmatprep.subr.bf16.mxu0 %v825_v17  ;;  %v828_v20 = vld [vmem:[%s1037_s13 + $0x64] ss:$8 sps:$4 sm:$0xff]   ;;  %v830_v21 = vld [vmem:[%s1037_s13 + $0x60] ss:$8 sps:$4 sm:$0xff]   ;;  %v831_v22 = vld [vmem:[%s1037_s13 + $0x54] ss:$8 sps:$4 sm:$0xff]  }
  0x32   : > { %507 = vmatpush1.bf16.msra.mxu0 %v827_v18  ;;  %v833_v23 = vld [vmem:[%s1037_s13 + $0x50] ss:$8 sps:$4 sm:$0xff]   ;;  %v834_v24 = vld [vmem:[%s1037_s13 + $0x44] ss:$8 sps:$4 sm:$0xff]   ;;  %v836_v25 = vld [vmem:[%s1037_s13 + $0x40] ss:$8 sps:$4 sm:$0xff]  }
  0x33   : > { %508 = vmatprep.subr.bf16.mxu0 %v828_v20  ;;  %v837_v26 = vld [vmem:[%s1037_s13 + $0x34] ss:$8 sps:$4 sm:$0xff]   ;;  %v839_v27 = vld [vmem:[%s1037_s13 + $0x30] ss:$8 sps:$4 sm:$0xff]   ;;  %v840_v28 = vld [vmem:[%s1037_s13 + $0x24] ss:$8 sps:$4 sm:$0xff]  }
  0x34   : > { %v842_v29 = vld [vmem:[%s1037_s13 + $0x20] ss:$8 sps:$4 sm:$0xff]   ;;  %v843_v30 = vld [vmem:[%s1037_s13 + $0x14] ss:$8 sps:$4 sm:$0xff]   ;;  %v845_v31 = vld [vmem:[%s1037_s13 + $0x10] ss:$8 sps:$4 sm:$0xff]  }
  0x35   : > { %v846_v32 = vld [vmem:[%s1037_s13 + $0x4] ss:$8 sps:$4 sm:$0xff]   ;;  %v848_v33 = vld [vmem:[%s1037_s13] ss:$8 sps:$4 sm:$0xff]  }
  0x36   : > { %509 = vmatpush1.bf16.msra.mxu0 %v830_v21  ;;  %v409_v34 = vld [vmem:[%s1021_s30] sm:$0xf]  ;;  %v407_v35 = vld [vmem:[#allocation2] sm:$0xff]  ;;  %v408_v37 = vld [vmem:[#allocation2 + $0x8] sm:$0xff] }
  0x37   : > { %510 = vmatprep.subr.bf16.mxu0 %v831_v22 }
  0x3a   : > { %511 = vmatpush1.bf16.msra.mxu0 %v833_v23 }
  0x3b   : > { %512 = vmatprep.subr.bf16.mxu0 %v834_v24 }
  0x3e   : > { %513 = vmatpush1.bf16.msra.mxu0 %v836_v25 }
  0x3f   : > { %514 = vmatprep.subr.bf16.mxu0 %v837_v26 }
  0x42   : > { %515 = vmatpush1.bf16.msra.mxu0 %v839_v27 }
  0x43   : > { %516 = vmatprep.subr.bf16.mxu0 %v840_v28 }
  0x46   : > { %517 = vmatpush1.bf16.msra.mxu0 %v842_v29 }
  0x47   : > { %518 = vmatprep.subr.bf16.mxu0 %v843_v30 }
  0x4a   : > { %519 = vmatpush1.bf16.msra.mxu0 %v845_v31 }
  0x4b   : > { %520 = vmatprep.subr.bf16.mxu0 %v846_v32 }
  0x4e   : > { %521 = vmatpush1.bf16.msra.mxu0 %v848_v33 }
  0x51   : > { %539 = vmatmul.mubr.bf16.vlgmr.msra.gmra.mxu0 %v409_v34 }
 0x111   : > { %v540_v36 = vpop.f32.mrf.mxu0 }
 0x112   : > { %v547_v38 = vadd.f32 %v540_v36, %v407_v35 }
 0x113   : > { %v542_v39 = vpop.f32.mrf.mxu0  ;;  %554 = sbr.rel (%p761_p13) target bundleno = 297 (0x129), region = 82 }
 0x114   : > { %549 = vst [vmem:[#allocation2] sm:$0xff] %v547_v38  ;;  %v548_v40 = vadd.f32 %v542_v39, %v408_v37 }
 0x115   : > { %v544_v41 = vpop.f32.mrf.mxu0 }
 0x116   : > { %550 = vst [vmem:[#allocation2 + $0x8] sm:$0xff] %v548_v40 }
 0x117   : > { %v545_v42 = vpop.f32.mrf.mxu0 }
 0x118   : > { %v559_v43 = vlaneseq  ;;  %v557_v45 = vld [vmem:[%s383_s15] sm:$0x3] }
 0x119   : > { %v571_v46 = vld [vmem:[%s388_s18] sm:$0x3] }
 0x11a   : > { %v560_v44 = vshrl.u32 %v559_v43, 7 }
 0x11b   : > { %v555_v49 = vld [vmem:[#allocation2] sm:$0xff] }
 0x11c   : > { %v561_v47 = vsub.s32 0, %v560_v44  ;;  %v565_v48 = vsub.s32 1, %v560_v44 }
 0x11d   : > { %v556_v50 = vld [vmem:[#allocation2 + $0x8] sm:$0xff] }
 0x11e   : > { %v562_v51 = vrot.slane %v557_v45, %v561_v47  ;;  %v566_v52 = vrot.slane %v557_v45, %v565_v48  ;;  %v576_v53 = vrot.slane %v571_v46, %v561_v47  ;;  %v580_v54 = vrot.slane %v571_v46, %v565_v48 }
 0x120   : > { %v569_v55 = vmul.f32 %v562_v51, %v555_v49  ;;  %v570_v56 = vmul.f32 %v566_v52, %v556_v50 }
 0x122   : > { %v583_v57 = vadd.f32 %v576_v53, %v569_v55  ;;  %v584_v58 = vadd.f32 %v580_v54, %v570_v56 }
 0x124   : > { %v585_v59 = vmax.f32 %v583_v57, 0.0  ;;  %v586_v60 = vmax.f32 %v584_v58, 0.0 }
 0x126   : > { %v766_v61 = vpack.c.bf16 %v586_v60, %v585_v59 }
 0x128   : > { %595 = vst [vmem:[%s1035_s12] sm:$0xff] %v766_v61 }
 0x129 PF: > { %s14_s21 = sadd.s32 1, %s903_s21   ;;  %s1095_s15 = smov %s883_s16 }
 0x12a   : > { %p11_p0 = scmp.ge.s32.totalorder %s14_s21, 34   ;;  %s1096_s16 = smov %s983_s28 }
 0x12b   : > { %s1097_s17 = smov %s895_s19  ;;  %s1098_s18 = smov %s899_s20 }
 0x12c   : > { %s1099_s19 = smov %s1102_s22  ;;  %s1100_s20 = smov %s1106_s23 }
 0x12d   :  { %13 = sbr.rel (!%p11_p0) target bundleno = 4 (0x4), region = 126 }

// kernel: resnet50_forward.103
= control target key start
LH: loop header
LB: loop body
LE: loop exit
PB: predicated region body
PF: predicated region fallthrough
CT: control target
= control target key end

     0   :  { %s1189_s0 = inlined_call_operand.vmem [shape: bf16[8,512], index: 0, kind: input, shape index: {}]   ;;  %s1190_s1 = inlined_call_operand.vmem [shape: bf16[512,2048], index: 1, kind: input, shape index: {}]   ;;  %s1191_s2 = inlined_call_operand.vmem [shape: f32[1,2048], index: 2, kind: input, shape index: {}]   ;;  %s1192_s3 = inlined_call_operand.vmem [shape: f32[1,2048], index: 3, kind: input, shape index: {}]   ;;  %s1193_s4 = inlined_call_operand.vmem [shape: bf16[8,2048], index: 4, kind: input, shape index: {}]   ;;  %s1194_s5 = inlined_call_operand.vmem [shape: bf16[8,2048], index: 5, kind: output, shape index: {}]  }
   0x1   :  { %1195 = sst [smem:[#allocation4_spill]] %s1190_s1 }
   0x2   :  { %s1025_s18 = smov 0   ;;  %s1027_s19 = smov 0  }
   0x3   :  { %s1029_s20 = smov 0   ;;  %s1031_s21 = smov 0  }
   0x4   :  { %s1033_s22 = smov 0   ;;  %s1035_s23 = smov 0  }
   0x5   :  { %s1037_s24 = smov 0  }
   0x6 LB: > { %s27_s25 = sadd.s32 1, %s983_s22  ;;  %s30_s26 = sadd.s32 1, %s987_s23  ;;  %s991_s24 = sphi %s1037_s24, %s15_s24   ;;  %s987_s23 = sphi %s1035_s23, %s1202_s23   ;;  %s983_s22 = sphi %s1033_s22, %s1201_s22   ;;  %s979_s21 = sphi %s1031_s21, %s1200_s21   ;;  %s975_s20 = sphi %s1029_s20, %s1199_s20   ;;  %s971_s19 = sphi %s1027_s19, %s1198_s19   ;;  %s967_s18 = sphi %s1025_s18, %s1197_s18  }
   0x7   : > { %p28_p0 = scmp.ge.s32.totalorder %s27_s25, 4  ;;  %p78_p1 = scmp.ne.s32.totalorder %s971_s19, %s967_s18 }
   0x8   : > { %p79_p2 = scmp.eq.s32.totalorder %s991_s24, 0  ;;  %s71_s30 = sadd.s32 1, %s971_s19 }
   0x9   : > { %s1204_s25 = smov (%p28_p0, %s27_s25), 0  ;;  %s1206_s26 = smov (!%p28_p0, %s30_s26), %s987_s23 }
   0xa   : > { %p80_p3 = por %p79_p2, %p78_p1  ;;  %p32_p4 = scmp.ge.s32.totalorder %s1206_s26, 8 }
   0xb   : > { %s66_s27 = ssub.s32 %s983_s22, %s1204_s25  ;;  %p817_p6 = scmp.ge.s32.totalorder %s991_s24, 32 }
   0xc   : > { %s1208_s26 = smov (%p32_p4, %s1206_s26), 0 }
   0xd   : > { %s67_s28 = ssub.s32 %s987_s23, %s1208_s26  ;;  %212 = sbr.rel (%p817_p6) target bundleno = 44 (0x2c), region = 16 }
   0xe   : > { %s68_s29 = sor.u32 %s67_s28, %s66_s27 }
   0xf   : > { %p69_p5 = scmp.eq.s32.totalorder %s68_s29, 0 }
  0x11   : > { %s1076_s6 = scalar_select %p69_p5, %s971_s19, %s71_s30  }
  0x12   : > { %226 = sbr.rel (!%p80_p3) target bundleno = 44 (0x2c), region = 24  ;;  %s228_s7 = sand.u32 (%p80_p3), 1, %s971_s19  }
  0x13   : > { %s820_s8 = sshll.u32 (%p80_p3), %s987_s23, 1  ;;  %s818_s9 = sshll.u32 (%p80_p3), %s228_s7, 7 }
  0x14   : > { %s853_s10 = sshll.u32 (%p80_p3), %s983_s22, 8  ;;  %s1196_s1 = sld [smem:[#allocation4_spill]] (%p80_p3) }
  0x15   : > { %s234_s11 = sadd.s32 (%p80_p3), %s853_s10, %s820_s8  ;;  %s230_s16 = scalar_lea.vmem (%p80_p3), [#allocation3], %s818_s9 }
  0x16   : > { %s822_s12 = sshll.u32 (%p80_p3), %s234_s11, 2 }
  0x1a   : > { %s1085_s15 = scalar_lea.vmem %s1196_s1, %s822_s12 }
  0x1b   : > { %v295_v0 = vld [vmem:[%s1085_s15] sm:$0xff] }
  0x1c   : > { %v297_v1 = vld [vmem:[%s1085_s15 + $0x40] sm:$0xff]  ;;  %296 = vst [vmem:[%s230_s16] sm:$0xff] %v295_v0 }
  0x1d   : > { %v299_v2 = vld [vmem:[%s1085_s15 + $0x80] sm:$0xff]  ;;  %298 = vst [vmem:[%s230_s16 + $0x8] sm:$0xff] %v297_v1 }
  0x1e   : > { %300 = vst [vmem:[%s230_s16 + $0x10] sm:$0xff] %v299_v2  ;;  %v301_v3 = vld [vmem:[%s1085_s15 + $0xc0] sm:$0xff] }
  0x1f   : > { %v303_v4 = vld [vmem:[%s1085_s15 + $0x100] sm:$0xff]  ;;  %302 = vst [vmem:[%s230_s16 + $0x18] sm:$0xff] %v301_v3 }
  0x20   : > { %v305_v5 = vld [vmem:[%s1085_s15 + $0x140] sm:$0xff]  ;;  %304 = vst [vmem:[%s230_s16 + $0x20] sm:$0xff] %v303_v4 }
  0x21   : > { %306 = vst [vmem:[%s230_s16 + $0x28] sm:$0xff] %v305_v5  ;;  %v307_v6 = vld [vmem:[%s1085_s15 + $0x180] sm:$0xff] }
  0x22   : > { %v309_v7 = vld [vmem:[%s1085_s15 + $0x1c0] sm:$0xff]  ;;  %308 = vst [vmem:[%s230_s16 + $0x30] sm:$0xff] %v307_v6 }
  0x23   : > { %v311_v8 = vld [vmem:[%s1085_s15 + $0x200] sm:$0xff]  ;;  %310 = vst [vmem:[%s230_s16 + $0x38] sm:$0xff] %v309_v7 }
  0x24   : > { %312 = vst [vmem:[%s230_s16 + $0x40] sm:$0xff] %v311_v8  ;;  %v313_v9 = vld [vmem:[%s1085_s15 + $0x240] sm:$0xff] }
  0x25   : > { %v315_v10 = vld [vmem:[%s1085_s15 + $0x280] sm:$0xff]  ;;  %314 = vst [vmem:[%s230_s16 + $0x48] sm:$0xff] %v313_v9 }
  0x26   : > { %v317_v11 = vld [vmem:[%s1085_s15 + $0x2c0] sm:$0xff]  ;;  %316 = vst [vmem:[%s230_s16 + $0x50] sm:$0xff] %v315_v10 }
  0x27   : > { %318 = vst [vmem:[%s230_s16 + $0x58] sm:$0xff] %v317_v11  ;;  %v319_v12 = vld [vmem:[%s1085_s15 + $0x300] sm:$0xff] }
  0x28   : > { %v321_v13 = vld [vmem:[%s1085_s15 + $0x340] sm:$0xff]  ;;  %320 = vst [vmem:[%s230_s16 + $0x60] sm:$0xff] %v319_v12 }
  0x29   : > { %v323_v14 = vld [vmem:[%s1085_s15 + $0x380] sm:$0xff]  ;;  %322 = vst [vmem:[%s230_s16 + $0x68] sm:$0xff] %v321_v13 }
  0x2a   : > { %324 = vst [vmem:[%s230_s16 + $0x70] sm:$0xff] %v323_v14  ;;  %v325_v15 = vld [vmem:[%s1085_s15 + $0x3c0] sm:$0xff] }
  0x2b   : > { %326 = vst [vmem:[%s230_s16 + $0x78] sm:$0xff] %v325_v15 }
  0x2c PF: > { %p823_p7 = scmp.ge.s32.totalorder %s991_s24, 1  ;;  %p360_p8 = scmp.lt.s32.totalorder %s991_s24, 33 }
  0x2e   : > { %p361_p9 = pnand %p823_p7, %p360_p8 }
  0x2f   : > { %s367_s17 = sand.u32 (!%p361_p9), 1, %s967_s18   ;;  %p425_p10 = scmp.lt.s32.totalorder (!%p361_p9), %s975_s20, 3 }
  0x30   : > { %364 = sbr.rel (%p361_p9) target bundleno = 312 (0x138), region = 74  ;;  %s824_s27 = sshll.u32 (!%p361_p9), %s367_s17, 7 }
  0x31   : > { %s826_s28 = sshll.u32 (!%p361_p9), %s979_s21, 1  ;;  %p832_p12 = scmp.ne.s32.totalorder (!%p361_p9), %s975_s20, 0 }
  0x32   : > { %p434_p11 = scmp.lt.s32.totalorder (!%p361_p9), %s826_s28, 15 }
  0x35   : > { %s426_s29 = scalar_select %p425_p10, %s975_s20, 3 }
  0x36   : > { %s1210_s28 = smov (!%p434_p11, %s826_s28), 15  ;;  %467 = sbr.rel (%p832_p12) target bundleno = 61 (0x3d), region = 82 }
  0x37   : > { %s825_s30 = sshll.u32 %s426_s29, 2  ;;  %s436_s18 = scalar_lea.vmem %s1191_s2, %s1210_s28 }
  0x38   : > { %s1114_s9 = scalar_lea.vmem %s1189_s0, %s825_s30  ;;  %s441_s21 = scalar_lea.vmem %s1192_s3, %s1210_s28 }
  0x39   : > { %s829_s14 = sshll.u32 %s1210_s28, 2  ;;  %s1135_s30 = scalar_lea.vmem [#allocation3], %s824_s27 }
  0x3a   : > { %s1128_s17 = scalar_lea.vmem %s1193_s4, %s829_s14  ;;  %s1133_s7 = scalar_lea.vmem %s1194_s5, %s829_s14 }
  0x3b   : > { %v993_v16 = vmov 0.0  }
  0x3c   : > { %468 = vst [vmem:[#allocation2] sm:$0xff] %v993_v16  ;;  %469 = vst [vmem:[#allocation2 + $0x8] sm:$0xff] %v993_v16 }
  0x3d PF: > { %v913_v17 = vld [vmem:[%s1135_s30 + $0x74] ss:$8 sps:$4 sm:$0xff]   ;;  %v915_v18 = vld [vmem:[%s1135_s30 + $0x70] ss:$8 sps:$4 sm:$0xff]   ;;  %v994_v19 = vmov 0   ;;  %p849_p13 = scmp.ne.s32.totalorder %s975_s20, 3 }
  0x3e   : > { %601 = vmatprep.mubr.bf16.mxu0 %v994_v19  ;;  %569 = vmatprep.subr.bf16.mxu0 %v913_v17  ;;  %v916_v20 = vld [vmem:[%s1135_s30 + $0x64] ss:$8 sps:$4 sm:$0xff]   ;;  %v918_v21 = vld [vmem:[%s1135_s30 + $0x60] ss:$8 sps:$4 sm:$0xff]   ;;  %v919_v22 = vld [vmem:[%s1135_s30 + $0x54] ss:$8 sps:$4 sm:$0xff]  }
  0x3f   : > { %570 = vmatpush1.bf16.msra.mxu0 %v915_v18  ;;  %v921_v23 = vld [vmem:[%s1135_s30 + $0x50] ss:$8 sps:$4 sm:$0xff]   ;;  %v922_v24 = vld [vmem:[%s1135_s30 + $0x44] ss:$8 sps:$4 sm:$0xff]   ;;  %v924_v25 = vld [vmem:[%s1135_s30 + $0x40] ss:$8 sps:$4 sm:$0xff]  }
  0x40   : > { %571 = vmatprep.subr.bf16.mxu0 %v916_v20  ;;  %v925_v26 = vld [vmem:[%s1135_s30 + $0x34] ss:$8 sps:$4 sm:$0xff]   ;;  %v927_v27 = vld [vmem:[%s1135_s30 + $0x30] ss:$8 sps:$4 sm:$0xff]   ;;  %v928_v28 = vld [vmem:[%s1135_s30 + $0x24] ss:$8 sps:$4 sm:$0xff]  }
  0x41   : > { %v930_v29 = vld [vmem:[%s1135_s30 + $0x20] ss:$8 sps:$4 sm:$0xff]   ;;  %v931_v30 = vld [vmem:[%s1135_s30 + $0x14] ss:$8 sps:$4 sm:$0xff]   ;;  %v933_v31 = vld [vmem:[%s1135_s30 + $0x10] ss:$8 sps:$4 sm:$0xff]  }
  0x42   : > { %v934_v32 = vld [vmem:[%s1135_s30 + $0x4] ss:$8 sps:$4 sm:$0xff]   ;;  %v936_v33 = vld [vmem:[%s1135_s30] ss:$8 sps:$4 sm:$0xff]  }
  0x43   : > { %572 = vmatpush1.bf16.msra.mxu0 %v918_v21  ;;  %v472_v34 = vld [vmem:[%s1114_s9] sm:$0xf]  ;;  %v470_v35 = vld [vmem:[#allocation2] sm:$0xff]  ;;  %v471_v37 = vld [vmem:[#allocation2 + $0x8] sm:$0xff] }
  0x44   : > { %573 = vmatprep.subr.bf16.mxu0 %v919_v22 }
  0x47   : > { %574 = vmatpush1.bf16.msra.mxu0 %v921_v23 }
  0x48   : > { %575 = vmatprep.subr.bf16.mxu0 %v922_v24 }
  0x4b   : > { %576 = vmatpush1.bf16.msra.mxu0 %v924_v25 }
  0x4c   : > { %577 = vmatprep.subr.bf16.mxu0 %v925_v26 }
  0x4f   : > { %578 = vmatpush1.bf16.msra.mxu0 %v927_v27 }
  0x50   : > { %579 = vmatprep.subr.bf16.mxu0 %v928_v28 }
  0x53   : > { %580 = vmatpush1.bf16.msra.mxu0 %v930_v29 }
  0x54   : > { %581 = vmatprep.subr.bf16.mxu0 %v931_v30 }
  0x57   : > { %582 = vmatpush1.bf16.msra.mxu0 %v933_v31 }
  0x58   : > { %583 = vmatprep.subr.bf16.mxu0 %v934_v32 }
  0x5b   : > { %584 = vmatpush1.bf16.msra.mxu0 %v936_v33 }
  0x5e   : > { %602 = vmatmul.mubr.bf16.vlgmr.msra.gmra.mxu0 %v472_v34 }
 0x11e   : > { %v603_v36 = vpop.f32.mrf.mxu0 }
 0x11f   : > { %v610_v38 = vadd.f32 %v603_v36, %v470_v35 }
 0x120   : > { %v605_v39 = vpop.f32.mrf.mxu0  ;;  %617 = sbr.rel (%p849_p13) target bundleno = 312 (0x138), region = 86 }
 0x121   : > { %612 = vst [vmem:[#allocation2] sm:$0xff] %v610_v38  ;;  %v611_v40 = vadd.f32 %v605_v39, %v471_v37 }
 0x122   : > { %v607_v41 = vpop.f32.mrf.mxu0 }
 0x123   : > { %613 = vst [vmem:[#allocation2 + $0x8] sm:$0xff] %v611_v40 }
 0x124   : > { %v608_v42 = vpop.f32.mrf.mxu0 }
 0x125   : > { %v622_v43 = vlaneseq  ;;  %v620_v45 = vld [vmem:[%s436_s18] sm:$0x3] }
 0x126   : > { %v634_v46 = vld [vmem:[%s441_s21] sm:$0x3] }
 0x127   : > { %v623_v44 = vshrl.u32 %v622_v43, 7  ;;  %v648_v51 = vld [vmem:[%s1128_s17] sm:$0xff] }
 0x128   : > { %v618_v49 = vld [vmem:[#allocation2] sm:$0xff]  ;;  %v649_v58 = vunpack.c.l.bf16 %v648_v51  ;;  %v650_v59 = vunpack.c.h.bf16 %v648_v51 }
 0x129   : > { %v624_v47 = vsub.s32 0, %v623_v44  ;;  %v628_v48 = vsub.s32 1, %v623_v44 }
 0x12a   : > { %v619_v50 = vld [vmem:[#allocation2 + $0x8] sm:$0xff] }
 0x12b   : > { %v625_v52 = vrot.slane %v620_v45, %v624_v47  ;;  %v629_v53 = vrot.slane %v620_v45, %v628_v48  ;;  %v639_v54 = vrot.slane %v634_v46, %v624_v47  ;;  %v643_v55 = vrot.slane %v634_v46, %v628_v48 }
 0x12d   : > { %v632_v56 = vmul.f32 %v625_v52, %v618_v49  ;;  %v633_v57 = vmul.f32 %v629_v53, %v619_v50 }
 0x12f   : > { %v646_v60 = vadd.f32 %v639_v54, %v632_v56  ;;  %v647_v61 = vadd.f32 %v643_v55, %v633_v57 }
 0x131   : > { %v651_v62 = vadd.f32 %v649_v58, %v646_v60  ;;  %v652_v63 = vadd.f32 %v650_v59, %v647_v61 }
 0x133   : > { %v653_v0 = vmax.f32 %v651_v62, 0.0  ;;  %v654_v1 = vmax.f32 %v652_v63, 0.0 }
 0x135   : > { %v854_v2 = vpack.c.bf16 %v654_v1, %v653_v0 }
 0x137   : > { %663 = vst [vmem:[%s1133_s7] sm:$0xff] %v854_v2 }
 0x138 PF: > { %s15_s24 = sadd.s32 1, %s991_s24   ;;  %s1197_s18 = smov %s971_s19 }
 0x139   : > { %p12_p0 = scmp.ge.s32.totalorder %s15_s24, 34   ;;  %s1198_s19 = smov %s1076_s6 }
 0x13a   : > { %s1199_s20 = smov %s983_s22  ;;  %s1200_s21 = smov %s987_s23 }
 0x13b   : > { %s1201_s22 = smov %s1204_s25  ;;  %s1202_s23 = smov %s1208_s26 }
 0x13c   :  { %14 = sbr.rel (!%p12_p0) target bundleno = 6 (0x6), region = 133 }

// kernel: resnet50_forward.110
= control target key start
LH: loop header
LB: loop body
LE: loop exit
PB: predicated region body
PF: predicated region fallthrough
CT: control target
= control target key end

     0   :  { %s250_s6 = smov 0   ;;  %s267_s0 = inlined_call_operand.vmem [shape: bf16[2,1,2048], index: 0, kind: input, shape index: {}]   ;;  %s268_s1 = inlined_call_operand.vmem [shape: f32[2,1,2048], index: 1, kind: output, shape index: {}]  }
   0x1 LB: > { %s213_s7 = sadd.s32 4294967295, %s237_s6   ;;  %p217_p0 = scmp.ge.s32.totalorder %s237_s6, 1  ;;  %s237_s6 = sphi %s250_s6, %s11_s6  }
   0x2   : > { %p86_p1 = scmp.lt.s32.totalorder %s237_s6, 3 }
   0x4   : > { %p87_p2 = pnand %p217_p0, %p86_p1 }
   0x5   : > { %p104_p3 = scmp.lt.s32.totalorder (!%p87_p2), %s213_s7, 1 }
   0x6   : > { %90 = sbr.rel (%p87_p2) target bundleno = 23 (0x17), region = 24 }
   0xb   : > { %v129_v0 = vlaneseq  ;;  %v239_v1 = vmov 1966171168   ;;  %s270_s7 = smov (!%p104_p3, %s213_s7), 1 }
   0xc   : > { %v127_v2 = vunpack.c.l.s4 %v239_v1  ;;  %s218_s8 = sshll.u32 %s270_s7, 4 }
   0xd   : > { %v130_v3 = vshrl.u32 %v129_v0, 7  ;;  %s107_s11 = scalar_lea.vmem %s267_s0, %s218_s8  ;;  %s111_s14 = scalar_lea.vmem %s268_s1, %s218_s8 }
   0xe   : > { %v128_v4 = vunpack.c.0.s8 %v127_v2  ;;  %v112_v6 = vld [vmem:[%s107_s11] sm:$0xff]  ;;  %v113_v7 = vld [vmem:[%s107_s11 + $0x8] sm:$0xff] }
   0xf   : > { %v114_v8 = vunpack.c.l.bf16 %v112_v6  ;;  %v115_v9 = vunpack.c.h.bf16 %v112_v6  ;;  %v116_v10 = vunpack.c.l.bf16 %v113_v7  ;;  %v117_v11 = vunpack.c.h.bf16 %v113_v7 }
  0x10   : > { %v131_v5 = vsub.s32 %v128_v4, %v130_v3 }
  0x12   : > { %v132_v12 = vrot.slane %v114_v8, %v131_v5  ;;  %v139_v13 = vrot.slane %v115_v9, %v131_v5  ;;  %v147_v14 = vrot.slane %v116_v10, %v131_v5  ;;  %v154_v15 = vrot.slane %v117_v11, %v131_v5 }
  0x14   : > { %v140_v16 = vcombine.low %v132_v12, %v139_v13  ;;  %v155_v17 = vcombine.low %v147_v14, %v154_v15 }
  0x16   : > { %158 = vst [vmem:[%s111_s14] sm:$0xff] %v140_v16  ;;  %159 = vst [vmem:[%s111_s14 + $0x8] sm:$0xff] %v155_v17 }
  0x17 PF: > { %s11_s6 = sadd.s32 1, %s237_s6  }
  0x18   : > { %p8_p4 = scmp.ge.s32.totalorder %s11_s6, 4  }
  0x1a   :  { %10 = sbr.rel (!%p8_p4) target bundleno = 1 (0x1), region = 54 }

// kernel: resnet50_forward.111
= control target key start
LH: loop header
LB: loop body
LE: loop exit
PB: predicated region body
PF: predicated region fallthrough
CT: control target
= control target key end

     0   :  { %s688_s15 = smov 0   ;;  %s690_s16 = smov 0   ;;  %s740_s0 = inlined_call_operand.vmem [shape: bf16[8,2048], index: 0, kind: input, shape index: {}]   ;;  %s741_s1 = inlined_call_operand.vmem [shape: bf16[2048,128], index: 1, kind: input, shape index: {}]   ;;  %s742_s2 = inlined_call_operand.vmem [shape: f32[1,128], index: 2, kind: input, shape index: {}]   ;;  %s743_s3 = inlined_call_operand.vmem [shape: f32[1,128], index: 3, kind: input, shape index: {}]   ;;  %s744_s4 = inlined_call_operand.vmem [shape: f32[8,128], index: 4, kind: output, shape index: {}]  }
   0x1   :  { %s692_s17 = smov 0  }
   0x2 LB: > { %s26_s18 = sadd.s32 1, %s654_s16  ;;  %p553_p0 = scmp.ge.s32.totalorder %s658_s17, 1  ;;  %s658_s17 = sphi %s692_s17, %s14_s17   ;;  %s654_s16 = sphi %s690_s16, %s746_s16   ;;  %s650_s15 = sphi %s688_s15, %s745_s15  }
   0x3   : > { %p27_p1 = scmp.ge.s32.totalorder %s26_s18, 16  ;;  %p220_p2 = scmp.lt.s32.totalorder %s658_s17, 17 }
   0x5   : > { %s748_s18 = smov (%p27_p1, %s26_s18), 0  ;;  %p221_p3 = pnand %p553_p0, %p220_p2 }
   0x6   : > { %p267_p4 = scmp.lt.s32.totalorder (!%p221_p3), %s650_s15, 15  ;;  %s555_s19 = sshll.u32 (!%p221_p3), %s650_s15, 4 }
   0x7   : > { %224 = sbr.rel (%p221_p3) target bundleno = 261 (0x105), region = 36  ;;  %p274_p5 = scmp.lt.s32.totalorder (!%p221_p3), %s555_s19, 255 }
   0x8   : > { %p557_p6 = scmp.ne.s32.totalorder (!%p221_p3), %s650_s15, 0 }
   0xc   : > { %s268_s20 = scalar_select %p267_p4, %s650_s15, 15 }
   0xd   : > { %s750_s19 = smov (!%p274_p5, %s555_s19), 255  ;;  %299 = sbr.rel (%p557_p6) target bundleno = 20 (0x14), region = 40 }
   0xe   : > { %s554_s21 = sshll.u32 %s268_s20, 2  ;;  %s556_s25 = sshll.u32 %s750_s19, 2 }
   0xf   : > { %s714_s24 = scalar_lea.vmem %s740_s0, %s554_s21  ;;  %s280_s28 = scalar_lea.vmem %s741_s1, %s556_s25 }
  0x12   : > { %v660_v0 = vmov 0.0  }
  0x13   : > { %300 = vst [vmem:[#allocation2] sm:$0xff] %v660_v0 }
  0x14 PF: > { %v628_v1 = vld [vmem:[%s280_s28 + $0x38] sm:$0xff]   ;;  %v661_v2 = vmov 0.0   ;;  %v629_v3 = vld [vmem:[%s280_s28 + $0x30] sm:$0xff]   ;;  %vm662_vm0 = vmmov 0   ;;  %v630_v4 = vld [vmem:[%s280_s28 + $0x28] sm:$0xff]   ;;  %p566_p7 = scmp.ne.s32.totalorder %s650_s15, 15 }
  0x15   : > { %581 = vmatprep.subr.bf16.mxu0 %v661_v2  ;;  %597 = vmatprep.mubr.msk.bf16.mxu0 %vm662_vm0, %v661_v2  ;;  %v631_v5 = vld [vmem:[%s280_s28 + $0x20] sm:$0xff]   ;;  %v632_v6 = vld [vmem:[%s280_s28 + $0x18] sm:$0xff]   ;;  %v633_v7 = vld [vmem:[%s280_s28 + $0x10] sm:$0xff]  }
  0x16   : > { %582 = vmatpush3.bf16.msra.mxu0 %v628_v1  ;;  %v634_v8 = vld [vmem:[%s280_s28 + $0x8] sm:$0xff]   ;;  %v635_v9 = vld [vmem:[%s280_s28] sm:$0xff]  }
  0x17   : > { %583 = vmatprep.subr.bf16.mxu0 %v661_v2  ;;  %v302_v10 = vld [vmem:[%s714_s24] sm:$0xf] }
  0x1a   : > { %584 = vmatpush3.bf16.msra.mxu0 %v629_v3  ;;  %v301_v11 = vld [vmem:[#allocation2] sm:$0xff] }
  0x1b   : > { %585 = vmatprep.subr.bf16.mxu0 %v661_v2 }
  0x1e   : > { %586 = vmatpush3.bf16.msra.mxu0 %v630_v4 }
  0x1f   : > { %587 = vmatprep.subr.bf16.mxu0 %v661_v2 }
  0x22   : > { %588 = vmatpush3.bf16.msra.mxu0 %v631_v5 }
  0x23   : > { %589 = vmatprep.subr.bf16.mxu0 %v661_v2 }
  0x26   : > { %590 = vmatpush3.bf16.msra.mxu0 %v632_v6 }
  0x27   : > { %591 = vmatprep.subr.bf16.mxu0 %v661_v2 }
  0x2a   : > { %592 = vmatpush3.bf16.msra.mxu0 %v633_v7 }
  0x2b   : > { %593 = vmatprep.subr.bf16.mxu0 %v661_v2 }
  0x2e   : > { %594 = vmatpush3.bf16.msra.mxu0 %v634_v8 }
  0x2f   : > { %595 = vmatprep.subr.bf16.mxu0 %v661_v2 }
  0x32   : > { %596 = vmatpush3.bf16.msra.mxu0 %v635_v9 }
  0x35   : > { %598 = vmatmul.mubr.bf16.vlgmr.msra.gmra.mxu0 %v302_v10 }
  0xf5   : > { %v401_v12 = vpop.f32.mrf.mxu0 }
  0xf6   : > { %v407_v13 = vadd.f32 %v401_v12, %v301_v11 }
  0xf7   : > { %v599_v14 = vpop.f32.mrf.mxu0  ;;  %412 = sbr.rel (%p566_p7) target bundleno = 261 (0x105), region = 44 }
  0xf8   : > { %408 = vst [vmem:[#allocation2] sm:$0xff] %v407_v13 }
  0xf9   : > { %v404_v15 = vpop.f32.mrf.mxu0 }
  0xfb   : > { %v600_v16 = vpop.f32.mrf.mxu0 }
  0xfc   : > { %v567_v18 = vld [vmem:[%s742_s2] ss:$0 sm:$0xff] }
  0xfd   : > { %v568_v19 = vld [vmem:[%s743_s3] ss:$0 sm:$0xff] }
  0xff   : > { %v413_v17 = vld [vmem:[#allocation2] sm:$0xff] }
 0x100   : > { %v421_v20 = vmul.f32 %v567_v18, %v413_v17 }
 0x102   : > { %v429_v21 = vadd.f32 %v568_v19, %v421_v20 }
 0x104   : > { %430 = vst [vmem:[%s744_s4] sm:$0xff] %v429_v21 }
 0x105 PF: > { %s14_s17 = sadd.s32 1, %s658_s17   ;;  %s745_s15 = smov %s654_s16 }
 0x106   : > { %p11_p8 = scmp.ge.s32.totalorder %s14_s17, 18   ;;  %s746_s16 = smov %s748_s18 }
 0x108   :  { %13 = sbr.rel (!%p11_p8) target bundleno = 2 (0x2), region = 83 }

</bundles_post_ra>
